<compile_context>
chip_gen: v7x
topology: tpu7x:2x2x1
jax: 0.10.0
libtpu: 0.0.40
codegen_flags: <defaults>
</compile_context>

<pallas_src>
import jax
import jax.numpy as jnp
import numpy as np
from jax import lax
from jax.experimental import pallas as pl
from jax.experimental.pallas import tpu as pltpu


def _input_proj_kernel(x_ref, wih_ref, b_ref, g_ref):
    """gates[t, p, :] = x[t + 1, p, :] @ W_ih + (b_ih + b_hh), all t at once."""
    s, p, F = x_ref.shape                       # batch dim squeezed away
    sm1 = s - 1
    H4 = g_ref.shape[-1]
    # Drop step 0 (== x[1:] in the reference) with a static leading-dim slice;
    # merging (s-1, p) -> rows is a layout-preserving (free) reshape.
    x_enc = x_ref[1:].reshape(sm1 * p, F)
    g = jnp.dot(x_enc, wih_ref[...], preferred_element_type=jnp.float32)
    g_ref[...] = (g + b_ref[...]).reshape(sm1, p, H4)


def _lstm_recurrence_kernel(g_ref, whh_ref, h_out_ref, h_sc, c_sc):
    """Serial LSTM recurrence over one (b, p)-tile.

    g_ref: (s-1, tp, 4H) f32 precomputed input-gate pre-activations
           (step 0 already dropped by kernel 1).
    """
    sm1 = g_ref.shape[0]
    H = whh_ref.shape[0]

    h_sc[...] = jnp.zeros_like(h_sc)
    c_sc[...] = jnp.zeros_like(c_sc)

    def step(t, carry):
        h = h_sc[...]
        c = c_sc[...]
        gates = g_ref[t] + jnp.dot(
            h.astype(whh_ref.dtype), whh_ref[...],
            preferred_element_type=jnp.float32)
        # H % 128 == 0 -> each slice is a whole-vreg view (no lane masking).
        i_g = jax.nn.sigmoid(gates[:, 0 * H:1 * H])
        f_g = jax.nn.sigmoid(gates[:, 1 * H:2 * H])
        g_g = jnp.tanh(gates[:, 2 * H:3 * H])
        o_g = jax.nn.sigmoid(gates[:, 3 * H:4 * H])
        c_new = f_g * c + i_g * g_g
        h_sc[...] = o_g * jnp.tanh(c_new)
        c_sc[...] = c_new
        return carry

    lax.fori_loop(0, sm1, step, 0, unroll=True)
    h_out_ref[...] = h_sc[...].astype(h_out_ref.dtype)


def lstm_encoder_forward(x_og, w_ih, w_hh, b_ih, b_hh):
    """Full LSTM_Encoder.forward: rearrange + drop step 0 + encode -> (B, H)."""
    b, s, p, l, f = x_og.shape
    B, F = b * p, l * f
    H4 = w_ih.shape[1]
    H = H4 // 4

    if s <= 1:
        # x[1:] is empty -> the zero initial hidden state is returned.
        return jnp.zeros((B, H), jnp.float32)

    # 'b s p l f -> b s p (l f)' is a free reshape (no HBM data movement);
    # the 's (b p)' reordering is handled purely by BlockSpec index maps.
    x = x_og.reshape(b, s, p, F).astype(jnp.bfloat16)
    wih_b = w_ih.astype(jnp.bfloat16)
    whh_b = w_hh.astype(jnp.bfloat16)
    bias = (b_ih + b_hh).astype(jnp.float32).reshape(1, H4)

    # ---- Kernel 1: hoisted input projection for all encoded timesteps. ----
    gates = pl.pallas_call(
        _input_proj_kernel,
        out_shape=jax.ShapeDtypeStruct((b, s - 1, p, H4), jnp.float32),
        grid_spec=pltpu.PrefetchScalarGridSpec(
            num_scalar_prefetch=0,
            grid=(b,),
            in_specs=[
                pl.BlockSpec((pl.Squeezed(), s, p, F),
                             lambda i: (i, 0, 0, 0)),           # x[i]
                pl.BlockSpec((F, H4), lambda i: (0, 0)),         # W_ih (const)
                pl.BlockSpec((1, H4), lambda i: (0, 0)),         # bias  (const)
            ],
            out_specs=pl.BlockSpec((pl.Squeezed(), s - 1, p, H4),
                                   lambda i: (i, 0, 0, 0)),
        ),
        compiler_params=pltpu.CompilerParams(
            dimension_semantics=("parallel",)),
    )(x, wih_b, bias)

    # ---- Kernel 2: serial recurrence, (b, p)-tiled "parallel" grid. ----
    tp = 128 if p % 128 == 0 else p
    n_ptiles = p // tp

    h = pl.pallas_call(
        _lstm_recurrence_kernel,
        out_shape=jax.ShapeDtypeStruct((b, p, H), jnp.float32),
        grid_spec=pltpu.PrefetchScalarGridSpec(
            num_scalar_prefetch=0,
            grid=(b, n_ptiles),
            in_specs=[
                pl.BlockSpec((pl.Squeezed(), s - 1, tp, H4),
                             lambda i, j: (i, 0, j, 0)),         # gate slab
                pl.BlockSpec((H, H4), lambda i, j: (0, 0)),      # W_hh (const)
            ],
            out_specs=pl.BlockSpec((pl.Squeezed(), tp, H),
                                   lambda i, j: (i, j, 0)),
            scratch_shapes=[
                pltpu.VMEM((tp, H), jnp.float32),    # h carry
                pltpu.VMEM((tp, H), jnp.float32),    # c carry
            ],
        ),
        compiler_params=pltpu.CompilerParams(
            dimension_semantics=("parallel", "parallel")),
    )(gates, whh_b)

    # '(b p)' row order is already b-major, p-minor -> free reshape.
    return h.reshape(B, H)


def _lstm_encoder_ref(x_og, w_ih, w_hh, b_ih, b_hh):
    """Pure-JAX reference (rearrange + x[1:] + lax.scan LSTM).

    Uses the same bf16 operands / f32 accumulation as the kernel so the
    comparison is apples-to-apples.
    """
    b, s, p, l, f = x_og.shape
    B, F = b * p, l * f
    H = w_hh.shape[0]
    x = jnp.transpose(x_og, (1, 0, 2, 3, 4)).reshape(s, B, F)[1:]
    x = x.astype(jnp.bfloat16)
    wih = w_ih.astype(jnp.bfloat16)
    whh = w_hh.astype(jnp.bfloat16)
    bias = (b_ih + b_hh).astype(jnp.float32)

    def step(carry, x_t):
        h, c = carry
        gates = (jnp.dot(x_t, wih, preferred_element_type=jnp.float32)
                 + jnp.dot(h.astype(jnp.bfloat16), whh,
                           preferred_element_type=jnp.float32)
                 + bias)
        i_g = jax.nn.sigmoid(gates[:, 0 * H:1 * H])
        f_g = jax.nn.sigmoid(gates[:, 1 * H:2 * H])
        g_g = jnp.tanh(gates[:, 2 * H:3 * H])
        o_g = jax.nn.sigmoid(gates[:, 3 * H:4 * H])
        c = f_g * c + i_g * g_g
        h = o_g * jnp.tanh(c)
        return (h, c), None

    init = (jnp.zeros((B, H), jnp.float32), jnp.zeros((B, H), jnp.float32))
    (h, _), _ = lax.scan(step, init, x)
    return h


if __name__ == "__main__":
    # b=2 batches, s=9 steps (encoder sees 8 after dropping step 0),
    # p=128 patches, l=4, f=32  ->  B = b*p = 256, F = l*f = 128.
    # Hidden H = 128 (multiple of 128 so gate slices are whole vregs).
    b, s, p, l, f = 2, 9, 128, 4, 32
    B, F, H = b * p, l * f, 128

    key = jax.random.PRNGKey(0)
    k_x, k_wih, k_whh, k_bih, k_bhh = jax.random.split(key, 5)

    x_og = jax.random.normal(k_x, (b, s, p, l, f), dtype=jnp.float32)

    # Deterministic PyTorch-style LSTM init: U(-1/sqrt(H), 1/sqrt(H)),
    # gate order i|f|g|o; weights stored transposed for the x @ W layout.
    bound = 1.0 / np.sqrt(H)
    w_ih = jax.random.uniform(k_wih, (F, 4 * H), jnp.float32, -bound, bound)
    w_hh = jax.random.uniform(k_whh, (H, 4 * H), jnp.float32, -bound, bound)
    b_ih = jax.random.uniform(k_bih, (4 * H,), jnp.float32, -bound, bound)
    b_hh = jax.random.uniform(k_bhh, (4 * H,), jnp.float32, -bound, bound)

    fwd = jax.jit(lstm_encoder_forward)
    h_x = jax.block_until_ready(fwd(x_og, w_ih, w_hh, b_ih, b_hh))

    h_ref = jax.block_until_ready(
        _lstm_encoder_ref(x_og, w_ih, w_hh, b_ih, b_hh))

    np.testing.assert_allclose(np.asarray(h_x), np.asarray(h_ref),
                               rtol=1e-2, atol=1e-2)
    assert h_x.shape == (B, H) and h_x.dtype == jnp.float32
    print("KERNEL_OK")
</pallas_src>

<mosaic_0001>
module attributes {stable_mosaic.version = 11 : i64} {
  func.func @_input_proj_kernel(%arg0: i32, %arg1: memref<1x9x128x128xbf16, #tpu.memory_space<vmem>>, %arg2: memref<128x512xbf16, #tpu.memory_space<vmem>>, %arg3: memref<1x512xf32, #tpu.memory_space<vmem>>, %arg4: memref<1x8x128x512xf32, #tpu.memory_space<vmem>>) attributes {dimension_semantics = [#tpu.dimension_semantics<parallel>], iteration_bounds = array<i64: 2>, scalar_prefetch = 0 : i64, scratch_operands = 0 : i64, tpu.core_type = #tpu.core_type<tc>, window_params = [{transform_indices = @transform_0, window_bounds = array<i64: 1, 9, 128, 128>}, {pipeline_mode = #tpu.pipeline_mode<synchronous>, transform_indices = @transform_1, window_bounds = array<i64: 128, 512>}, {pipeline_mode = #tpu.pipeline_mode<synchronous>, transform_indices = @transform_2, window_bounds = array<i64: 1, 512>}, {transform_indices = @transform_3, window_bounds = array<i64: 1, 8, 128, 512>}]} {
    %c0 = arith.constant 0 : index
    %c1 = arith.constant 1 : index
    %c0_0 = arith.constant 0 : index
    %c0_1 = arith.constant 0 : index
    %0 = vector.load %arg1[%c0, %c1, %c0_0, %c0_1] : memref<1x9x128x128xbf16, #tpu.memory_space<vmem>>, vector<1x8x128x128xbf16>
    %1 = vector.shape_cast %0 : vector<1x8x128x128xbf16> to vector<8x128x128xbf16>
    %2 = vector.shape_cast %1 : vector<8x128x128xbf16> to vector<1024x128xbf16>
    %c0_2 = arith.constant 0 : index
    %c0_3 = arith.constant 0 : index
    %3 = vector.load %arg2[%c0_2, %c0_3] : memref<128x512xbf16, #tpu.memory_space<vmem>>, vector<128x512xbf16>
    %cst = arith.constant dense<0.000000e+00> : vector<1024x512xf32>
    %4 = tpu.matmul %2, %3, %cst {dimension_numbers = #tpu.dot_dimension_numbers<[1], [0], [0], [1], [0, 0, 1, 1], [], []>} : vector<1024x128xbf16>, vector<128x512xbf16>, vector<1024x512xf32> -> vector<1024x512xf32>
    %c0_4 = arith.constant 0 : index
    %c0_5 = arith.constant 0 : index
    %5 = vector.load %arg3[%c0_4, %c0_5] : memref<1x512xf32, #tpu.memory_space<vmem>>, vector<1x512xf32>
    %6 = vector.broadcast %5 : vector<1x512xf32> to vector<1024x512xf32>
    %7 = arith.addf %4, %6 : vector<1024x512xf32>
    %8 = vector.shape_cast %7 : vector<1024x512xf32> to vector<8x128x512xf32>
    %c0_6 = arith.constant 0 : index
    %c0_7 = arith.constant 0 : index
    %c0_8 = arith.constant 0 : index
    %c0_9 = arith.constant 0 : index
    %9 = vector.load %arg4[%c0_6, %c0_7, %c0_8, %c0_9] : memref<1x8x128x512xf32, #tpu.memory_space<vmem>>, vector<1x8x128x512xf32>
    %10 = vector.shape_cast %9 : vector<1x8x128x512xf32> to vector<8x128x512xf32>
    %11 = vector.shape_cast %8 : vector<8x128x512xf32> to vector<1x8x128x512xf32>
    tpu.vector_store %arg4[%c0_6, %c0_7, %c0_8, %c0_9], %11 {strides = array<i32>} : memref<1x8x128x512xf32, #tpu.memory_space<vmem>>, vector<1x8x128x512xf32>,
    return
  }
  func.func @transform_0(%arg0: i32) -> (i32, i32, i32, i32) {
    %c0_i32 = arith.constant 0 : i32
    %c0_i32_0 = arith.constant 0 : i32
    %c0_i32_1 = arith.constant 0 : i32
    %c0_i32_2 = arith.constant 0 : i32
    return %arg0, %c0_i32, %c0_i32_0, %c0_i32_1 : i32, i32, i32, i32
  }
  func.func @transform_1(%arg0: i32) -> (i32, i32) {
    %c0_i32 = arith.constant 0 : i32
    %c0_i32_0 = arith.constant 0 : i32
    %c0_i32_1 = arith.constant 0 : i32
    return %c0_i32, %c0_i32_0 : i32, i32
  }
  func.func @transform_2(%arg0: i32) -> (i32, i32) {
    %c0_i32 = arith.constant 0 : i32
    %c0_i32_0 = arith.constant 0 : i32
    %c0_i32_1 = arith.constant 0 : i32
    return %c0_i32, %c0_i32_0 : i32, i32
  }
  func.func @transform_3(%arg0: i32) -> (i32, i32, i32, i32) {
    %c0_i32 = arith.constant 0 : i32
    %c0_i32_0 = arith.constant 0 : i32
    %c0_i32_1 = arith.constant 0 : i32
    %c0_i32_2 = arith.constant 0 : i32
    return %arg0, %c0_i32, %c0_i32_0, %c0_i32_1 : i32, i32, i32, i32
  }
}

module attributes {stable_mosaic.version = 11 : i64} {
  func.func @_lstm_recurrence_kernel(%arg0: i32, %arg1: i32, %arg2: memref<1x8x128x512xf32, #tpu.memory_space<vmem>>, %arg3: memref<128x512xbf16, #tpu.memory_space<vmem>>, %arg4: memref<1x128x128xf32, #tpu.memory_space<vmem>>, %arg5: memref<128x128xf32, #tpu.memory_space<vmem>>, %arg6: memref<128x128xf32, #tpu.memory_space<vmem>>) attributes {dimension_semantics = [#tpu.dimension_semantics<parallel>, #tpu.dimension_semantics<parallel>], iteration_bounds = array<i64: 2, 1>, scalar_prefetch = 0 : i64, scratch_operands = 2 : i64, tpu.core_type = #tpu.core_type<tc>, window_params = [{transform_indices = @transform_0, window_bounds = array<i64: 1, 8, 128, 512>}, {pipeline_mode = #tpu.pipeline_mode<synchronous>, transform_indices = @transform_1, window_bounds = array<i64: 128, 512>}, {transform_indices = @transform_2, window_bounds = array<i64: 1, 128, 128>}]} {
    %cst = arith.constant 0.000000e+00 : f32
    %0 = vector.broadcast %cst : f32 to vector<128x128xf32>
    %c0 = arith.constant 0 : index
    %c0_0 = arith.constant 0 : index
    %1 = vector.load %arg5[%c0, %c0_0] : memref<128x128xf32, #tpu.memory_space<vmem>>, vector<128x128xf32>
    tpu.vector_store %arg5[%c0, %c0_0], %0 {strides = array<i32>} : memref<128x128xf32, #tpu.memory_space<vmem>>, vector<128x128xf32>,
    %cst_1 = arith.constant 0.000000e+00 : f32
    %2 = vector.broadcast %cst_1 : f32 to vector<128x128xf32>
    %c0_2 = arith.constant 0 : index
    %c0_3 = arith.constant 0 : index
    %3 = vector.load %arg6[%c0_2, %c0_3] : memref<128x128xf32, #tpu.memory_space<vmem>>, vector<128x128xf32>
    tpu.vector_store %arg6[%c0_2, %c0_3], %2 {strides = array<i32>} : memref<128x128xf32, #tpu.memory_space<vmem>>, vector<128x128xf32>,
    %c0_i32 = arith.constant 0 : i32
    %c0_4 = arith.constant 0 : index
    %c0_5 = arith.constant 0 : index
    %4 = vector.load %arg5[%c0_4, %c0_5] : memref<128x128xf32, #tpu.memory_space<vmem>>, vector<128x128xf32>
    %c0_6 = arith.constant 0 : index
    %c0_7 = arith.constant 0 : index
    %5 = vector.load %arg6[%c0_6, %c0_7] : memref<128x128xf32, #tpu.memory_space<vmem>>, vector<128x128xf32>
    %c0_8 = arith.constant 0 : index
    %6 = arith.index_cast %c0_i32 : i32 to index
    %c0_9 = arith.constant 0 : index
    %c0_10 = arith.constant 0 : index
    %7 = vector.load %arg2[%c0_8, %6, %c0_9, %c0_10] : memref<1x8x128x512xf32, #tpu.memory_space<vmem>>, vector<1x1x128x512xf32>
    %8 = vector.shape_cast %7 : vector<1x1x128x512xf32> to vector<128x512xf32>
    %9 = arith.truncf %4 : vector<128x128xf32> to vector<128x128xbf16>
    %c0_11 = arith.constant 0 : index
    %c0_12 = arith.constant 0 : index
    %10 = vector.load %arg3[%c0_11, %c0_12] : memref<128x512xbf16, #tpu.memory_space<vmem>>, vector<128x512xbf16>
    %cst_13 = arith.constant dense<0.000000e+00> : vector<128x512xf32>
    %11 = tpu.matmul %9, %10, %cst_13 {dimension_numbers = #tpu.dot_dimension_numbers<[1], [0], [0], [1], [0, 0, 1, 1], [], []>} : vector<128x128xbf16>, vector<128x512xbf16>, vector<128x512xf32> -> vector<128x512xf32>
    %12 = arith.addf %8, %11 : vector<128x512xf32>
    %13 = vector.extract_strided_slice %12 {offsets = [0, 0], sizes = [128, 128], strides = [1, 1]} : vector<128x512xf32> to vector<128x128xf32>
    %14 = arith.negf %13 : vector<128x128xf32>
    %15 = math.exp %14 : vector<128x128xf32>
    %cst_14 = arith.constant 1.000000e+00 : f32
    %16 = vector.broadcast %cst_14 : f32 to vector<128x128xf32>
    %17 = arith.addf %16, %15 : vector<128x128xf32>
    %18 = arith.divf %16, %17 : vector<128x128xf32>
    %19 = vector.extract_strided_slice %12 {offsets = [0, 128], sizes = [128, 128], strides = [1, 1]} : vector<128x512xf32> to vector<128x128xf32>
    %20 = arith.negf %19 : vector<128x128xf32>
    %21 = math.exp %20 : vector<128x128xf32>
    %cst_15 = arith.constant 1.000000e+00 : f32
    %22 = vector.broadcast %cst_15 : f32 to vector<128x128xf32>
    %23 = arith.addf %22, %21 : vector<128x128xf32>
    %24 = arith.divf %22, %23 : vector<128x128xf32>
    %25 = vector.extract_strided_slice %12 {offsets = [0, 256], sizes = [128, 128], strides = [1, 1]} : vector<128x512xf32> to vector<128x128xf32>
    %26 = math.tanh %25 : vector<128x128xf32>
    %27 = vector.extract_strided_slice %12 {offsets = [0, 384], sizes = [128, 128], strides = [1, 1]} : vector<128x512xf32> to vector<128x128xf32>
    %28 = arith.negf %27 : vector<128x128xf32>
    %29 = math.exp %28 : vector<128x128xf32>
    %cst_16 = arith.constant 1.000000e+00 : f32
    %30 = vector.broadcast %cst_16 : f32 to vector<128x128xf32>
    %31 = arith.addf %30, %29 : vector<128x128xf32>
    %32 = arith.divf %30, %31 : vector<128x128xf32>
    %33 = arith.mulf %24, %5 : vector<128x128xf32>
    %34 = arith.mulf %18, %26 : vector<128x128xf32>
    %35 = arith.addf %33, %34 : vector<128x128xf32>
    %36 = math.tanh %35 : vector<128x128xf32>
    %37 = arith.mulf %32, %36 : vector<128x128xf32>
    %c0_17 = arith.constant 0 : index
    %c0_18 = arith.constant 0 : index
    %38 = vector.load %arg5[%c0_17, %c0_18] : memref<128x128xf32, #tpu.memory_space<vmem>>, vector<128x128xf32>
    tpu.vector_store %arg5[%c0_17, %c0_18], %37 {strides = array<i32>} : memref<128x128xf32, #tpu.memory_space<vmem>>, vector<128x128xf32>,
    %c0_19 = arith.constant 0 : index
    %c0_20 = arith.constant 0 : index
    %39 = vector.load %arg6[%c0_19, %c0_20] : memref<128x128xf32, #tpu.memory_space<vmem>>, vector<128x128xf32>
    tpu.vector_store %arg6[%c0_19, %c0_20], %35 {strides = array<i32>} : memref<128x128xf32, #tpu.memory_space<vmem>>, vector<128x128xf32>,
    %c1_i32 = arith.constant 1 : i32
    %c0_21 = arith.constant 0 : index
    %c0_22 = arith.constant 0 : index
    %40 = vector.load %arg5[%c0_21, %c0_22] : memref<128x128xf32, #tpu.memory_space<vmem>>, vector<128x128xf32>
    %c0_23 = arith.constant 0 : index
    %c0_24 = arith.constant 0 : index
    %41 = vector.load %arg6[%c0_23, %c0_24] : memref<128x128xf32, #tpu.memory_space<vmem>>, vector<128x128xf32>
    %c0_25 = arith.constant 0 : index
    %42 = arith.index_cast %c1_i32 : i32 to index
    %c0_26 = arith.constant 0 : index
    %c0_27 = arith.constant 0 : index
    %43 = vector.load %arg2[%c0_25, %42, %c0_26, %c0_27] : memref<1x8x128x512xf32, #tpu.memory_space<vmem>>, vector<1x1x128x512xf32>
    %44 = vector.shape_cast %43 : vector<1x1x128x512xf32> to vector<128x512xf32>
    %45 = arith.truncf %40 : vector<128x128xf32> to vector<128x128xbf16>
    %c0_28 = arith.constant 0 : index
    %c0_29 = arith.constant 0 : index
    %46 = vector.load %arg3[%c0_28, %c0_29] : memref<128x512xbf16, #tpu.memory_space<vmem>>, vector<128x512xbf16>
    %cst_30 = arith.constant dense<0.000000e+00> : vector<128x512xf32>
    %47 = tpu.matmul %45, %46, %cst_30 {dimension_numbers = #tpu.dot_dimension_numbers<[1], [0], [0], [1], [0, 0, 1, 1], [], []>} : vector<128x128xbf16>, vector<128x512xbf16>, vector<128x512xf32> -> vector<128x512xf32>
    %48 = arith.addf %44, %47 : vector<128x512xf32>
    %49 = vector.extract_strided_slice %48 {offsets = [0, 0], sizes = [128, 128], strides = [1, 1]} : vector<128x512xf32> to vector<128x128xf32>
    %50 = arith.negf %49 : vector<128x128xf32>
    %51 = math.exp %50 : vector<128x128xf32>
    %cst_31 = arith.constant 1.000000e+00 : f32
    %52 = vector.broadcast %cst_31 : f32 to vector<128x128xf32>
    %53 = arith.addf %52, %51 : vector<128x128xf32>
    %54 = arith.divf %52, %53 : vector<128x128xf32>
    %55 = vector.extract_strided_slice %48 {offsets = [0, 128], sizes = [128, 128], strides = [1, 1]} : vector<128x512xf32> to vector<128x128xf32>
    %56 = arith.negf %55 : vector<128x128xf32>
    %57 = math.exp %56 : vector<128x128xf32>
    %cst_32 = arith.constant 1.000000e+00 : f32
    %58 = vector.broadcast %cst_32 : f32 to vector<128x128xf32>
    %59 = arith.addf %58, %57 : vector<128x128xf32>
    %60 = arith.divf %58, %59 : vector<128x128xf32>
    %61 = vector.extract_strided_slice %48 {offsets = [0, 256], sizes = [128, 128], strides = [1, 1]} : vector<128x512xf32> to vector<128x128xf32>
    %62 = math.tanh %61 : vector<128x128xf32>
    %63 = vector.extract_strided_slice %48 {offsets = [0, 384], sizes = [128, 128], strides = [1, 1]} : vector<128x512xf32> to vector<128x128xf32>
    %64 = arith.negf %63 : vector<128x128xf32>
    %65 = math.exp %64 : vector<128x128xf32>
    %cst_33 = arith.constant 1.000000e+00 : f32
    %66 = vector.broadcast %cst_33 : f32 to vector<128x128xf32>
    %67 = arith.addf %66, %65 : vector<128x128xf32>
    %68 = arith.divf %66, %67 : vector<128x128xf32>
    %69 = arith.mulf %60, %41 : vector<128x128xf32>
    %70 = arith.mulf %54, %62 : vector<128x128xf32>
    %71 = arith.addf %69, %70 : vector<128x128xf32>
    %72 = math.tanh %71 : vector<128x128xf32>
    %73 = arith.mulf %68, %72 : vector<128x128xf32>
    %c0_34 = arith.constant 0 : index
    %c0_35 = arith.constant 0 : index
    %74 = vector.load %arg5[%c0_34, %c0_35] : memref<128x128xf32, #tpu.memory_space<vmem>>, vector<128x128xf32>
    tpu.vector_store %arg5[%c0_34, %c0_35], %73 {strides = array<i32>} : memref<128x128xf32, #tpu.memory_space<vmem>>, vector<128x128xf32>,
    %c0_36 = arith.constant 0 : index
    %c0_37 = arith.constant 0 : index
    %75 = vector.load %arg6[%c0_36, %c0_37] : memref<128x128xf32, #tpu.memory_space<vmem>>, vector<128x128xf32>
    tpu.vector_store %arg6[%c0_36, %c0_37], %71 {strides = array<i32>} : memref<128x128xf32, #tpu.memory_space<vmem>>, vector<128x128xf32>,
    %c2_i32 = arith.constant 2 : i32
    %c0_38 = arith.constant 0 : index
    %c0_39 = arith.constant 0 : index
    %76 = vector.load %arg5[%c0_38, %c0_39] : memref<128x128xf32, #tpu.memory_space<vmem>>, vector<128x128xf32>
    %c0_40 = arith.constant 0 : index
    %c0_41 = arith.constant 0 : index
    %77 = vector.load %arg6[%c0_40, %c0_41] : memref<128x128xf32, #tpu.memory_space<vmem>>, vector<128x128xf32>
    %c0_42 = arith.constant 0 : index
    %78 = arith.index_cast %c2_i32 : i32 to index
    %c0_43 = arith.constant 0 : index
    %c0_44 = arith.constant 0 : index
    %79 = vector.load %arg2[%c0_42, %78, %c0_43, %c0_44] : memref<1x8x128x512xf32, #tpu.memory_space<vmem>>, vector<1x1x128x512xf32>
    %80 = vector.shape_cast %79 : vector<1x1x128x512xf32> to vector<128x512xf32>
    %81 = arith.truncf %76 : vector<128x128xf32> to vector<128x128xbf16>
    %c0_45 = arith.constant 0 : index
    %c0_46 = arith.constant 0 : index
    %82 = vector.load %arg3[%c0_45, %c0_46] : memref<128x512xbf16, #tpu.memory_space<vmem>>, vector<128x512xbf16>
    %cst_47 = arith.constant dense<0.000000e+00> : vector<128x512xf32>
    %83 = tpu.matmul %81, %82, %cst_47 {dimension_numbers = #tpu.dot_dimension_numbers<[1], [0], [0], [1], [0, 0, 1, 1], [], []>} : vector<128x128xbf16>, vector<128x512xbf16>, vector<128x512xf32> -> vector<128x512xf32>
    %84 = arith.addf %80, %83 : vector<128x512xf32>
    %85 = vector.extract_strided_slice %84 {offsets = [0, 0], sizes = [128, 128], strides = [1, 1]} : vector<128x512xf32> to vector<128x128xf32>
    %86 = arith.negf %85 : vector<128x128xf32>
    %87 = math.exp %86 : vector<128x128xf32>
    %cst_48 = arith.constant 1.000000e+00 : f32
    %88 = vector.broadcast %cst_48 : f32 to vector<128x128xf32>
    %89 = arith.addf %88, %87 : vector<128x128xf32>
    %90 = arith.divf %88, %89 : vector<128x128xf32>
    %91 = vector.extract_strided_slice %84 {offsets = [0, 128], sizes = [128, 128], strides = [1, 1]} : vector<128x512xf32> to vector<128x128xf32>
    %92 = arith.negf %91 : vector<128x128xf32>
    %93 = math.exp %92 : vector<128x128xf32>
    %cst_49 = arith.constant 1.000000e+00 : f32
    %94 = vector.broadcast %cst_49 : f32 to vector<128x128xf32>
    %95 = arith.addf %94, %93 : vector<128x128xf32>
    %96 = arith.divf %94, %95 : vector<128x128xf32>
    %97 = vector.extract_strided_slice %84 {offsets = [0, 256], sizes = [128, 128], strides = [1, 1]} : vector<128x512xf32> to vector<128x128xf32>
    %98 = math.tanh %97 : vector<128x128xf32>
    %99 = vector.extract_strided_slice %84 {offsets = [0, 384], sizes = [128, 128], strides = [1, 1]} : vector<128x512xf32> to vector<128x128xf32>
    %100 = arith.negf %99 : vector<128x128xf32>
    %101 = math.exp %100 : vector<128x128xf32>
    %cst_50 = arith.constant 1.000000e+00 : f32
    %102 = vector.broadcast %cst_50 : f32 to vector<128x128xf32>
    %103 = arith.addf %102, %101 : vector<128x128xf32>
    %104 = arith.divf %102, %103 : vector<128x128xf32>
    %105 = arith.mulf %96, %77 : vector<128x128xf32>
    %106 = arith.mulf %90, %98 : vector<128x128xf32>
    %107 = arith.addf %105, %106 : vector<128x128xf32>
    %108 = math.tanh %107 : vector<128x128xf32>
    %109 = arith.mulf %104, %108 : vector<128x128xf32>
    %c0_51 = arith.constant 0 : index
    %c0_52 = arith.constant 0 : index
    %110 = vector.load %arg5[%c0_51, %c0_52] : memref<128x128xf32, #tpu.memory_space<vmem>>, vector<128x128xf32>
    tpu.vector_store %arg5[%c0_51, %c0_52], %109 {strides = array<i32>} : memref<128x128xf32, #tpu.memory_space<vmem>>, vector<128x128xf32>,
    %c0_53 = arith.constant 0 : index
    %c0_54 = arith.constant 0 : index
    %111 = vector.load %arg6[%c0_53, %c0_54] : memref<128x128xf32, #tpu.memory_space<vmem>>, vector<128x128xf32>
    tpu.vector_store %arg6[%c0_53, %c0_54], %107 {strides = array<i32>} : memref<128x128xf32, #tpu.memory_space<vmem>>, vector<128x128xf32>,
    %c3_i32 = arith.constant 3 : i32
    %c0_55 = arith.constant 0 : index
    %c0_56 = arith.constant 0 : index
    %112 = vector.load %arg5[%c0_55, %c0_56] : memref<128x128xf32, #tpu.memory_space<vmem>>, vector<128x128xf32>
    %c0_57 = arith.constant 0 : index
    %c0_58 = arith.constant 0 : index
    %113 = vector.load %arg6[%c0_57, %c0_58] : memref<128x128xf32, #tpu.memory_space<vmem>>, vector<128x128xf32>
    %c0_59 = arith.constant 0 : index
    %114 = arith.index_cast %c3_i32 : i32 to index
    %c0_60 = arith.constant 0 : index
    %c0_61 = arith.constant 0 : index
    %115 = vector.load %arg2[%c0_59, %114, %c0_60, %c0_61] : memref<1x8x128x512xf32, #tpu.memory_space<vmem>>, vector<1x1x128x512xf32>
    %116 = vector.shape_cast %115 : vector<1x1x128x512xf32> to vector<128x512xf32>
    %117 = arith.truncf %112 : vector<128x128xf32> to vector<128x128xbf16>
    %c0_62 = arith.constant 0 : index
    %c0_63 = arith.constant 0 : index
    %118 = vector.load %arg3[%c0_62, %c0_63] : memref<128x512xbf16, #tpu.memory_space<vmem>>, vector<128x512xbf16>
    %cst_64 = arith.constant dense<0.000000e+00> : vector<128x512xf32>
    %119 = tpu.matmul %117, %118, %cst_64 {dimension_numbers = #tpu.dot_dimension_numbers<[1], [0], [0], [1], [0, 0, 1, 1], [], []>} : vector<128x128xbf16>, vector<128x512xbf16>, vector<128x512xf32> -> vector<128x512xf32>
    %120 = arith.addf %116, %119 : vector<128x512xf32>
    %121 = vector.extract_strided_slice %120 {offsets = [0, 0], sizes = [128, 128], strides = [1, 1]} : vector<128x512xf32> to vector<128x128xf32>
    %122 = arith.negf %121 : vector<128x128xf32>
    %123 = math.exp %122 : vector<128x128xf32>
    %cst_65 = arith.constant 1.000000e+00 : f32
    %124 = vector.broadcast %cst_65 : f32 to vector<128x128xf32>
    %125 = arith.addf %124, %123 : vector<128x128xf32>
    %126 = arith.divf %124, %125 : vector<128x128xf32>
    %127 = vector.extract_strided_slice %120 {offsets = [0, 128], sizes = [128, 128], strides = [1, 1]} : vector<128x512xf32> to vector<128x128xf32>
    %128 = arith.negf %127 : vector<128x128xf32>
    %129 = math.exp %128 : vector<128x128xf32>
    %cst_66 = arith.constant 1.000000e+00 : f32
    %130 = vector.broadcast %cst_66 : f32 to vector<128x128xf32>
    %131 = arith.addf %130, %129 : vector<128x128xf32>
    %132 = arith.divf %130, %131 : vector<128x128xf32>
    %133 = vector.extract_strided_slice %120 {offsets = [0, 256], sizes = [128, 128], strides = [1, 1]} : vector<128x512xf32> to vector<128x128xf32>
    %134 = math.tanh %133 : vector<128x128xf32>
    %135 = vector.extract_strided_slice %120 {offsets = [0, 384], sizes = [128, 128], strides = [1, 1]} : vector<128x512xf32> to vector<128x128xf32>
    %136 = arith.negf %135 : vector<128x128xf32>
    %137 = math.exp %136 : vector<128x128xf32>
    %cst_67 = arith.constant 1.000000e+00 : f32
    %138 = vector.broadcast %cst_67 : f32 to vector<128x128xf32>
    %139 = arith.addf %138, %137 : vector<128x128xf32>
    %140 = arith.divf %138, %139 : vector<128x128xf32>
    %141 = arith.mulf %132, %113 : vector<128x128xf32>
    %142 = arith.mulf %126, %134 : vector<128x128xf32>
    %143 = arith.addf %141, %142 : vector<128x128xf32>
    %144 = math.tanh %143 : vector<128x128xf32>
    %145 = arith.mulf %140, %144 : vector<128x128xf32>
    %c0_68 = arith.constant 0 : index
    %c0_69 = arith.constant 0 : index
    %146 = vector.load %arg5[%c0_68, %c0_69] : memref<128x128xf32, #tpu.memory_space<vmem>>, vector<128x128xf32>
    tpu.vector_store %arg5[%c0_68, %c0_69], %145 {strides = array<i32>} : memref<128x128xf32, #tpu.memory_space<vmem>>, vector<128x128xf32>,
    %c0_70 = arith.constant 0 : index
    %c0_71 = arith.constant 0 : index
    %147 = vector.load %arg6[%c0_70, %c0_71] : memref<128x128xf32, #tpu.memory_space<vmem>>, vector<128x128xf32>
    tpu.vector_store %arg6[%c0_70, %c0_71], %143 {strides = array<i32>} : memref<128x128xf32, #tpu.memory_space<vmem>>, vector<128x128xf32>,
    %c4_i32 = arith.constant 4 : i32
    %c0_72 = arith.constant 0 : index
    %c0_73 = arith.constant 0 : index
    %148 = vector.load %arg5[%c0_72, %c0_73] : memref<128x128xf32, #tpu.memory_space<vmem>>, vector<128x128xf32>
    %c0_74 = arith.constant 0 : index
    %c0_75 = arith.constant 0 : index
    %149 = vector.load %arg6[%c0_74, %c0_75] : memref<128x128xf32, #tpu.memory_space<vmem>>, vector<128x128xf32>
    %c0_76 = arith.constant 0 : index
    %150 = arith.index_cast %c4_i32 : i32 to index
    %c0_77 = arith.constant 0 : index
    %c0_78 = arith.constant 0 : index
    %151 = vector.load %arg2[%c0_76, %150, %c0_77, %c0_78] : memref<1x8x128x512xf32, #tpu.memory_space<vmem>>, vector<1x1x128x512xf32>
    %152 = vector.shape_cast %151 : vector<1x1x128x512xf32> to vector<128x512xf32>
    %153 = arith.truncf %148 : vector<128x128xf32> to vector<128x128xbf16>
    %c0_79 = arith.constant 0 : index
    %c0_80 = arith.constant 0 : index
    %154 = vector.load %arg3[%c0_79, %c0_80] : memref<128x512xbf16, #tpu.memory_space<vmem>>, vector<128x512xbf16>
    %cst_81 = arith.constant dense<0.000000e+00> : vector<128x512xf32>
    %155 = tpu.matmul %153, %154, %cst_81 {dimension_numbers = #tpu.dot_dimension_numbers<[1], [0], [0], [1], [0, 0, 1, 1], [], []>} : vector<128x128xbf16>, vector<128x512xbf16>, vector<128x512xf32> -> vector<128x512xf32>
    %156 = arith.addf %152, %155 : vector<128x512xf32>
    %157 = vector.extract_strided_slice %156 {offsets = [0, 0], sizes = [128, 128], strides = [1, 1]} : vector<128x512xf32> to vector<128x128xf32>
    %158 = arith.negf %157 : vector<128x128xf32>
    %159 = math.exp %158 : vector<128x128xf32>
    %cst_82 = arith.constant 1.000000e+00 : f32
    %160 = vector.broadcast %cst_82 : f32 to vector<128x128xf32>
    %161 = arith.addf %160, %159 : vector<128x128xf32>
    %162 = arith.divf %160, %161 : vector<128x128xf32>
    %163 = vector.extract_strided_slice %156 {offsets = [0, 128], sizes = [128, 128], strides = [1, 1]} : vector<128x512xf32> to vector<128x128xf32>
    %164 = arith.negf %163 : vector<128x128xf32>
    %165 = math.exp %164 : vector<128x128xf32>
    %cst_83 = arith.constant 1.000000e+00 : f32
    %166 = vector.broadcast %cst_83 : f32 to vector<128x128xf32>
    %167 = arith.addf %166, %165 : vector<128x128xf32>
    %168 = arith.divf %166, %167 : vector<128x128xf32>
    %169 = vector.extract_strided_slice %156 {offsets = [0, 256], sizes = [128, 128], strides = [1, 1]} : vector<128x512xf32> to vector<128x128xf32>
    %170 = math.tanh %169 : vector<128x128xf32>
    %171 = vector.extract_strided_slice %156 {offsets = [0, 384], sizes = [128, 128], strides = [1, 1]} : vector<128x512xf32> to vector<128x128xf32>
    %172 = arith.negf %171 : vector<128x128xf32>
    %173 = math.exp %172 : vector<128x128xf32>
    %cst_84 = arith.constant 1.000000e+00 : f32
    %174 = vector.broadcast %cst_84 : f32 to vector<128x128xf32>
    %175 = arith.addf %174, %173 : vector<128x128xf32>
    %176 = arith.divf %174, %175 : vector<128x128xf32>
    %177 = arith.mulf %168, %149 : vector<128x128xf32>
    %178 = arith.mulf %162, %170 : vector<128x128xf32>
    %179 = arith.addf %177, %178 : vector<128x128xf32>
    %180 = math.tanh %179 : vector<128x128xf32>
    %181 = arith.mulf %176, %180 : vector<128x128xf32>
    %c0_85 = arith.constant 0 : index
    %c0_86 = arith.constant 0 : index
    %182 = vector.load %arg5[%c0_85, %c0_86] : memref<128x128xf32, #tpu.memory_space<vmem>>, vector<128x128xf32>
    tpu.vector_store %arg5[%c0_85, %c0_86], %181 {strides = array<i32>} : memref<128x128xf32, #tpu.memory_space<vmem>>, vector<128x128xf32>,
    %c0_87 = arith.constant 0 : index
    %c0_88 = arith.constant 0 : index
    %183 = vector.load %arg6[%c0_87, %c0_88] : memref<128x128xf32, #tpu.memory_space<vmem>>, vector<128x128xf32>
    tpu.vector_store %arg6[%c0_87, %c0_88], %179 {strides = array<i32>} : memref<128x128xf32, #tpu.memory_space<vmem>>, vector<128x128xf32>,
    %c5_i32 = arith.constant 5 : i32
    %c0_89 = arith.constant 0 : index
    %c0_90 = arith.constant 0 : index
    %184 = vector.load %arg5[%c0_89, %c0_90] : memref<128x128xf32, #tpu.memory_space<vmem>>, vector<128x128xf32>
    %c0_91 = arith.constant 0 : index
    %c0_92 = arith.constant 0 : index
    %185 = vector.load %arg6[%c0_91, %c0_92] : memref<128x128xf32, #tpu.memory_space<vmem>>, vector<128x128xf32>
    %c0_93 = arith.constant 0 : index
    %186 = arith.index_cast %c5_i32 : i32 to index
    %c0_94 = arith.constant 0 : index
    %c0_95 = arith.constant 0 : index
    %187 = vector.load %arg2[%c0_93, %186, %c0_94, %c0_95] : memref<1x8x128x512xf32, #tpu.memory_space<vmem>>, vector<1x1x128x512xf32>
    %188 = vector.shape_cast %187 : vector<1x1x128x512xf32> to vector<128x512xf32>
    %189 = arith.truncf %184 : vector<128x128xf32> to vector<128x128xbf16>
    %c0_96 = arith.constant 0 : index
    %c0_97 = arith.constant 0 : index
    %190 = vector.load %arg3[%c0_96, %c0_97] : memref<128x512xbf16, #tpu.memory_space<vmem>>, vector<128x512xbf16>
    %cst_98 = arith.constant dense<0.000000e+00> : vector<128x512xf32>
    %191 = tpu.matmul %189, %190, %cst_98 {dimension_numbers = #tpu.dot_dimension_numbers<[1], [0], [0], [1], [0, 0, 1, 1], [], []>} : vector<128x128xbf16>, vector<128x512xbf16>, vector<128x512xf32> -> vector<128x512xf32>
    %192 = arith.addf %188, %191 : vector<128x512xf32>
    %193 = vector.extract_strided_slice %192 {offsets = [0, 0], sizes = [128, 128], strides = [1, 1]} : vector<128x512xf32> to vector<128x128xf32>
    %194 = arith.negf %193 : vector<128x128xf32>
    %195 = math.exp %194 : vector<128x128xf32>
    %cst_99 = arith.constant 1.000000e+00 : f32
    %196 = vector.broadcast %cst_99 : f32 to vector<128x128xf32>
    %197 = arith.addf %196, %195 : vector<128x128xf32>
    %198 = arith.divf %196, %197 : vector<128x128xf32>
    %199 = vector.extract_strided_slice %192 {offsets = [0, 128], sizes = [128, 128], strides = [1, 1]} : vector<128x512xf32> to vector<128x128xf32>
    %200 = arith.negf %199 : vector<128x128xf32>
    %201 = math.exp %200 : vector<128x128xf32>
    %cst_100 = arith.constant 1.000000e+00 : f32
    %202 = vector.broadcast %cst_100 : f32 to vector<128x128xf32>
    %203 = arith.addf %202, %201 : vector<128x128xf32>
    %204 = arith.divf %202, %203 : vector<128x128xf32>
    %205 = vector.extract_strided_slice %192 {offsets = [0, 256], sizes = [128, 128], strides = [1, 1]} : vector<128x512xf32> to vector<128x128xf32>
    %206 = math.tanh %205 : vector<128x128xf32>
    %207 = vector.extract_strided_slice %192 {offsets = [0, 384], sizes = [128, 128], strides = [1, 1]} : vector<128x512xf32> to vector<128x128xf32>
    %208 = arith.negf %207 : vector<128x128xf32>
    %209 = math.exp %208 : vector<128x128xf32>
    %cst_101 = arith.constant 1.000000e+00 : f32
    %210 = vector.broadcast %cst_101 : f32 to vector<128x128xf32>
    %211 = arith.addf %210, %209 : vector<128x128xf32>
    %212 = arith.divf %210, %211 : vector<128x128xf32>
    %213 = arith.mulf %204, %185 : vector<128x128xf32>
    %214 = arith.mulf %198, %206 : vector<128x128xf32>
    %215 = arith.addf %213, %214 : vector<128x128xf32>
    %216 = math.tanh %215 : vector<128x128xf32>
    %217 = arith.mulf %212, %216 : vector<128x128xf32>
    %c0_102 = arith.constant 0 : index
    %c0_103 = arith.constant 0 : index
    %218 = vector.load %arg5[%c0_102, %c0_103] : memref<128x128xf32, #tpu.memory_space<vmem>>, vector<128x128xf32>
    tpu.vector_store %arg5[%c0_102, %c0_103], %217 {strides = array<i32>} : memref<128x128xf32, #tpu.memory_space<vmem>>, vector<128x128xf32>,
    %c0_104 = arith.constant 0 : index
    %c0_105 = arith.constant 0 : index
    %219 = vector.load %arg6[%c0_104, %c0_105] : memref<128x128xf32, #tpu.memory_space<vmem>>, vector<128x128xf32>
    tpu.vector_store %arg6[%c0_104, %c0_105], %215 {strides = array<i32>} : memref<128x128xf32, #tpu.memory_space<vmem>>, vector<128x128xf32>,
    %c6_i32 = arith.constant 6 : i32
    %c0_106 = arith.constant 0 : index
    %c0_107 = arith.constant 0 : index
    %220 = vector.load %arg5[%c0_106, %c0_107] : memref<128x128xf32, #tpu.memory_space<vmem>>, vector<128x128xf32>
    %c0_108 = arith.constant 0 : index
    %c0_109 = arith.constant 0 : index
    %221 = vector.load %arg6[%c0_108, %c0_109] : memref<128x128xf32, #tpu.memory_space<vmem>>, vector<128x128xf32>
    %c0_110 = arith.constant 0 : index
    %222 = arith.index_cast %c6_i32 : i32 to index
    %c0_111 = arith.constant 0 : index
    %c0_112 = arith.constant 0 : index
    %223 = vector.load %arg2[%c0_110, %222, %c0_111, %c0_112] : memref<1x8x128x512xf32, #tpu.memory_space<vmem>>, vector<1x1x128x512xf32>
    %224 = vector.shape_cast %223 : vector<1x1x128x512xf32> to vector<128x512xf32>
    %225 = arith.truncf %220 : vector<128x128xf32> to vector<128x128xbf16>
    %c0_113 = arith.constant 0 : index
    %c0_114 = arith.constant 0 : index
    %226 = vector.load %arg3[%c0_113, %c0_114] : memref<128x512xbf16, #tpu.memory_space<vmem>>, vector<128x512xbf16>
    %cst_115 = arith.constant dense<0.000000e+00> : vector<128x512xf32>
    %227 = tpu.matmul %225, %226, %cst_115 {dimension_numbers = #tpu.dot_dimension_numbers<[1], [0], [0], [1], [0, 0, 1, 1], [], []>} : vector<128x128xbf16>, vector<128x512xbf16>, vector<128x512xf32> -> vector<128x512xf32>
    %228 = arith.addf %224, %227 : vector<128x512xf32>
    %229 = vector.extract_strided_slice %228 {offsets = [0, 0], sizes = [128, 128], strides = [1, 1]} : vector<128x512xf32> to vector<128x128xf32>
    %230 = arith.negf %229 : vector<128x128xf32>
    %231 = math.exp %230 : vector<128x128xf32>
    %cst_116 = arith.constant 1.000000e+00 : f32
    %232 = vector.broadcast %cst_116 : f32 to vector<128x128xf32>
    %233 = arith.addf %232, %231 : vector<128x128xf32>
    %234 = arith.divf %232, %233 : vector<128x128xf32>
    %235 = vector.extract_strided_slice %228 {offsets = [0, 128], sizes = [128, 128], strides = [1, 1]} : vector<128x512xf32> to vector<128x128xf32>
    %236 = arith.negf %235 : vector<128x128xf32>
    %237 = math.exp %236 : vector<128x128xf32>
    %cst_117 = arith.constant 1.000000e+00 : f32
    %238 = vector.broadcast %cst_117 : f32 to vector<128x128xf32>
    %239 = arith.addf %238, %237 : vector<128x128xf32>
    %240 = arith.divf %238, %239 : vector<128x128xf32>
    %241 = vector.extract_strided_slice %228 {offsets = [0, 256], sizes = [128, 128], strides = [1, 1]} : vector<128x512xf32> to vector<128x128xf32>
    %242 = math.tanh %241 : vector<128x128xf32>
    %243 = vector.extract_strided_slice %228 {offsets = [0, 384], sizes = [128, 128], strides = [1, 1]} : vector<128x512xf32> to vector<128x128xf32>
    %244 = arith.negf %243 : vector<128x128xf32>
    %245 = math.exp %244 : vector<128x128xf32>
    %cst_118 = arith.constant 1.000000e+00 : f32
    %246 = vector.broadcast %cst_118 : f32 to vector<128x128xf32>
    %247 = arith.addf %246, %245 : vector<128x128xf32>
    %248 = arith.divf %246, %247 : vector<128x128xf32>
    %249 = arith.mulf %240, %221 : vector<128x128xf32>
    %250 = arith.mulf %234, %242 : vector<128x128xf32>
    %251 = arith.addf %249, %250 : vector<128x128xf32>
    %252 = math.tanh %251 : vector<128x128xf32>
    %253 = arith.mulf %248, %252 : vector<128x128xf32>
    %c0_119 = arith.constant 0 : index
    %c0_120 = arith.constant 0 : index
    %254 = vector.load %arg5[%c0_119, %c0_120] : memref<128x128xf32, #tpu.memory_space<vmem>>, vector<128x128xf32>
    tpu.vector_store %arg5[%c0_119, %c0_120], %253 {strides = array<i32>} : memref<128x128xf32, #tpu.memory_space<vmem>>, vector<128x128xf32>,
    %c0_121 = arith.constant 0 : index
    %c0_122 = arith.constant 0 : index
    %255 = vector.load %arg6[%c0_121, %c0_122] : memref<128x128xf32, #tpu.memory_space<vmem>>, vector<128x128xf32>
    tpu.vector_store %arg6[%c0_121, %c0_122], %251 {strides = array<i32>} : memref<128x128xf32, #tpu.memory_space<vmem>>, vector<128x128xf32>,
    %c7_i32 = arith.constant 7 : i32
    %c0_123 = arith.constant 0 : index
    %c0_124 = arith.constant 0 : index
    %256 = vector.load %arg5[%c0_123, %c0_124] : memref<128x128xf32, #tpu.memory_space<vmem>>, vector<128x128xf32>
    %c0_125 = arith.constant 0 : index
    %c0_126 = arith.constant 0 : index
    %257 = vector.load %arg6[%c0_125, %c0_126] : memref<128x128xf32, #tpu.memory_space<vmem>>, vector<128x128xf32>
    %c0_127 = arith.constant 0 : index
    %258 = arith.index_cast %c7_i32 : i32 to index
    %c0_128 = arith.constant 0 : index
    %c0_129 = arith.constant 0 : index
    %259 = vector.load %arg2[%c0_127, %258, %c0_128, %c0_129] : memref<1x8x128x512xf32, #tpu.memory_space<vmem>>, vector<1x1x128x512xf32>
    %260 = vector.shape_cast %259 : vector<1x1x128x512xf32> to vector<128x512xf32>
    %261 = arith.truncf %256 : vector<128x128xf32> to vector<128x128xbf16>
    %c0_130 = arith.constant 0 : index
    %c0_131 = arith.constant 0 : index
    %262 = vector.load %arg3[%c0_130, %c0_131] : memref<128x512xbf16, #tpu.memory_space<vmem>>, vector<128x512xbf16>
    %cst_132 = arith.constant dense<0.000000e+00> : vector<128x512xf32>
    %263 = tpu.matmul %261, %262, %cst_132 {dimension_numbers = #tpu.dot_dimension_numbers<[1], [0], [0], [1], [0, 0, 1, 1], [], []>} : vector<128x128xbf16>, vector<128x512xbf16>, vector<128x512xf32> -> vector<128x512xf32>
    %264 = arith.addf %260, %263 : vector<128x512xf32>
    %265 = vector.extract_strided_slice %264 {offsets = [0, 0], sizes = [128, 128], strides = [1, 1]} : vector<128x512xf32> to vector<128x128xf32>
    %266 = arith.negf %265 : vector<128x128xf32>
    %267 = math.exp %266 : vector<128x128xf32>
    %cst_133 = arith.constant 1.000000e+00 : f32
    %268 = vector.broadcast %cst_133 : f32 to vector<128x128xf32>
    %269 = arith.addf %268, %267 : vector<128x128xf32>
    %270 = arith.divf %268, %269 : vector<128x128xf32>
    %271 = vector.extract_strided_slice %264 {offsets = [0, 128], sizes = [128, 128], strides = [1, 1]} : vector<128x512xf32> to vector<128x128xf32>
    %272 = arith.negf %271 : vector<128x128xf32>
    %273 = math.exp %272 : vector<128x128xf32>
    %cst_134 = arith.constant 1.000000e+00 : f32
    %274 = vector.broadcast %cst_134 : f32 to vector<128x128xf32>
    %275 = arith.addf %274, %273 : vector<128x128xf32>
    %276 = arith.divf %274, %275 : vector<128x128xf32>
    %277 = vector.extract_strided_slice %264 {offsets = [0, 256], sizes = [128, 128], strides = [1, 1]} : vector<128x512xf32> to vector<128x128xf32>
    %278 = math.tanh %277 : vector<128x128xf32>
    %279 = vector.extract_strided_slice %264 {offsets = [0, 384], sizes = [128, 128], strides = [1, 1]} : vector<128x512xf32> to vector<128x128xf32>
    %280 = arith.negf %279 : vector<128x128xf32>
    %281 = math.exp %280 : vector<128x128xf32>
    %cst_135 = arith.constant 1.000000e+00 : f32
    %282 = vector.broadcast %cst_135 : f32 to vector<128x128xf32>
    %283 = arith.addf %282, %281 : vector<128x128xf32>
    %284 = arith.divf %282, %283 : vector<128x128xf32>
    %285 = arith.mulf %276, %257 : vector<128x128xf32>
    %286 = arith.mulf %270, %278 : vector<128x128xf32>
    %287 = arith.addf %285, %286 : vector<128x128xf32>
    %288 = math.tanh %287 : vector<128x128xf32>
    %289 = arith.mulf %284, %288 : vector<128x128xf32>
    %c0_136 = arith.constant 0 : index
    %c0_137 = arith.constant 0 : index
    %290 = vector.load %arg5[%c0_136, %c0_137] : memref<128x128xf32, #tpu.memory_space<vmem>>, vector<128x128xf32>
    tpu.vector_store %arg5[%c0_136, %c0_137], %289 {strides = array<i32>} : memref<128x128xf32, #tpu.memory_space<vmem>>, vector<128x128xf32>,
    %c0_138 = arith.constant 0 : index
    %c0_139 = arith.constant 0 : index
    %291 = vector.load %arg6[%c0_138, %c0_139] : memref<128x128xf32, #tpu.memory_space<vmem>>, vector<128x128xf32>
    tpu.vector_store %arg6[%c0_138, %c0_139], %287 {strides = array<i32>} : memref<128x128xf32, #tpu.memory_space<vmem>>, vector<128x128xf32>,
    %c8_i32 = arith.constant 8 : i32
    %c0_140 = arith.constant 0 : index
    %c0_141 = arith.constant 0 : index
    %292 = vector.load %arg5[%c0_140, %c0_141] : memref<128x128xf32, #tpu.memory_space<vmem>>, vector<128x128xf32>
    %c0_142 = arith.constant 0 : index
    %c0_143 = arith.constant 0 : index
    %c0_144 = arith.constant 0 : index
    %293 = vector.load %arg4[%c0_142, %c0_143, %c0_144] : memref<1x128x128xf32, #tpu.memory_space<vmem>>, vector<1x128x128xf32>
    %294 = vector.shape_cast %293 : vector<1x128x128xf32> to vector<128x128xf32>
    %295 = vector.shape_cast %292 : vector<128x128xf32> to vector<1x128x128xf32>
    tpu.vector_store %arg4[%c0_142, %c0_143, %c0_144], %295 {strides = array<i32>} : memref<1x128x128xf32, #tpu.memory_space<vmem>>, vector<1x128x128xf32>,
    return
  }
  func.func @transform_0(%arg0: i32, %arg1: i32) -> (i32, i32, i32, i32) {
    %c0_i32 = arith.constant 0 : i32
    %c0_i32_0 = arith.constant 0 : i32
    %c0_i32_1 = arith.constant 0 : i32
    return %arg0, %c0_i32, %arg1, %c0_i32_0 : i32, i32, i32, i32
  }
  func.func @transform_1(%arg0: i32, %arg1: i32) -> (i32, i32) {
    %c0_i32 = arith.constant 0 : i32
    %c0_i32_0 = arith.constant 0 : i32
    %c0_i32_1 = arith.constant 0 : i32
    return %c0_i32, %c0_i32_0 : i32, i32
  }
  func.func @transform_2(%arg0: i32, %arg1: i32) -> (i32, i32, i32) {
    %c0_i32 = arith.constant 0 : i32
    %c0_i32_0 = arith.constant 0 : i32
    return %arg0, %arg1, %c0_i32 : i32, i32, i32
  }
}

</mosaic_0001>

<bundles_post_ra>
// kernel: lstm_encoder_forward.2
= control target key start
LH: loop header
LB: loop body
LE: loop exit
PB: predicated region body
PF: predicated region fallthrough
CT: control target
= control target key end

     0   :  { %s3198_s12 = smov 0   ;;  %s4550_s0 = inlined_call_operand.vmem [shape: bf16[2,9,128,128], index: 0, kind: input, shape index: {}]   ;;  %s4551_s1 = inlined_call_operand.vmem [shape: bf16[128,512], index: 1, kind: input, shape index: {}]   ;;  %s4552_s2 = inlined_call_operand.vmem [shape: f32[1,512], index: 2, kind: input, shape index: {}]   ;;  %s4553_s3 = inlined_call_operand.vmem [shape: f32[2,8,128,512], index: 3, kind: output, shape index: {}]  }
   0x1 LB: > { %s2812_s13 = sadd.s32 4294967295, %s3175_s12   ;;  %p2816_p0 = scmp.ge.s32.totalorder %s3175_s12, 1  ;;  %s3175_s12 = sphi %s3198_s12, %s13_s12  }
   0x2   : > { %p137_p1 = scmp.lt.s32.totalorder %s3175_s12, 3 }
   0x4   : > { %p138_p2 = pnand %p2816_p0, %p137_p1 }
   0x5   : > { %v3057_v0 = vld [vmem:[%s4551_s1 + $0x4] ss:$16 sps:$4 sm:$0xff] (!%p138_p2)   ;;  %v3059_v1 = vld [vmem:[%s4551_s1 + $0xc] ss:$16 sps:$4 sm:$0xff] (!%p138_p2)   ;;  %v3177_v2 = vmov (!%p138_p2), 0   ;;  %p161_p3 = scmp.lt.s32.totalorder (!%p138_p2), %s2812_s13, 1  ;;  %v335_v59 = vlaneseq (!%p138_p2) }
   0x6   : > { %141 = sbr.rel (%p138_p2) target bundleno = 761 (0x2f9), region = 32  ;;  %931 = vmatprep.mubr.bf16.mxu0 (!%p138_p2), %v3177_v2  ;;  %1604 = vmatprep.mubr.bf16.mxu1 (!%p138_p2), %v3177_v2  ;;  %v3061_v3 = vld [vmem:[%s4551_s1] ss:$16 sps:$4 sm:$0xff] (!%p138_p2)   ;;  %v3062_v4 = vld [vmem:[%s4551_s1 + $0x8] ss:$16 sps:$4 sm:$0xff] (!%p138_p2)  }
   0x7   : > { %899 = vmatprep.subr.bf16.mxu0 (!%p138_p2), %v3057_v0  ;;  %1572 = vmatprep.subr.bf16.mxu1 (!%p138_p2), %v3059_v1  ;;  %v3063_v5 = vld [vmem:[%s4551_s1 + $0x24] ss:$16 sps:$4 sm:$0xff] (!%p138_p2)   ;;  %v3065_v6 = vld [vmem:[%s4551_s1 + $0x2c] ss:$16 sps:$4 sm:$0xff] (!%p138_p2)   ;;  %v3067_v7 = vld [vmem:[%s4551_s1 + $0x20] ss:$16 sps:$4 sm:$0xff] (!%p138_p2)  }
   0x8   : > { %900 = vmatpush1.bf16.msra.mxu0 (!%p138_p2), %v3061_v3  ;;  %1573 = vmatpush1.bf16.msra.mxu1 (!%p138_p2), %v3062_v4  ;;  %v3068_v8 = vld [vmem:[%s4551_s1 + $0x28] ss:$16 sps:$4 sm:$0xff] (!%p138_p2)   ;;  %v3069_v9 = vld [vmem:[%s4551_s1 + $0x44] ss:$16 sps:$4 sm:$0xff] (!%p138_p2)   ;;  %v3071_v10 = vld [vmem:[%s4551_s1 + $0x4c] ss:$16 sps:$4 sm:$0xff] (!%p138_p2)  }
   0x9   : > { %901 = vmatprep.subr.bf16.mxu0 (!%p138_p2), %v3063_v5  ;;  %1574 = vmatprep.subr.bf16.mxu1 (!%p138_p2), %v3065_v6  ;;  %v3073_v11 = vld [vmem:[%s4551_s1 + $0x40] ss:$16 sps:$4 sm:$0xff] (!%p138_p2)   ;;  %v3074_v12 = vld [vmem:[%s4551_s1 + $0x48] ss:$16 sps:$4 sm:$0xff] (!%p138_p2)   ;;  %v3075_v13 = vld [vmem:[%s4551_s1 + $0x64] ss:$16 sps:$4 sm:$0xff] (!%p138_p2)  }
   0xa   : > { %v3077_v14 = vld [vmem:[%s4551_s1 + $0x6c] ss:$16 sps:$4 sm:$0xff] (!%p138_p2)   ;;  %v3079_v15 = vld [vmem:[%s4551_s1 + $0x60] ss:$16 sps:$4 sm:$0xff] (!%p138_p2)   ;;  %v3080_v16 = vld [vmem:[%s4551_s1 + $0x68] ss:$16 sps:$4 sm:$0xff] (!%p138_p2)  }
   0xb   : > { %v3081_v17 = vld [vmem:[%s4551_s1 + $0x84] ss:$16 sps:$4 sm:$0xff] (!%p138_p2)   ;;  %v3083_v18 = vld [vmem:[%s4551_s1 + $0x8c] ss:$16 sps:$4 sm:$0xff] (!%p138_p2)   ;;  %v3085_v19 = vld [vmem:[%s4551_s1 + $0x80] ss:$16 sps:$4 sm:$0xff] (!%p138_p2)  }
   0xc   : > { %902 = vmatpush1.bf16.msra.mxu0 (!%p138_p2), %v3067_v7  ;;  %1575 = vmatpush1.bf16.msra.mxu1 (!%p138_p2), %v3068_v8  ;;  %v3086_v20 = vld [vmem:[%s4551_s1 + $0x88] ss:$16 sps:$4 sm:$0xff] (!%p138_p2)   ;;  %v3087_v21 = vld [vmem:[%s4551_s1 + $0xa4] ss:$16 sps:$4 sm:$0xff] (!%p138_p2)   ;;  %v3089_v22 = vld [vmem:[%s4551_s1 + $0xac] ss:$16 sps:$4 sm:$0xff] (!%p138_p2)  }
   0xd   : > { %903 = vmatprep.subr.bf16.mxu0 %v3069_v9  ;;  %1576 = vmatprep.subr.bf16.mxu1 %v3071_v10  ;;  %s4555_s13 = smov (!%p161_p3, %s2812_s13), 1  ;;  %v3091_v23 = vld [vmem:[%s4551_s1 + $0xa0] ss:$16 sps:$4 sm:$0xff]   ;;  %v3092_v24 = vld [vmem:[%s4551_s1 + $0xa8] ss:$16 sps:$4 sm:$0xff]   ;;  %v336_v60 = vshrl.u32 %v335_v59, 7 }
   0xe   : > { %s3047_s4 = smul.u32 576, %s4555_s13  ;;  %v3093_v25 = vld [vmem:[%s4551_s1 + $0xc4] ss:$16 sps:$4 sm:$0xff]   ;;  %v3095_v26 = vld [vmem:[%s4551_s1 + $0xcc] ss:$16 sps:$4 sm:$0xff]   ;;  %s3046_s7 = sshll.u32 %s4555_s13, 12 }
   0xf   : > { %v3097_v27 = vld [vmem:[%s4551_s1 + $0xc0] ss:$16 sps:$4 sm:$0xff]   ;;  %v3098_v28 = vld [vmem:[%s4551_s1 + $0xc8] ss:$16 sps:$4 sm:$0xff]   ;;  %v3099_v29 = vld [vmem:[%s4551_s1 + $0xe4] ss:$16 sps:$4 sm:$0xff]   ;;  %s3412_s10 = scalar_lea.vmem %s4553_s3, %s3046_s7 }
  0x10   : > { %904 = vmatpush1.bf16.msra.mxu0 %v3073_v11  ;;  %1577 = vmatpush1.bf16.msra.mxu1 %v3074_v12  ;;  %s3293_s17 = scalar_lea.vmem %s4550_s0, %s3047_s4  ;;  %v3101_v30 = vld [vmem:[%s4551_s1 + $0xec] ss:$16 sps:$4 sm:$0xff]   ;;  %v3103_v31 = vld [vmem:[%s4551_s1 + $0xe0] ss:$16 sps:$4 sm:$0xff]   ;;  %v3104_v32 = vld [vmem:[%s4551_s1 + $0xe8] ss:$16 sps:$4 sm:$0xff]  }
  0x11   : > { %905 = vmatprep.subr.bf16.mxu0 %v3075_v13  ;;  %1578 = vmatprep.subr.bf16.mxu1 %v3077_v14  ;;  %v3105_v33 = vld [vmem:[%s3293_s17 + $0x40] sm:$0xff]   ;;  %v3106_v34 = vld [vmem:[%s3293_s17 + $0x48] sm:$0xff]   ;;  %v3107_v35 = vld [vmem:[%s3293_s17 + $0x50] sm:$0xff]   ;;  %v337_v62 = vsub.s32 0, %v336_v60  ;;  %v345_v63 = vsub.s32 2, %v336_v60  ;;  %v341_v1 = vsub.s32 1, %v336_v60 }
  0x12   : > { %v3108_v36 = vld [vmem:[%s3293_s17 + $0x58] sm:$0xff]   ;;  %v3109_v37 = vld [vmem:[%s3293_s17 + $0x60] sm:$0xff]   ;;  %v3110_v38 = vld [vmem:[%s3293_s17 + $0x68] sm:$0xff]   ;;  %v349_v3 = vsub.s32 3, %v336_v60 }
  0x13   : > { %v3111_v39 = vld [vmem:[%s3293_s17 + $0x70] sm:$0xff]   ;;  %v3112_v40 = vld [vmem:[%s3293_s17 + $0x78] sm:$0xff]   ;;  %v3113_v41 = vld [vmem:[%s3293_s17 + $0x80] sm:$0xff]  }
  0x14   : > { %906 = vmatpush1.bf16.msra.mxu0 %v3079_v15  ;;  %1579 = vmatpush1.bf16.msra.mxu1 %v3080_v16  ;;  %v3114_v42 = vld [vmem:[%s3293_s17 + $0x88] sm:$0xff]   ;;  %v3115_v43 = vld [vmem:[%s3293_s17 + $0x90] sm:$0xff]   ;;  %v3116_v44 = vld [vmem:[%s3293_s17 + $0x98] sm:$0xff]  }
  0x15   : > { %907 = vmatprep.subr.bf16.mxu0 %v3081_v17  ;;  %1580 = vmatprep.subr.bf16.mxu1 %v3083_v18  ;;  %v3117_v45 = vld [vmem:[%s3293_s17 + $0xa0] sm:$0xff]   ;;  %v3118_v46 = vld [vmem:[%s3293_s17 + $0xa8] sm:$0xff]   ;;  %v3119_v47 = vld [vmem:[%s3293_s17 + $0xb0] sm:$0xff]  }
  0x16   : > { %v3120_v48 = vld [vmem:[%s3293_s17 + $0xb8] sm:$0xff]   ;;  %v3121_v49 = vld [vmem:[%s3293_s17 + $0xc0] sm:$0xff]   ;;  %v3122_v50 = vld [vmem:[%s3293_s17 + $0xc8] sm:$0xff]  }
  0x17   : > { %v3123_v51 = vld [vmem:[%s3293_s17 + $0xd0] sm:$0xff]   ;;  %v3124_v52 = vld [vmem:[%s3293_s17 + $0xd8] sm:$0xff]   ;;  %v3125_v53 = vld [vmem:[%s3293_s17 + $0xe0] sm:$0xff]  }
  0x18   : > { %908 = vmatpush1.bf16.msra.mxu0 %v3085_v19  ;;  %1581 = vmatpush1.bf16.msra.mxu1 %v3086_v20  ;;  %v3126_v54 = vld [vmem:[%s3293_s17 + $0xe8] sm:$0xff]   ;;  %v3127_v55 = vld [vmem:[%s3293_s17 + $0xf0] sm:$0xff]   ;;  %v3128_v56 = vld [vmem:[%s3293_s17 + $0xf8] sm:$0xff]  }
  0x19   : > { %909 = vmatprep.subr.bf16.mxu0 %v3087_v21  ;;  %1582 = vmatprep.subr.bf16.mxu1 %v3089_v22  ;;  %v3129_v57 = vld [vmem:[%s3293_s17 + $0x100] sm:$0xff]   ;;  %v3130_v58 = vld [vmem:[%s3293_s17 + $0x108] sm:$0xff]   ;;  %v3131_v61 = vld [vmem:[%s3293_s17 + $0x110] sm:$0xff]  }
  0x1a   : > { %v333_v0 = vld [vmem:[%s4552_s2] sm:$0xf]  ;;  %v3132_v14 = vld [vmem:[%s3293_s17 + $0x118] sm:$0xff]  }
  0x1b   : > { %v3399_v4 = vrot.slane %v333_v0, %v337_v62  ;;  %v3401_v5 = vrot.slane %v333_v0, %v345_v63  ;;  %v3403_v6 = vrot.slane %v333_v0, %v341_v1  ;;  %v3405_v7 = vrot.slane %v333_v0, %v349_v3  ;;  %v3135_v1 = vld [vmem:[%s3293_s17 + $0x130] sm:$0xff]  }
  0x1c   : > { %910 = vmatpush1.bf16.msra.mxu0 %v3091_v23  ;;  %1583 = vmatpush1.bf16.msra.mxu1 %v3092_v24 }
  0x1d   : > { %911 = vmatprep.subr.bf16.mxu0 %v3093_v25  ;;  %1584 = vmatprep.subr.bf16.mxu1 %v3095_v26 }
  0x20   : > { %912 = vmatpush1.bf16.msra.mxu0 %v3097_v27  ;;  %1585 = vmatpush1.bf16.msra.mxu1 %v3098_v28 }
  0x21   : > { %913 = vmatprep.subr.bf16.mxu0 %v3099_v29  ;;  %1586 = vmatprep.subr.bf16.mxu1 %v3101_v30 }
  0x24   : > { %914 = vmatpush1.bf16.msra.mxu0 %v3103_v31  ;;  %1587 = vmatpush1.bf16.msra.mxu1 %v3104_v32  ;;  %v3133_v31 = vld [vmem:[%s3293_s17 + $0x120] sm:$0xff]  }
  0x27   : > { %932 = vmatmul.mubr.bf16.vlgmr.msra.gmra.mrb[0].mxu0 %v3105_v33  ;;  %1605 = vmatmul.mubr.bf16.vlgmr.msra.gmra.mrb[0].mxu1 %v3105_v33 }
  0x28   : > { %941 = vmatprep.mubr.bf16.mxu0 %v3177_v2  ;;  %1614 = vmatprep.mubr.bf16.mxu1 %v3177_v2 }
  0x2f   : > { %942 = vmatmul.mubr.bf16.gmra.mrb[4].mxu0 %v3106_v34  ;;  %1615 = vmatmul.mubr.bf16.gmra.mrb[4].mxu1 %v3106_v34 }
  0x30   : > { %951 = vmatprep.mubr.bf16.mxu0 %v3177_v2  ;;  %1624 = vmatprep.mubr.bf16.mxu1 %v3177_v2 }
  0x37   : > { %952 = vmatmul.mubr.bf16.gmra.mrb[8].mxu0 %v3107_v35  ;;  %1625 = vmatmul.mubr.bf16.gmra.mrb[8].mxu1 %v3107_v35 }
  0x38   : > { %961 = vmatprep.mubr.bf16.mxu0 %v3177_v2  ;;  %1634 = vmatprep.mubr.bf16.mxu1 %v3177_v2 }
  0x3f   : > { %962 = vmatmul.mubr.bf16.gmra.mrb[12].mxu0 %v3108_v36  ;;  %1635 = vmatmul.mubr.bf16.gmra.mrb[12].mxu1 %v3108_v36 }
  0x40   : > { %971 = vmatprep.mubr.bf16.mxu0 %v3177_v2  ;;  %1644 = vmatprep.mubr.bf16.mxu1 %v3177_v2 }
  0x47   : > { %972 = vmatmul.mubr.bf16.gmra.mrb[16].mxu0 %v3109_v37  ;;  %1645 = vmatmul.mubr.bf16.gmra.mrb[16].mxu1 %v3109_v37 }
  0x48   : > { %981 = vmatprep.mubr.bf16.mxu0 %v3177_v2  ;;  %1654 = vmatprep.mubr.bf16.mxu1 %v3177_v2 }
  0x4f   : > { %982 = vmatmul.mubr.bf16.gmra.mrb[20].mxu0 %v3110_v38  ;;  %1655 = vmatmul.mubr.bf16.gmra.mrb[20].mxu1 %v3110_v38 }
  0x50   : > { %991 = vmatprep.mubr.bf16.mxu0 %v3177_v2  ;;  %1664 = vmatprep.mubr.bf16.mxu1 %v3177_v2 }
  0x57   : > { %992 = vmatmul.mubr.bf16.gmra.mrb[24].mxu0 %v3111_v39  ;;  %1665 = vmatmul.mubr.bf16.gmra.mrb[24].mxu1 %v3111_v39 }
  0x58   : > { %1001 = vmatprep.mubr.bf16.mxu0 %v3177_v2  ;;  %1674 = vmatprep.mubr.bf16.mxu1 %v3177_v2 }
  0x5f   : > { %1002 = vmatmul.mubr.bf16.gmra.mrb[28].mxu0 %v3112_v40  ;;  %1675 = vmatmul.mubr.bf16.gmra.mrb[28].mxu1 %v3112_v40 }
  0x60   : > { %1011 = vmatprep.mubr.bf16.mxu0 %v3177_v2  ;;  %1684 = vmatprep.mubr.bf16.mxu1 %v3177_v2 }
  0x67   : > { %1012 = vmatmul.mubr.bf16.gmra.mrb[32].mxu0 %v3113_v41  ;;  %1685 = vmatmul.mubr.bf16.gmra.mrb[32].mxu1 %v3113_v41 }
  0x68   : > { %1021 = vmatprep.mubr.bf16.mxu0 %v3177_v2  ;;  %1694 = vmatprep.mubr.bf16.mxu1 %v3177_v2 }
  0x6f   : > { %1022 = vmatmul.mubr.bf16.gmra.mrb[36].mxu0 %v3114_v42  ;;  %1695 = vmatmul.mubr.bf16.gmra.mrb[36].mxu1 %v3114_v42 }
  0x70   : > { %1031 = vmatprep.mubr.bf16.mxu0 %v3177_v2  ;;  %1704 = vmatprep.mubr.bf16.mxu1 %v3177_v2 }
  0x77   : > { %1032 = vmatmul.mubr.bf16.gmra.mrb[40].mxu0 %v3115_v43  ;;  %1705 = vmatmul.mubr.bf16.gmra.mrb[40].mxu1 %v3115_v43 }
  0x78   : > { %1041 = vmatprep.mubr.bf16.mxu0 %v3177_v2  ;;  %1714 = vmatprep.mubr.bf16.mxu1 %v3177_v2 }
  0x7f   : > { %1042 = vmatmul.mubr.bf16.gmra.mrb[44].mxu0 %v3116_v44  ;;  %1715 = vmatmul.mubr.bf16.gmra.mrb[44].mxu1 %v3116_v44 }
  0x80   : > { %1051 = vmatprep.mubr.bf16.mxu0 %v3177_v2  ;;  %1724 = vmatprep.mubr.bf16.mxu1 %v3177_v2 }
  0x87   : > { %1052 = vmatmul.mubr.bf16.gmra.mrb[48].mxu0 %v3117_v45  ;;  %1725 = vmatmul.mubr.bf16.gmra.mrb[48].mxu1 %v3117_v45 }
  0x88   : > { %1061 = vmatprep.mubr.bf16.mxu0 %v3177_v2  ;;  %1734 = vmatprep.mubr.bf16.mxu1 %v3177_v2 }
  0x8f   : > { %1062 = vmatmul.mubr.bf16.gmra.mrb[52].mxu0 %v3118_v46  ;;  %1735 = vmatmul.mubr.bf16.gmra.mrb[52].mxu1 %v3118_v46 }
  0x90   : > { %1071 = vmatprep.mubr.bf16.mxu0 %v3177_v2  ;;  %1744 = vmatprep.mubr.bf16.mxu1 %v3177_v2 }
  0x97   : > { %1072 = vmatmul.mubr.bf16.gmra.mrb[56].mxu0 %v3119_v47  ;;  %1745 = vmatmul.mubr.bf16.gmra.mrb[56].mxu1 %v3119_v47 }
  0x98   : > { %1081 = vmatprep.mubr.bf16.mxu0 %v3177_v2  ;;  %1754 = vmatprep.mubr.bf16.mxu1 %v3177_v2 }
  0x9f   : > { %1082 = vmatmul.mubr.bf16.gmra.mrb[60].mxu0 %v3120_v48  ;;  %1755 = vmatmul.mubr.bf16.gmra.mrb[60].mxu1 %v3120_v48  ;;  %v3134_v48 = vld [vmem:[%s3293_s17 + $0x128] sm:$0xff]  }
  0xa0   : > { %1091 = vmatprep.mubr.bf16.mxu0 %v3177_v2  ;;  %1764 = vmatprep.mubr.bf16.mxu1 %v3177_v2 }
  0xa7   : > { %1092 = vmatmul.mubr.bf16.gmra.mrb[64].mxu0 %v3121_v49  ;;  %1765 = vmatmul.mubr.bf16.gmra.mrb[64].mxu1 %v3121_v49 }
  0xa8   : > { %1101 = vmatprep.mubr.bf16.mxu0 %v3177_v2  ;;  %1774 = vmatprep.mubr.bf16.mxu1 %v3177_v2 }
  0xaf   : > { %1102 = vmatmul.mubr.bf16.gmra.mrb[68].mxu0 %v3122_v50  ;;  %1775 = vmatmul.mubr.bf16.gmra.mrb[68].mxu1 %v3122_v50 }
  0xb0   : > { %1111 = vmatprep.mubr.bf16.mxu0 %v3177_v2  ;;  %1784 = vmatprep.mubr.bf16.mxu1 %v3177_v2 }
  0xb7   : > { %1112 = vmatmul.mubr.bf16.gmra.mrb[72].mxu0 %v3123_v51  ;;  %1785 = vmatmul.mubr.bf16.gmra.mrb[72].mxu1 %v3123_v51 }
  0xb8   : > { %1121 = vmatprep.mubr.bf16.mxu0 %v3177_v2  ;;  %1794 = vmatprep.mubr.bf16.mxu1 %v3177_v2 }
  0xbf   : > { %1122 = vmatmul.mubr.bf16.gmra.mrb[76].mxu0 %v3124_v52  ;;  %1795 = vmatmul.mubr.bf16.gmra.mrb[76].mxu1 %v3124_v52 }
  0xc0   : > { %1131 = vmatprep.mubr.bf16.mxu0 %v3177_v2  ;;  %1804 = vmatprep.mubr.bf16.mxu1 %v3177_v2 }
  0xc7   : > { %1132 = vmatmul.mubr.bf16.gmra.mrb[80].mxu0 %v3125_v53  ;;  %1805 = vmatmul.mubr.bf16.gmra.mrb[80].mxu1 %v3125_v53 }
  0xc8   : > { %1141 = vmatprep.mubr.bf16.mxu0 %v3177_v2  ;;  %1814 = vmatprep.mubr.bf16.mxu1 %v3177_v2 }
  0xcf   : > { %1142 = vmatmul.mubr.bf16.gmra.mrb[84].mxu0 %v3126_v54  ;;  %1815 = vmatmul.mubr.bf16.gmra.mrb[84].mxu1 %v3126_v54 }
  0xd0   : > { %1151 = vmatprep.mubr.bf16.mxu0 %v3177_v2  ;;  %1824 = vmatprep.mubr.bf16.mxu1 %v3177_v2 }
  0xd7   : > { %1152 = vmatmul.mubr.bf16.gmra.mrb[88].mxu0 %v3127_v55  ;;  %1825 = vmatmul.mubr.bf16.gmra.mrb[88].mxu1 %v3127_v55 }
  0xd8   : > { %1161 = vmatprep.mubr.bf16.mxu0 %v3177_v2  ;;  %1834 = vmatprep.mubr.bf16.mxu1 %v3177_v2 }
  0xdf   : > { %1162 = vmatmul.mubr.bf16.gmra.mrb[92].mxu0 %v3128_v56  ;;  %1835 = vmatmul.mubr.bf16.gmra.mrb[92].mxu1 %v3128_v56 }
  0xe0   : > { %1171 = vmatprep.mubr.bf16.mxu0 %v3177_v2  ;;  %1844 = vmatprep.mubr.bf16.mxu1 %v3177_v2 }
  0xe7   : > { %1172 = vmatmul.mubr.bf16.gmra.mrb[96].mxu0 %v3129_v57  ;;  %1845 = vmatmul.mubr.bf16.gmra.mrb[96].mxu1 %v3129_v57 }
  0xe8   : > { %1181 = vmatprep.mubr.bf16.mxu0 %v3177_v2  ;;  %1854 = vmatprep.mubr.bf16.mxu1 %v3177_v2 }
  0xef   : > { %1182 = vmatmul.mubr.bf16.gmra.mrb[100].mxu0 %v3130_v58  ;;  %1855 = vmatmul.mubr.bf16.gmra.mrb[100].mxu1 %v3130_v58 }
  0xf0   : > { %1191 = vmatprep.mubr.bf16.mxu0 %v3177_v2  ;;  %1864 = vmatprep.mubr.bf16.mxu1 %v3177_v2 }
  0xf7   : > { %1192 = vmatmul.mubr.bf16.gmra.mrb[104].mxu0 %v3131_v61  ;;  %1865 = vmatmul.mubr.bf16.gmra.mrb[104].mxu1 %v3131_v61 }
  0xf8   : > { %1201 = vmatprep.mubr.bf16.mxu0 %v3177_v2  ;;  %1874 = vmatprep.mubr.bf16.mxu1 %v3177_v2 }
  0xfa   : > { %v933_v8 = vpop.f32.mrb[0].mxu0  ;;  %v1606_v9 = vpop.f32.mrb[0].mxu1 }
  0xfb   : > { %v934_v10 = vadd.f32 %v933_v8, %v3399_v4  ;;  %v1607_v11 = vadd.f32 %v1606_v9, %v3401_v5  ;;  %v935_v12 = vpop.f32.mrb[1].mxu0  ;;  %v1608_v13 = vpop.f32.mrb[1].mxu1 }
  0xfc   : > { %v936_v15 = vadd.f32 %v935_v12, %v3403_v6  ;;  %v1609_v16 = vadd.f32 %v1608_v13, %v3405_v7  ;;  %v937_v17 = vpop.f32.mrb[2].mxu0  ;;  %v1610_v18 = vpop.f32.mrb[2].mxu1 }
  0xfd   : > { %2245 = vst [vmem:[%s3412_s10] sm:$0xff] %v934_v10  ;;  %2247 = vst [vmem:[%s3412_s10 + $0x10] sm:$0xff] %v1607_v11  ;;  %v938_v19 = vadd.f32 %v937_v17, %v3399_v4  ;;  %v1611_v20 = vadd.f32 %v1610_v18, %v3401_v5  ;;  %v939_v21 = vpop.f32.mrb[3].mxu0  ;;  %v1612_v22 = vpop.f32.mrb[3].mxu1 }
  0xfe   : > { %2246 = vst [vmem:[%s3412_s10 + $0x8] sm:$0xff] %v936_v15  ;;  %2248 = vst [vmem:[%s3412_s10 + $0x18] sm:$0xff] %v1609_v16  ;;  %v940_v23 = vadd.f32 %v939_v21, %v3403_v6  ;;  %v1613_v24 = vadd.f32 %v1612_v22, %v3405_v7 }
  0xff   : > { %2249 = vst [vmem:[%s3412_s10 + $0x20] sm:$0xff] %v938_v19  ;;  %2251 = vst [vmem:[%s3412_s10 + $0x30] sm:$0xff] %v1611_v20  ;;  %1202 = vmatmul.mubr.bf16.gmra.mrb[108].mxu0 %v3132_v14  ;;  %1875 = vmatmul.mubr.bf16.gmra.mrb[108].mxu1 %v3132_v14 }
 0x100   : > { %2250 = vst [vmem:[%s3412_s10 + $0x28] sm:$0xff] %v940_v23  ;;  %2252 = vst [vmem:[%s3412_s10 + $0x38] sm:$0xff] %v1613_v24  ;;  %1211 = vmatprep.mubr.bf16.mxu0 %v3177_v2  ;;  %1884 = vmatprep.mubr.bf16.mxu1 %v3177_v2  ;;  %v3136_v23 = vld [vmem:[%s3293_s17 + $0x138] sm:$0xff]  }
 0x102   : > { %v943_v25 = vpop.f32.mrb[4].mxu0  ;;  %v1616_v26 = vpop.f32.mrb[4].mxu1 }
 0x103   : > { %v944_v27 = vadd.f32 %v943_v25, %v3399_v4  ;;  %v1617_v28 = vadd.f32 %v1616_v26, %v3401_v5  ;;  %v945_v29 = vpop.f32.mrb[5].mxu0  ;;  %v1618_v30 = vpop.f32.mrb[5].mxu1 }
 0x104   : > { %v946_v32 = vadd.f32 %v945_v29, %v3403_v6  ;;  %v1619_v33 = vadd.f32 %v1618_v30, %v3405_v7  ;;  %v947_v34 = vpop.f32.mrb[6].mxu0  ;;  %v1620_v35 = vpop.f32.mrb[6].mxu1 }
 0x105   : > { %2253 = vst [vmem:[%s3412_s10 + $0x40] sm:$0xff] %v944_v27  ;;  %2255 = vst [vmem:[%s3412_s10 + $0x50] sm:$0xff] %v1617_v28  ;;  %v948_v36 = vadd.f32 %v947_v34, %v3399_v4  ;;  %v1621_v37 = vadd.f32 %v1620_v35, %v3401_v5  ;;  %v949_v38 = vpop.f32.mrb[7].mxu0  ;;  %v1622_v39 = vpop.f32.mrb[7].mxu1 }
 0x106   : > { %2254 = vst [vmem:[%s3412_s10 + $0x48] sm:$0xff] %v946_v32  ;;  %2256 = vst [vmem:[%s3412_s10 + $0x58] sm:$0xff] %v1619_v33  ;;  %v950_v40 = vadd.f32 %v949_v38, %v3403_v6  ;;  %v1623_v41 = vadd.f32 %v1622_v39, %v3405_v7 }
 0x107   : > { %2257 = vst [vmem:[%s3412_s10 + $0x60] sm:$0xff] %v948_v36  ;;  %2259 = vst [vmem:[%s3412_s10 + $0x70] sm:$0xff] %v1621_v37  ;;  %1212 = vmatmul.mubr.bf16.gmra.mrb[112].mxu0 %v3133_v31  ;;  %1885 = vmatmul.mubr.bf16.gmra.mrb[112].mxu1 %v3133_v31 }
 0x108   : > { %2258 = vst [vmem:[%s3412_s10 + $0x68] sm:$0xff] %v950_v40  ;;  %2260 = vst [vmem:[%s3412_s10 + $0x78] sm:$0xff] %v1623_v41  ;;  %1221 = vmatprep.mubr.bf16.mxu0 %v3177_v2  ;;  %1894 = vmatprep.mubr.bf16.mxu1 %v3177_v2  ;;  %v3137_v40 = vld [vmem:[%s3293_s17 + $0x140] sm:$0xff]  }
 0x10a   : > { %v953_v42 = vpop.f32.mrb[8].mxu0  ;;  %v1626_v43 = vpop.f32.mrb[8].mxu1 }
 0x10b   : > { %v954_v44 = vadd.f32 %v953_v42, %v3399_v4  ;;  %v1627_v45 = vadd.f32 %v1626_v43, %v3401_v5  ;;  %v955_v46 = vpop.f32.mrb[9].mxu0  ;;  %v1628_v47 = vpop.f32.mrb[9].mxu1 }
 0x10c   : > { %v956_v49 = vadd.f32 %v955_v46, %v3403_v6  ;;  %v1629_v50 = vadd.f32 %v1628_v47, %v3405_v7  ;;  %v957_v51 = vpop.f32.mrb[10].mxu0  ;;  %v1630_v52 = vpop.f32.mrb[10].mxu1 }
 0x10d   : > { %2261 = vst [vmem:[%s3412_s10 + $0x80] sm:$0xff] %v954_v44  ;;  %2263 = vst [vmem:[%s3412_s10 + $0x90] sm:$0xff] %v1627_v45  ;;  %v958_v53 = vadd.f32 %v957_v51, %v3399_v4  ;;  %v1631_v54 = vadd.f32 %v1630_v52, %v3401_v5  ;;  %v959_v55 = vpop.f32.mrb[11].mxu0  ;;  %v1632_v56 = vpop.f32.mrb[11].mxu1 }
 0x10e   : > { %2262 = vst [vmem:[%s3412_s10 + $0x88] sm:$0xff] %v956_v49  ;;  %2264 = vst [vmem:[%s3412_s10 + $0x98] sm:$0xff] %v1629_v50  ;;  %v960_v57 = vadd.f32 %v959_v55, %v3403_v6  ;;  %v1633_v58 = vadd.f32 %v1632_v56, %v3405_v7 }
 0x10f   : > { %2265 = vst [vmem:[%s3412_s10 + $0xa0] sm:$0xff] %v958_v53  ;;  %2267 = vst [vmem:[%s3412_s10 + $0xb0] sm:$0xff] %v1631_v54  ;;  %1222 = vmatmul.mubr.bf16.gmra.mrb[116].mxu0 %v3134_v48  ;;  %1895 = vmatmul.mubr.bf16.gmra.mrb[116].mxu1 %v3134_v48 }
 0x110   : > { %2266 = vst [vmem:[%s3412_s10 + $0xa8] sm:$0xff] %v960_v57  ;;  %2268 = vst [vmem:[%s3412_s10 + $0xb8] sm:$0xff] %v1633_v58  ;;  %1231 = vmatprep.mubr.bf16.mxu0 %v3177_v2  ;;  %1904 = vmatprep.mubr.bf16.mxu1 %v3177_v2  ;;  %v3138_v57 = vld [vmem:[%s3293_s17 + $0x148] sm:$0xff]  }
 0x112   : > { %v963_v59 = vpop.f32.mrb[12].mxu0  ;;  %v1636_v60 = vpop.f32.mrb[12].mxu1 }
 0x113   : > { %v964_v61 = vadd.f32 %v963_v59, %v3399_v4  ;;  %v1637_v62 = vadd.f32 %v1636_v60, %v3401_v5  ;;  %v965_v63 = vpop.f32.mrb[13].mxu0  ;;  %v1638_v0 = vpop.f32.mrb[13].mxu1 }
 0x114   : > { %v966_v3 = vadd.f32 %v965_v63, %v3403_v6  ;;  %v1639_v8 = vadd.f32 %v1638_v0, %v3405_v7  ;;  %v967_v9 = vpop.f32.mrb[14].mxu0  ;;  %v1640_v10 = vpop.f32.mrb[14].mxu1 }
 0x115   : > { %2269 = vst [vmem:[%s3412_s10 + $0xc0] sm:$0xff] %v964_v61  ;;  %2271 = vst [vmem:[%s3412_s10 + $0xd0] sm:$0xff] %v1637_v62  ;;  %v968_v11 = vadd.f32 %v967_v9, %v3399_v4  ;;  %v1641_v12 = vadd.f32 %v1640_v10, %v3401_v5  ;;  %v969_v13 = vpop.f32.mrb[15].mxu0  ;;  %v1642_v14 = vpop.f32.mrb[15].mxu1 }
 0x116   : > { %2270 = vst [vmem:[%s3412_s10 + $0xc8] sm:$0xff] %v966_v3  ;;  %2272 = vst [vmem:[%s3412_s10 + $0xd8] sm:$0xff] %v1639_v8  ;;  %v970_v15 = vadd.f32 %v969_v13, %v3403_v6  ;;  %v1643_v16 = vadd.f32 %v1642_v14, %v3405_v7 }
 0x117   : > { %2273 = vst [vmem:[%s3412_s10 + $0xe0] sm:$0xff] %v968_v11  ;;  %2275 = vst [vmem:[%s3412_s10 + $0xf0] sm:$0xff] %v1641_v12  ;;  %1232 = vmatmul.mubr.bf16.gmra.mrb[120].mxu0 %v3135_v1  ;;  %1905 = vmatmul.mubr.bf16.gmra.mrb[120].mxu1 %v3135_v1 }
 0x118   : > { %2274 = vst [vmem:[%s3412_s10 + $0xe8] sm:$0xff] %v970_v15  ;;  %2276 = vst [vmem:[%s3412_s10 + $0xf8] sm:$0xff] %v1643_v16  ;;  %1241 = vmatprep.mubr.bf16.mxu0 %v3177_v2  ;;  %1914 = vmatprep.mubr.bf16.mxu1 %v3177_v2  ;;  %v3139_v15 = vld [vmem:[%s3293_s17 + $0x150] sm:$0xff]  }
 0x11a   : > { %v973_v17 = vpop.f32.mrb[16].mxu0  ;;  %v1646_v18 = vpop.f32.mrb[16].mxu1 }
 0x11b   : > { %v974_v19 = vadd.f32 %v973_v17, %v3399_v4  ;;  %v1647_v20 = vadd.f32 %v1646_v18, %v3401_v5  ;;  %v975_v21 = vpop.f32.mrb[17].mxu0  ;;  %v1648_v22 = vpop.f32.mrb[17].mxu1 }
 0x11c   : > { %v976_v24 = vadd.f32 %v975_v21, %v3403_v6  ;;  %v1649_v25 = vadd.f32 %v1648_v22, %v3405_v7  ;;  %v977_v26 = vpop.f32.mrb[18].mxu0  ;;  %v1650_v27 = vpop.f32.mrb[18].mxu1 }
 0x11d   : > { %2277 = vst [vmem:[%s3412_s10 + $0x100] sm:$0xff] %v974_v19  ;;  %2279 = vst [vmem:[%s3412_s10 + $0x110] sm:$0xff] %v1647_v20  ;;  %v978_v28 = vadd.f32 %v977_v26, %v3399_v4  ;;  %v1651_v29 = vadd.f32 %v1650_v27, %v3401_v5  ;;  %v979_v30 = vpop.f32.mrb[19].mxu0  ;;  %v1652_v31 = vpop.f32.mrb[19].mxu1 }
 0x11e   : > { %2278 = vst [vmem:[%s3412_s10 + $0x108] sm:$0xff] %v976_v24  ;;  %2280 = vst [vmem:[%s3412_s10 + $0x118] sm:$0xff] %v1649_v25  ;;  %v980_v32 = vadd.f32 %v979_v30, %v3403_v6  ;;  %v1653_v33 = vadd.f32 %v1652_v31, %v3405_v7 }
 0x11f   : > { %2281 = vst [vmem:[%s3412_s10 + $0x120] sm:$0xff] %v978_v28  ;;  %2283 = vst [vmem:[%s3412_s10 + $0x130] sm:$0xff] %v1651_v29  ;;  %1242 = vmatmul.mubr.bf16.gmra.mrb[124].mxu0 %v3136_v23  ;;  %1915 = vmatmul.mubr.bf16.gmra.mrb[124].mxu1 %v3136_v23 }
 0x120   : > { %2282 = vst [vmem:[%s3412_s10 + $0x128] sm:$0xff] %v980_v32  ;;  %2284 = vst [vmem:[%s3412_s10 + $0x138] sm:$0xff] %v1653_v33  ;;  %1251 = vmatprep.mubr.bf16.mxu0 %v3177_v2  ;;  %1924 = vmatprep.mubr.bf16.mxu1 %v3177_v2  ;;  %v3140_v32 = vld [vmem:[%s3293_s17 + $0x158] sm:$0xff]  }
 0x122   : > { %v983_v34 = vpop.f32.mrb[20].mxu0  ;;  %v1656_v35 = vpop.f32.mrb[20].mxu1 }
 0x123   : > { %v984_v36 = vadd.f32 %v983_v34, %v3399_v4  ;;  %v1657_v37 = vadd.f32 %v1656_v35, %v3401_v5  ;;  %v985_v38 = vpop.f32.mrb[21].mxu0  ;;  %v1658_v39 = vpop.f32.mrb[21].mxu1 }
 0x124   : > { %v986_v41 = vadd.f32 %v985_v38, %v3403_v6  ;;  %v1659_v42 = vadd.f32 %v1658_v39, %v3405_v7  ;;  %v987_v43 = vpop.f32.mrb[22].mxu0  ;;  %v1660_v44 = vpop.f32.mrb[22].mxu1 }
 0x125   : > { %2285 = vst [vmem:[%s3412_s10 + $0x140] sm:$0xff] %v984_v36  ;;  %2287 = vst [vmem:[%s3412_s10 + $0x150] sm:$0xff] %v1657_v37  ;;  %v988_v45 = vadd.f32 %v987_v43, %v3399_v4  ;;  %v1661_v46 = vadd.f32 %v1660_v44, %v3401_v5  ;;  %v989_v47 = vpop.f32.mrb[23].mxu0  ;;  %v1662_v48 = vpop.f32.mrb[23].mxu1 }
 0x126   : > { %2286 = vst [vmem:[%s3412_s10 + $0x148] sm:$0xff] %v986_v41  ;;  %2288 = vst [vmem:[%s3412_s10 + $0x158] sm:$0xff] %v1659_v42  ;;  %v990_v49 = vadd.f32 %v989_v47, %v3403_v6  ;;  %v1663_v50 = vadd.f32 %v1662_v48, %v3405_v7 }
 0x127   : > { %2289 = vst [vmem:[%s3412_s10 + $0x160] sm:$0xff] %v988_v45  ;;  %2291 = vst [vmem:[%s3412_s10 + $0x170] sm:$0xff] %v1661_v46  ;;  %1252 = vmatmul.mubr.bf16.gmra.mrb[128].mxu0 %v3137_v40  ;;  %1925 = vmatmul.mubr.bf16.gmra.mrb[128].mxu1 %v3137_v40 }
 0x128   : > { %2290 = vst [vmem:[%s3412_s10 + $0x168] sm:$0xff] %v990_v49  ;;  %2292 = vst [vmem:[%s3412_s10 + $0x178] sm:$0xff] %v1663_v50  ;;  %1261 = vmatprep.mubr.bf16.mxu0 %v3177_v2  ;;  %1934 = vmatprep.mubr.bf16.mxu1 %v3177_v2  ;;  %v3141_v49 = vld [vmem:[%s3293_s17 + $0x160] sm:$0xff]  }
 0x12a   : > { %v993_v51 = vpop.f32.mrb[24].mxu0  ;;  %v1666_v52 = vpop.f32.mrb[24].mxu1 }
 0x12b   : > { %v994_v53 = vadd.f32 %v993_v51, %v3399_v4  ;;  %v1667_v54 = vadd.f32 %v1666_v52, %v3401_v5  ;;  %v995_v55 = vpop.f32.mrb[25].mxu0  ;;  %v1668_v56 = vpop.f32.mrb[25].mxu1 }
 0x12c   : > { %v996_v58 = vadd.f32 %v995_v55, %v3403_v6  ;;  %v1669_v59 = vadd.f32 %v1668_v56, %v3405_v7  ;;  %v997_v60 = vpop.f32.mrb[26].mxu0  ;;  %v1670_v61 = vpop.f32.mrb[26].mxu1 }
 0x12d   : > { %2293 = vst [vmem:[%s3412_s10 + $0x180] sm:$0xff] %v994_v53  ;;  %2295 = vst [vmem:[%s3412_s10 + $0x190] sm:$0xff] %v1667_v54  ;;  %v998_v62 = vadd.f32 %v997_v60, %v3399_v4  ;;  %v1671_v63 = vadd.f32 %v1670_v61, %v3401_v5  ;;  %v999_v0 = vpop.f32.mrb[27].mxu0  ;;  %v1672_v1 = vpop.f32.mrb[27].mxu1 }
 0x12e   : > { %2294 = vst [vmem:[%s3412_s10 + $0x188] sm:$0xff] %v996_v58  ;;  %2296 = vst [vmem:[%s3412_s10 + $0x198] sm:$0xff] %v1669_v59  ;;  %v1000_v3 = vadd.f32 %v999_v0, %v3403_v6  ;;  %v1673_v8 = vadd.f32 %v1672_v1, %v3405_v7 }
 0x12f   : > { %2297 = vst [vmem:[%s3412_s10 + $0x1a0] sm:$0xff] %v998_v62  ;;  %2299 = vst [vmem:[%s3412_s10 + $0x1b0] sm:$0xff] %v1671_v63  ;;  %1262 = vmatmul.mubr.bf16.gmra.mrb[132].mxu0 %v3138_v57  ;;  %1935 = vmatmul.mubr.bf16.gmra.mrb[132].mxu1 %v3138_v57 }
 0x130   : > { %2298 = vst [vmem:[%s3412_s10 + $0x1a8] sm:$0xff] %v1000_v3  ;;  %2300 = vst [vmem:[%s3412_s10 + $0x1b8] sm:$0xff] %v1673_v8  ;;  %1271 = vmatprep.mubr.bf16.mxu0 %v3177_v2  ;;  %1944 = vmatprep.mubr.bf16.mxu1 %v3177_v2  ;;  %v3142_v3 = vld [vmem:[%s3293_s17 + $0x168] sm:$0xff]  }
 0x132   : > { %v1003_v9 = vpop.f32.mrb[28].mxu0  ;;  %v1676_v10 = vpop.f32.mrb[28].mxu1 }
 0x133   : > { %v1004_v11 = vadd.f32 %v1003_v9, %v3399_v4  ;;  %v1677_v12 = vadd.f32 %v1676_v10, %v3401_v5  ;;  %v1005_v13 = vpop.f32.mrb[29].mxu0  ;;  %v1678_v14 = vpop.f32.mrb[29].mxu1 }
 0x134   : > { %v1006_v16 = vadd.f32 %v1005_v13, %v3403_v6  ;;  %v1679_v17 = vadd.f32 %v1678_v14, %v3405_v7  ;;  %v1007_v18 = vpop.f32.mrb[30].mxu0  ;;  %v1680_v19 = vpop.f32.mrb[30].mxu1 }
 0x135   : > { %2301 = vst [vmem:[%s3412_s10 + $0x1c0] sm:$0xff] %v1004_v11  ;;  %2303 = vst [vmem:[%s3412_s10 + $0x1d0] sm:$0xff] %v1677_v12  ;;  %v1008_v20 = vadd.f32 %v1007_v18, %v3399_v4  ;;  %v1681_v21 = vadd.f32 %v1680_v19, %v3401_v5  ;;  %v1009_v22 = vpop.f32.mrb[31].mxu0  ;;  %v1682_v23 = vpop.f32.mrb[31].mxu1 }
 0x136   : > { %2302 = vst [vmem:[%s3412_s10 + $0x1c8] sm:$0xff] %v1006_v16  ;;  %2304 = vst [vmem:[%s3412_s10 + $0x1d8] sm:$0xff] %v1679_v17  ;;  %v1010_v24 = vadd.f32 %v1009_v22, %v3403_v6  ;;  %v1683_v25 = vadd.f32 %v1682_v23, %v3405_v7 }
 0x137   : > { %2305 = vst [vmem:[%s3412_s10 + $0x1e0] sm:$0xff] %v1008_v20  ;;  %2307 = vst [vmem:[%s3412_s10 + $0x1f0] sm:$0xff] %v1681_v21  ;;  %1272 = vmatmul.mubr.bf16.gmra.mrb[136].mxu0 %v3139_v15  ;;  %1945 = vmatmul.mubr.bf16.gmra.mrb[136].mxu1 %v3139_v15 }
 0x138   : > { %2306 = vst [vmem:[%s3412_s10 + $0x1e8] sm:$0xff] %v1010_v24  ;;  %2308 = vst [vmem:[%s3412_s10 + $0x1f8] sm:$0xff] %v1683_v25  ;;  %1281 = vmatprep.mubr.bf16.mxu0 %v3177_v2  ;;  %1954 = vmatprep.mubr.bf16.mxu1 %v3177_v2  ;;  %v3143_v24 = vld [vmem:[%s3293_s17 + $0x170] sm:$0xff]  }
 0x13a   : > { %v1013_v26 = vpop.f32.mrb[32].mxu0  ;;  %v1686_v27 = vpop.f32.mrb[32].mxu1 }
 0x13b   : > { %v1014_v28 = vadd.f32 %v1013_v26, %v3399_v4  ;;  %v1687_v29 = vadd.f32 %v1686_v27, %v3401_v5  ;;  %v1015_v30 = vpop.f32.mrb[33].mxu0  ;;  %v1688_v31 = vpop.f32.mrb[33].mxu1 }
 0x13c   : > { %v1016_v33 = vadd.f32 %v1015_v30, %v3403_v6  ;;  %v1689_v34 = vadd.f32 %v1688_v31, %v3405_v7  ;;  %v1017_v35 = vpop.f32.mrb[34].mxu0  ;;  %v1690_v36 = vpop.f32.mrb[34].mxu1 }
 0x13d   : > { %2309 = vst [vmem:[%s3412_s10 + $0x200] sm:$0xff] %v1014_v28  ;;  %2311 = vst [vmem:[%s3412_s10 + $0x210] sm:$0xff] %v1687_v29  ;;  %v1018_v37 = vadd.f32 %v1017_v35, %v3399_v4  ;;  %v1691_v38 = vadd.f32 %v1690_v36, %v3401_v5  ;;  %v1019_v39 = vpop.f32.mrb[35].mxu0  ;;  %v1692_v40 = vpop.f32.mrb[35].mxu1 }
 0x13e   : > { %2310 = vst [vmem:[%s3412_s10 + $0x208] sm:$0xff] %v1016_v33  ;;  %2312 = vst [vmem:[%s3412_s10 + $0x218] sm:$0xff] %v1689_v34  ;;  %v1020_v41 = vadd.f32 %v1019_v39, %v3403_v6  ;;  %v1693_v42 = vadd.f32 %v1692_v40, %v3405_v7 }
 0x13f   : > { %2313 = vst [vmem:[%s3412_s10 + $0x220] sm:$0xff] %v1018_v37  ;;  %2315 = vst [vmem:[%s3412_s10 + $0x230] sm:$0xff] %v1691_v38  ;;  %1282 = vmatmul.mubr.bf16.gmra.mrb[140].mxu0 %v3140_v32  ;;  %1955 = vmatmul.mubr.bf16.gmra.mrb[140].mxu1 %v3140_v32 }
 0x140   : > { %2314 = vst [vmem:[%s3412_s10 + $0x228] sm:$0xff] %v1020_v41  ;;  %2316 = vst [vmem:[%s3412_s10 + $0x238] sm:$0xff] %v1693_v42  ;;  %1291 = vmatprep.mubr.bf16.mxu0 %v3177_v2  ;;  %1964 = vmatprep.mubr.bf16.mxu1 %v3177_v2  ;;  %v3144_v41 = vld [vmem:[%s3293_s17 + $0x178] sm:$0xff]  }
 0x142   : > { %v1023_v43 = vpop.f32.mrb[36].mxu0  ;;  %v1696_v44 = vpop.f32.mrb[36].mxu1 }
 0x143   : > { %v1024_v45 = vadd.f32 %v1023_v43, %v3399_v4  ;;  %v1697_v46 = vadd.f32 %v1696_v44, %v3401_v5  ;;  %v1025_v47 = vpop.f32.mrb[37].mxu0  ;;  %v1698_v48 = vpop.f32.mrb[37].mxu1 }
 0x144   : > { %v1026_v50 = vadd.f32 %v1025_v47, %v3403_v6  ;;  %v1699_v51 = vadd.f32 %v1698_v48, %v3405_v7  ;;  %v1027_v52 = vpop.f32.mrb[38].mxu0  ;;  %v1700_v53 = vpop.f32.mrb[38].mxu1 }
 0x145   : > { %2317 = vst [vmem:[%s3412_s10 + $0x240] sm:$0xff] %v1024_v45  ;;  %2319 = vst [vmem:[%s3412_s10 + $0x250] sm:$0xff] %v1697_v46  ;;  %v1028_v54 = vadd.f32 %v1027_v52, %v3399_v4  ;;  %v1701_v55 = vadd.f32 %v1700_v53, %v3401_v5  ;;  %v1029_v56 = vpop.f32.mrb[39].mxu0  ;;  %v1702_v57 = vpop.f32.mrb[39].mxu1 }
 0x146   : > { %2318 = vst [vmem:[%s3412_s10 + $0x248] sm:$0xff] %v1026_v50  ;;  %2320 = vst [vmem:[%s3412_s10 + $0x258] sm:$0xff] %v1699_v51  ;;  %v1030_v58 = vadd.f32 %v1029_v56, %v3403_v6  ;;  %v1703_v59 = vadd.f32 %v1702_v57, %v3405_v7 }
 0x147   : > { %2321 = vst [vmem:[%s3412_s10 + $0x260] sm:$0xff] %v1028_v54  ;;  %2323 = vst [vmem:[%s3412_s10 + $0x270] sm:$0xff] %v1701_v55  ;;  %1292 = vmatmul.mubr.bf16.gmra.mrb[144].mxu0 %v3141_v49  ;;  %1965 = vmatmul.mubr.bf16.gmra.mrb[144].mxu1 %v3141_v49 }
 0x148   : > { %2322 = vst [vmem:[%s3412_s10 + $0x268] sm:$0xff] %v1030_v58  ;;  %2324 = vst [vmem:[%s3412_s10 + $0x278] sm:$0xff] %v1703_v59  ;;  %1301 = vmatprep.mubr.bf16.mxu0 %v3177_v2  ;;  %1974 = vmatprep.mubr.bf16.mxu1 %v3177_v2  ;;  %v3145_v58 = vld [vmem:[%s3293_s17 + $0x180] sm:$0xff]  }
 0x14a   : > { %v1033_v60 = vpop.f32.mrb[40].mxu0  ;;  %v1706_v61 = vpop.f32.mrb[40].mxu1 }
 0x14b   : > { %v1034_v62 = vadd.f32 %v1033_v60, %v3399_v4  ;;  %v1707_v63 = vadd.f32 %v1706_v61, %v3401_v5  ;;  %v1035_v0 = vpop.f32.mrb[41].mxu0  ;;  %v1708_v1 = vpop.f32.mrb[41].mxu1 }
 0x14c   : > { %v1036_v8 = vadd.f32 %v1035_v0, %v3403_v6  ;;  %v1709_v9 = vadd.f32 %v1708_v1, %v3405_v7  ;;  %v1037_v10 = vpop.f32.mrb[42].mxu0  ;;  %v1710_v11 = vpop.f32.mrb[42].mxu1 }
 0x14d   : > { %2325 = vst [vmem:[%s3412_s10 + $0x280] sm:$0xff] %v1034_v62  ;;  %2327 = vst [vmem:[%s3412_s10 + $0x290] sm:$0xff] %v1707_v63  ;;  %v1038_v12 = vadd.f32 %v1037_v10, %v3399_v4  ;;  %v1711_v13 = vadd.f32 %v1710_v11, %v3401_v5  ;;  %v1039_v14 = vpop.f32.mrb[43].mxu0  ;;  %v1712_v15 = vpop.f32.mrb[43].mxu1 }
 0x14e   : > { %2326 = vst [vmem:[%s3412_s10 + $0x288] sm:$0xff] %v1036_v8  ;;  %2328 = vst [vmem:[%s3412_s10 + $0x298] sm:$0xff] %v1709_v9  ;;  %v1040_v16 = vadd.f32 %v1039_v14, %v3403_v6  ;;  %v1713_v17 = vadd.f32 %v1712_v15, %v3405_v7 }
 0x14f   : > { %2329 = vst [vmem:[%s3412_s10 + $0x2a0] sm:$0xff] %v1038_v12  ;;  %2331 = vst [vmem:[%s3412_s10 + $0x2b0] sm:$0xff] %v1711_v13  ;;  %1302 = vmatmul.mubr.bf16.gmra.mrb[148].mxu0 %v3142_v3  ;;  %1975 = vmatmul.mubr.bf16.gmra.mrb[148].mxu1 %v3142_v3 }
 0x150   : > { %2330 = vst [vmem:[%s3412_s10 + $0x2a8] sm:$0xff] %v1040_v16  ;;  %2332 = vst [vmem:[%s3412_s10 + $0x2b8] sm:$0xff] %v1713_v17  ;;  %1311 = vmatprep.mubr.bf16.mxu0 %v3177_v2  ;;  %1984 = vmatprep.mubr.bf16.mxu1 %v3177_v2  ;;  %v3146_v16 = vld [vmem:[%s3293_s17 + $0x188] sm:$0xff]  }
 0x152   : > { %v1043_v18 = vpop.f32.mrb[44].mxu0  ;;  %v1716_v19 = vpop.f32.mrb[44].mxu1 }
 0x153   : > { %v1044_v20 = vadd.f32 %v1043_v18, %v3399_v4  ;;  %v1717_v21 = vadd.f32 %v1716_v19, %v3401_v5  ;;  %v1045_v22 = vpop.f32.mrb[45].mxu0  ;;  %v1718_v23 = vpop.f32.mrb[45].mxu1 }
 0x154   : > { %v1046_v25 = vadd.f32 %v1045_v22, %v3403_v6  ;;  %v1719_v26 = vadd.f32 %v1718_v23, %v3405_v7  ;;  %v1047_v27 = vpop.f32.mrb[46].mxu0  ;;  %v1720_v28 = vpop.f32.mrb[46].mxu1 }
 0x155   : > { %2333 = vst [vmem:[%s3412_s10 + $0x2c0] sm:$0xff] %v1044_v20  ;;  %2335 = vst [vmem:[%s3412_s10 + $0x2d0] sm:$0xff] %v1717_v21  ;;  %v1048_v29 = vadd.f32 %v1047_v27, %v3399_v4  ;;  %v1721_v30 = vadd.f32 %v1720_v28, %v3401_v5  ;;  %v1049_v31 = vpop.f32.mrb[47].mxu0  ;;  %v1722_v32 = vpop.f32.mrb[47].mxu1 }
 0x156   : > { %2334 = vst [vmem:[%s3412_s10 + $0x2c8] sm:$0xff] %v1046_v25  ;;  %2336 = vst [vmem:[%s3412_s10 + $0x2d8] sm:$0xff] %v1719_v26  ;;  %v1050_v33 = vadd.f32 %v1049_v31, %v3403_v6  ;;  %v1723_v34 = vadd.f32 %v1722_v32, %v3405_v7 }
 0x157   : > { %2337 = vst [vmem:[%s3412_s10 + $0x2e0] sm:$0xff] %v1048_v29  ;;  %2339 = vst [vmem:[%s3412_s10 + $0x2f0] sm:$0xff] %v1721_v30  ;;  %1312 = vmatmul.mubr.bf16.gmra.mrb[152].mxu0 %v3143_v24  ;;  %1985 = vmatmul.mubr.bf16.gmra.mrb[152].mxu1 %v3143_v24 }
 0x158   : > { %2338 = vst [vmem:[%s3412_s10 + $0x2e8] sm:$0xff] %v1050_v33  ;;  %2340 = vst [vmem:[%s3412_s10 + $0x2f8] sm:$0xff] %v1723_v34  ;;  %1321 = vmatprep.mubr.bf16.mxu0 %v3177_v2  ;;  %1994 = vmatprep.mubr.bf16.mxu1 %v3177_v2  ;;  %v3147_v33 = vld [vmem:[%s3293_s17 + $0x190] sm:$0xff]  }
 0x15a   : > { %v1053_v35 = vpop.f32.mrb[48].mxu0  ;;  %v1726_v36 = vpop.f32.mrb[48].mxu1 }
 0x15b   : > { %v1054_v37 = vadd.f32 %v1053_v35, %v3399_v4  ;;  %v1727_v38 = vadd.f32 %v1726_v36, %v3401_v5  ;;  %v1055_v39 = vpop.f32.mrb[49].mxu0  ;;  %v1728_v40 = vpop.f32.mrb[49].mxu1 }
 0x15c   : > { %v1056_v42 = vadd.f32 %v1055_v39, %v3403_v6  ;;  %v1729_v43 = vadd.f32 %v1728_v40, %v3405_v7  ;;  %v1057_v44 = vpop.f32.mrb[50].mxu0  ;;  %v1730_v45 = vpop.f32.mrb[50].mxu1 }
 0x15d   : > { %2341 = vst [vmem:[%s3412_s10 + $0x300] sm:$0xff] %v1054_v37  ;;  %2343 = vst [vmem:[%s3412_s10 + $0x310] sm:$0xff] %v1727_v38  ;;  %v1058_v46 = vadd.f32 %v1057_v44, %v3399_v4  ;;  %v1731_v47 = vadd.f32 %v1730_v45, %v3401_v5  ;;  %v1059_v48 = vpop.f32.mrb[51].mxu0  ;;  %v1732_v49 = vpop.f32.mrb[51].mxu1 }
 0x15e   : > { %2342 = vst [vmem:[%s3412_s10 + $0x308] sm:$0xff] %v1056_v42  ;;  %2344 = vst [vmem:[%s3412_s10 + $0x318] sm:$0xff] %v1729_v43  ;;  %v1060_v50 = vadd.f32 %v1059_v48, %v3403_v6  ;;  %v1733_v51 = vadd.f32 %v1732_v49, %v3405_v7 }
 0x15f   : > { %2345 = vst [vmem:[%s3412_s10 + $0x320] sm:$0xff] %v1058_v46  ;;  %2347 = vst [vmem:[%s3412_s10 + $0x330] sm:$0xff] %v1731_v47  ;;  %1322 = vmatmul.mubr.bf16.gmra.mrb[156].mxu0 %v3144_v41  ;;  %1995 = vmatmul.mubr.bf16.gmra.mrb[156].mxu1 %v3144_v41 }
 0x160   : > { %2346 = vst [vmem:[%s3412_s10 + $0x328] sm:$0xff] %v1060_v50  ;;  %2348 = vst [vmem:[%s3412_s10 + $0x338] sm:$0xff] %v1733_v51  ;;  %1331 = vmatprep.mubr.bf16.mxu0 %v3177_v2  ;;  %2004 = vmatprep.mubr.bf16.mxu1 %v3177_v2  ;;  %v3148_v50 = vld [vmem:[%s3293_s17 + $0x198] sm:$0xff]  }
 0x162   : > { %v1063_v52 = vpop.f32.mrb[52].mxu0  ;;  %v1736_v53 = vpop.f32.mrb[52].mxu1 }
 0x163   : > { %v1064_v54 = vadd.f32 %v1063_v52, %v3399_v4  ;;  %v1737_v55 = vadd.f32 %v1736_v53, %v3401_v5  ;;  %v1065_v56 = vpop.f32.mrb[53].mxu0  ;;  %v1738_v57 = vpop.f32.mrb[53].mxu1 }
 0x164   : > { %v1066_v59 = vadd.f32 %v1065_v56, %v3403_v6  ;;  %v1739_v60 = vadd.f32 %v1738_v57, %v3405_v7  ;;  %v1067_v61 = vpop.f32.mrb[54].mxu0  ;;  %v1740_v62 = vpop.f32.mrb[54].mxu1 }
 0x165   : > { %2349 = vst [vmem:[%s3412_s10 + $0x340] sm:$0xff] %v1064_v54  ;;  %2351 = vst [vmem:[%s3412_s10 + $0x350] sm:$0xff] %v1737_v55  ;;  %v1068_v63 = vadd.f32 %v1067_v61, %v3399_v4  ;;  %v1741_v0 = vadd.f32 %v1740_v62, %v3401_v5  ;;  %v1069_v1 = vpop.f32.mrb[55].mxu0  ;;  %v1742_v3 = vpop.f32.mrb[55].mxu1 }
 0x166   : > { %2350 = vst [vmem:[%s3412_s10 + $0x348] sm:$0xff] %v1066_v59  ;;  %2352 = vst [vmem:[%s3412_s10 + $0x358] sm:$0xff] %v1739_v60  ;;  %v1070_v8 = vadd.f32 %v1069_v1, %v3403_v6  ;;  %v1743_v9 = vadd.f32 %v1742_v3, %v3405_v7 }
 0x167   : > { %2353 = vst [vmem:[%s3412_s10 + $0x360] sm:$0xff] %v1068_v63  ;;  %2355 = vst [vmem:[%s3412_s10 + $0x370] sm:$0xff] %v1741_v0  ;;  %1332 = vmatmul.mubr.bf16.gmra.mrb[160].mxu0 %v3145_v58  ;;  %2005 = vmatmul.mubr.bf16.gmra.mrb[160].mxu1 %v3145_v58 }
 0x168   : > { %2354 = vst [vmem:[%s3412_s10 + $0x368] sm:$0xff] %v1070_v8  ;;  %2356 = vst [vmem:[%s3412_s10 + $0x378] sm:$0xff] %v1743_v9  ;;  %1341 = vmatprep.mubr.bf16.mxu0 %v3177_v2  ;;  %2014 = vmatprep.mubr.bf16.mxu1 %v3177_v2  ;;  %v3149_v8 = vld [vmem:[%s3293_s17 + $0x1a0] sm:$0xff]  }
 0x16a   : > { %v1073_v10 = vpop.f32.mrb[56].mxu0  ;;  %v1746_v11 = vpop.f32.mrb[56].mxu1 }
 0x16b   : > { %v1074_v12 = vadd.f32 %v1073_v10, %v3399_v4  ;;  %v1747_v13 = vadd.f32 %v1746_v11, %v3401_v5  ;;  %v1075_v14 = vpop.f32.mrb[57].mxu0  ;;  %v1748_v15 = vpop.f32.mrb[57].mxu1 }
 0x16c   : > { %v1076_v17 = vadd.f32 %v1075_v14, %v3403_v6  ;;  %v1749_v18 = vadd.f32 %v1748_v15, %v3405_v7  ;;  %v1077_v19 = vpop.f32.mrb[58].mxu0  ;;  %v1750_v20 = vpop.f32.mrb[58].mxu1 }
 0x16d   : > { %2357 = vst [vmem:[%s3412_s10 + $0x380] sm:$0xff] %v1074_v12  ;;  %2359 = vst [vmem:[%s3412_s10 + $0x390] sm:$0xff] %v1747_v13  ;;  %v1078_v21 = vadd.f32 %v1077_v19, %v3399_v4  ;;  %v1751_v22 = vadd.f32 %v1750_v20, %v3401_v5  ;;  %v1079_v23 = vpop.f32.mrb[59].mxu0  ;;  %v1752_v24 = vpop.f32.mrb[59].mxu1 }
 0x16e   : > { %2358 = vst [vmem:[%s3412_s10 + $0x388] sm:$0xff] %v1076_v17  ;;  %2360 = vst [vmem:[%s3412_s10 + $0x398] sm:$0xff] %v1749_v18  ;;  %v1080_v25 = vadd.f32 %v1079_v23, %v3403_v6  ;;  %v1753_v26 = vadd.f32 %v1752_v24, %v3405_v7 }
 0x16f   : > { %2361 = vst [vmem:[%s3412_s10 + $0x3a0] sm:$0xff] %v1078_v21  ;;  %2363 = vst [vmem:[%s3412_s10 + $0x3b0] sm:$0xff] %v1751_v22  ;;  %1342 = vmatmul.mubr.bf16.gmra.mrb[164].mxu0 %v3146_v16  ;;  %2015 = vmatmul.mubr.bf16.gmra.mrb[164].mxu1 %v3146_v16 }
 0x170   : > { %2362 = vst [vmem:[%s3412_s10 + $0x3a8] sm:$0xff] %v1080_v25  ;;  %2364 = vst [vmem:[%s3412_s10 + $0x3b8] sm:$0xff] %v1753_v26  ;;  %1351 = vmatprep.mubr.bf16.mxu0 %v3177_v2  ;;  %2024 = vmatprep.mubr.bf16.mxu1 %v3177_v2  ;;  %v3150_v25 = vld [vmem:[%s3293_s17 + $0x1a8] sm:$0xff]  }
 0x172   : > { %v1083_v27 = vpop.f32.mrb[60].mxu0  ;;  %v1756_v28 = vpop.f32.mrb[60].mxu1 }
 0x173   : > { %v1084_v29 = vadd.f32 %v1083_v27, %v3399_v4  ;;  %v1757_v30 = vadd.f32 %v1756_v28, %v3401_v5  ;;  %v1085_v31 = vpop.f32.mrb[61].mxu0  ;;  %v1758_v32 = vpop.f32.mrb[61].mxu1 }
 0x174   : > { %v1086_v34 = vadd.f32 %v1085_v31, %v3403_v6  ;;  %v1759_v35 = vadd.f32 %v1758_v32, %v3405_v7  ;;  %v1087_v36 = vpop.f32.mrb[62].mxu0  ;;  %v1760_v37 = vpop.f32.mrb[62].mxu1 }
 0x175   : > { %2365 = vst [vmem:[%s3412_s10 + $0x3c0] sm:$0xff] %v1084_v29  ;;  %2367 = vst [vmem:[%s3412_s10 + $0x3d0] sm:$0xff] %v1757_v30  ;;  %v1088_v38 = vadd.f32 %v1087_v36, %v3399_v4  ;;  %v1761_v39 = vadd.f32 %v1760_v37, %v3401_v5  ;;  %v1089_v40 = vpop.f32.mrb[63].mxu0  ;;  %v1762_v41 = vpop.f32.mrb[63].mxu1 }
 0x176   : > { %2366 = vst [vmem:[%s3412_s10 + $0x3c8] sm:$0xff] %v1086_v34  ;;  %2368 = vst [vmem:[%s3412_s10 + $0x3d8] sm:$0xff] %v1759_v35  ;;  %v1090_v42 = vadd.f32 %v1089_v40, %v3403_v6  ;;  %v1763_v43 = vadd.f32 %v1762_v41, %v3405_v7 }
 0x177   : > { %2369 = vst [vmem:[%s3412_s10 + $0x3e0] sm:$0xff] %v1088_v38  ;;  %2371 = vst [vmem:[%s3412_s10 + $0x3f0] sm:$0xff] %v1761_v39  ;;  %1352 = vmatmul.mubr.bf16.gmra.mrb[168].mxu0 %v3147_v33  ;;  %2025 = vmatmul.mubr.bf16.gmra.mrb[168].mxu1 %v3147_v33 }
 0x178   : > { %2370 = vst [vmem:[%s3412_s10 + $0x3e8] sm:$0xff] %v1090_v42  ;;  %2372 = vst [vmem:[%s3412_s10 + $0x3f8] sm:$0xff] %v1763_v43  ;;  %1361 = vmatprep.mubr.bf16.mxu0 %v3177_v2  ;;  %2034 = vmatprep.mubr.bf16.mxu1 %v3177_v2  ;;  %v3151_v42 = vld [vmem:[%s3293_s17 + $0x1b0] sm:$0xff]  }
 0x17a   : > { %v1093_v44 = vpop.f32.mrb[64].mxu0  ;;  %v1766_v45 = vpop.f32.mrb[64].mxu1 }
 0x17b   : > { %v1094_v46 = vadd.f32 %v1093_v44, %v3399_v4  ;;  %v1767_v47 = vadd.f32 %v1766_v45, %v3401_v5  ;;  %v1095_v48 = vpop.f32.mrb[65].mxu0  ;;  %v1768_v49 = vpop.f32.mrb[65].mxu1 }
 0x17c   : > { %v1096_v51 = vadd.f32 %v1095_v48, %v3403_v6  ;;  %v1769_v52 = vadd.f32 %v1768_v49, %v3405_v7  ;;  %v1097_v53 = vpop.f32.mrb[66].mxu0  ;;  %v1770_v54 = vpop.f32.mrb[66].mxu1 }
 0x17d   : > { %2373 = vst [vmem:[%s3412_s10 + $0x400] sm:$0xff] %v1094_v46  ;;  %2375 = vst [vmem:[%s3412_s10 + $0x410] sm:$0xff] %v1767_v47  ;;  %v1098_v55 = vadd.f32 %v1097_v53, %v3399_v4  ;;  %v1771_v56 = vadd.f32 %v1770_v54, %v3401_v5  ;;  %v1099_v57 = vpop.f32.mrb[67].mxu0  ;;  %v1772_v58 = vpop.f32.mrb[67].mxu1 }
 0x17e   : > { %2374 = vst [vmem:[%s3412_s10 + $0x408] sm:$0xff] %v1096_v51  ;;  %2376 = vst [vmem:[%s3412_s10 + $0x418] sm:$0xff] %v1769_v52  ;;  %v1100_v59 = vadd.f32 %v1099_v57, %v3403_v6  ;;  %v1773_v60 = vadd.f32 %v1772_v58, %v3405_v7 }
 0x17f   : > { %2377 = vst [vmem:[%s3412_s10 + $0x420] sm:$0xff] %v1098_v55  ;;  %2379 = vst [vmem:[%s3412_s10 + $0x430] sm:$0xff] %v1771_v56  ;;  %1362 = vmatmul.mubr.bf16.gmra.mrb[172].mxu0 %v3148_v50  ;;  %2035 = vmatmul.mubr.bf16.gmra.mrb[172].mxu1 %v3148_v50 }
 0x180   : > { %2378 = vst [vmem:[%s3412_s10 + $0x428] sm:$0xff] %v1100_v59  ;;  %2380 = vst [vmem:[%s3412_s10 + $0x438] sm:$0xff] %v1773_v60  ;;  %1371 = vmatprep.mubr.bf16.mxu0 %v3177_v2  ;;  %2044 = vmatprep.mubr.bf16.mxu1 %v3177_v2  ;;  %v3152_v59 = vld [vmem:[%s3293_s17 + $0x1b8] sm:$0xff]  }
 0x182   : > { %v1103_v61 = vpop.f32.mrb[68].mxu0  ;;  %v1776_v62 = vpop.f32.mrb[68].mxu1 }
 0x183   : > { %v1104_v63 = vadd.f32 %v1103_v61, %v3399_v4  ;;  %v1777_v0 = vadd.f32 %v1776_v62, %v3401_v5  ;;  %v1105_v1 = vpop.f32.mrb[69].mxu0  ;;  %v1778_v3 = vpop.f32.mrb[69].mxu1 }
 0x184   : > { %v1106_v9 = vadd.f32 %v1105_v1, %v3403_v6  ;;  %v1779_v10 = vadd.f32 %v1778_v3, %v3405_v7  ;;  %v1107_v11 = vpop.f32.mrb[70].mxu0  ;;  %v1780_v12 = vpop.f32.mrb[70].mxu1 }
 0x185   : > { %2381 = vst [vmem:[%s3412_s10 + $0x440] sm:$0xff] %v1104_v63  ;;  %2383 = vst [vmem:[%s3412_s10 + $0x450] sm:$0xff] %v1777_v0  ;;  %v1108_v13 = vadd.f32 %v1107_v11, %v3399_v4  ;;  %v1781_v14 = vadd.f32 %v1780_v12, %v3401_v5  ;;  %v1109_v15 = vpop.f32.mrb[71].mxu0  ;;  %v1782_v16 = vpop.f32.mrb[71].mxu1 }
 0x186   : > { %2382 = vst [vmem:[%s3412_s10 + $0x448] sm:$0xff] %v1106_v9  ;;  %2384 = vst [vmem:[%s3412_s10 + $0x458] sm:$0xff] %v1779_v10  ;;  %v1110_v17 = vadd.f32 %v1109_v15, %v3403_v6  ;;  %v1783_v18 = vadd.f32 %v1782_v16, %v3405_v7 }
 0x187   : > { %2385 = vst [vmem:[%s3412_s10 + $0x460] sm:$0xff] %v1108_v13  ;;  %2387 = vst [vmem:[%s3412_s10 + $0x470] sm:$0xff] %v1781_v14  ;;  %1372 = vmatmul.mubr.bf16.gmra.mrb[176].mxu0 %v3149_v8  ;;  %2045 = vmatmul.mubr.bf16.gmra.mrb[176].mxu1 %v3149_v8 }
 0x188   : > { %2386 = vst [vmem:[%s3412_s10 + $0x468] sm:$0xff] %v1110_v17  ;;  %2388 = vst [vmem:[%s3412_s10 + $0x478] sm:$0xff] %v1783_v18  ;;  %1381 = vmatprep.mubr.bf16.mxu0 %v3177_v2  ;;  %2054 = vmatprep.mubr.bf16.mxu1 %v3177_v2  ;;  %v3153_v17 = vld [vmem:[%s3293_s17 + $0x1c0] sm:$0xff]  }
 0x18a   : > { %v1113_v19 = vpop.f32.mrb[72].mxu0  ;;  %v1786_v20 = vpop.f32.mrb[72].mxu1 }
 0x18b   : > { %v1114_v21 = vadd.f32 %v1113_v19, %v3399_v4  ;;  %v1787_v22 = vadd.f32 %v1786_v20, %v3401_v5  ;;  %v1115_v23 = vpop.f32.mrb[73].mxu0  ;;  %v1788_v24 = vpop.f32.mrb[73].mxu1 }
 0x18c   : > { %v1116_v26 = vadd.f32 %v1115_v23, %v3403_v6  ;;  %v1789_v27 = vadd.f32 %v1788_v24, %v3405_v7  ;;  %v1117_v28 = vpop.f32.mrb[74].mxu0  ;;  %v1790_v29 = vpop.f32.mrb[74].mxu1 }
 0x18d   : > { %2389 = vst [vmem:[%s3412_s10 + $0x480] sm:$0xff] %v1114_v21  ;;  %2391 = vst [vmem:[%s3412_s10 + $0x490] sm:$0xff] %v1787_v22  ;;  %v1118_v30 = vadd.f32 %v1117_v28, %v3399_v4  ;;  %v1791_v31 = vadd.f32 %v1790_v29, %v3401_v5  ;;  %v1119_v32 = vpop.f32.mrb[75].mxu0  ;;  %v1792_v33 = vpop.f32.mrb[75].mxu1 }
 0x18e   : > { %2390 = vst [vmem:[%s3412_s10 + $0x488] sm:$0xff] %v1116_v26  ;;  %2392 = vst [vmem:[%s3412_s10 + $0x498] sm:$0xff] %v1789_v27  ;;  %v1120_v34 = vadd.f32 %v1119_v32, %v3403_v6  ;;  %v1793_v35 = vadd.f32 %v1792_v33, %v3405_v7 }
 0x18f   : > { %2393 = vst [vmem:[%s3412_s10 + $0x4a0] sm:$0xff] %v1118_v30  ;;  %2395 = vst [vmem:[%s3412_s10 + $0x4b0] sm:$0xff] %v1791_v31  ;;  %1382 = vmatmul.mubr.bf16.gmra.mrb[180].mxu0 %v3150_v25  ;;  %2055 = vmatmul.mubr.bf16.gmra.mrb[180].mxu1 %v3150_v25 }
 0x190   : > { %2394 = vst [vmem:[%s3412_s10 + $0x4a8] sm:$0xff] %v1120_v34  ;;  %2396 = vst [vmem:[%s3412_s10 + $0x4b8] sm:$0xff] %v1793_v35  ;;  %1391 = vmatprep.mubr.bf16.mxu0 %v3177_v2  ;;  %2064 = vmatprep.mubr.bf16.mxu1 %v3177_v2  ;;  %v3154_v34 = vld [vmem:[%s3293_s17 + $0x1c8] sm:$0xff]  }
 0x192   : > { %v1123_v36 = vpop.f32.mrb[76].mxu0  ;;  %v1796_v37 = vpop.f32.mrb[76].mxu1 }
 0x193   : > { %v1124_v38 = vadd.f32 %v1123_v36, %v3399_v4  ;;  %v1797_v39 = vadd.f32 %v1796_v37, %v3401_v5  ;;  %v1125_v40 = vpop.f32.mrb[77].mxu0  ;;  %v1798_v41 = vpop.f32.mrb[77].mxu1 }
 0x194   : > { %v1126_v43 = vadd.f32 %v1125_v40, %v3403_v6  ;;  %v1799_v44 = vadd.f32 %v1798_v41, %v3405_v7  ;;  %v1127_v45 = vpop.f32.mrb[78].mxu0  ;;  %v1800_v46 = vpop.f32.mrb[78].mxu1 }
 0x195   : > { %2397 = vst [vmem:[%s3412_s10 + $0x4c0] sm:$0xff] %v1124_v38  ;;  %2399 = vst [vmem:[%s3412_s10 + $0x4d0] sm:$0xff] %v1797_v39  ;;  %v1128_v47 = vadd.f32 %v1127_v45, %v3399_v4  ;;  %v1801_v48 = vadd.f32 %v1800_v46, %v3401_v5  ;;  %v1129_v49 = vpop.f32.mrb[79].mxu0  ;;  %v1802_v50 = vpop.f32.mrb[79].mxu1 }
 0x196   : > { %2398 = vst [vmem:[%s3412_s10 + $0x4c8] sm:$0xff] %v1126_v43  ;;  %2400 = vst [vmem:[%s3412_s10 + $0x4d8] sm:$0xff] %v1799_v44  ;;  %v1130_v51 = vadd.f32 %v1129_v49, %v3403_v6  ;;  %v1803_v52 = vadd.f32 %v1802_v50, %v3405_v7 }
 0x197   : > { %2401 = vst [vmem:[%s3412_s10 + $0x4e0] sm:$0xff] %v1128_v47  ;;  %2403 = vst [vmem:[%s3412_s10 + $0x4f0] sm:$0xff] %v1801_v48  ;;  %1392 = vmatmul.mubr.bf16.gmra.mrb[184].mxu0 %v3151_v42  ;;  %2065 = vmatmul.mubr.bf16.gmra.mrb[184].mxu1 %v3151_v42 }
 0x198   : > { %2402 = vst [vmem:[%s3412_s10 + $0x4e8] sm:$0xff] %v1130_v51  ;;  %2404 = vst [vmem:[%s3412_s10 + $0x4f8] sm:$0xff] %v1803_v52  ;;  %1401 = vmatprep.mubr.bf16.mxu0 %v3177_v2  ;;  %2074 = vmatprep.mubr.bf16.mxu1 %v3177_v2  ;;  %v3155_v51 = vld [vmem:[%s3293_s17 + $0x1d0] sm:$0xff]  }
 0x19a   : > { %v1133_v53 = vpop.f32.mrb[80].mxu0  ;;  %v1806_v54 = vpop.f32.mrb[80].mxu1 }
 0x19b   : > { %v1134_v55 = vadd.f32 %v1133_v53, %v3399_v4  ;;  %v1807_v56 = vadd.f32 %v1806_v54, %v3401_v5  ;;  %v1135_v57 = vpop.f32.mrb[81].mxu0  ;;  %v1808_v58 = vpop.f32.mrb[81].mxu1 }
 0x19c   : > { %v1136_v60 = vadd.f32 %v1135_v57, %v3403_v6  ;;  %v1809_v61 = vadd.f32 %v1808_v58, %v3405_v7  ;;  %v1137_v62 = vpop.f32.mrb[82].mxu0  ;;  %v1810_v63 = vpop.f32.mrb[82].mxu1 }
 0x19d   : > { %2405 = vst [vmem:[%s3412_s10 + $0x500] sm:$0xff] %v1134_v55  ;;  %2407 = vst [vmem:[%s3412_s10 + $0x510] sm:$0xff] %v1807_v56  ;;  %v1138_v0 = vadd.f32 %v1137_v62, %v3399_v4  ;;  %v1811_v1 = vadd.f32 %v1810_v63, %v3401_v5  ;;  %v1139_v3 = vpop.f32.mrb[83].mxu0  ;;  %v1812_v8 = vpop.f32.mrb[83].mxu1 }
 0x19e   : > { %2406 = vst [vmem:[%s3412_s10 + $0x508] sm:$0xff] %v1136_v60  ;;  %2408 = vst [vmem:[%s3412_s10 + $0x518] sm:$0xff] %v1809_v61  ;;  %v1140_v9 = vadd.f32 %v1139_v3, %v3403_v6  ;;  %v1813_v10 = vadd.f32 %v1812_v8, %v3405_v7 }
 0x19f   : > { %2409 = vst [vmem:[%s3412_s10 + $0x520] sm:$0xff] %v1138_v0  ;;  %2411 = vst [vmem:[%s3412_s10 + $0x530] sm:$0xff] %v1811_v1  ;;  %1402 = vmatmul.mubr.bf16.gmra.mrb[188].mxu0 %v3152_v59  ;;  %2075 = vmatmul.mubr.bf16.gmra.mrb[188].mxu1 %v3152_v59 }
 0x1a0   : > { %2410 = vst [vmem:[%s3412_s10 + $0x528] sm:$0xff] %v1140_v9  ;;  %2412 = vst [vmem:[%s3412_s10 + $0x538] sm:$0xff] %v1813_v10  ;;  %1411 = vmatprep.mubr.bf16.mxu0 %v3177_v2  ;;  %2084 = vmatprep.mubr.bf16.mxu1 %v3177_v2  ;;  %v3156_v9 = vld [vmem:[%s3293_s17 + $0x1d8] sm:$0xff]  }
 0x1a2   : > { %v1143_v11 = vpop.f32.mrb[84].mxu0  ;;  %v1816_v12 = vpop.f32.mrb[84].mxu1 }
 0x1a3   : > { %v1144_v13 = vadd.f32 %v1143_v11, %v3399_v4  ;;  %v1817_v14 = vadd.f32 %v1816_v12, %v3401_v5  ;;  %v1145_v15 = vpop.f32.mrb[85].mxu0  ;;  %v1818_v16 = vpop.f32.mrb[85].mxu1 }
 0x1a4   : > { %v1146_v18 = vadd.f32 %v1145_v15, %v3403_v6  ;;  %v1819_v19 = vadd.f32 %v1818_v16, %v3405_v7  ;;  %v1147_v20 = vpop.f32.mrb[86].mxu0  ;;  %v1820_v21 = vpop.f32.mrb[86].mxu1 }
 0x1a5   : > { %2413 = vst [vmem:[%s3412_s10 + $0x540] sm:$0xff] %v1144_v13  ;;  %2415 = vst [vmem:[%s3412_s10 + $0x550] sm:$0xff] %v1817_v14  ;;  %v1148_v22 = vadd.f32 %v1147_v20, %v3399_v4  ;;  %v1821_v23 = vadd.f32 %v1820_v21, %v3401_v5  ;;  %v1149_v24 = vpop.f32.mrb[87].mxu0  ;;  %v1822_v25 = vpop.f32.mrb[87].mxu1 }
 0x1a6   : > { %2414 = vst [vmem:[%s3412_s10 + $0x548] sm:$0xff] %v1146_v18  ;;  %2416 = vst [vmem:[%s3412_s10 + $0x558] sm:$0xff] %v1819_v19  ;;  %v1150_v26 = vadd.f32 %v1149_v24, %v3403_v6  ;;  %v1823_v27 = vadd.f32 %v1822_v25, %v3405_v7 }
 0x1a7   : > { %2417 = vst [vmem:[%s3412_s10 + $0x560] sm:$0xff] %v1148_v22  ;;  %2419 = vst [vmem:[%s3412_s10 + $0x570] sm:$0xff] %v1821_v23  ;;  %1412 = vmatmul.mubr.bf16.gmra.mrb[192].mxu0 %v3153_v17  ;;  %2085 = vmatmul.mubr.bf16.gmra.mrb[192].mxu1 %v3153_v17 }
 0x1a8   : > { %2418 = vst [vmem:[%s3412_s10 + $0x568] sm:$0xff] %v1150_v26  ;;  %2420 = vst [vmem:[%s3412_s10 + $0x578] sm:$0xff] %v1823_v27  ;;  %1421 = vmatprep.mubr.bf16.mxu0 %v3177_v2  ;;  %2094 = vmatprep.mubr.bf16.mxu1 %v3177_v2  ;;  %v3157_v26 = vld [vmem:[%s3293_s17 + $0x1e0] sm:$0xff]  }
 0x1aa   : > { %v1153_v28 = vpop.f32.mrb[88].mxu0  ;;  %v1826_v29 = vpop.f32.mrb[88].mxu1 }
 0x1ab   : > { %v1154_v30 = vadd.f32 %v1153_v28, %v3399_v4  ;;  %v1827_v31 = vadd.f32 %v1826_v29, %v3401_v5  ;;  %v1155_v32 = vpop.f32.mrb[89].mxu0  ;;  %v1828_v33 = vpop.f32.mrb[89].mxu1 }
 0x1ac   : > { %v1156_v35 = vadd.f32 %v1155_v32, %v3403_v6  ;;  %v1829_v36 = vadd.f32 %v1828_v33, %v3405_v7  ;;  %v1157_v37 = vpop.f32.mrb[90].mxu0  ;;  %v1830_v38 = vpop.f32.mrb[90].mxu1 }
 0x1ad   : > { %2421 = vst [vmem:[%s3412_s10 + $0x580] sm:$0xff] %v1154_v30  ;;  %2423 = vst [vmem:[%s3412_s10 + $0x590] sm:$0xff] %v1827_v31  ;;  %v1158_v39 = vadd.f32 %v1157_v37, %v3399_v4  ;;  %v1831_v40 = vadd.f32 %v1830_v38, %v3401_v5  ;;  %v1159_v41 = vpop.f32.mrb[91].mxu0  ;;  %v1832_v42 = vpop.f32.mrb[91].mxu1 }
 0x1ae   : > { %2422 = vst [vmem:[%s3412_s10 + $0x588] sm:$0xff] %v1156_v35  ;;  %2424 = vst [vmem:[%s3412_s10 + $0x598] sm:$0xff] %v1829_v36  ;;  %v1160_v43 = vadd.f32 %v1159_v41, %v3403_v6  ;;  %v1833_v44 = vadd.f32 %v1832_v42, %v3405_v7 }
 0x1af   : > { %2425 = vst [vmem:[%s3412_s10 + $0x5a0] sm:$0xff] %v1158_v39  ;;  %2427 = vst [vmem:[%s3412_s10 + $0x5b0] sm:$0xff] %v1831_v40  ;;  %1422 = vmatmul.mubr.bf16.gmra.mrb[196].mxu0 %v3154_v34  ;;  %2095 = vmatmul.mubr.bf16.gmra.mrb[196].mxu1 %v3154_v34 }
 0x1b0   : > { %2426 = vst [vmem:[%s3412_s10 + $0x5a8] sm:$0xff] %v1160_v43  ;;  %2428 = vst [vmem:[%s3412_s10 + $0x5b8] sm:$0xff] %v1833_v44  ;;  %1431 = vmatprep.mubr.bf16.mxu0 %v3177_v2  ;;  %2104 = vmatprep.mubr.bf16.mxu1 %v3177_v2  ;;  %v3158_v43 = vld [vmem:[%s3293_s17 + $0x1e8] sm:$0xff]  }
 0x1b2   : > { %v1163_v45 = vpop.f32.mrb[92].mxu0  ;;  %v1836_v46 = vpop.f32.mrb[92].mxu1 }
 0x1b3   : > { %v1164_v47 = vadd.f32 %v1163_v45, %v3399_v4  ;;  %v1837_v48 = vadd.f32 %v1836_v46, %v3401_v5  ;;  %v1165_v49 = vpop.f32.mrb[93].mxu0  ;;  %v1838_v50 = vpop.f32.mrb[93].mxu1 }
 0x1b4   : > { %v1166_v52 = vadd.f32 %v1165_v49, %v3403_v6  ;;  %v1839_v53 = vadd.f32 %v1838_v50, %v3405_v7  ;;  %v1167_v54 = vpop.f32.mrb[94].mxu0  ;;  %v1840_v55 = vpop.f32.mrb[94].mxu1 }
 0x1b5   : > { %2429 = vst [vmem:[%s3412_s10 + $0x5c0] sm:$0xff] %v1164_v47  ;;  %2431 = vst [vmem:[%s3412_s10 + $0x5d0] sm:$0xff] %v1837_v48  ;;  %v1168_v56 = vadd.f32 %v1167_v54, %v3399_v4  ;;  %v1841_v57 = vadd.f32 %v1840_v55, %v3401_v5  ;;  %v1169_v58 = vpop.f32.mrb[95].mxu0  ;;  %v1842_v59 = vpop.f32.mrb[95].mxu1 }
 0x1b6   : > { %2430 = vst [vmem:[%s3412_s10 + $0x5c8] sm:$0xff] %v1166_v52  ;;  %2432 = vst [vmem:[%s3412_s10 + $0x5d8] sm:$0xff] %v1839_v53  ;;  %v1170_v60 = vadd.f32 %v1169_v58, %v3403_v6  ;;  %v1843_v61 = vadd.f32 %v1842_v59, %v3405_v7 }
 0x1b7   : > { %2433 = vst [vmem:[%s3412_s10 + $0x5e0] sm:$0xff] %v1168_v56  ;;  %2435 = vst [vmem:[%s3412_s10 + $0x5f0] sm:$0xff] %v1841_v57  ;;  %1432 = vmatmul.mubr.bf16.gmra.mrb[200].mxu0 %v3155_v51  ;;  %2105 = vmatmul.mubr.bf16.gmra.mrb[200].mxu1 %v3155_v51 }
 0x1b8   : > { %2434 = vst [vmem:[%s3412_s10 + $0x5e8] sm:$0xff] %v1170_v60  ;;  %2436 = vst [vmem:[%s3412_s10 + $0x5f8] sm:$0xff] %v1843_v61  ;;  %1441 = vmatprep.mubr.bf16.mxu0 %v3177_v2  ;;  %2114 = vmatprep.mubr.bf16.mxu1 %v3177_v2  ;;  %v3159_v60 = vld [vmem:[%s3293_s17 + $0x1f0] sm:$0xff]  }
 0x1ba   : > { %v1173_v62 = vpop.f32.mrb[96].mxu0  ;;  %v1846_v63 = vpop.f32.mrb[96].mxu1 }
 0x1bb   : > { %v1174_v0 = vadd.f32 %v1173_v62, %v3399_v4  ;;  %v1847_v1 = vadd.f32 %v1846_v63, %v3401_v5  ;;  %v1175_v3 = vpop.f32.mrb[97].mxu0  ;;  %v1848_v8 = vpop.f32.mrb[97].mxu1 }
 0x1bc   : > { %v1176_v10 = vadd.f32 %v1175_v3, %v3403_v6  ;;  %v1849_v11 = vadd.f32 %v1848_v8, %v3405_v7  ;;  %v1177_v12 = vpop.f32.mrb[98].mxu0  ;;  %v1850_v13 = vpop.f32.mrb[98].mxu1 }
 0x1bd   : > { %2437 = vst [vmem:[%s3412_s10 + $0x600] sm:$0xff] %v1174_v0  ;;  %2439 = vst [vmem:[%s3412_s10 + $0x610] sm:$0xff] %v1847_v1  ;;  %v1178_v14 = vadd.f32 %v1177_v12, %v3399_v4  ;;  %v1851_v15 = vadd.f32 %v1850_v13, %v3401_v5  ;;  %v1179_v16 = vpop.f32.mrb[99].mxu0  ;;  %v1852_v17 = vpop.f32.mrb[99].mxu1 }
 0x1be   : > { %2438 = vst [vmem:[%s3412_s10 + $0x608] sm:$0xff] %v1176_v10  ;;  %2440 = vst [vmem:[%s3412_s10 + $0x618] sm:$0xff] %v1849_v11  ;;  %v1180_v18 = vadd.f32 %v1179_v16, %v3403_v6  ;;  %v1853_v19 = vadd.f32 %v1852_v17, %v3405_v7 }
 0x1bf   : > { %2441 = vst [vmem:[%s3412_s10 + $0x620] sm:$0xff] %v1178_v14  ;;  %2443 = vst [vmem:[%s3412_s10 + $0x630] sm:$0xff] %v1851_v15  ;;  %1442 = vmatmul.mubr.bf16.gmra.mrb[204].mxu0 %v3156_v9  ;;  %2115 = vmatmul.mubr.bf16.gmra.mrb[204].mxu1 %v3156_v9 }
 0x1c0   : > { %2442 = vst [vmem:[%s3412_s10 + $0x628] sm:$0xff] %v1180_v18  ;;  %2444 = vst [vmem:[%s3412_s10 + $0x638] sm:$0xff] %v1853_v19  ;;  %1451 = vmatprep.mubr.bf16.mxu0 %v3177_v2  ;;  %2124 = vmatprep.mubr.bf16.mxu1 %v3177_v2  ;;  %v3160_v18 = vld [vmem:[%s3293_s17 + $0x1f8] sm:$0xff]  }
 0x1c2   : > { %v1183_v20 = vpop.f32.mrb[100].mxu0  ;;  %v1856_v21 = vpop.f32.mrb[100].mxu1 }
 0x1c3   : > { %v1184_v22 = vadd.f32 %v1183_v20, %v3399_v4  ;;  %v1857_v23 = vadd.f32 %v1856_v21, %v3401_v5  ;;  %v1185_v24 = vpop.f32.mrb[101].mxu0  ;;  %v1858_v25 = vpop.f32.mrb[101].mxu1 }
 0x1c4   : > { %v1186_v27 = vadd.f32 %v1185_v24, %v3403_v6  ;;  %v1859_v28 = vadd.f32 %v1858_v25, %v3405_v7  ;;  %v1187_v29 = vpop.f32.mrb[102].mxu0  ;;  %v1860_v30 = vpop.f32.mrb[102].mxu1 }
 0x1c5   : > { %2445 = vst [vmem:[%s3412_s10 + $0x640] sm:$0xff] %v1184_v22  ;;  %2447 = vst [vmem:[%s3412_s10 + $0x650] sm:$0xff] %v1857_v23  ;;  %v1188_v31 = vadd.f32 %v1187_v29, %v3399_v4  ;;  %v1861_v32 = vadd.f32 %v1860_v30, %v3401_v5  ;;  %v1189_v33 = vpop.f32.mrb[103].mxu0  ;;  %v1862_v34 = vpop.f32.mrb[103].mxu1 }
 0x1c6   : > { %2446 = vst [vmem:[%s3412_s10 + $0x648] sm:$0xff] %v1186_v27  ;;  %2448 = vst [vmem:[%s3412_s10 + $0x658] sm:$0xff] %v1859_v28  ;;  %v1190_v35 = vadd.f32 %v1189_v33, %v3403_v6  ;;  %v1863_v36 = vadd.f32 %v1862_v34, %v3405_v7 }
 0x1c7   : > { %2449 = vst [vmem:[%s3412_s10 + $0x660] sm:$0xff] %v1188_v31  ;;  %2451 = vst [vmem:[%s3412_s10 + $0x670] sm:$0xff] %v1861_v32  ;;  %1452 = vmatmul.mubr.bf16.gmra.mrb[208].mxu0 %v3157_v26  ;;  %2125 = vmatmul.mubr.bf16.gmra.mrb[208].mxu1 %v3157_v26 }
 0x1c8   : > { %2450 = vst [vmem:[%s3412_s10 + $0x668] sm:$0xff] %v1190_v35  ;;  %2452 = vst [vmem:[%s3412_s10 + $0x678] sm:$0xff] %v1863_v36  ;;  %1461 = vmatprep.mubr.bf16.mxu0 %v3177_v2  ;;  %2134 = vmatprep.mubr.bf16.mxu1 %v3177_v2  ;;  %v3161_v35 = vld [vmem:[%s3293_s17 + $0x200] sm:$0xff]  }
 0x1ca   : > { %v1193_v37 = vpop.f32.mrb[104].mxu0  ;;  %v1866_v38 = vpop.f32.mrb[104].mxu1 }
 0x1cb   : > { %v1194_v39 = vadd.f32 %v1193_v37, %v3399_v4  ;;  %v1867_v40 = vadd.f32 %v1866_v38, %v3401_v5  ;;  %v1195_v41 = vpop.f32.mrb[105].mxu0  ;;  %v1868_v42 = vpop.f32.mrb[105].mxu1 }
 0x1cc   : > { %v1196_v44 = vadd.f32 %v1195_v41, %v3403_v6  ;;  %v1869_v45 = vadd.f32 %v1868_v42, %v3405_v7  ;;  %v1197_v46 = vpop.f32.mrb[106].mxu0  ;;  %v1870_v47 = vpop.f32.mrb[106].mxu1 }
 0x1cd   : > { %2453 = vst [vmem:[%s3412_s10 + $0x680] sm:$0xff] %v1194_v39  ;;  %2455 = vst [vmem:[%s3412_s10 + $0x690] sm:$0xff] %v1867_v40  ;;  %v1198_v48 = vadd.f32 %v1197_v46, %v3399_v4  ;;  %v1871_v49 = vadd.f32 %v1870_v47, %v3401_v5  ;;  %v1199_v50 = vpop.f32.mrb[107].mxu0  ;;  %v1872_v51 = vpop.f32.mrb[107].mxu1 }
 0x1ce   : > { %2454 = vst [vmem:[%s3412_s10 + $0x688] sm:$0xff] %v1196_v44  ;;  %2456 = vst [vmem:[%s3412_s10 + $0x698] sm:$0xff] %v1869_v45  ;;  %v1200_v52 = vadd.f32 %v1199_v50, %v3403_v6  ;;  %v1873_v53 = vadd.f32 %v1872_v51, %v3405_v7 }
 0x1cf   : > { %2457 = vst [vmem:[%s3412_s10 + $0x6a0] sm:$0xff] %v1198_v48  ;;  %2459 = vst [vmem:[%s3412_s10 + $0x6b0] sm:$0xff] %v1871_v49  ;;  %1462 = vmatmul.mubr.bf16.gmra.mrb[212].mxu0 %v3158_v43  ;;  %2135 = vmatmul.mubr.bf16.gmra.mrb[212].mxu1 %v3158_v43 }
 0x1d0   : > { %2458 = vst [vmem:[%s3412_s10 + $0x6a8] sm:$0xff] %v1200_v52  ;;  %2460 = vst [vmem:[%s3412_s10 + $0x6b8] sm:$0xff] %v1873_v53  ;;  %1471 = vmatprep.mubr.bf16.mxu0 %v3177_v2  ;;  %2144 = vmatprep.mubr.bf16.mxu1 %v3177_v2  ;;  %v3162_v52 = vld [vmem:[%s3293_s17 + $0x208] sm:$0xff]  }
 0x1d2   : > { %v1203_v54 = vpop.f32.mrb[108].mxu0  ;;  %v1876_v55 = vpop.f32.mrb[108].mxu1 }
 0x1d3   : > { %v1204_v56 = vadd.f32 %v1203_v54, %v3399_v4  ;;  %v1877_v57 = vadd.f32 %v1876_v55, %v3401_v5  ;;  %v1205_v58 = vpop.f32.mrb[109].mxu0  ;;  %v1878_v59 = vpop.f32.mrb[109].mxu1 }
 0x1d4   : > { %v1206_v61 = vadd.f32 %v1205_v58, %v3403_v6  ;;  %v1879_v62 = vadd.f32 %v1878_v59, %v3405_v7  ;;  %v1207_v63 = vpop.f32.mrb[110].mxu0  ;;  %v1880_v0 = vpop.f32.mrb[110].mxu1 }
 0x1d5   : > { %2461 = vst [vmem:[%s3412_s10 + $0x6c0] sm:$0xff] %v1204_v56  ;;  %2463 = vst [vmem:[%s3412_s10 + $0x6d0] sm:$0xff] %v1877_v57  ;;  %v1208_v1 = vadd.f32 %v1207_v63, %v3399_v4  ;;  %v1881_v3 = vadd.f32 %v1880_v0, %v3401_v5  ;;  %v1209_v8 = vpop.f32.mrb[111].mxu0  ;;  %v1882_v9 = vpop.f32.mrb[111].mxu1 }
 0x1d6   : > { %2462 = vst [vmem:[%s3412_s10 + $0x6c8] sm:$0xff] %v1206_v61  ;;  %2464 = vst [vmem:[%s3412_s10 + $0x6d8] sm:$0xff] %v1879_v62  ;;  %v1210_v10 = vadd.f32 %v1209_v8, %v3403_v6  ;;  %v1883_v11 = vadd.f32 %v1882_v9, %v3405_v7 }
 0x1d7   : > { %2465 = vst [vmem:[%s3412_s10 + $0x6e0] sm:$0xff] %v1208_v1  ;;  %2467 = vst [vmem:[%s3412_s10 + $0x6f0] sm:$0xff] %v1881_v3  ;;  %1472 = vmatmul.mubr.bf16.gmra.mrb[216].mxu0 %v3159_v60  ;;  %2145 = vmatmul.mubr.bf16.gmra.mrb[216].mxu1 %v3159_v60 }
 0x1d8   : > { %2466 = vst [vmem:[%s3412_s10 + $0x6e8] sm:$0xff] %v1210_v10  ;;  %2468 = vst [vmem:[%s3412_s10 + $0x6f8] sm:$0xff] %v1883_v11  ;;  %1481 = vmatprep.mubr.bf16.mxu0 %v3177_v2  ;;  %2154 = vmatprep.mubr.bf16.mxu1 %v3177_v2  ;;  %v3163_v10 = vld [vmem:[%s3293_s17 + $0x210] sm:$0xff]  }
 0x1da   : > { %v1213_v12 = vpop.f32.mrb[112].mxu0  ;;  %v1886_v13 = vpop.f32.mrb[112].mxu1 }
 0x1db   : > { %v1214_v14 = vadd.f32 %v1213_v12, %v3399_v4  ;;  %v1887_v15 = vadd.f32 %v1886_v13, %v3401_v5  ;;  %v1215_v16 = vpop.f32.mrb[113].mxu0  ;;  %v1888_v17 = vpop.f32.mrb[113].mxu1 }
 0x1dc   : > { %v1216_v19 = vadd.f32 %v1215_v16, %v3403_v6  ;;  %v1889_v20 = vadd.f32 %v1888_v17, %v3405_v7  ;;  %v1217_v21 = vpop.f32.mrb[114].mxu0  ;;  %v1890_v22 = vpop.f32.mrb[114].mxu1 }
 0x1dd   : > { %2469 = vst [vmem:[%s3412_s10 + $0x700] sm:$0xff] %v1214_v14  ;;  %2471 = vst [vmem:[%s3412_s10 + $0x710] sm:$0xff] %v1887_v15  ;;  %v1218_v23 = vadd.f32 %v1217_v21, %v3399_v4  ;;  %v1891_v24 = vadd.f32 %v1890_v22, %v3401_v5  ;;  %v1219_v25 = vpop.f32.mrb[115].mxu0  ;;  %v1892_v26 = vpop.f32.mrb[115].mxu1 }
 0x1de   : > { %2470 = vst [vmem:[%s3412_s10 + $0x708] sm:$0xff] %v1216_v19  ;;  %2472 = vst [vmem:[%s3412_s10 + $0x718] sm:$0xff] %v1889_v20  ;;  %v1220_v27 = vadd.f32 %v1219_v25, %v3403_v6  ;;  %v1893_v28 = vadd.f32 %v1892_v26, %v3405_v7 }
 0x1df   : > { %2473 = vst [vmem:[%s3412_s10 + $0x720] sm:$0xff] %v1218_v23  ;;  %2475 = vst [vmem:[%s3412_s10 + $0x730] sm:$0xff] %v1891_v24  ;;  %1482 = vmatmul.mubr.bf16.gmra.mrb[220].mxu0 %v3160_v18  ;;  %2155 = vmatmul.mubr.bf16.gmra.mrb[220].mxu1 %v3160_v18 }
 0x1e0   : > { %2474 = vst [vmem:[%s3412_s10 + $0x728] sm:$0xff] %v1220_v27  ;;  %2476 = vst [vmem:[%s3412_s10 + $0x738] sm:$0xff] %v1893_v28  ;;  %1491 = vmatprep.mubr.bf16.mxu0 %v3177_v2  ;;  %2164 = vmatprep.mubr.bf16.mxu1 %v3177_v2  ;;  %v3164_v27 = vld [vmem:[%s3293_s17 + $0x218] sm:$0xff]  }
 0x1e2   : > { %v1223_v29 = vpop.f32.mrb[116].mxu0  ;;  %v1896_v30 = vpop.f32.mrb[116].mxu1 }
 0x1e3   : > { %v1224_v31 = vadd.f32 %v1223_v29, %v3399_v4  ;;  %v1897_v32 = vadd.f32 %v1896_v30, %v3401_v5  ;;  %v1225_v33 = vpop.f32.mrb[117].mxu0  ;;  %v1898_v34 = vpop.f32.mrb[117].mxu1 }
 0x1e4   : > { %v1226_v36 = vadd.f32 %v1225_v33, %v3403_v6  ;;  %v1899_v37 = vadd.f32 %v1898_v34, %v3405_v7  ;;  %v1227_v38 = vpop.f32.mrb[118].mxu0  ;;  %v1900_v39 = vpop.f32.mrb[118].mxu1 }
 0x1e5   : > { %2477 = vst [vmem:[%s3412_s10 + $0x740] sm:$0xff] %v1224_v31  ;;  %2479 = vst [vmem:[%s3412_s10 + $0x750] sm:$0xff] %v1897_v32  ;;  %v1228_v40 = vadd.f32 %v1227_v38, %v3399_v4  ;;  %v1901_v41 = vadd.f32 %v1900_v39, %v3401_v5  ;;  %v1229_v42 = vpop.f32.mrb[119].mxu0  ;;  %v1902_v43 = vpop.f32.mrb[119].mxu1 }
 0x1e6   : > { %2478 = vst [vmem:[%s3412_s10 + $0x748] sm:$0xff] %v1226_v36  ;;  %2480 = vst [vmem:[%s3412_s10 + $0x758] sm:$0xff] %v1899_v37  ;;  %v1230_v44 = vadd.f32 %v1229_v42, %v3403_v6  ;;  %v1903_v45 = vadd.f32 %v1902_v43, %v3405_v7 }
 0x1e7   : > { %2481 = vst [vmem:[%s3412_s10 + $0x760] sm:$0xff] %v1228_v40  ;;  %2483 = vst [vmem:[%s3412_s10 + $0x770] sm:$0xff] %v1901_v41  ;;  %1492 = vmatmul.mubr.bf16.gmra.mrb[224].mxu0 %v3161_v35  ;;  %2165 = vmatmul.mubr.bf16.gmra.mrb[224].mxu1 %v3161_v35 }
 0x1e8   : > { %2482 = vst [vmem:[%s3412_s10 + $0x768] sm:$0xff] %v1230_v44  ;;  %2484 = vst [vmem:[%s3412_s10 + $0x778] sm:$0xff] %v1903_v45  ;;  %1501 = vmatprep.mubr.bf16.mxu0 %v3177_v2  ;;  %2174 = vmatprep.mubr.bf16.mxu1 %v3177_v2  ;;  %v3165_v44 = vld [vmem:[%s3293_s17 + $0x220] sm:$0xff]  }
 0x1ea   : > { %v1233_v46 = vpop.f32.mrb[120].mxu0  ;;  %v1906_v47 = vpop.f32.mrb[120].mxu1 }
 0x1eb   : > { %v1234_v48 = vadd.f32 %v1233_v46, %v3399_v4  ;;  %v1907_v49 = vadd.f32 %v1906_v47, %v3401_v5  ;;  %v1235_v50 = vpop.f32.mrb[121].mxu0  ;;  %v1908_v51 = vpop.f32.mrb[121].mxu1 }
 0x1ec   : > { %v1236_v53 = vadd.f32 %v1235_v50, %v3403_v6  ;;  %v1909_v54 = vadd.f32 %v1908_v51, %v3405_v7  ;;  %v1237_v55 = vpop.f32.mrb[122].mxu0  ;;  %v1910_v56 = vpop.f32.mrb[122].mxu1 }
 0x1ed   : > { %2485 = vst [vmem:[%s3412_s10 + $0x780] sm:$0xff] %v1234_v48  ;;  %2487 = vst [vmem:[%s3412_s10 + $0x790] sm:$0xff] %v1907_v49  ;;  %v1238_v57 = vadd.f32 %v1237_v55, %v3399_v4  ;;  %v1911_v58 = vadd.f32 %v1910_v56, %v3401_v5  ;;  %v1239_v59 = vpop.f32.mrb[123].mxu0  ;;  %v1912_v60 = vpop.f32.mrb[123].mxu1 }
 0x1ee   : > { %2486 = vst [vmem:[%s3412_s10 + $0x788] sm:$0xff] %v1236_v53  ;;  %2488 = vst [vmem:[%s3412_s10 + $0x798] sm:$0xff] %v1909_v54  ;;  %v1240_v61 = vadd.f32 %v1239_v59, %v3403_v6  ;;  %v1913_v62 = vadd.f32 %v1912_v60, %v3405_v7 }
 0x1ef   : > { %2489 = vst [vmem:[%s3412_s10 + $0x7a0] sm:$0xff] %v1238_v57  ;;  %2491 = vst [vmem:[%s3412_s10 + $0x7b0] sm:$0xff] %v1911_v58  ;;  %1502 = vmatmul.mubr.bf16.gmra.mrb[228].mxu0 %v3162_v52  ;;  %2175 = vmatmul.mubr.bf16.gmra.mrb[228].mxu1 %v3162_v52 }
 0x1f0   : > { %2490 = vst [vmem:[%s3412_s10 + $0x7a8] sm:$0xff] %v1240_v61  ;;  %2492 = vst [vmem:[%s3412_s10 + $0x7b8] sm:$0xff] %v1913_v62  ;;  %1511 = vmatprep.mubr.bf16.mxu0 %v3177_v2  ;;  %2184 = vmatprep.mubr.bf16.mxu1 %v3177_v2  ;;  %v3166_v61 = vld [vmem:[%s3293_s17 + $0x228] sm:$0xff]  }
 0x1f2   : > { %v1243_v63 = vpop.f32.mrb[124].mxu0  ;;  %v1916_v0 = vpop.f32.mrb[124].mxu1 }
 0x1f3   : > { %v1244_v1 = vadd.f32 %v1243_v63, %v3399_v4  ;;  %v1917_v3 = vadd.f32 %v1916_v0, %v3401_v5  ;;  %v1245_v8 = vpop.f32.mrb[125].mxu0  ;;  %v1918_v9 = vpop.f32.mrb[125].mxu1 }
 0x1f4   : > { %v1246_v11 = vadd.f32 %v1245_v8, %v3403_v6  ;;  %v1919_v12 = vadd.f32 %v1918_v9, %v3405_v7  ;;  %v1247_v13 = vpop.f32.mrb[126].mxu0  ;;  %v1920_v14 = vpop.f32.mrb[126].mxu1 }
 0x1f5   : > { %2493 = vst [vmem:[%s3412_s10 + $0x7c0] sm:$0xff] %v1244_v1  ;;  %2495 = vst [vmem:[%s3412_s10 + $0x7d0] sm:$0xff] %v1917_v3  ;;  %v1248_v15 = vadd.f32 %v1247_v13, %v3399_v4  ;;  %v1921_v16 = vadd.f32 %v1920_v14, %v3401_v5  ;;  %v1249_v17 = vpop.f32.mrb[127].mxu0  ;;  %v1922_v18 = vpop.f32.mrb[127].mxu1 }
 0x1f6   : > { %2494 = vst [vmem:[%s3412_s10 + $0x7c8] sm:$0xff] %v1246_v11  ;;  %2496 = vst [vmem:[%s3412_s10 + $0x7d8] sm:$0xff] %v1919_v12  ;;  %v1250_v19 = vadd.f32 %v1249_v17, %v3403_v6  ;;  %v1923_v20 = vadd.f32 %v1922_v18, %v3405_v7 }
 0x1f7   : > { %2497 = vst [vmem:[%s3412_s10 + $0x7e0] sm:$0xff] %v1248_v15  ;;  %2499 = vst [vmem:[%s3412_s10 + $0x7f0] sm:$0xff] %v1921_v16  ;;  %1512 = vmatmul.mubr.bf16.gmra.mrb[232].mxu0 %v3163_v10  ;;  %2185 = vmatmul.mubr.bf16.gmra.mrb[232].mxu1 %v3163_v10 }
 0x1f8   : > { %2498 = vst [vmem:[%s3412_s10 + $0x7e8] sm:$0xff] %v1250_v19  ;;  %2500 = vst [vmem:[%s3412_s10 + $0x7f8] sm:$0xff] %v1923_v20  ;;  %1521 = vmatprep.mubr.bf16.mxu0 %v3177_v2  ;;  %2194 = vmatprep.mubr.bf16.mxu1 %v3177_v2  ;;  %v3167_v19 = vld [vmem:[%s3293_s17 + $0x230] sm:$0xff]  }
 0x1fa   : > { %v1253_v21 = vpop.f32.mrb[128].mxu0  ;;  %v1926_v22 = vpop.f32.mrb[128].mxu1 }
 0x1fb   : > { %v1254_v23 = vadd.f32 %v1253_v21, %v3399_v4  ;;  %v1927_v24 = vadd.f32 %v1926_v22, %v3401_v5  ;;  %v1255_v25 = vpop.f32.mrb[129].mxu0  ;;  %v1928_v26 = vpop.f32.mrb[129].mxu1 }
 0x1fc   : > { %v1256_v28 = vadd.f32 %v1255_v25, %v3403_v6  ;;  %v1929_v29 = vadd.f32 %v1928_v26, %v3405_v7  ;;  %v1257_v30 = vpop.f32.mrb[130].mxu0  ;;  %v1930_v31 = vpop.f32.mrb[130].mxu1 }
 0x1fd   : > { %2501 = vst [vmem:[%s3412_s10 + $0x800] sm:$0xff] %v1254_v23  ;;  %2503 = vst [vmem:[%s3412_s10 + $0x810] sm:$0xff] %v1927_v24  ;;  %v1258_v32 = vadd.f32 %v1257_v30, %v3399_v4  ;;  %v1931_v33 = vadd.f32 %v1930_v31, %v3401_v5  ;;  %v1259_v34 = vpop.f32.mrb[131].mxu0  ;;  %v1932_v35 = vpop.f32.mrb[131].mxu1 }
 0x1fe   : > { %2502 = vst [vmem:[%s3412_s10 + $0x808] sm:$0xff] %v1256_v28  ;;  %2504 = vst [vmem:[%s3412_s10 + $0x818] sm:$0xff] %v1929_v29  ;;  %v1260_v36 = vadd.f32 %v1259_v34, %v3403_v6  ;;  %v1933_v37 = vadd.f32 %v1932_v35, %v3405_v7 }
 0x1ff   : > { %2505 = vst [vmem:[%s3412_s10 + $0x820] sm:$0xff] %v1258_v32  ;;  %2507 = vst [vmem:[%s3412_s10 + $0x830] sm:$0xff] %v1931_v33  ;;  %1522 = vmatmul.mubr.bf16.gmra.mrb[236].mxu0 %v3164_v27  ;;  %2195 = vmatmul.mubr.bf16.gmra.mrb[236].mxu1 %v3164_v27 }
 0x200   : > { %2506 = vst [vmem:[%s3412_s10 + $0x828] sm:$0xff] %v1260_v36  ;;  %2508 = vst [vmem:[%s3412_s10 + $0x838] sm:$0xff] %v1933_v37  ;;  %1531 = vmatprep.mubr.bf16.mxu0 %v3177_v2  ;;  %2204 = vmatprep.mubr.bf16.mxu1 %v3177_v2  ;;  %v3168_v36 = vld [vmem:[%s3293_s17 + $0x238] sm:$0xff]  }
 0x202   : > { %v1263_v38 = vpop.f32.mrb[132].mxu0  ;;  %v1936_v39 = vpop.f32.mrb[132].mxu1 }
 0x203   : > { %v1264_v40 = vadd.f32 %v1263_v38, %v3399_v4  ;;  %v1937_v41 = vadd.f32 %v1936_v39, %v3401_v5  ;;  %v1265_v42 = vpop.f32.mrb[133].mxu0  ;;  %v1938_v43 = vpop.f32.mrb[133].mxu1 }
 0x204   : > { %v1266_v45 = vadd.f32 %v1265_v42, %v3403_v6  ;;  %v1939_v46 = vadd.f32 %v1938_v43, %v3405_v7  ;;  %v1267_v47 = vpop.f32.mrb[134].mxu0  ;;  %v1940_v48 = vpop.f32.mrb[134].mxu1 }
 0x205   : > { %2509 = vst [vmem:[%s3412_s10 + $0x840] sm:$0xff] %v1264_v40  ;;  %2511 = vst [vmem:[%s3412_s10 + $0x850] sm:$0xff] %v1937_v41  ;;  %v1268_v49 = vadd.f32 %v1267_v47, %v3399_v4  ;;  %v1941_v50 = vadd.f32 %v1940_v48, %v3401_v5  ;;  %v1269_v51 = vpop.f32.mrb[135].mxu0  ;;  %v1942_v52 = vpop.f32.mrb[135].mxu1 }
 0x206   : > { %2510 = vst [vmem:[%s3412_s10 + $0x848] sm:$0xff] %v1266_v45  ;;  %2512 = vst [vmem:[%s3412_s10 + $0x858] sm:$0xff] %v1939_v46  ;;  %v1270_v53 = vadd.f32 %v1269_v51, %v3403_v6  ;;  %v1943_v54 = vadd.f32 %v1942_v52, %v3405_v7 }
 0x207   : > { %2513 = vst [vmem:[%s3412_s10 + $0x860] sm:$0xff] %v1268_v49  ;;  %2515 = vst [vmem:[%s3412_s10 + $0x870] sm:$0xff] %v1941_v50  ;;  %1532 = vmatmul.mubr.bf16.gmra.mrb[240].mxu0 %v3165_v44  ;;  %2205 = vmatmul.mubr.bf16.gmra.mrb[240].mxu1 %v3165_v44 }
 0x208   : > { %2514 = vst [vmem:[%s3412_s10 + $0x868] sm:$0xff] %v1270_v53  ;;  %2516 = vst [vmem:[%s3412_s10 + $0x878] sm:$0xff] %v1943_v54  ;;  %1541 = vmatprep.mubr.bf16.mxu0 %v3177_v2  ;;  %2214 = vmatprep.mubr.bf16.mxu1 %v3177_v2 }
 0x20a   : > { %v1273_v55 = vpop.f32.mrb[136].mxu0  ;;  %v1946_v56 = vpop.f32.mrb[136].mxu1 }
 0x20b   : > { %v1274_v57 = vadd.f32 %v1273_v55, %v3399_v4  ;;  %v1947_v58 = vadd.f32 %v1946_v56, %v3401_v5  ;;  %v1275_v59 = vpop.f32.mrb[137].mxu0  ;;  %v1948_v60 = vpop.f32.mrb[137].mxu1 }
 0x20c   : > { %v1276_v62 = vadd.f32 %v1275_v59, %v3403_v6  ;;  %v1949_v63 = vadd.f32 %v1948_v60, %v3405_v7  ;;  %v1277_v0 = vpop.f32.mrb[138].mxu0  ;;  %v1950_v1 = vpop.f32.mrb[138].mxu1 }
 0x20d   : > { %2517 = vst [vmem:[%s3412_s10 + $0x880] sm:$0xff] %v1274_v57  ;;  %2519 = vst [vmem:[%s3412_s10 + $0x890] sm:$0xff] %v1947_v58  ;;  %v1278_v3 = vadd.f32 %v1277_v0, %v3399_v4  ;;  %v1951_v8 = vadd.f32 %v1950_v1, %v3401_v5  ;;  %v1279_v9 = vpop.f32.mrb[139].mxu0  ;;  %v1952_v10 = vpop.f32.mrb[139].mxu1 }
 0x20e   : > { %2518 = vst [vmem:[%s3412_s10 + $0x888] sm:$0xff] %v1276_v62  ;;  %2520 = vst [vmem:[%s3412_s10 + $0x898] sm:$0xff] %v1949_v63  ;;  %v1280_v11 = vadd.f32 %v1279_v9, %v3403_v6  ;;  %v1953_v12 = vadd.f32 %v1952_v10, %v3405_v7 }
 0x20f   : > { %2521 = vst [vmem:[%s3412_s10 + $0x8a0] sm:$0xff] %v1278_v3  ;;  %2523 = vst [vmem:[%s3412_s10 + $0x8b0] sm:$0xff] %v1951_v8  ;;  %1542 = vmatmul.mubr.bf16.gmra.mrb[244].mxu0 %v3166_v61  ;;  %2215 = vmatmul.mubr.bf16.gmra.mrb[244].mxu1 %v3166_v61 }
 0x210   : > { %2522 = vst [vmem:[%s3412_s10 + $0x8a8] sm:$0xff] %v1280_v11  ;;  %2524 = vst [vmem:[%s3412_s10 + $0x8b8] sm:$0xff] %v1953_v12  ;;  %1551 = vmatprep.mubr.bf16.mxu0 %v3177_v2  ;;  %2224 = vmatprep.mubr.bf16.mxu1 %v3177_v2 }
 0x212   : > { %v1283_v13 = vpop.f32.mrb[140].mxu0  ;;  %v1956_v14 = vpop.f32.mrb[140].mxu1 }
 0x213   : > { %v1284_v15 = vadd.f32 %v1283_v13, %v3399_v4  ;;  %v1957_v16 = vadd.f32 %v1956_v14, %v3401_v5  ;;  %v1285_v17 = vpop.f32.mrb[141].mxu0  ;;  %v1958_v18 = vpop.f32.mrb[141].mxu1 }
 0x214   : > { %v1286_v20 = vadd.f32 %v1285_v17, %v3403_v6  ;;  %v1959_v21 = vadd.f32 %v1958_v18, %v3405_v7  ;;  %v1287_v22 = vpop.f32.mrb[142].mxu0  ;;  %v1960_v23 = vpop.f32.mrb[142].mxu1 }
 0x215   : > { %2525 = vst [vmem:[%s3412_s10 + $0x8c0] sm:$0xff] %v1284_v15  ;;  %2527 = vst [vmem:[%s3412_s10 + $0x8d0] sm:$0xff] %v1957_v16  ;;  %v1288_v24 = vadd.f32 %v1287_v22, %v3399_v4  ;;  %v1961_v25 = vadd.f32 %v1960_v23, %v3401_v5  ;;  %v1289_v26 = vpop.f32.mrb[143].mxu0  ;;  %v1962_v27 = vpop.f32.mrb[143].mxu1 }
 0x216   : > { %2526 = vst [vmem:[%s3412_s10 + $0x8c8] sm:$0xff] %v1286_v20  ;;  %2528 = vst [vmem:[%s3412_s10 + $0x8d8] sm:$0xff] %v1959_v21  ;;  %v1290_v28 = vadd.f32 %v1289_v26, %v3403_v6  ;;  %v1963_v29 = vadd.f32 %v1962_v27, %v3405_v7 }
 0x217   : > { %2529 = vst [vmem:[%s3412_s10 + $0x8e0] sm:$0xff] %v1288_v24  ;;  %2531 = vst [vmem:[%s3412_s10 + $0x8f0] sm:$0xff] %v1961_v25  ;;  %1552 = vmatmul.mubr.bf16.gmra.mrb[248].mxu0 %v3167_v19  ;;  %2225 = vmatmul.mubr.bf16.gmra.mrb[248].mxu1 %v3167_v19 }
 0x218   : > { %2530 = vst [vmem:[%s3412_s10 + $0x8e8] sm:$0xff] %v1290_v28  ;;  %2532 = vst [vmem:[%s3412_s10 + $0x8f8] sm:$0xff] %v1963_v29  ;;  %1561 = vmatprep.mubr.bf16.mxu0 %v3177_v2  ;;  %2234 = vmatprep.mubr.bf16.mxu1 %v3177_v2 }
 0x21a   : > { %v1293_v30 = vpop.f32.mrb[144].mxu0  ;;  %v1966_v31 = vpop.f32.mrb[144].mxu1 }
 0x21b   : > { %v1294_v32 = vadd.f32 %v1293_v30, %v3399_v4  ;;  %v1967_v33 = vadd.f32 %v1966_v31, %v3401_v5  ;;  %v1295_v34 = vpop.f32.mrb[145].mxu0  ;;  %v1968_v35 = vpop.f32.mrb[145].mxu1 }
 0x21c   : > { %v1296_v37 = vadd.f32 %v1295_v34, %v3403_v6  ;;  %v1969_v38 = vadd.f32 %v1968_v35, %v3405_v7  ;;  %v1297_v39 = vpop.f32.mrb[146].mxu0  ;;  %v1970_v2 = vpop.f32.mrb[146].mxu1 }
 0x21d   : > { %2533 = vst [vmem:[%s3412_s10 + $0x900] sm:$0xff] %v1294_v32  ;;  %2535 = vst [vmem:[%s3412_s10 + $0x910] sm:$0xff] %v1967_v33  ;;  %v1298_v40 = vadd.f32 %v1297_v39, %v3399_v4  ;;  %v1971_v41 = vadd.f32 %v1970_v2, %v3401_v5  ;;  %v1299_v42 = vpop.f32.mrb[147].mxu0  ;;  %v1972_v43 = vpop.f32.mrb[147].mxu1 }
 0x21e   : > { %2534 = vst [vmem:[%s3412_s10 + $0x908] sm:$0xff] %v1296_v37  ;;  %2536 = vst [vmem:[%s3412_s10 + $0x918] sm:$0xff] %v1969_v38  ;;  %v1300_v44 = vadd.f32 %v1299_v42, %v3403_v6  ;;  %v1973_v45 = vadd.f32 %v1972_v43, %v3405_v7 }
 0x21f   : > { %2537 = vst [vmem:[%s3412_s10 + $0x920] sm:$0xff] %v1298_v40  ;;  %2539 = vst [vmem:[%s3412_s10 + $0x930] sm:$0xff] %v1971_v41  ;;  %1562 = vmatmul.mubr.bf16.gmra.mrb[252].mxu0 %v3168_v36  ;;  %2235 = vmatmul.mubr.bf16.gmra.mrb[252].mxu1 %v3168_v36 }
 0x220   : > { %2538 = vst [vmem:[%s3412_s10 + $0x928] sm:$0xff] %v1300_v44  ;;  %2540 = vst [vmem:[%s3412_s10 + $0x938] sm:$0xff] %v1973_v45 }
 0x222   : > { %v1303_v46 = vpop.f32.mrb[148].mxu0  ;;  %v1976_v47 = vpop.f32.mrb[148].mxu1 }
 0x223   : > { %v1304_v48 = vadd.f32 %v1303_v46, %v3399_v4  ;;  %v1977_v49 = vadd.f32 %v1976_v47, %v3401_v5  ;;  %v1305_v50 = vpop.f32.mrb[149].mxu0  ;;  %v1978_v51 = vpop.f32.mrb[149].mxu1 }
 0x224   : > { %v1306_v52 = vadd.f32 %v1305_v50, %v3403_v6  ;;  %v1979_v53 = vadd.f32 %v1978_v51, %v3405_v7  ;;  %v1307_v54 = vpop.f32.mrb[150].mxu0  ;;  %v1980_v55 = vpop.f32.mrb[150].mxu1 }
 0x225   : > { %2541 = vst [vmem:[%s3412_s10 + $0x940] sm:$0xff] %v1304_v48  ;;  %2543 = vst [vmem:[%s3412_s10 + $0x950] sm:$0xff] %v1977_v49  ;;  %v1308_v56 = vadd.f32 %v1307_v54, %v3399_v4  ;;  %v1981_v57 = vadd.f32 %v1980_v55, %v3401_v5  ;;  %v1309_v58 = vpop.f32.mrb[151].mxu0  ;;  %v1982_v59 = vpop.f32.mrb[151].mxu1 }
 0x226   : > { %2542 = vst [vmem:[%s3412_s10 + $0x948] sm:$0xff] %v1306_v52  ;;  %2544 = vst [vmem:[%s3412_s10 + $0x958] sm:$0xff] %v1979_v53  ;;  %v1310_v60 = vadd.f32 %v1309_v58, %v3403_v6  ;;  %v1983_v61 = vadd.f32 %v1982_v59, %v3405_v7 }
 0x227   : > { %2545 = vst [vmem:[%s3412_s10 + $0x960] sm:$0xff] %v1308_v56  ;;  %2547 = vst [vmem:[%s3412_s10 + $0x970] sm:$0xff] %v1981_v57 }
 0x228   : > { %2546 = vst [vmem:[%s3412_s10 + $0x968] sm:$0xff] %v1310_v60  ;;  %2548 = vst [vmem:[%s3412_s10 + $0x978] sm:$0xff] %v1983_v61 }
 0x22a   : > { %v1313_v62 = vpop.f32.mrb[152].mxu0  ;;  %v1986_v63 = vpop.f32.mrb[152].mxu1 }
 0x22b   : > { %v1314_v0 = vadd.f32 %v1313_v62, %v3399_v4  ;;  %v1987_v1 = vadd.f32 %v1986_v63, %v3401_v5  ;;  %v1315_v3 = vpop.f32.mrb[153].mxu0  ;;  %v1988_v8 = vpop.f32.mrb[153].mxu1 }
 0x22c   : > { %v1316_v9 = vadd.f32 %v1315_v3, %v3403_v6  ;;  %v1989_v10 = vadd.f32 %v1988_v8, %v3405_v7  ;;  %v1317_v11 = vpop.f32.mrb[154].mxu0  ;;  %v1990_v12 = vpop.f32.mrb[154].mxu1 }
 0x22d   : > { %2549 = vst [vmem:[%s3412_s10 + $0x980] sm:$0xff] %v1314_v0  ;;  %2551 = vst [vmem:[%s3412_s10 + $0x990] sm:$0xff] %v1987_v1  ;;  %v1318_v13 = vadd.f32 %v1317_v11, %v3399_v4  ;;  %v1991_v14 = vadd.f32 %v1990_v12, %v3401_v5  ;;  %v1319_v15 = vpop.f32.mrb[155].mxu0  ;;  %v1992_v16 = vpop.f32.mrb[155].mxu1 }
 0x22e   : > { %2550 = vst [vmem:[%s3412_s10 + $0x988] sm:$0xff] %v1316_v9  ;;  %2552 = vst [vmem:[%s3412_s10 + $0x998] sm:$0xff] %v1989_v10  ;;  %v1320_v17 = vadd.f32 %v1319_v15, %v3403_v6  ;;  %v1993_v18 = vadd.f32 %v1992_v16, %v3405_v7 }
 0x22f   : > { %2553 = vst [vmem:[%s3412_s10 + $0x9a0] sm:$0xff] %v1318_v13  ;;  %2555 = vst [vmem:[%s3412_s10 + $0x9b0] sm:$0xff] %v1991_v14 }
 0x230   : > { %2554 = vst [vmem:[%s3412_s10 + $0x9a8] sm:$0xff] %v1320_v17  ;;  %2556 = vst [vmem:[%s3412_s10 + $0x9b8] sm:$0xff] %v1993_v18 }
 0x232   : > { %v1323_v19 = vpop.f32.mrb[156].mxu0  ;;  %v1996_v20 = vpop.f32.mrb[156].mxu1 }
 0x233   : > { %v1324_v21 = vadd.f32 %v1323_v19, %v3399_v4  ;;  %v1997_v22 = vadd.f32 %v1996_v20, %v3401_v5  ;;  %v1325_v23 = vpop.f32.mrb[157].mxu0  ;;  %v1998_v24 = vpop.f32.mrb[157].mxu1 }
 0x234   : > { %v1326_v25 = vadd.f32 %v1325_v23, %v3403_v6  ;;  %v1999_v26 = vadd.f32 %v1998_v24, %v3405_v7  ;;  %v1327_v27 = vpop.f32.mrb[158].mxu0  ;;  %v2000_v28 = vpop.f32.mrb[158].mxu1 }
 0x235   : > { %2557 = vst [vmem:[%s3412_s10 + $0x9c0] sm:$0xff] %v1324_v21  ;;  %2559 = vst [vmem:[%s3412_s10 + $0x9d0] sm:$0xff] %v1997_v22  ;;  %v1328_v29 = vadd.f32 %v1327_v27, %v3399_v4  ;;  %v2001_v30 = vadd.f32 %v2000_v28, %v3401_v5  ;;  %v1329_v31 = vpop.f32.mrb[159].mxu0  ;;  %v2002_v32 = vpop.f32.mrb[159].mxu1 }
 0x236   : > { %2558 = vst [vmem:[%s3412_s10 + $0x9c8] sm:$0xff] %v1326_v25  ;;  %2560 = vst [vmem:[%s3412_s10 + $0x9d8] sm:$0xff] %v1999_v26  ;;  %v1330_v33 = vadd.f32 %v1329_v31, %v3403_v6  ;;  %v2003_v34 = vadd.f32 %v2002_v32, %v3405_v7 }
 0x237   : > { %2561 = vst [vmem:[%s3412_s10 + $0x9e0] sm:$0xff] %v1328_v29  ;;  %2563 = vst [vmem:[%s3412_s10 + $0x9f0] sm:$0xff] %v2001_v30 }
 0x238   : > { %2562 = vst [vmem:[%s3412_s10 + $0x9e8] sm:$0xff] %v1330_v33  ;;  %2564 = vst [vmem:[%s3412_s10 + $0x9f8] sm:$0xff] %v2003_v34 }
 0x23a   : > { %v1333_v35 = vpop.f32.mrb[160].mxu0  ;;  %v2006_v36 = vpop.f32.mrb[160].mxu1 }
 0x23b   : > { %v1334_v37 = vadd.f32 %v1333_v35, %v3399_v4  ;;  %v2007_v38 = vadd.f32 %v2006_v36, %v3401_v5  ;;  %v1335_v39 = vpop.f32.mrb[161].mxu0  ;;  %v2008_v2 = vpop.f32.mrb[161].mxu1 }
 0x23c   : > { %v1336_v40 = vadd.f32 %v1335_v39, %v3403_v6  ;;  %v2009_v41 = vadd.f32 %v2008_v2, %v3405_v7  ;;  %v1337_v42 = vpop.f32.mrb[162].mxu0  ;;  %v2010_v43 = vpop.f32.mrb[162].mxu1 }
 0x23d   : > { %2565 = vst [vmem:[%s3412_s10 + $0xa00] sm:$0xff] %v1334_v37  ;;  %2567 = vst [vmem:[%s3412_s10 + $0xa10] sm:$0xff] %v2007_v38  ;;  %v1338_v44 = vadd.f32 %v1337_v42, %v3399_v4  ;;  %v2011_v45 = vadd.f32 %v2010_v43, %v3401_v5  ;;  %v1339_v46 = vpop.f32.mrb[163].mxu0  ;;  %v2012_v47 = vpop.f32.mrb[163].mxu1 }
 0x23e   : > { %2566 = vst [vmem:[%s3412_s10 + $0xa08] sm:$0xff] %v1336_v40  ;;  %2568 = vst [vmem:[%s3412_s10 + $0xa18] sm:$0xff] %v2009_v41  ;;  %v1340_v48 = vadd.f32 %v1339_v46, %v3403_v6  ;;  %v2013_v49 = vadd.f32 %v2012_v47, %v3405_v7 }
 0x23f   : > { %2569 = vst [vmem:[%s3412_s10 + $0xa20] sm:$0xff] %v1338_v44  ;;  %2571 = vst [vmem:[%s3412_s10 + $0xa30] sm:$0xff] %v2011_v45 }
 0x240   : > { %2570 = vst [vmem:[%s3412_s10 + $0xa28] sm:$0xff] %v1340_v48  ;;  %2572 = vst [vmem:[%s3412_s10 + $0xa38] sm:$0xff] %v2013_v49 }
 0x242   : > { %v1343_v50 = vpop.f32.mrb[164].mxu0  ;;  %v2016_v51 = vpop.f32.mrb[164].mxu1 }
 0x243   : > { %v1344_v52 = vadd.f32 %v1343_v50, %v3399_v4  ;;  %v2017_v53 = vadd.f32 %v2016_v51, %v3401_v5  ;;  %v1345_v54 = vpop.f32.mrb[165].mxu0  ;;  %v2018_v55 = vpop.f32.mrb[165].mxu1 }
 0x244   : > { %v1346_v56 = vadd.f32 %v1345_v54, %v3403_v6  ;;  %v2019_v57 = vadd.f32 %v2018_v55, %v3405_v7  ;;  %v1347_v58 = vpop.f32.mrb[166].mxu0  ;;  %v2020_v59 = vpop.f32.mrb[166].mxu1 }
 0x245   : > { %2573 = vst [vmem:[%s3412_s10 + $0xa40] sm:$0xff] %v1344_v52  ;;  %2575 = vst [vmem:[%s3412_s10 + $0xa50] sm:$0xff] %v2017_v53  ;;  %v1348_v60 = vadd.f32 %v1347_v58, %v3399_v4  ;;  %v2021_v61 = vadd.f32 %v2020_v59, %v3401_v5  ;;  %v1349_v62 = vpop.f32.mrb[167].mxu0  ;;  %v2022_v63 = vpop.f32.mrb[167].mxu1 }
 0x246   : > { %2574 = vst [vmem:[%s3412_s10 + $0xa48] sm:$0xff] %v1346_v56  ;;  %2576 = vst [vmem:[%s3412_s10 + $0xa58] sm:$0xff] %v2019_v57  ;;  %v1350_v0 = vadd.f32 %v1349_v62, %v3403_v6  ;;  %v2023_v1 = vadd.f32 %v2022_v63, %v3405_v7 }
 0x247   : > { %2577 = vst [vmem:[%s3412_s10 + $0xa60] sm:$0xff] %v1348_v60  ;;  %2579 = vst [vmem:[%s3412_s10 + $0xa70] sm:$0xff] %v2021_v61 }
 0x248   : > { %2578 = vst [vmem:[%s3412_s10 + $0xa68] sm:$0xff] %v1350_v0  ;;  %2580 = vst [vmem:[%s3412_s10 + $0xa78] sm:$0xff] %v2023_v1 }
 0x24a   : > { %v1353_v3 = vpop.f32.mrb[168].mxu0  ;;  %v2026_v8 = vpop.f32.mrb[168].mxu1 }
 0x24b   : > { %v1354_v9 = vadd.f32 %v1353_v3, %v3399_v4  ;;  %v2027_v10 = vadd.f32 %v2026_v8, %v3401_v5  ;;  %v1355_v11 = vpop.f32.mrb[169].mxu0  ;;  %v2028_v12 = vpop.f32.mrb[169].mxu1 }
 0x24c   : > { %v1356_v13 = vadd.f32 %v1355_v11, %v3403_v6  ;;  %v2029_v14 = vadd.f32 %v2028_v12, %v3405_v7  ;;  %v1357_v15 = vpop.f32.mrb[170].mxu0  ;;  %v2030_v16 = vpop.f32.mrb[170].mxu1 }
 0x24d   : > { %2581 = vst [vmem:[%s3412_s10 + $0xa80] sm:$0xff] %v1354_v9  ;;  %2583 = vst [vmem:[%s3412_s10 + $0xa90] sm:$0xff] %v2027_v10  ;;  %v1358_v17 = vadd.f32 %v1357_v15, %v3399_v4  ;;  %v2031_v18 = vadd.f32 %v2030_v16, %v3401_v5  ;;  %v1359_v19 = vpop.f32.mrb[171].mxu0  ;;  %v2032_v20 = vpop.f32.mrb[171].mxu1 }
 0x24e   : > { %2582 = vst [vmem:[%s3412_s10 + $0xa88] sm:$0xff] %v1356_v13  ;;  %2584 = vst [vmem:[%s3412_s10 + $0xa98] sm:$0xff] %v2029_v14  ;;  %v1360_v21 = vadd.f32 %v1359_v19, %v3403_v6  ;;  %v2033_v22 = vadd.f32 %v2032_v20, %v3405_v7 }
 0x24f   : > { %2585 = vst [vmem:[%s3412_s10 + $0xaa0] sm:$0xff] %v1358_v17  ;;  %2587 = vst [vmem:[%s3412_s10 + $0xab0] sm:$0xff] %v2031_v18 }
 0x250   : > { %2586 = vst [vmem:[%s3412_s10 + $0xaa8] sm:$0xff] %v1360_v21  ;;  %2588 = vst [vmem:[%s3412_s10 + $0xab8] sm:$0xff] %v2033_v22 }
 0x252   : > { %v1363_v23 = vpop.f32.mrb[172].mxu0  ;;  %v2036_v24 = vpop.f32.mrb[172].mxu1 }
 0x253   : > { %v1364_v25 = vadd.f32 %v1363_v23, %v3399_v4  ;;  %v2037_v26 = vadd.f32 %v2036_v24, %v3401_v5  ;;  %v1365_v27 = vpop.f32.mrb[173].mxu0  ;;  %v2038_v28 = vpop.f32.mrb[173].mxu1 }
 0x254   : > { %v1366_v29 = vadd.f32 %v1365_v27, %v3403_v6  ;;  %v2039_v30 = vadd.f32 %v2038_v28, %v3405_v7  ;;  %v1367_v31 = vpop.f32.mrb[174].mxu0  ;;  %v2040_v32 = vpop.f32.mrb[174].mxu1 }
 0x255   : > { %2589 = vst [vmem:[%s3412_s10 + $0xac0] sm:$0xff] %v1364_v25  ;;  %2591 = vst [vmem:[%s3412_s10 + $0xad0] sm:$0xff] %v2037_v26  ;;  %v1368_v33 = vadd.f32 %v1367_v31, %v3399_v4  ;;  %v2041_v34 = vadd.f32 %v2040_v32, %v3401_v5  ;;  %v1369_v35 = vpop.f32.mrb[175].mxu0  ;;  %v2042_v36 = vpop.f32.mrb[175].mxu1 }
 0x256   : > { %2590 = vst [vmem:[%s3412_s10 + $0xac8] sm:$0xff] %v1366_v29  ;;  %2592 = vst [vmem:[%s3412_s10 + $0xad8] sm:$0xff] %v2039_v30  ;;  %v1370_v37 = vadd.f32 %v1369_v35, %v3403_v6  ;;  %v2043_v38 = vadd.f32 %v2042_v36, %v3405_v7 }
 0x257   : > { %2593 = vst [vmem:[%s3412_s10 + $0xae0] sm:$0xff] %v1368_v33  ;;  %2595 = vst [vmem:[%s3412_s10 + $0xaf0] sm:$0xff] %v2041_v34 }
 0x258   : > { %2594 = vst [vmem:[%s3412_s10 + $0xae8] sm:$0xff] %v1370_v37  ;;  %2596 = vst [vmem:[%s3412_s10 + $0xaf8] sm:$0xff] %v2043_v38 }
 0x25a   : > { %v1373_v39 = vpop.f32.mrb[176].mxu0  ;;  %v2046_v2 = vpop.f32.mrb[176].mxu1 }
 0x25b   : > { %v1374_v40 = vadd.f32 %v1373_v39, %v3399_v4  ;;  %v2047_v41 = vadd.f32 %v2046_v2, %v3401_v5  ;;  %v1375_v42 = vpop.f32.mrb[177].mxu0  ;;  %v2048_v43 = vpop.f32.mrb[177].mxu1 }
 0x25c   : > { %v1376_v44 = vadd.f32 %v1375_v42, %v3403_v6  ;;  %v2049_v45 = vadd.f32 %v2048_v43, %v3405_v7  ;;  %v1377_v46 = vpop.f32.mrb[178].mxu0  ;;  %v2050_v47 = vpop.f32.mrb[178].mxu1 }
 0x25d   : > { %2597 = vst [vmem:[%s3412_s10 + $0xb00] sm:$0xff] %v1374_v40  ;;  %2599 = vst [vmem:[%s3412_s10 + $0xb10] sm:$0xff] %v2047_v41  ;;  %v1378_v48 = vadd.f32 %v1377_v46, %v3399_v4  ;;  %v2051_v49 = vadd.f32 %v2050_v47, %v3401_v5  ;;  %v1379_v50 = vpop.f32.mrb[179].mxu0  ;;  %v2052_v51 = vpop.f32.mrb[179].mxu1 }
 0x25e   : > { %2598 = vst [vmem:[%s3412_s10 + $0xb08] sm:$0xff] %v1376_v44  ;;  %2600 = vst [vmem:[%s3412_s10 + $0xb18] sm:$0xff] %v2049_v45  ;;  %v1380_v52 = vadd.f32 %v1379_v50, %v3403_v6  ;;  %v2053_v53 = vadd.f32 %v2052_v51, %v3405_v7 }
 0x25f   : > { %2601 = vst [vmem:[%s3412_s10 + $0xb20] sm:$0xff] %v1378_v48  ;;  %2603 = vst [vmem:[%s3412_s10 + $0xb30] sm:$0xff] %v2051_v49 }
 0x260   : > { %2602 = vst [vmem:[%s3412_s10 + $0xb28] sm:$0xff] %v1380_v52  ;;  %2604 = vst [vmem:[%s3412_s10 + $0xb38] sm:$0xff] %v2053_v53 }
 0x262   : > { %v1383_v54 = vpop.f32.mrb[180].mxu0  ;;  %v2056_v55 = vpop.f32.mrb[180].mxu1 }
 0x263   : > { %v1384_v56 = vadd.f32 %v1383_v54, %v3399_v4  ;;  %v2057_v57 = vadd.f32 %v2056_v55, %v3401_v5  ;;  %v1385_v58 = vpop.f32.mrb[181].mxu0  ;;  %v2058_v59 = vpop.f32.mrb[181].mxu1 }
 0x264   : > { %v1386_v60 = vadd.f32 %v1385_v58, %v3403_v6  ;;  %v2059_v61 = vadd.f32 %v2058_v59, %v3405_v7  ;;  %v1387_v62 = vpop.f32.mrb[182].mxu0  ;;  %v2060_v63 = vpop.f32.mrb[182].mxu1 }
 0x265   : > { %2605 = vst [vmem:[%s3412_s10 + $0xb40] sm:$0xff] %v1384_v56  ;;  %2607 = vst [vmem:[%s3412_s10 + $0xb50] sm:$0xff] %v2057_v57  ;;  %v1388_v0 = vadd.f32 %v1387_v62, %v3399_v4  ;;  %v2061_v1 = vadd.f32 %v2060_v63, %v3401_v5  ;;  %v1389_v3 = vpop.f32.mrb[183].mxu0  ;;  %v2062_v8 = vpop.f32.mrb[183].mxu1 }
 0x266   : > { %2606 = vst [vmem:[%s3412_s10 + $0xb48] sm:$0xff] %v1386_v60  ;;  %2608 = vst [vmem:[%s3412_s10 + $0xb58] sm:$0xff] %v2059_v61  ;;  %v1390_v9 = vadd.f32 %v1389_v3, %v3403_v6  ;;  %v2063_v10 = vadd.f32 %v2062_v8, %v3405_v7 }
 0x267   : > { %2609 = vst [vmem:[%s3412_s10 + $0xb60] sm:$0xff] %v1388_v0  ;;  %2611 = vst [vmem:[%s3412_s10 + $0xb70] sm:$0xff] %v2061_v1 }
 0x268   : > { %2610 = vst [vmem:[%s3412_s10 + $0xb68] sm:$0xff] %v1390_v9  ;;  %2612 = vst [vmem:[%s3412_s10 + $0xb78] sm:$0xff] %v2063_v10 }
 0x26a   : > { %v1393_v11 = vpop.f32.mrb[184].mxu0  ;;  %v2066_v12 = vpop.f32.mrb[184].mxu1 }
 0x26b   : > { %v1394_v13 = vadd.f32 %v1393_v11, %v3399_v4  ;;  %v2067_v14 = vadd.f32 %v2066_v12, %v3401_v5  ;;  %v1395_v15 = vpop.f32.mrb[185].mxu0  ;;  %v2068_v16 = vpop.f32.mrb[185].mxu1 }
 0x26c   : > { %v1396_v17 = vadd.f32 %v1395_v15, %v3403_v6  ;;  %v2069_v18 = vadd.f32 %v2068_v16, %v3405_v7  ;;  %v1397_v19 = vpop.f32.mrb[186].mxu0  ;;  %v2070_v20 = vpop.f32.mrb[186].mxu1 }
 0x26d   : > { %2613 = vst [vmem:[%s3412_s10 + $0xb80] sm:$0xff] %v1394_v13  ;;  %2615 = vst [vmem:[%s3412_s10 + $0xb90] sm:$0xff] %v2067_v14  ;;  %v1398_v21 = vadd.f32 %v1397_v19, %v3399_v4  ;;  %v2071_v22 = vadd.f32 %v2070_v20, %v3401_v5  ;;  %v1399_v23 = vpop.f32.mrb[187].mxu0  ;;  %v2072_v24 = vpop.f32.mrb[187].mxu1 }
 0x26e   : > { %2614 = vst [vmem:[%s3412_s10 + $0xb88] sm:$0xff] %v1396_v17  ;;  %2616 = vst [vmem:[%s3412_s10 + $0xb98] sm:$0xff] %v2069_v18  ;;  %v1400_v25 = vadd.f32 %v1399_v23, %v3403_v6  ;;  %v2073_v26 = vadd.f32 %v2072_v24, %v3405_v7 }
 0x26f   : > { %2617 = vst [vmem:[%s3412_s10 + $0xba0] sm:$0xff] %v1398_v21  ;;  %2619 = vst [vmem:[%s3412_s10 + $0xbb0] sm:$0xff] %v2071_v22 }
 0x270   : > { %2618 = vst [vmem:[%s3412_s10 + $0xba8] sm:$0xff] %v1400_v25  ;;  %2620 = vst [vmem:[%s3412_s10 + $0xbb8] sm:$0xff] %v2073_v26 }
 0x272   : > { %v1403_v27 = vpop.f32.mrb[188].mxu0  ;;  %v2076_v28 = vpop.f32.mrb[188].mxu1 }
 0x273   : > { %v1404_v29 = vadd.f32 %v1403_v27, %v3399_v4  ;;  %v2077_v30 = vadd.f32 %v2076_v28, %v3401_v5  ;;  %v1405_v31 = vpop.f32.mrb[189].mxu0  ;;  %v2078_v32 = vpop.f32.mrb[189].mxu1 }
 0x274   : > { %v1406_v33 = vadd.f32 %v1405_v31, %v3403_v6  ;;  %v2079_v34 = vadd.f32 %v2078_v32, %v3405_v7  ;;  %v1407_v35 = vpop.f32.mrb[190].mxu0  ;;  %v2080_v36 = vpop.f32.mrb[190].mxu1 }
 0x275   : > { %2621 = vst [vmem:[%s3412_s10 + $0xbc0] sm:$0xff] %v1404_v29  ;;  %2623 = vst [vmem:[%s3412_s10 + $0xbd0] sm:$0xff] %v2077_v30  ;;  %v1408_v37 = vadd.f32 %v1407_v35, %v3399_v4  ;;  %v2081_v38 = vadd.f32 %v2080_v36, %v3401_v5  ;;  %v1409_v39 = vpop.f32.mrb[191].mxu0  ;;  %v2082_v2 = vpop.f32.mrb[191].mxu1 }
 0x276   : > { %2622 = vst [vmem:[%s3412_s10 + $0xbc8] sm:$0xff] %v1406_v33  ;;  %2624 = vst [vmem:[%s3412_s10 + $0xbd8] sm:$0xff] %v2079_v34  ;;  %v1410_v40 = vadd.f32 %v1409_v39, %v3403_v6  ;;  %v2083_v41 = vadd.f32 %v2082_v2, %v3405_v7 }
 0x277   : > { %2625 = vst [vmem:[%s3412_s10 + $0xbe0] sm:$0xff] %v1408_v37  ;;  %2627 = vst [vmem:[%s3412_s10 + $0xbf0] sm:$0xff] %v2081_v38 }
 0x278   : > { %2626 = vst [vmem:[%s3412_s10 + $0xbe8] sm:$0xff] %v1410_v40  ;;  %2628 = vst [vmem:[%s3412_s10 + $0xbf8] sm:$0xff] %v2083_v41 }
 0x27a   : > { %v1413_v42 = vpop.f32.mrb[192].mxu0  ;;  %v2086_v43 = vpop.f32.mrb[192].mxu1 }
 0x27b   : > { %v1414_v44 = vadd.f32 %v1413_v42, %v3399_v4  ;;  %v2087_v45 = vadd.f32 %v2086_v43, %v3401_v5  ;;  %v1415_v46 = vpop.f32.mrb[193].mxu0  ;;  %v2088_v47 = vpop.f32.mrb[193].mxu1 }
 0x27c   : > { %v1416_v48 = vadd.f32 %v1415_v46, %v3403_v6  ;;  %v2089_v49 = vadd.f32 %v2088_v47, %v3405_v7  ;;  %v1417_v50 = vpop.f32.mrb[194].mxu0  ;;  %v2090_v51 = vpop.f32.mrb[194].mxu1 }
 0x27d   : > { %2629 = vst [vmem:[%s3412_s10 + $0xc00] sm:$0xff] %v1414_v44  ;;  %2631 = vst [vmem:[%s3412_s10 + $0xc10] sm:$0xff] %v2087_v45  ;;  %v1418_v52 = vadd.f32 %v1417_v50, %v3399_v4  ;;  %v2091_v53 = vadd.f32 %v2090_v51, %v3401_v5  ;;  %v1419_v54 = vpop.f32.mrb[195].mxu0  ;;  %v2092_v55 = vpop.f32.mrb[195].mxu1 }
 0x27e   : > { %2630 = vst [vmem:[%s3412_s10 + $0xc08] sm:$0xff] %v1416_v48  ;;  %2632 = vst [vmem:[%s3412_s10 + $0xc18] sm:$0xff] %v2089_v49  ;;  %v1420_v56 = vadd.f32 %v1419_v54, %v3403_v6  ;;  %v2093_v57 = vadd.f32 %v2092_v55, %v3405_v7 }
 0x27f   : > { %2633 = vst [vmem:[%s3412_s10 + $0xc20] sm:$0xff] %v1418_v52  ;;  %2635 = vst [vmem:[%s3412_s10 + $0xc30] sm:$0xff] %v2091_v53 }
 0x280   : > { %2634 = vst [vmem:[%s3412_s10 + $0xc28] sm:$0xff] %v1420_v56  ;;  %2636 = vst [vmem:[%s3412_s10 + $0xc38] sm:$0xff] %v2093_v57 }
 0x282   : > { %v1423_v58 = vpop.f32.mrb[196].mxu0  ;;  %v2096_v59 = vpop.f32.mrb[196].mxu1 }
 0x283   : > { %v1424_v60 = vadd.f32 %v1423_v58, %v3399_v4  ;;  %v2097_v61 = vadd.f32 %v2096_v59, %v3401_v5  ;;  %v1425_v62 = vpop.f32.mrb[197].mxu0  ;;  %v2098_v63 = vpop.f32.mrb[197].mxu1 }
 0x284   : > { %v1426_v0 = vadd.f32 %v1425_v62, %v3403_v6  ;;  %v2099_v1 = vadd.f32 %v2098_v63, %v3405_v7  ;;  %v1427_v3 = vpop.f32.mrb[198].mxu0  ;;  %v2100_v8 = vpop.f32.mrb[198].mxu1 }
 0x285   : > { %2637 = vst [vmem:[%s3412_s10 + $0xc40] sm:$0xff] %v1424_v60  ;;  %2639 = vst [vmem:[%s3412_s10 + $0xc50] sm:$0xff] %v2097_v61  ;;  %v1428_v9 = vadd.f32 %v1427_v3, %v3399_v4  ;;  %v2101_v10 = vadd.f32 %v2100_v8, %v3401_v5  ;;  %v1429_v11 = vpop.f32.mrb[199].mxu0  ;;  %v2102_v12 = vpop.f32.mrb[199].mxu1 }
 0x286   : > { %2638 = vst [vmem:[%s3412_s10 + $0xc48] sm:$0xff] %v1426_v0  ;;  %2640 = vst [vmem:[%s3412_s10 + $0xc58] sm:$0xff] %v2099_v1  ;;  %v1430_v13 = vadd.f32 %v1429_v11, %v3403_v6  ;;  %v2103_v14 = vadd.f32 %v2102_v12, %v3405_v7 }
 0x287   : > { %2641 = vst [vmem:[%s3412_s10 + $0xc60] sm:$0xff] %v1428_v9  ;;  %2643 = vst [vmem:[%s3412_s10 + $0xc70] sm:$0xff] %v2101_v10 }
 0x288   : > { %2642 = vst [vmem:[%s3412_s10 + $0xc68] sm:$0xff] %v1430_v13  ;;  %2644 = vst [vmem:[%s3412_s10 + $0xc78] sm:$0xff] %v2103_v14 }
 0x28a   : > { %v1433_v15 = vpop.f32.mrb[200].mxu0  ;;  %v2106_v16 = vpop.f32.mrb[200].mxu1 }
 0x28b   : > { %v1434_v17 = vadd.f32 %v1433_v15, %v3399_v4  ;;  %v2107_v18 = vadd.f32 %v2106_v16, %v3401_v5  ;;  %v1435_v19 = vpop.f32.mrb[201].mxu0  ;;  %v2108_v20 = vpop.f32.mrb[201].mxu1 }
 0x28c   : > { %v1436_v21 = vadd.f32 %v1435_v19, %v3403_v6  ;;  %v2109_v22 = vadd.f32 %v2108_v20, %v3405_v7  ;;  %v1437_v23 = vpop.f32.mrb[202].mxu0  ;;  %v2110_v24 = vpop.f32.mrb[202].mxu1 }
 0x28d   : > { %2645 = vst [vmem:[%s3412_s10 + $0xc80] sm:$0xff] %v1434_v17  ;;  %2647 = vst [vmem:[%s3412_s10 + $0xc90] sm:$0xff] %v2107_v18  ;;  %v1438_v25 = vadd.f32 %v1437_v23, %v3399_v4  ;;  %v2111_v26 = vadd.f32 %v2110_v24, %v3401_v5  ;;  %v1439_v27 = vpop.f32.mrb[203].mxu0  ;;  %v2112_v28 = vpop.f32.mrb[203].mxu1 }
 0x28e   : > { %2646 = vst [vmem:[%s3412_s10 + $0xc88] sm:$0xff] %v1436_v21  ;;  %2648 = vst [vmem:[%s3412_s10 + $0xc98] sm:$0xff] %v2109_v22  ;;  %v1440_v29 = vadd.f32 %v1439_v27, %v3403_v6  ;;  %v2113_v30 = vadd.f32 %v2112_v28, %v3405_v7 }
 0x28f   : > { %2649 = vst [vmem:[%s3412_s10 + $0xca0] sm:$0xff] %v1438_v25  ;;  %2651 = vst [vmem:[%s3412_s10 + $0xcb0] sm:$0xff] %v2111_v26 }
 0x290   : > { %2650 = vst [vmem:[%s3412_s10 + $0xca8] sm:$0xff] %v1440_v29  ;;  %2652 = vst [vmem:[%s3412_s10 + $0xcb8] sm:$0xff] %v2113_v30 }
 0x292   : > { %v1443_v31 = vpop.f32.mrb[204].mxu0  ;;  %v2116_v32 = vpop.f32.mrb[204].mxu1 }
 0x293   : > { %v1444_v33 = vadd.f32 %v1443_v31, %v3399_v4  ;;  %v2117_v34 = vadd.f32 %v2116_v32, %v3401_v5  ;;  %v1445_v35 = vpop.f32.mrb[205].mxu0  ;;  %v2118_v36 = vpop.f32.mrb[205].mxu1 }
 0x294   : > { %v1446_v37 = vadd.f32 %v1445_v35, %v3403_v6  ;;  %v2119_v38 = vadd.f32 %v2118_v36, %v3405_v7  ;;  %v1447_v39 = vpop.f32.mrb[206].mxu0  ;;  %v2120_v2 = vpop.f32.mrb[206].mxu1 }
 0x295   : > { %2653 = vst [vmem:[%s3412_s10 + $0xcc0] sm:$0xff] %v1444_v33  ;;  %2655 = vst [vmem:[%s3412_s10 + $0xcd0] sm:$0xff] %v2117_v34  ;;  %v1448_v40 = vadd.f32 %v1447_v39, %v3399_v4  ;;  %v2121_v41 = vadd.f32 %v2120_v2, %v3401_v5  ;;  %v1449_v42 = vpop.f32.mrb[207].mxu0  ;;  %v2122_v43 = vpop.f32.mrb[207].mxu1 }
 0x296   : > { %2654 = vst [vmem:[%s3412_s10 + $0xcc8] sm:$0xff] %v1446_v37  ;;  %2656 = vst [vmem:[%s3412_s10 + $0xcd8] sm:$0xff] %v2119_v38  ;;  %v1450_v44 = vadd.f32 %v1449_v42, %v3403_v6  ;;  %v2123_v45 = vadd.f32 %v2122_v43, %v3405_v7 }
 0x297   : > { %2657 = vst [vmem:[%s3412_s10 + $0xce0] sm:$0xff] %v1448_v40  ;;  %2659 = vst [vmem:[%s3412_s10 + $0xcf0] sm:$0xff] %v2121_v41 }
 0x298   : > { %2658 = vst [vmem:[%s3412_s10 + $0xce8] sm:$0xff] %v1450_v44  ;;  %2660 = vst [vmem:[%s3412_s10 + $0xcf8] sm:$0xff] %v2123_v45 }
 0x29a   : > { %v1453_v46 = vpop.f32.mrb[208].mxu0  ;;  %v2126_v47 = vpop.f32.mrb[208].mxu1 }
 0x29b   : > { %v1454_v48 = vadd.f32 %v1453_v46, %v3399_v4  ;;  %v2127_v49 = vadd.f32 %v2126_v47, %v3401_v5  ;;  %v1455_v50 = vpop.f32.mrb[209].mxu0  ;;  %v2128_v51 = vpop.f32.mrb[209].mxu1 }
 0x29c   : > { %v1456_v52 = vadd.f32 %v1455_v50, %v3403_v6  ;;  %v2129_v53 = vadd.f32 %v2128_v51, %v3405_v7  ;;  %v1457_v54 = vpop.f32.mrb[210].mxu0  ;;  %v2130_v55 = vpop.f32.mrb[210].mxu1 }
 0x29d   : > { %2661 = vst [vmem:[%s3412_s10 + $0xd00] sm:$0xff] %v1454_v48  ;;  %2663 = vst [vmem:[%s3412_s10 + $0xd10] sm:$0xff] %v2127_v49  ;;  %v1458_v56 = vadd.f32 %v1457_v54, %v3399_v4  ;;  %v2131_v57 = vadd.f32 %v2130_v55, %v3401_v5  ;;  %v1459_v58 = vpop.f32.mrb[211].mxu0  ;;  %v2132_v59 = vpop.f32.mrb[211].mxu1 }
 0x29e   : > { %2662 = vst [vmem:[%s3412_s10 + $0xd08] sm:$0xff] %v1456_v52  ;;  %2664 = vst [vmem:[%s3412_s10 + $0xd18] sm:$0xff] %v2129_v53  ;;  %v1460_v60 = vadd.f32 %v1459_v58, %v3403_v6  ;;  %v2133_v61 = vadd.f32 %v2132_v59, %v3405_v7 }
 0x29f   : > { %2665 = vst [vmem:[%s3412_s10 + $0xd20] sm:$0xff] %v1458_v56  ;;  %2667 = vst [vmem:[%s3412_s10 + $0xd30] sm:$0xff] %v2131_v57 }
 0x2a0   : > { %2666 = vst [vmem:[%s3412_s10 + $0xd28] sm:$0xff] %v1460_v60  ;;  %2668 = vst [vmem:[%s3412_s10 + $0xd38] sm:$0xff] %v2133_v61 }
 0x2a2   : > { %v1463_v62 = vpop.f32.mrb[212].mxu0  ;;  %v2136_v63 = vpop.f32.mrb[212].mxu1 }
 0x2a3   : > { %v1464_v0 = vadd.f32 %v1463_v62, %v3399_v4  ;;  %v2137_v1 = vadd.f32 %v2136_v63, %v3401_v5  ;;  %v1465_v3 = vpop.f32.mrb[213].mxu0  ;;  %v2138_v8 = vpop.f32.mrb[213].mxu1 }
 0x2a4   : > { %v1466_v9 = vadd.f32 %v1465_v3, %v3403_v6  ;;  %v2139_v10 = vadd.f32 %v2138_v8, %v3405_v7  ;;  %v1467_v11 = vpop.f32.mrb[214].mxu0  ;;  %v2140_v12 = vpop.f32.mrb[214].mxu1 }
 0x2a5   : > { %2669 = vst [vmem:[%s3412_s10 + $0xd40] sm:$0xff] %v1464_v0  ;;  %2671 = vst [vmem:[%s3412_s10 + $0xd50] sm:$0xff] %v2137_v1  ;;  %v1468_v13 = vadd.f32 %v1467_v11, %v3399_v4  ;;  %v2141_v14 = vadd.f32 %v2140_v12, %v3401_v5  ;;  %v1469_v15 = vpop.f32.mrb[215].mxu0  ;;  %v2142_v16 = vpop.f32.mrb[215].mxu1 }
 0x2a6   : > { %2670 = vst [vmem:[%s3412_s10 + $0xd48] sm:$0xff] %v1466_v9  ;;  %2672 = vst [vmem:[%s3412_s10 + $0xd58] sm:$0xff] %v2139_v10  ;;  %v1470_v17 = vadd.f32 %v1469_v15, %v3403_v6  ;;  %v2143_v18 = vadd.f32 %v2142_v16, %v3405_v7 }
 0x2a7   : > { %2673 = vst [vmem:[%s3412_s10 + $0xd60] sm:$0xff] %v1468_v13  ;;  %2675 = vst [vmem:[%s3412_s10 + $0xd70] sm:$0xff] %v2141_v14 }
 0x2a8   : > { %2674 = vst [vmem:[%s3412_s10 + $0xd68] sm:$0xff] %v1470_v17  ;;  %2676 = vst [vmem:[%s3412_s10 + $0xd78] sm:$0xff] %v2143_v18 }
 0x2aa   : > { %v1473_v19 = vpop.f32.mrb[216].mxu0  ;;  %v2146_v20 = vpop.f32.mrb[216].mxu1 }
 0x2ab   : > { %v1474_v21 = vadd.f32 %v1473_v19, %v3399_v4  ;;  %v2147_v22 = vadd.f32 %v2146_v20, %v3401_v5  ;;  %v1475_v23 = vpop.f32.mrb[217].mxu0  ;;  %v2148_v24 = vpop.f32.mrb[217].mxu1 }
 0x2ac   : > { %v1476_v25 = vadd.f32 %v1475_v23, %v3403_v6  ;;  %v2149_v26 = vadd.f32 %v2148_v24, %v3405_v7  ;;  %v1477_v27 = vpop.f32.mrb[218].mxu0  ;;  %v2150_v28 = vpop.f32.mrb[218].mxu1 }
 0x2ad   : > { %2677 = vst [vmem:[%s3412_s10 + $0xd80] sm:$0xff] %v1474_v21  ;;  %2679 = vst [vmem:[%s3412_s10 + $0xd90] sm:$0xff] %v2147_v22  ;;  %v1478_v29 = vadd.f32 %v1477_v27, %v3399_v4  ;;  %v2151_v30 = vadd.f32 %v2150_v28, %v3401_v5  ;;  %v1479_v31 = vpop.f32.mrb[219].mxu0  ;;  %v2152_v32 = vpop.f32.mrb[219].mxu1 }
 0x2ae   : > { %2678 = vst [vmem:[%s3412_s10 + $0xd88] sm:$0xff] %v1476_v25  ;;  %2680 = vst [vmem:[%s3412_s10 + $0xd98] sm:$0xff] %v2149_v26  ;;  %v1480_v33 = vadd.f32 %v1479_v31, %v3403_v6  ;;  %v2153_v34 = vadd.f32 %v2152_v32, %v3405_v7 }
 0x2af   : > { %2681 = vst [vmem:[%s3412_s10 + $0xda0] sm:$0xff] %v1478_v29  ;;  %2683 = vst [vmem:[%s3412_s10 + $0xdb0] sm:$0xff] %v2151_v30 }
 0x2b0   : > { %2682 = vst [vmem:[%s3412_s10 + $0xda8] sm:$0xff] %v1480_v33  ;;  %2684 = vst [vmem:[%s3412_s10 + $0xdb8] sm:$0xff] %v2153_v34 }
 0x2b2   : > { %v1483_v35 = vpop.f32.mrb[220].mxu0  ;;  %v2156_v36 = vpop.f32.mrb[220].mxu1 }
 0x2b3   : > { %v1484_v37 = vadd.f32 %v1483_v35, %v3399_v4  ;;  %v2157_v38 = vadd.f32 %v2156_v36, %v3401_v5  ;;  %v1485_v39 = vpop.f32.mrb[221].mxu0  ;;  %v2158_v2 = vpop.f32.mrb[221].mxu1 }
 0x2b4   : > { %v1486_v40 = vadd.f32 %v1485_v39, %v3403_v6  ;;  %v2159_v41 = vadd.f32 %v2158_v2, %v3405_v7  ;;  %v1487_v42 = vpop.f32.mrb[222].mxu0  ;;  %v2160_v43 = vpop.f32.mrb[222].mxu1 }
 0x2b5   : > { %2685 = vst [vmem:[%s3412_s10 + $0xdc0] sm:$0xff] %v1484_v37  ;;  %2687 = vst [vmem:[%s3412_s10 + $0xdd0] sm:$0xff] %v2157_v38  ;;  %v1488_v44 = vadd.f32 %v1487_v42, %v3399_v4  ;;  %v2161_v45 = vadd.f32 %v2160_v43, %v3401_v5  ;;  %v1489_v46 = vpop.f32.mrb[223].mxu0  ;;  %v2162_v47 = vpop.f32.mrb[223].mxu1 }
 0x2b6   : > { %2686 = vst [vmem:[%s3412_s10 + $0xdc8] sm:$0xff] %v1486_v40  ;;  %2688 = vst [vmem:[%s3412_s10 + $0xdd8] sm:$0xff] %v2159_v41  ;;  %v1490_v48 = vadd.f32 %v1489_v46, %v3403_v6  ;;  %v2163_v49 = vadd.f32 %v2162_v47, %v3405_v7 }
 0x2b7   : > { %2689 = vst [vmem:[%s3412_s10 + $0xde0] sm:$0xff] %v1488_v44  ;;  %2691 = vst [vmem:[%s3412_s10 + $0xdf0] sm:$0xff] %v2161_v45 }
 0x2b8   : > { %2690 = vst [vmem:[%s3412_s10 + $0xde8] sm:$0xff] %v1490_v48  ;;  %2692 = vst [vmem:[%s3412_s10 + $0xdf8] sm:$0xff] %v2163_v49 }
 0x2ba   : > { %v1493_v50 = vpop.f32.mrb[224].mxu0  ;;  %v2166_v51 = vpop.f32.mrb[224].mxu1 }
 0x2bb   : > { %v1494_v52 = vadd.f32 %v1493_v50, %v3399_v4  ;;  %v2167_v53 = vadd.f32 %v2166_v51, %v3401_v5  ;;  %v1495_v54 = vpop.f32.mrb[225].mxu0  ;;  %v2168_v55 = vpop.f32.mrb[225].mxu1 }
 0x2bc   : > { %v1496_v56 = vadd.f32 %v1495_v54, %v3403_v6  ;;  %v2169_v57 = vadd.f32 %v2168_v55, %v3405_v7  ;;  %v1497_v58 = vpop.f32.mrb[226].mxu0  ;;  %v2170_v59 = vpop.f32.mrb[226].mxu1 }
 0x2bd   : > { %2693 = vst [vmem:[%s3412_s10 + $0xe00] sm:$0xff] %v1494_v52  ;;  %2695 = vst [vmem:[%s3412_s10 + $0xe10] sm:$0xff] %v2167_v53  ;;  %v1498_v60 = vadd.f32 %v1497_v58, %v3399_v4  ;;  %v2171_v61 = vadd.f32 %v2170_v59, %v3401_v5  ;;  %v1499_v62 = vpop.f32.mrb[227].mxu0  ;;  %v2172_v63 = vpop.f32.mrb[227].mxu1 }
 0x2be   : > { %2694 = vst [vmem:[%s3412_s10 + $0xe08] sm:$0xff] %v1496_v56  ;;  %2696 = vst [vmem:[%s3412_s10 + $0xe18] sm:$0xff] %v2169_v57  ;;  %v1500_v0 = vadd.f32 %v1499_v62, %v3403_v6  ;;  %v2173_v1 = vadd.f32 %v2172_v63, %v3405_v7 }
 0x2bf   : > { %2697 = vst [vmem:[%s3412_s10 + $0xe20] sm:$0xff] %v1498_v60  ;;  %2699 = vst [vmem:[%s3412_s10 + $0xe30] sm:$0xff] %v2171_v61 }
 0x2c0   : > { %2698 = vst [vmem:[%s3412_s10 + $0xe28] sm:$0xff] %v1500_v0  ;;  %2700 = vst [vmem:[%s3412_s10 + $0xe38] sm:$0xff] %v2173_v1 }
 0x2c2   : > { %v1503_v3 = vpop.f32.mrb[228].mxu0  ;;  %v2176_v8 = vpop.f32.mrb[228].mxu1 }
 0x2c3   : > { %v1504_v9 = vadd.f32 %v1503_v3, %v3399_v4  ;;  %v2177_v10 = vadd.f32 %v2176_v8, %v3401_v5  ;;  %v1505_v11 = vpop.f32.mrb[229].mxu0  ;;  %v2178_v12 = vpop.f32.mrb[229].mxu1 }
 0x2c4   : > { %v1506_v13 = vadd.f32 %v1505_v11, %v3403_v6  ;;  %v2179_v14 = vadd.f32 %v2178_v12, %v3405_v7  ;;  %v1507_v15 = vpop.f32.mrb[230].mxu0  ;;  %v2180_v16 = vpop.f32.mrb[230].mxu1 }
 0x2c5   : > { %2701 = vst [vmem:[%s3412_s10 + $0xe40] sm:$0xff] %v1504_v9  ;;  %2703 = vst [vmem:[%s3412_s10 + $0xe50] sm:$0xff] %v2177_v10  ;;  %v1508_v17 = vadd.f32 %v1507_v15, %v3399_v4  ;;  %v2181_v18 = vadd.f32 %v2180_v16, %v3401_v5  ;;  %v1509_v19 = vpop.f32.mrb[231].mxu0  ;;  %v2182_v20 = vpop.f32.mrb[231].mxu1 }
 0x2c6   : > { %2702 = vst [vmem:[%s3412_s10 + $0xe48] sm:$0xff] %v1506_v13  ;;  %2704 = vst [vmem:[%s3412_s10 + $0xe58] sm:$0xff] %v2179_v14  ;;  %v1510_v21 = vadd.f32 %v1509_v19, %v3403_v6  ;;  %v2183_v22 = vadd.f32 %v2182_v20, %v3405_v7 }
 0x2c7   : > { %2705 = vst [vmem:[%s3412_s10 + $0xe60] sm:$0xff] %v1508_v17  ;;  %2707 = vst [vmem:[%s3412_s10 + $0xe70] sm:$0xff] %v2181_v18 }
 0x2c8   : > { %2706 = vst [vmem:[%s3412_s10 + $0xe68] sm:$0xff] %v1510_v21  ;;  %2708 = vst [vmem:[%s3412_s10 + $0xe78] sm:$0xff] %v2183_v22 }
 0x2ca   : > { %v1513_v23 = vpop.f32.mrb[232].mxu0  ;;  %v2186_v24 = vpop.f32.mrb[232].mxu1 }
 0x2cb   : > { %v1514_v25 = vadd.f32 %v1513_v23, %v3399_v4  ;;  %v2187_v26 = vadd.f32 %v2186_v24, %v3401_v5  ;;  %v1515_v27 = vpop.f32.mrb[233].mxu0  ;;  %v2188_v28 = vpop.f32.mrb[233].mxu1 }
 0x2cc   : > { %v1516_v29 = vadd.f32 %v1515_v27, %v3403_v6  ;;  %v2189_v30 = vadd.f32 %v2188_v28, %v3405_v7  ;;  %v1517_v31 = vpop.f32.mrb[234].mxu0  ;;  %v2190_v32 = vpop.f32.mrb[234].mxu1 }
 0x2cd   : > { %2709 = vst [vmem:[%s3412_s10 + $0xe80] sm:$0xff] %v1514_v25  ;;  %2711 = vst [vmem:[%s3412_s10 + $0xe90] sm:$0xff] %v2187_v26  ;;  %v1518_v33 = vadd.f32 %v1517_v31, %v3399_v4  ;;  %v2191_v34 = vadd.f32 %v2190_v32, %v3401_v5  ;;  %v1519_v35 = vpop.f32.mrb[235].mxu0  ;;  %v2192_v36 = vpop.f32.mrb[235].mxu1 }
 0x2ce   : > { %2710 = vst [vmem:[%s3412_s10 + $0xe88] sm:$0xff] %v1516_v29  ;;  %2712 = vst [vmem:[%s3412_s10 + $0xe98] sm:$0xff] %v2189_v30  ;;  %v1520_v37 = vadd.f32 %v1519_v35, %v3403_v6  ;;  %v2193_v38 = vadd.f32 %v2192_v36, %v3405_v7 }
 0x2cf   : > { %2713 = vst [vmem:[%s3412_s10 + $0xea0] sm:$0xff] %v1518_v33  ;;  %2715 = vst [vmem:[%s3412_s10 + $0xeb0] sm:$0xff] %v2191_v34 }
 0x2d0   : > { %2714 = vst [vmem:[%s3412_s10 + $0xea8] sm:$0xff] %v1520_v37  ;;  %2716 = vst [vmem:[%s3412_s10 + $0xeb8] sm:$0xff] %v2193_v38 }
 0x2d2   : > { %v1523_v39 = vpop.f32.mrb[236].mxu0  ;;  %v2196_v2 = vpop.f32.mrb[236].mxu1 }
 0x2d3   : > { %v1524_v40 = vadd.f32 %v1523_v39, %v3399_v4  ;;  %v2197_v41 = vadd.f32 %v2196_v2, %v3401_v5  ;;  %v1525_v42 = vpop.f32.mrb[237].mxu0  ;;  %v2198_v43 = vpop.f32.mrb[237].mxu1 }
 0x2d4   : > { %v1526_v44 = vadd.f32 %v1525_v42, %v3403_v6  ;;  %v2199_v45 = vadd.f32 %v2198_v43, %v3405_v7  ;;  %v1527_v46 = vpop.f32.mrb[238].mxu0  ;;  %v2200_v47 = vpop.f32.mrb[238].mxu1 }
 0x2d5   : > { %2717 = vst [vmem:[%s3412_s10 + $0xec0] sm:$0xff] %v1524_v40  ;;  %2719 = vst [vmem:[%s3412_s10 + $0xed0] sm:$0xff] %v2197_v41  ;;  %v1528_v48 = vadd.f32 %v1527_v46, %v3399_v4  ;;  %v2201_v49 = vadd.f32 %v2200_v47, %v3401_v5  ;;  %v1529_v50 = vpop.f32.mrb[239].mxu0  ;;  %v2202_v51 = vpop.f32.mrb[239].mxu1 }
 0x2d6   : > { %2718 = vst [vmem:[%s3412_s10 + $0xec8] sm:$0xff] %v1526_v44  ;;  %2720 = vst [vmem:[%s3412_s10 + $0xed8] sm:$0xff] %v2199_v45  ;;  %v1530_v52 = vadd.f32 %v1529_v50, %v3403_v6  ;;  %v2203_v53 = vadd.f32 %v2202_v51, %v3405_v7 }
 0x2d7   : > { %2721 = vst [vmem:[%s3412_s10 + $0xee0] sm:$0xff] %v1528_v48  ;;  %2723 = vst [vmem:[%s3412_s10 + $0xef0] sm:$0xff] %v2201_v49 }
 0x2d8   : > { %2722 = vst [vmem:[%s3412_s10 + $0xee8] sm:$0xff] %v1530_v52  ;;  %2724 = vst [vmem:[%s3412_s10 + $0xef8] sm:$0xff] %v2203_v53 }
 0x2da   : > { %v1533_v54 = vpop.f32.mrb[240].mxu0  ;;  %v2206_v55 = vpop.f32.mrb[240].mxu1 }
 0x2db   : > { %v1534_v56 = vadd.f32 %v1533_v54, %v3399_v4  ;;  %v2207_v57 = vadd.f32 %v2206_v55, %v3401_v5  ;;  %v1535_v58 = vpop.f32.mrb[241].mxu0  ;;  %v2208_v59 = vpop.f32.mrb[241].mxu1 }
 0x2dc   : > { %v1536_v60 = vadd.f32 %v1535_v58, %v3403_v6  ;;  %v2209_v61 = vadd.f32 %v2208_v59, %v3405_v7  ;;  %v1537_v62 = vpop.f32.mrb[242].mxu0  ;;  %v2210_v63 = vpop.f32.mrb[242].mxu1 }
 0x2dd   : > { %2725 = vst [vmem:[%s3412_s10 + $0xf00] sm:$0xff] %v1534_v56  ;;  %2727 = vst [vmem:[%s3412_s10 + $0xf10] sm:$0xff] %v2207_v57  ;;  %v1538_v0 = vadd.f32 %v1537_v62, %v3399_v4  ;;  %v2211_v1 = vadd.f32 %v2210_v63, %v3401_v5  ;;  %v1539_v3 = vpop.f32.mrb[243].mxu0  ;;  %v2212_v8 = vpop.f32.mrb[243].mxu1 }
 0x2de   : > { %2726 = vst [vmem:[%s3412_s10 + $0xf08] sm:$0xff] %v1536_v60  ;;  %2728 = vst [vmem:[%s3412_s10 + $0xf18] sm:$0xff] %v2209_v61  ;;  %v1540_v9 = vadd.f32 %v1539_v3, %v3403_v6  ;;  %v2213_v10 = vadd.f32 %v2212_v8, %v3405_v7 }
 0x2df   : > { %2729 = vst [vmem:[%s3412_s10 + $0xf20] sm:$0xff] %v1538_v0  ;;  %2731 = vst [vmem:[%s3412_s10 + $0xf30] sm:$0xff] %v2211_v1 }
 0x2e0   : > { %2730 = vst [vmem:[%s3412_s10 + $0xf28] sm:$0xff] %v1540_v9  ;;  %2732 = vst [vmem:[%s3412_s10 + $0xf38] sm:$0xff] %v2213_v10 }
 0x2e2   : > { %v1543_v11 = vpop.f32.mrb[244].mxu0  ;;  %v2216_v12 = vpop.f32.mrb[244].mxu1 }
 0x2e3   : > { %v1544_v13 = vadd.f32 %v1543_v11, %v3399_v4  ;;  %v2217_v14 = vadd.f32 %v2216_v12, %v3401_v5  ;;  %v1545_v15 = vpop.f32.mrb[245].mxu0  ;;  %v2218_v16 = vpop.f32.mrb[245].mxu1 }
 0x2e4   : > { %v1546_v17 = vadd.f32 %v1545_v15, %v3403_v6  ;;  %v2219_v18 = vadd.f32 %v2218_v16, %v3405_v7  ;;  %v1547_v19 = vpop.f32.mrb[246].mxu0  ;;  %v2220_v20 = vpop.f32.mrb[246].mxu1 }
 0x2e5   : > { %2733 = vst [vmem:[%s3412_s10 + $0xf40] sm:$0xff] %v1544_v13  ;;  %2735 = vst [vmem:[%s3412_s10 + $0xf50] sm:$0xff] %v2217_v14  ;;  %v1548_v21 = vadd.f32 %v1547_v19, %v3399_v4  ;;  %v2221_v22 = vadd.f32 %v2220_v20, %v3401_v5  ;;  %v1549_v23 = vpop.f32.mrb[247].mxu0  ;;  %v2222_v24 = vpop.f32.mrb[247].mxu1 }
 0x2e6   : > { %2734 = vst [vmem:[%s3412_s10 + $0xf48] sm:$0xff] %v1546_v17  ;;  %2736 = vst [vmem:[%s3412_s10 + $0xf58] sm:$0xff] %v2219_v18  ;;  %v1550_v25 = vadd.f32 %v1549_v23, %v3403_v6  ;;  %v2223_v26 = vadd.f32 %v2222_v24, %v3405_v7 }
 0x2e7   : > { %2737 = vst [vmem:[%s3412_s10 + $0xf60] sm:$0xff] %v1548_v21  ;;  %2739 = vst [vmem:[%s3412_s10 + $0xf70] sm:$0xff] %v2221_v22 }
 0x2e8   : > { %2738 = vst [vmem:[%s3412_s10 + $0xf68] sm:$0xff] %v1550_v25  ;;  %2740 = vst [vmem:[%s3412_s10 + $0xf78] sm:$0xff] %v2223_v26 }
 0x2ea   : > { %v1553_v27 = vpop.f32.mrb[248].mxu0  ;;  %v2226_v28 = vpop.f32.mrb[248].mxu1 }
 0x2eb   : > { %v1554_v29 = vadd.f32 %v1553_v27, %v3399_v4  ;;  %v2227_v30 = vadd.f32 %v2226_v28, %v3401_v5  ;;  %v1555_v31 = vpop.f32.mrb[249].mxu0  ;;  %v2228_v32 = vpop.f32.mrb[249].mxu1 }
 0x2ec   : > { %v1556_v33 = vadd.f32 %v1555_v31, %v3403_v6  ;;  %v2229_v34 = vadd.f32 %v2228_v32, %v3405_v7  ;;  %v1557_v35 = vpop.f32.mrb[250].mxu0  ;;  %v2230_v36 = vpop.f32.mrb[250].mxu1 }
 0x2ed   : > { %2741 = vst [vmem:[%s3412_s10 + $0xf80] sm:$0xff] %v1554_v29  ;;  %2743 = vst [vmem:[%s3412_s10 + $0xf90] sm:$0xff] %v2227_v30  ;;  %v1558_v37 = vadd.f32 %v1557_v35, %v3399_v4  ;;  %v2231_v38 = vadd.f32 %v2230_v36, %v3401_v5  ;;  %v1559_v39 = vpop.f32.mrb[251].mxu0  ;;  %v2232_v2 = vpop.f32.mrb[251].mxu1 }
 0x2ee   : > { %2742 = vst [vmem:[%s3412_s10 + $0xf88] sm:$0xff] %v1556_v33  ;;  %2744 = vst [vmem:[%s3412_s10 + $0xf98] sm:$0xff] %v2229_v34  ;;  %v1560_v40 = vadd.f32 %v1559_v39, %v3403_v6  ;;  %v2233_v41 = vadd.f32 %v2232_v2, %v3405_v7 }
 0x2ef   : > { %2745 = vst [vmem:[%s3412_s10 + $0xfa0] sm:$0xff] %v1558_v37  ;;  %2747 = vst [vmem:[%s3412_s10 + $0xfb0] sm:$0xff] %v2231_v38 }
 0x2f0   : > { %2746 = vst [vmem:[%s3412_s10 + $0xfa8] sm:$0xff] %v1560_v40  ;;  %2748 = vst [vmem:[%s3412_s10 + $0xfb8] sm:$0xff] %v2233_v41 }
 0x2f2   : > { %v1563_v42 = vpop.f32.mrb[252].mxu0  ;;  %v2236_v43 = vpop.f32.mrb[252].mxu1 }
 0x2f3   : > { %v1564_v44 = vadd.f32 %v1563_v42, %v3399_v4  ;;  %v2237_v45 = vadd.f32 %v2236_v43, %v3401_v5  ;;  %v1565_v46 = vpop.f32.mrb[253].mxu0  ;;  %v2238_v47 = vpop.f32.mrb[253].mxu1 }
 0x2f4   : > { %v1566_v48 = vadd.f32 %v1565_v46, %v3403_v6  ;;  %v2239_v49 = vadd.f32 %v2238_v47, %v3405_v7  ;;  %v1567_v50 = vpop.f32.mrb[254].mxu0  ;;  %v2240_v51 = vpop.f32.mrb[254].mxu1 }
 0x2f5   : > { %2749 = vst [vmem:[%s3412_s10 + $0xfc0] sm:$0xff] %v1564_v44  ;;  %2751 = vst [vmem:[%s3412_s10 + $0xfd0] sm:$0xff] %v2237_v45  ;;  %v1568_v52 = vadd.f32 %v1567_v50, %v3399_v4  ;;  %v2241_v53 = vadd.f32 %v2240_v51, %v3401_v5  ;;  %v1569_v54 = vpop.f32.mrb[255].mxu0  ;;  %v2242_v55 = vpop.f32.mrb[255].mxu1 }
 0x2f6   : > { %2750 = vst [vmem:[%s3412_s10 + $0xfc8] sm:$0xff] %v1566_v48  ;;  %2752 = vst [vmem:[%s3412_s10 + $0xfd8] sm:$0xff] %v2239_v49  ;;  %v1570_v56 = vadd.f32 %v1569_v54, %v3403_v6  ;;  %v2243_v57 = vadd.f32 %v2242_v55, %v3405_v7 }
 0x2f7   : > { %2753 = vst [vmem:[%s3412_s10 + $0xfe0] sm:$0xff] %v1568_v52  ;;  %2755 = vst [vmem:[%s3412_s10 + $0xff0] sm:$0xff] %v2241_v53 }
 0x2f8   : > { %2754 = vst [vmem:[%s3412_s10 + $0xfe8] sm:$0xff] %v1570_v56  ;;  %2756 = vst [vmem:[%s3412_s10 + $0xff8] sm:$0xff] %v2243_v57 }
 0x2f9 PF: > { %s13_s12 = sadd.s32 1, %s3175_s12  }
 0x2fa   : > { %p10_p4 = scmp.ge.s32.totalorder %s13_s12, 4  }
 0x2fc   :  { %12 = sbr.rel (!%p10_p4) target bundleno = 1 (0x1), region = 63 }

// kernel: lstm_encoder_forward.3
= control target key start
LH: loop header
LB: loop body
LE: loop exit
PB: predicated region body
PF: predicated region fallthrough
CT: control target
= control target key end

     0   :  { %7 = vsyncpa [#allocation5], 0  ;;  %s14585_s0 = inlined_call_operand.vmem [shape: f32[2,8,128,512], index: 0, kind: input, shape index: {}]   ;;  %s14586_s1 = inlined_call_operand.vmem [shape: bf16[128,512], index: 1, kind: input, shape index: {}]   ;;  %s14587_s2 = inlined_call_operand.hbm [shape: f32[2,128,128], index: 2, kind: output, shape index: {}]  }
   0x1   :  { %9 = vsyncpa [#allocation5 + $0x1], 0  ;;  %s12008_s9 = smov 0   ;;  %s12010_s10 = smov 0  }
   0x2   :  { %s12012_s11 = smov 0   ;;  %s12014_s12 = smov 0  }
   0x3   :  { %s12016_s13 = smov 0   ;;  %s12018_s14 = smov 0  }
   0x4 LB: > { %s8362_s15 = sadd.s32 4294967295, %s11986_s14   ;;  %s8363_s16 = sadd.s32 4294967294, %s11986_s14   ;;  %s11986_s14 = sphi %s12018_s14, %s15_s14   ;;  %s11982_s13 = sphi %s12016_s13, %s14594_s13   ;;  %s11978_s12 = sphi %s12014_s12, %s14593_s12   ;;  %s11974_s11 = sphi %s12012_s11, %s14592_s11   ;;  %s11970_s10 = sphi %s12010_s10, %s14591_s10   ;;  %s11966_s9 = sphi %s12008_s9, %s14590_s9  }
   0x5   : > { %s27_s17 = sadd.s32 1, %s11982_s13  ;;  %s85_s18 = sadd.s32 1, %s11974_s11 }
   0x6   : > { %p29_p0 = scmp.ge.s32.totalorder %s27_s17, 2  ;;  %p95_p1 = scmp.ne.s32.totalorder %s11974_s11, %s11970_s10 }
   0x7   : > { %p96_p2 = scmp.eq.s32.totalorder %s8362_s15, 1  ;;  %p101_p3 = scmp.ne.s32.totalorder %s11970_s10, %s11966_s9 }
   0x8   : > { %s14596_s17 = smov (%p29_p0, %s27_s17), 0  ;;  %p102_p5 = scmp.eq.s32.totalorder %s8363_s16, 1 }
   0x9   : > { %p12048_p4 = por %p96_p2, %p95_p1  ;;  %s80_s20 = ssub.s32 %s11982_s13, %s14596_s17 }
   0xa   : > { %p8366_p6 = scmp.ge.s32.totalorder %s11986_s14, 1  ;;  %p83_p7 = scmp.eq.s32.totalorder %s80_s20, 0 }
   0xb   : > { %p12055_p8 = por %p102_p5, %p101_p3  ;;  %p137_p9 = scmp.lt.s32.totalorder %s11986_s14, 3 }
   0xc   : > { %s12061_s22 = scalar_select %p83_p7, %s11974_s11, %s85_s18  }
   0xd   : > { %p138_p10 = pnand %p8366_p6, %p137_p9 }
   0xe   : > { %v12066_v0 = vld [vmem:[%s14586_s1 + $0x4] ss:$16 sps:$4 sm:$0xff] (!%p138_p10)   ;;  %v12071_v1 = vld [vmem:[%s14586_s1] ss:$16 sps:$4 sm:$0xff] (!%p138_p10)   ;;  %v11988_v2 = vmov (!%p138_p10), 0   ;;  %v11989_v33 = vmov (!%p138_p10), 0.0|0.0  }
   0xf   : > { %141 = sbr.rel (%p138_p10) target bundleno = 2495 (0x9bf), region = 28  ;;  %537 = vmatprep.mubr.bf16.mxu0 (!%p138_p10), %v11988_v2  ;;  %650 = vmatprep.mubr.bf16.mxu1 (!%p138_p10), %v11988_v2  ;;  %v12079_v3 = vld [vmem:[%s14586_s1 + $0x24] ss:$16 sps:$4 sm:$0xff] (!%p138_p10)   ;;  %v12085_v4 = vld [vmem:[%s14586_s1 + $0x20] ss:$16 sps:$4 sm:$0xff] (!%p138_p10)   ;;  %p165_p11 = scmp.lt.s32.totalorder (!%p138_p10), %s11978_s12, 1 }
  0x10   : > { %505 = vmatprep.subr.bf16.mxu0 (!%p138_p10), %v12066_v0  ;;  %v12091_v5 = vld [vmem:[%s14586_s1 + $0x44] ss:$16 sps:$4 sm:$0xff] (!%p138_p10)   ;;  %v9535_v6 = vld [vmem:[%s14586_s1 + $0xc] ss:$16 sps:$4 sm:$0xff] (!%p138_p10)   ;;  %v12099_v7 = vld [vmem:[%s14586_s1 + $0x8] ss:$16 sps:$4 sm:$0xff] (!%p138_p10)  }
  0x11   : > { %506 = vmatpush1.bf16.msra.mxu0 (!%p138_p10), %v12071_v1  ;;  %v12105_v8 = vld [vmem:[%s14586_s1 + $0x40] ss:$16 sps:$4 sm:$0xff] (!%p138_p10)   ;;  %618 = vmatprep.subr.bf16.mxu1 (!%p138_p10), %v9535_v6  ;;  %v12111_v9 = vld [vmem:[%s14586_s1 + $0x64] ss:$16 sps:$4 sm:$0xff] (!%p138_p10)   ;;  %v9541_v10 = vld [vmem:[%s14586_s1 + $0x2c] ss:$16 sps:$4 sm:$0xff] (!%p138_p10)  }
  0x12   : > { %507 = vmatprep.subr.bf16.mxu0 (!%p138_p10), %v12079_v3  ;;  %619 = vmatpush1.bf16.msra.mxu1 (!%p138_p10), %v12099_v7  ;;  %v12120_v11 = vld [vmem:[%s14586_s1 + $0x28] ss:$16 sps:$4 sm:$0xff] (!%p138_p10)   ;;  %v12126_v12 = vld [vmem:[%s14586_s1 + $0x60] ss:$16 sps:$4 sm:$0xff] (!%p138_p10)   ;;  %v12131_v13 = vld [vmem:[%s14586_s1 + $0x84] ss:$16 sps:$4 sm:$0xff] (!%p138_p10)  }
  0x13   : > { %620 = vmatprep.subr.bf16.mxu1 (!%p138_p10), %v9541_v10  ;;  %v9547_v14 = vld [vmem:[%s14586_s1 + $0x4c] ss:$16 sps:$4 sm:$0xff] (!%p138_p10)   ;;  %v9550_v15 = vld [vmem:[%s14586_s1 + $0x48] ss:$16 sps:$4 sm:$0xff] (!%p138_p10)   ;;  %v9543_v17 = vld [vmem:[%s14586_s1 + $0x80] ss:$16 sps:$4 sm:$0xff] (!%p138_p10)  }
  0x14   : > { %v9553_v16 = vld [vmem:[%s14586_s1 + $0x6c] ss:$16 sps:$4 sm:$0xff] (!%p138_p10)   ;;  %v9545_v18 = vld [vmem:[%s14586_s1 + $0xa4] ss:$16 sps:$4 sm:$0xff] (!%p138_p10)   ;;  %v9556_v19 = vld [vmem:[%s14586_s1 + $0x68] ss:$16 sps:$4 sm:$0xff] (!%p138_p10)  }
  0x15   : > { %508 = vmatpush1.bf16.msra.mxu0 (!%p138_p10), %v12085_v4  ;;  %v9559_v20 = vld [vmem:[%s14586_s1 + $0x8c] ss:$16 sps:$4 sm:$0xff] (!%p138_p10)   ;;  %v9549_v21 = vld [vmem:[%s14586_s1 + $0xa0] ss:$16 sps:$4 sm:$0xff] (!%p138_p10)   ;;  %v9551_v22 = vld [vmem:[%s14586_s1 + $0xc4] ss:$16 sps:$4 sm:$0xff] (!%p138_p10)  }
  0x16   : > { %509 = vmatprep.subr.bf16.mxu0 %v12091_v5  ;;  %621 = vmatpush1.bf16.msra.mxu1 %v12120_v11  ;;  %v9562_v23 = vld [vmem:[%s14586_s1 + $0x88] ss:$16 sps:$4 sm:$0xff]   ;;  %v9555_v24 = vld [vmem:[%s14586_s1 + $0xc0] ss:$16 sps:$4 sm:$0xff]   ;;  %v9563_v25 = vld [vmem:[%s14586_s1 + $0xac] ss:$16 sps:$4 sm:$0xff]  }
  0x17   : > { %622 = vmatprep.subr.bf16.mxu1 %v9547_v14  ;;  %v9557_v26 = vld [vmem:[%s14586_s1 + $0xe4] ss:$16 sps:$4 sm:$0xff]   ;;  %v9565_v27 = vld [vmem:[%s14586_s1 + $0xa8] ss:$16 sps:$4 sm:$0xff]   ;;  %v9566_v28 = vld [vmem:[%s14586_s1 + $0xcc] ss:$16 sps:$4 sm:$0xff]  }
  0x18   : > { %v9561_v29 = vld [vmem:[%s14586_s1 + $0xe0] ss:$16 sps:$4 sm:$0xff]   ;;  %v9568_v30 = vld [vmem:[%s14586_s1 + $0xc8] ss:$16 sps:$4 sm:$0xff]   ;;  %v9569_v31 = vld [vmem:[%s14586_s1 + $0xec] ss:$16 sps:$4 sm:$0xff]  }
  0x19   : > { %510 = vmatpush1.bf16.msra.mxu0 %v12105_v8  ;;  %v9571_v32 = vld [vmem:[%s14586_s1 + $0xe8] ss:$16 sps:$4 sm:$0xff]   ;;  %s166_s5 = scalar_select %p165_p11, %s11978_s12, 1 }
  0x1a   : > { %511 = vmatprep.subr.bf16.mxu0 %v12111_v9  ;;  %623 = vmatpush1.bf16.msra.mxu1 %v9550_v15  ;;  %s161_s30 = sand.u32 1, %s11970_s10  }
  0x1b   : > { %624 = vmatprep.subr.bf16.mxu1 %v9553_v16  ;;  %s9463_s6 = sshll.u32 %s166_s5, 12  ;;  %s8367_s3 = sshll.u32 %s161_s30, 7 }
  0x1c   : > { %s12226_s15 = scalar_lea.vmem %s14585_s0, %s9463_s6  ;;  %s14399_s4 = scalar_lea.vmem [#allocation4], %s8367_s3 }
  0x1d   : > { %512 = vmatpush1.bf16.msra.mxu0 %v12126_v12  ;;  %v241_v34 = vld [vmem:[%s12226_s15] sm:$0xff]  ;;  %v242_v35 = vld [vmem:[%s12226_s15 + $0x8] sm:$0xff]  ;;  %v243_v46 = vld [vmem:[%s12226_s15 + $0x10] sm:$0xff]  ;;  %s8280_s5 = sshll.u32 %s14399_s4, 4  ;;  %s14539_s16 = scalar_lea.sflag [#allocation5], %s161_s30  ;;  %s14534_s5 = int_to_ptr.vmem [resolvable:$true] %s8280_s5 }
  0x1e   : > { %513 = vmatprep.subr.bf16.mxu0 %v12131_v13  ;;  %625 = vmatpush1.bf16.msra.mxu1 %v9556_v19  ;;  %v245_v37 = vld [vmem:[%s12226_s15 + $0x20] sm:$0xff]  ;;  %v246_v40 = vld [vmem:[%s12226_s15 + $0x28] sm:$0xff]  ;;  %v244_v49 = vld [vmem:[%s12226_s15 + $0x18] sm:$0xff]  ;;  %s11908_s18 = scalar_lea.vmem %s14534_s5, 2048 }
  0x1f   : > { %626 = vmatprep.subr.bf16.mxu1 %v9559_v20  ;;  %v247_v52 = vld [vmem:[%s12226_s15 + $0x30] sm:$0xff]  ;;  %v249_v54 = vld [vmem:[%s12226_s15 + $0x40] sm:$0xff]  ;;  %v248_v57 = vld [vmem:[%s12226_s15 + $0x38] sm:$0xff]  ;;  %p11909_p12 = scmp.ne.s32.totalorder %s14534_s5, %s11908_s18 }
  0x20   : > { %v250_v58 = vld [vmem:[%s12226_s15 + $0x48] sm:$0xff]  ;;  %v253_v62 = vld [vmem:[%s12226_s15 + $0x60] sm:$0xff] }
  0x21   : > { %514 = vmatpush1.bf16.msra.mxu0 %v9543_v17  ;;  %p11910_p13 = pnand %p11909_p12, %p12048_p4 }
  0x22   : > { %515 = vmatprep.subr.bf16.mxu0 %v9545_v18  ;;  %627 = vmatpush1.bf16.msra.mxu1 %v9562_v23 }
  0x23   : > { %628 = vmatprep.subr.bf16.mxu1 %v9563_v25  ;;  %p11911_p0 = pneg %p11910_p13 }
  0x25   : > { %516 = vmatpush1.bf16.msra.mxu0 %v9549_v21 }
  0x26   : > { %517 = vmatprep.subr.bf16.mxu0 %v9551_v22  ;;  %629 = vmatpush1.bf16.msra.mxu1 %v9565_v27 }
  0x27   : > { %630 = vmatprep.subr.bf16.mxu1 %v9566_v28 }
  0x29   : > { %518 = vmatpush1.bf16.msra.mxu0 %v9555_v24 }
  0x2a   : > { %519 = vmatprep.subr.bf16.mxu0 %v9557_v26  ;;  %631 = vmatpush1.bf16.msra.mxu1 %v9568_v30 }
  0x2b   : > { %632 = vmatprep.subr.bf16.mxu1 %v9569_v31 }
  0x2d   : > { %520 = vmatpush1.bf16.msra.mxu0 %v9561_v29 }
  0x2e   : > { %1508 = vmatprep.subr.bf16.mxu0 %v12066_v0  ;;  %633 = vmatpush1.bf16.msra.mxu1 %v9571_v32 }
  0x2f   : > { %1621 = vmatprep.subr.bf16.mxu1 %v9535_v6 }
  0x30   : > { %538 = vmatmul.mubr.bf16.vlgmr.msra.gmra.mrb[0].mxu0 %v11989_v33 }
  0x31   : > { %547 = vmatprep.mubr.bf16.mxu0 %v11988_v2  ;;  %1509 = vmatpush1.bf16.msra.mxu0 %v12071_v1 }
  0x32   : > { %1510 = vmatprep.subr.bf16.mxu0 %v12079_v3  ;;  %651 = vmatmul.mubr.bf16.vlgmr.msra.gmra.mrb[0].mxu1 %v11989_v33 }
  0x33   : > { %660 = vmatprep.mubr.bf16.mxu1 %v11988_v2  ;;  %1622 = vmatpush1.bf16.msra.mxu1 %v12099_v7 }
  0x34   : > { %1623 = vmatprep.subr.bf16.mxu1 %v9541_v10 }
  0x35   : > { %1511 = vmatpush1.bf16.msra.mxu0 %v12085_v4  ;;  %v254_v4 = vld [vmem:[%s12226_s15 + $0x68] sm:$0xff] }
  0x36   : > { %1512 = vmatprep.subr.bf16.mxu0 %v12091_v5 }
  0x37   : > { %1624 = vmatpush1.bf16.msra.mxu1 %v12120_v11 }
  0x38   : > { %548 = vmatmul.mubr.bf16.gmra.mrb[4].mxu0 %v11989_v33  ;;  %1625 = vmatprep.subr.bf16.mxu1 %v9547_v14 }
  0x39   : > { %557 = vmatprep.mubr.bf16.mxu0 %v11988_v2  ;;  %1513 = vmatpush1.bf16.msra.mxu0 %v12105_v8 }
  0x3a   : > { %1514 = vmatprep.subr.bf16.mxu0 %v12111_v9  ;;  %661 = vmatmul.mubr.bf16.gmra.mrb[4].mxu1 %v11989_v33 }
  0x3b   : > { %670 = vmatprep.mubr.bf16.mxu1 %v11988_v2  ;;  %1626 = vmatpush1.bf16.msra.mxu1 %v9550_v15 }
  0x3c   : > { %1627 = vmatprep.subr.bf16.mxu1 %v9553_v16 }
  0x3d   : > { %1515 = vmatpush1.bf16.msra.mxu0 %v12126_v12 }
  0x3e   : > { %1516 = vmatprep.subr.bf16.mxu0 %v12131_v13 }
  0x3f   : > { %1628 = vmatpush1.bf16.msra.mxu1 %v9556_v19 }
  0x40   : > { %558 = vmatmul.mubr.bf16.gmra.mrb[8].mxu0 %v11989_v33  ;;  %1629 = vmatprep.subr.bf16.mxu1 %v9559_v20 }
  0x41   : > { %567 = vmatprep.mubr.bf16.mxu0 %v11988_v2  ;;  %1517 = vmatpush1.bf16.msra.mxu0 %v9543_v17 }
  0x42   : > { %1518 = vmatprep.subr.bf16.mxu0 %v9545_v18  ;;  %671 = vmatmul.mubr.bf16.gmra.mrb[8].mxu1 %v11989_v33  ;;  %v257_v18 = vld [vmem:[%s12226_s15 + $0x80] sm:$0xff] }
  0x43   : > { %680 = vmatprep.mubr.bf16.mxu1 %v11988_v2  ;;  %1630 = vmatpush1.bf16.msra.mxu1 %v9562_v23 }
  0x44   : > { %1631 = vmatprep.subr.bf16.mxu1 %v9563_v25 }
  0x45   : > { %1519 = vmatpush1.bf16.msra.mxu0 %v9549_v21  ;;  %v258_v21 = vld [vmem:[%s12226_s15 + $0x88] sm:$0xff] }
  0x46   : > { %1520 = vmatprep.subr.bf16.mxu0 %v9551_v22 }
  0x47   : > { %1632 = vmatpush1.bf16.msra.mxu1 %v9565_v27 }
  0x48   : > { %568 = vmatmul.mubr.bf16.gmra.mrb[12].mxu0 %v11989_v33  ;;  %1633 = vmatprep.subr.bf16.mxu1 %v9566_v28 }
  0x49   : > { %577 = vmatprep.mubr.bf16.mxu0 %v11988_v2  ;;  %1521 = vmatpush1.bf16.msra.mxu0 %v9555_v24 }
  0x4a   : > { %1522 = vmatprep.subr.bf16.mxu0 %v9557_v26  ;;  %681 = vmatmul.mubr.bf16.gmra.mrb[12].mxu1 %v11989_v33  ;;  %v261_v26 = vld [vmem:[%s12226_s15 + $0xa0] sm:$0xff] }
  0x4b   : > { %690 = vmatprep.mubr.bf16.mxu1 %v11988_v2  ;;  %1634 = vmatpush1.bf16.msra.mxu1 %v9568_v30 }
  0x4c   : > { %1635 = vmatprep.subr.bf16.mxu1 %v9569_v31 }
  0x4d   : > { %1523 = vmatpush1.bf16.msra.mxu0 %v9561_v29 }
  0x4f   : > { %1636 = vmatpush1.bf16.msra.mxu1 %v9571_v32 }
  0x50   : > { %578 = vmatmul.mubr.bf16.gmra.mrb[16].mxu0 %v11989_v33 }
  0x51   : > { %587 = vmatprep.mubr.bf16.mxu0 %v11988_v2 }
  0x52   : > { %691 = vmatmul.mubr.bf16.gmra.mrb[16].mxu1 %v11989_v33 }
  0x53   : > { %700 = vmatprep.mubr.bf16.mxu1 %v11988_v2 }
  0x58   : > { %588 = vmatmul.mubr.bf16.gmra.mrb[20].mxu0 %v11989_v33 }
  0x59   : > { %597 = vmatprep.mubr.bf16.mxu0 %v11988_v2 }
  0x5a   : > { %701 = vmatmul.mubr.bf16.gmra.mrb[20].mxu1 %v11989_v33 }
  0x5b   : > { %710 = vmatprep.mubr.bf16.mxu1 %v11988_v2 }
  0x60   : > { %598 = vmatmul.mubr.bf16.gmra.mrb[24].mxu0 %v11989_v33 }
  0x61   : > { %607 = vmatprep.mubr.bf16.mxu0 %v11988_v2 }
  0x62   : > { %711 = vmatmul.mubr.bf16.gmra.mrb[24].mxu1 %v11989_v33 }
  0x63   : > { %720 = vmatprep.mubr.bf16.mxu1 %v11988_v2 }
  0x68   : > { %608 = vmatmul.mubr.bf16.gmra.mrb[28].mxu0 %v11989_v33 }
  0x69   : > { %1540 = vmatprep.mubr.bf16.mxu0 %v11988_v2 }
  0x6a   : > { %721 = vmatmul.mubr.bf16.gmra.mrb[28].mxu1 %v11989_v33 }
  0x6b   : > { %1653 = vmatprep.mubr.bf16.mxu1 %v11988_v2 }
 0x103   : > { %v539_v36 = vpop.f32.mrb[0].mxu0 }
 0x104   : > { %v731_v38 = vadd.f32 %v539_v36, %v241_v34  ;;  %v541_v39 = vpop.f32.mrb[1].mxu0 }
 0x105   : > { %v732_v41 = vadd.f32 %v541_v39, %v242_v35  ;;  %v543_v42 = vpop.f32.mrb[2].mxu0  ;;  %v652_v51 = vpop.f32.mrb[0].mxu1 }
 0x106   : > { %v8402_v43 = vmul.f32 -1.442695, %v731_v38  ;;  %v735_v44 = vadd.f32 %v543_v42, %v245_v37  ;;  %v545_v45 = vpop.f32.mrb[3].mxu0  ;;  %v733_v55 = vadd.f32 %v652_v51, %v243_v46  ;;  %v654_v56 = vpop.f32.mrb[1].mxu1  ;;  %v262_v42 = vld [vmem:[%s12226_s15 + $0xa8] sm:$0xff] }
 0x107   : > { %v8418_v47 = vmul.f32 -1.442695, %v732_v41  ;;  %v736_v48 = vadd.f32 %v545_v45, %v246_v40  ;;  %v734_v59 = vadd.f32 %v654_v56, %v244_v49  ;;  %v656_v60 = vpop.f32.mrb[2].mxu1 }
 0x108   : > { %9860 = vpow2.f32 %v8402_v43  ;;  %v8403_v50 = vmul.f32 -1.442695, %v735_v44  ;;  %v737_v63 = vadd.f32 %v656_v60, %v247_v52  ;;  %v658_v0 = vpop.f32.mrb[3].mxu1 }
 0x109   : > { %9862 = vpow2.f32 %v8418_v47  ;;  %v8419_v53 = vmul.f32 -1.442695, %v736_v48  ;;  %v8434_v5 = vmul.f32 -1.442695, %v734_v59  ;;  %v738_v6 = vadd.f32 %v658_v0, %v248_v57  ;;  %v252_v48 = vld [vmem:[%s12226_s15 + $0x58] sm:$0xff]  ;;  %v251_v59 = vld [vmem:[%s12226_s15 + $0x50] sm:$0xff] }
 0x10a   : > { %9864 = vpow2.f32 %v8403_v50 }
 0x10b   : > { %9866 = vpow2.f32 %v8419_v53  ;;  %v549_v61 = vpop.f32.mrb[4].mxu0  ;;  %v8435_v15 = vmul.f32 -1.442695, %v738_v6 }
 0x10c   : > { %v739_v1 = vadd.f32 %v549_v61, %v249_v54  ;;  %v551_v3 = vpop.f32.mrb[5].mxu0  ;;  %9868 = vtanh.f32 %v733_v55 }
 0x10d   : > { %v740_v7 = vadd.f32 %v551_v3, %v250_v58  ;;  %v553_v8 = vpop.f32.mrb[6].mxu0  ;;  %9870 = vpow2.f32 %v8434_v5  ;;  %v12240_v16 = vpop.f32.mrb[4].mxu1 }
 0x10e   : > { %v8404_v9 = vmul.f32 -1.442695, %v739_v1  ;;  %v743_v10 = vadd.f32 %v553_v8, %v253_v62  ;;  %v555_v11 = vpop.f32.mrb[7].mxu0  ;;  %9872 = vtanh.f32 %v737_v63  ;;  %v664_v19 = vpop.f32.mrb[5].mxu1  ;;  %v741_v8 = vadd.f32 %v12240_v16, %v251_v59  ;;  %v9574_v16 = vld [vmem:[%s14586_s1 + $0x4] ss:$16 sps:$4 sm:$0xff]  }
 0x10f   : > { %v8420_v12 = vmul.f32 -1.442695, %v740_v7  ;;  %v744_v13 = vadd.f32 %v555_v11, %v254_v4  ;;  %v12244_v22 = vpop.f32.mrb[6].mxu1  ;;  %v742_v60 = vadd.f32 %v664_v19, %v252_v48  ;;  %2511 = vmatprep.subr.bf16.mxu0 %v9574_v16  ;;  %v263_v16 = vld [vmem:[%s12226_s15 + $0xb0] sm:$0xff] }
 0x110   : > { %9874 = vpow2.f32 %v8404_v9  ;;  %v8405_v14 = vmul.f32 -1.442695, %v743_v10  ;;  %v12247_v27 = vpop.f32.mrb[7].mxu1 }
 0x111   : > { %9876 = vpow2.f32 %v8420_v12  ;;  %v8421_v17 = vmul.f32 -1.442695, %v744_v13  ;;  %v8436_v11 = vmul.f32 -1.442695, %v742_v60  ;;  %v256_v12 = vld [vmem:[%s12226_s15 + $0x78] sm:$0xff] }
 0x112   : > { %v9861_v20 = vpop.eup %9860  ;;  %9878 = vpow2.f32 %v8405_v14 }
 0x113   : > { %v9863_v23 = vpop.eup %9862  ;;  %v843_v24 = vadd.f32 1.0, %v9861_v20  ;;  %9880 = vpow2.f32 %v8421_v17  ;;  %v559_v25 = vpop.f32.mrb[8].mxu0  ;;  %v265_v17 = vld [vmem:[%s12226_s15 + $0xc0] sm:$0xff] }
 0x114   : > { %v9865_v28 = vpop.eup %9864  ;;  %v939_v29 = vadd.f32 1.0, %v9863_v23  ;;  %9882 = vpow2.f32 %v8435_v15  ;;  %v747_v30 = vadd.f32 %v559_v25, %v257_v18  ;;  %v561_v31 = vpop.f32.mrb[9].mxu0 }
 0x115   : > { %v9867_v32 = vpop.eup %9866  ;;  %9884 = vrcp.f32 %v843_v24  ;;  %v844_v33 = vadd.f32 1.0, %v9865_v28  ;;  %v748_v34 = vadd.f32 %v561_v31, %v258_v21  ;;  %v563_v35 = vpop.f32.mrb[10].mxu0  ;;  %v266_v21 = vld [vmem:[%s12226_s15 + $0xc8] sm:$0xff]  ;;  %v255_v28 = vld [vmem:[%s12226_s15 + $0x70] sm:$0xff] }
 0x116   : > { %9886 = vrcp.f32 %v939_v29  ;;  %v940_v36 = vadd.f32 1.0, %v9867_v32  ;;  %v8406_v37 = vmul.f32 -1.442695, %v747_v30  ;;  %v751_v38 = vadd.f32 %v563_v35, %v261_v26  ;;  %v565_v39 = vpop.f32.mrb[11].mxu0  ;;  %v9869_v40 = vpop.eup %9868  ;;  %v269_v30 = vld [vmem:[%s12226_s15 + $0xe0] sm:$0xff] }
 0x117   : > { %9888 = vrcp.f32 %v844_v33  ;;  %v8422_v41 = vmul.f32 -1.442695, %v748_v34  ;;  %v9871_v43 = vpop.eup %9870  ;;  %v12250_v45 = vpop.f32.mrb[8].mxu1  ;;  %v752_v51 = vadd.f32 %v565_v39, %v262_v42  ;;  %v746_v29 = vadd.f32 %v12247_v27, %v256_v12 }
 0x118   : > { %9890 = vrcp.f32 %v940_v36  ;;  %v8407_v44 = vmul.f32 -1.442695, %v751_v38  ;;  %v9873_v46 = vpop.eup %9872  ;;  %v1051_v47 = vadd.f32 1.0, %v9871_v43  ;;  %v12253_v49 = vpop.f32.mrb[9].mxu1  ;;  %v745_v43 = vadd.f32 %v12244_v22, %v255_v28  ;;  %v260_v22 = vld [vmem:[%s12226_s15 + $0x98] sm:$0xff] }
 0x119   : > { %9892 = vpow2.f32 %v8406_v37  ;;  %v12255_v52 = vpop.f32.mrb[10].mxu1  ;;  %v8423_v4 = vmul.f32 -1.442695, %v752_v51 }
 0x11a   : > { %v9875_v50 = vpop.eup %9874  ;;  %9894 = vpow2.f32 %v8422_v41  ;;  %v12257_v56 = vpop.f32.mrb[11].mxu1 }
 0x11b   : > { %v9877_v53 = vpop.eup %9876  ;;  %v845_v54 = vadd.f32 1.0, %v9875_v50  ;;  %9896 = vrcp.f32 %v1051_v47  ;;  %v569_v55 = vpop.f32.mrb[12].mxu0  ;;  %v8437_v50 = vmul.f32 -1.442695, %v746_v29 }
 0x11c   : > { %v9879_v57 = vpop.eup %9878  ;;  %v941_v58 = vadd.f32 1.0, %v9877_v53  ;;  %9898 = vpow2.f32 %v8407_v44  ;;  %v571_v61 = vpop.f32.mrb[13].mxu0  ;;  %v755_v35 = vadd.f32 %v569_v55, %v265_v17 }
 0x11d   : > { %v9881_v62 = vpop.eup %9880  ;;  %9900 = vrcp.f32 %v845_v54  ;;  %v846_v63 = vadd.f32 1.0, %v9879_v57  ;;  %v573_v0 = vpop.f32.mrb[14].mxu0  ;;  %v756_v27 = vadd.f32 %v571_v61, %v266_v21 }
 0x11e   : > { %v9883_v1 = vpop.eup %9882  ;;  %9902 = vrcp.f32 %v941_v58  ;;  %v942_v3 = vadd.f32 1.0, %v9881_v62  ;;  %v575_v5 = vpop.f32.mrb[15].mxu0  ;;  %v759_v44 = vadd.f32 %v573_v0, %v269_v30  ;;  %v8408_v53 = vmul.f32 -1.442695, %v755_v35  ;;  %v264_v0 = vld [vmem:[%s12226_s15 + $0xb8] sm:$0xff] }
 0x11f   : > { %v9885_v6 = vpop.eup %9884  ;;  %9904 = vrcp.f32 %v846_v63  ;;  %v1052_v7 = vadd.f32 1.0, %v9883_v1  ;;  %v12262_v13 = vpop.f32.mrb[12].mxu1  ;;  %v8424_v58 = vmul.f32 -1.442695, %v756_v27 }
 0x120   : > { %v9887_v9 = vpop.eup %9886  ;;  %9906 = vrcp.f32 %v942_v3  ;;  %v1115_v10 = vmul.f32 %v9885_v6, %v9869_v40  ;;  %v12265_v18 = vpop.f32.mrb[13].mxu1  ;;  %v270_v40 = vld [vmem:[%s12226_s15 + $0xe8] sm:$0xff]  ;;  %v8409_v61 = vmul.f32 -1.442695, %v759_v44 }
 0x121   : > { %v9889_v14 = vpop.eup %9888  ;;  %v1099_v15 = vmul.f32 0.0, %v9887_v9  ;;  %9908 = vrcp.f32 %v1052_v7  ;;  %v12271_v23 = vpop.f32.mrb[14].mxu1  ;;  %v760_v54 = vadd.f32 %v575_v5, %v270_v40  ;;  %v259_v7 = vld [vmem:[%s12226_s15 + $0x90] sm:$0xff]  ;;  %v273_v9 = vld [vmem:[%s12226_s15 + $0x100] sm:$0xff] }
 0x122   : > { %v9891_v19 = vpop.eup %9890  ;;  %v1116_v20 = vmul.f32 %v9889_v14, %v9873_v46  ;;  %9910 = vpow2.f32 %v8423_v4  ;;  %v12280_v32 = vpop.f32.mrb[15].mxu1 }
 0x123   : > { %v9893_v24 = vpop.eup %9892  ;;  %v1100_v25 = vmul.f32 0.0, %v9891_v19  ;;  %v12273_v26 = vadd.f32 %v1115_v10, %v1099_v15  ;;  %9912 = vtanh.f32 %v741_v8  ;;  %v12278_v31 = vpop.f32.mrb[16].mxu0  ;;  %v8425_v6 = vmul.f32 -1.442695, %v760_v54  ;;  %v9572_v54 = vld [vmem:[%s14586_s1] ss:$16 sps:$4 sm:$0xff]  }
 0x124   : > { %v9895_v33 = vpop.eup %9894  ;;  %v847_v34 = vadd.f32 1.0, %v9893_v24  ;;  %9914 = vpow2.f32 %v8436_v11  ;;  %v12282_v36 = vpop.f32.mrb[17].mxu0  ;;  %v750_v8 = vadd.f32 %v12253_v49, %v260_v22  ;;  %v754_v19 = vadd.f32 %v12257_v56, %v264_v0 }
 0x125   : > { %v12284_v37 = vpop.eup %9896  ;;  %9916 = vtanh.f32 %v12273_v26  ;;  %v12287_v38 = vadd.f32 %v1116_v20, %v1100_v25  ;;  %v943_v39 = vadd.f32 1.0, %v9895_v33  ;;  %v12290_v41 = vpop.f32.mrb[18].mxu0  ;;  %v749_v49 = vadd.f32 %v12250_v45, %v259_v7 }
 0x126   : > { %v9899_v42 = vpop.eup %9898  ;;  %9918 = vrcp.f32 %v847_v34  ;;  %v12293_v46 = vpop.f32.mrb[19].mxu0  ;;  %v763_v25 = vadd.f32 %v12278_v31, %v273_v9  ;;  %v8438_v30 = vmul.f32 -1.442695, %v750_v8  ;;  %v753_v56 = vadd.f32 %v12255_v52, %v263_v16 }
 0x127   : > { %v9901_v47 = vpop.eup %9900  ;;  %9920 = vtanh.f32 %v12287_v38  ;;  %v848_v48 = vadd.f32 1.0, %v9899_v42  ;;  %v12296_v55 = vpop.f32.mrb[16].mxu1  ;;  %v8439_v45 = vmul.f32 -1.442695, %v754_v19 }
 0x128   : > { %v9903_v51 = vpop.eup %9902  ;;  %9922 = vrcp.f32 %v943_v39  ;;  %v12301_v59 = vpop.f32.mrb[17].mxu1  ;;  %v8410_v44 = vmul.f32 -1.442695, %v763_v25 }
 0x129   : > { %v12298_v57 = vpop.eup %9904  ;;  %9924 = vrcp.f32 %v848_v48  ;;  %v12303_v62 = vpop.f32.mrb[18].mxu1  ;;  %v1101_v5 = vmul.f32 0.0, %v9903_v51  ;;  %v277_v51 = vld [vmem:[%s12226_s15 + $0x120] sm:$0xff] }
 0x12a   : > { %v9907_v60 = vpop.eup %9906  ;;  %9926 = vtanh.f32 %v745_v43  ;;  %v12308_v3 = vpop.f32.mrb[19].mxu1  ;;  %v767_v9 = vadd.f32 %v12290_v41, %v277_v51 }
 0x12b   : > { %v9909_v63 = vpop.eup %9908  ;;  %9928 = vpow2.f32 %v8437_v50  ;;  %v12306_v1 = vpop.f32.mrb[20].mxu0  ;;  %v1102_v43 = vmul.f32 0.0, %v9907_v60  ;;  %v278_v60 = vld [vmem:[%s12226_s15 + $0x128] sm:$0xff] }
 0x12c   : > { %v9911_v4 = vpop.eup %9910  ;;  %9930 = vpow2.f32 %v8408_v53  ;;  %v12313_v10 = vpop.f32.mrb[21].mxu0 }
 0x12d   : > { %v9913_v11 = vpop.eup %9912  ;;  %v944_v12 = vadd.f32 1.0, %v9911_v4  ;;  %9932 = vpow2.f32 %v8424_v58  ;;  %v12315_v14 = vpop.f32.mrb[22].mxu0 }
 0x12e   : > { %v9915_v15 = vpop.eup %9914  ;;  %v1117_v17 = vmul.f32 %v9913_v11, %v9901_v47  ;;  %9934 = vpow2.f32 %v8409_v61  ;;  %v12319_v20 = vpop.f32.mrb[23].mxu0  ;;  %v274_v47 = vld [vmem:[%s12226_s15 + $0x108] sm:$0xff] }
 0x12f   : > { %v9917_v21 = vpop.eup %9916  ;;  %9936 = vrcp.f32 %v944_v12  ;;  %v1053_v24 = vadd.f32 1.0, %v9915_v15  ;;  %v12327_v33 = vpop.f32.mrb[20].mxu1 }
 0x130   : > { %v12323_v28 = vpop.eup %9918  ;;  %v12325_v29 = vadd.f32 %v1117_v17, %v1101_v5  ;;  %9938 = vpow2.f32 %v8425_v6  ;;  %v12330_v35 = vpop.f32.mrb[21].mxu1  ;;  %v1163_v31 = vmul.f32 %v9917_v21, %v12284_v37  ;;  %v764_v5 = vadd.f32 %v12282_v36, %v274_v47  ;;  %v9575_v17 = vld [vmem:[%s14586_s1 + $0x20] ss:$16 sps:$4 sm:$0xff]  }
 0x131   : > { %v9921_v34 = vpop.eup %9920  ;;  %9940 = vrcp.f32 %v1053_v24  ;;  %v12334_v40 = vpop.f32.mrb[22].mxu1  ;;  %v768_v36 = vadd.f32 %v12293_v46, %v278_v60 }
 0x132   : > { %v9923_v39 = vpop.eup %9922  ;;  %9942 = vtanh.f32 %v12325_v29  ;;  %v1164_v27 = vmul.f32 %v9921_v34, %v9909_v63  ;;  %v12341_v48 = vpop.f32.mrb[23].mxu1  ;;  %v9577_v63 = vld [vmem:[%s14586_s1 + $0x24] ss:$16 sps:$4 sm:$0xff]   ;;  %v8426_v24 = vmul.f32 -1.442695, %v764_v5 }
 0x133   : > { %v12336_v42 = vpop.eup %9924  ;;  %9944 = vtanh.f32 %v749_v49  ;;  %v12339_v52 = vpop.f32.mrb[24].mxu0 }
 0x134   : > { %v9927_v50 = vpop.eup %9926  ;;  %9946 = vpow2.f32 %v8438_v30  ;;  %v12344_v53 = vpop.f32.mrb[25].mxu0  ;;  %v1308_v37 = vpack.c.bf16 %v1164_v27, %v1163_v31  ;;  %v8411_v30 = vmul.f32 -1.442695, %v767_v9  ;;  %v1103_v31 = vmul.f32 0.0, %v9923_v39 }
 0x135   : > { %v9929_v58 = vpop.eup %9928  ;;  %v1118_v22 = vmul.f32 %v9927_v50, %v12298_v57  ;;  %9948 = vtanh.f32 %v753_v56  ;;  %v12351_v61 = vpop.f32.mrb[26].mxu0  ;;  %v8427_v27 = vmul.f32 -1.442695, %v768_v36  ;;  %v271_v36 = vld [vmem:[%s12226_s15 + $0xf0] sm:$0xff] }
 0x136   : > { %v9931_v0 = vpop.eup %9930  ;;  %v1054_v4 = vadd.f32 1.0, %v9929_v58  ;;  %9950 = vpow2.f32 %v8439_v45  ;;  %v12357_v6 = vpop.f32.mrb[27].mxu0  ;;  %1541 = vmatmul.mubr.bf16.vlgmr.msra.gmra.mrb[32].mxu0 %v1308_v37  ;;  %1654 = vmatmul.mubr.bf16.vlgmr.msra.gmra.mrb[32].mxu1 %v1308_v37  ;;  %v267_v58 = vld [vmem:[%s12226_s15 + $0xd0] sm:$0xff] }
 0x137   : > { %v9933_v7 = vpop.eup %9932  ;;  %v12359_v8 = vadd.f32 %v1118_v22, %v1102_v43  ;;  %v849_v57 = vadd.f32 1.0, %v9931_v0  ;;  %9952 = vpow2.f32 %v8410_v44  ;;  %1550 = vmatprep.mubr.bf16.mxu0 %v11988_v2  ;;  %1663 = vmatprep.mubr.bf16.mxu1 %v11988_v2  ;;  %v12365_v15 = vpop.f32.mrb[24].mxu1  ;;  %v268_v43 = vld [vmem:[%s12226_s15 + $0xd8] sm:$0xff] }
 0x138   : > { %v9935_v11 = vpop.eup %9934  ;;  %9954 = vrcp.f32 %v1054_v4  ;;  %v945_v12 = vadd.f32 1.0, %v9933_v7  ;;  %2512 = vmatpush1.bf16.msra.mxu0 %v9572_v54  ;;  %v12371_v19 = vpop.f32.mrb[25].mxu1  ;;  %v272_v22 = vld [vmem:[%s12226_s15 + $0xf8] sm:$0xff]  ;;  %v758_v0 = vadd.f32 %v12265_v18, %v268_v43  ;;  %v281_v4 = vld [vmem:[%s12226_s15 + $0x140] sm:$0xff] }
 0x139   : > { %v9937_v16 = vpop.eup %9936  ;;  %9956 = vtanh.f32 %v12359_v8  ;;  %v850_v41 = vadd.f32 1.0, %v9935_v11  ;;  %2513 = vmatprep.subr.bf16.mxu0 %v9577_v63  ;;  %v12373_v49 = vpop.f32.mrb[26].mxu1  ;;  %v285_v43 = vld [vmem:[%s12226_s15 + $0x160] sm:$0xff] }
 0x13a   : > { %v9939_v21 = vpop.eup %9938  ;;  %9958 = vrcp.f32 %v849_v57  ;;  %v12377_v56 = vpop.f32.mrb[27].mxu1  ;;  %v1104_v37 = vmul.f32 0.0, %v9937_v16 }
 0x13b   : > { %v9941_v46 = vpop.eup %9940  ;;  %9960 = vrcp.f32 %v945_v12  ;;  %v946_v25 = vadd.f32 1.0, %v9939_v21  ;;  %v12375_v34 = vpop.f32.mrb[28].mxu0  ;;  %v757_v12 = vadd.f32 %v12262_v13, %v267_v58  ;;  %v771_v21 = vadd.f32 %v12306_v1, %v281_v4 }
 0x13c   : > { %v9943_v45 = vpop.eup %9942  ;;  %9962 = vrcp.f32 %v850_v41  ;;  %v12380_v44 = vpop.f32.mrb[29].mxu0  ;;  %2514 = vmatpush1.bf16.msra.mxu0 %v9575_v17  ;;  %v762_v17 = vadd.f32 %v12280_v32, %v272_v22  ;;  %v8440_v13 = vmul.f32 -1.442695, %v758_v0  ;;  %v775_v4 = vadd.f32 %v12315_v14, %v285_v43 }
 0x13d   : > { %v9945_v47 = vpop.eup %9944  ;;  %9964 = vrcp.f32 %v946_v25  ;;  %v12382_v50 = vpop.f32.mrb[30].mxu0  ;;  %v8412_v22 = vmul.f32 -1.442695, %v771_v21 }
 0x13e   : > { %v9947_v51 = vpop.eup %9946  ;;  %v1119_v54 = vmul.f32 %v9945_v47, %v12323_v28  ;;  %9966 = vpow2.f32 %v8426_v24  ;;  %v12387_v39 = vpop.f32.mrb[31].mxu0  ;;  %v1165_v47 = vmul.f32 %v9943_v45, %v9941_v46  ;;  %v8441_v1 = vmul.f32 -1.442695, %v762_v17 }
 0x13f   : > { %v9949_v60 = vpop.eup %9948  ;;  %v1055_v63 = vadd.f32 1.0, %v9947_v51  ;;  %9968 = vpow2.f32 %v8411_v30  ;;  %v12394_v9 = vpop.f32.mrb[28].mxu1  ;;  %v282_v30 = vld [vmem:[%s12226_s15 + $0x148] sm:$0xff]  ;;  %v8413_v17 = vmul.f32 -1.442695, %v775_v4 }
 0x140   : > { %v9951_v5 = vpop.eup %9950  ;;  %v12391_v7 = vadd.f32 %v1119_v54, %v1103_v31  ;;  %v1120_v57 = vmul.f32 %v9949_v60, %v12336_v42  ;;  %9970 = vpow2.f32 %v8427_v27  ;;  %v12399_v18 = vpop.f32.mrb[29].mxu1  ;;  %v761_v27 = vadd.f32 %v12271_v23, %v271_v36  ;;  %v286_v54 = vld [vmem:[%s12226_s15 + $0x168] sm:$0xff]  ;;  %v276_v23 = vld [vmem:[%s12226_s15 + $0x118] sm:$0xff] }
 0x141   : > { %v9953_v28 = vpop.eup %9952  ;;  %9972 = vrcp.f32 %v1055_v63  ;;  %v1056_v11 = vadd.f32 1.0, %v9951_v5  ;;  %v12405_v24 = vpop.f32.mrb[30].mxu1  ;;  %v772_v60 = vadd.f32 %v12313_v10, %v282_v30  ;;  %v776_v46 = vadd.f32 %v12319_v20, %v286_v54  ;;  %v280_v30 = vld [vmem:[%s12226_s15 + $0x138] sm:$0xff] }
 0x142   : > { %v9955_v16 = vpop.eup %9954  ;;  %9974 = vtanh.f32 %v12391_v7  ;;  %v12402_v41 = vadd.f32 %v1120_v57, %v1104_v37  ;;  %v851_v42 = vadd.f32 1.0, %v9953_v28  ;;  %v12408_v31 = vpop.f32.mrb[31].mxu1 }
 0x143   : > { %v9957_v25 = vpop.eup %9956  ;;  %9976 = vrcp.f32 %v1056_v11  ;;  %v8428_v14 = vmul.f32 -1.442695, %v772_v60  ;;  %v275_v11 = vld [vmem:[%s12226_s15 + $0x110] sm:$0xff]  ;;  %v8429_v21 = vmul.f32 -1.442695, %v776_v46 }
 0x144   : > { %v9959_v32 = vpop.eup %9958  ;;  %9978 = vtanh.f32 %v12402_v41  ;;  %v1166_v51 = vmul.f32 %v9957_v25, %v9955_v16  ;;  %v279_v16 = vld [vmem:[%s12226_s15 + $0x130] sm:$0xff] }
 0x145   : > { %v9961_v37 = vpop.eup %9960  ;;  %9980 = vrcp.f32 %v851_v42 }
 0x146   : > { %v9963_v58 = vpop.eup %9962  ;;  %9982 = vtanh.f32 %v757_v12  ;;  %v1309_v63 = vpack.c.bf16 %v1166_v51, %v1165_v47  ;;  %v766_v12 = vadd.f32 %v12301_v59, %v276_v23  ;;  %v769_v47 = vadd.f32 %v12303_v62, %v279_v16 }
 0x147   : > { %v9965_v0 = vpop.eup %9964  ;;  %9984 = vpow2.f32 %v8440_v13  ;;  %v765_v13 = vadd.f32 %v12296_v55, %v275_v11  ;;  %v1105_v51 = vmul.f32 0.0, %v9961_v37 }
 0x148   : > { %v9967_v5 = vpop.eup %9966  ;;  %9986 = vtanh.f32 %v761_v27  ;;  %1551 = vmatmul.mubr.bf16.gmra.mrb[36].mxu0 %v1309_v63  ;;  %1664 = vmatmul.mubr.bf16.gmra.mrb[36].mxu1 %v1309_v63  ;;  %v8442_v43 = vmul.f32 -1.442695, %v766_v12  ;;  %v770_v63 = vadd.f32 %v12308_v3, %v280_v30  ;;  %v1106_v23 = vmul.f32 0.0, %v9965_v0 }
 0x149   : > { %v9969_v45 = vpop.eup %9968  ;;  %v947_v57 = vadd.f32 1.0, %v9967_v5  ;;  %9988 = vpow2.f32 %v8441_v1  ;;  %1560 = vmatprep.mubr.bf16.mxu0 %v11988_v2  ;;  %1673 = vmatprep.mubr.bf16.mxu1 %v11988_v2  ;;  %v289_v1 = vld [vmem:[%s12226_s15 + $0x180] sm:$0xff] }
 0x14a   : > { %v9971_v10 = vpop.eup %9970  ;;  %v852_v28 = vadd.f32 1.0, %v9969_v45  ;;  %9990 = vpow2.f32 %v8412_v22  ;;  %v779_v62 = vadd.f32 %v12339_v52, %v289_v1 }
 0x14b   : > { %v9973_v36 = vpop.eup %9972  ;;  %9992 = vrcp.f32 %v947_v57  ;;  %v948_v20 = vadd.f32 1.0, %v9971_v10 }
 0x14c   : > { %v9975_v42 = vpop.eup %9974  ;;  %9994 = vrcp.f32 %v852_v28  ;;  %v290_v28 = vld [vmem:[%s12226_s15 + $0x188] sm:$0xff]  ;;  %v8414_v12 = vmul.f32 -1.442695, %v779_v62 }
 0x14d   : > { %v9977_v25 = vpop.eup %9976  ;;  %9996 = vrcp.f32 %v948_v20  ;;  %v1167_v54 = vmul.f32 %v9975_v42, %v9973_v36  ;;  %v780_v36 = vadd.f32 %v12344_v53, %v290_v28  ;;  %v293_v20 = vld [vmem:[%s12226_s15 + $0x1a0] sm:$0xff]  ;;  %v294_v42 = vld [vmem:[%s12226_s15 + $0x1a8] sm:$0xff]  ;;  %v284_v53 = vld [vmem:[%s12226_s15 + $0x158] sm:$0xff] }
 0x14e   : > { %v9979_v27 = vpop.eup %9978  ;;  %9998 = vpow2.f32 %v8428_v14 }
 0x14f   : > { %v9981_v59 = vpop.eup %9980  ;;  %10000 = vpow2.f32 %v8413_v17  ;;  %v1168_v22 = vmul.f32 %v9979_v27, %v9977_v25 }
 0x150   : > { %v9983_v60 = vpop.eup %9982  ;;  %10002 = vpow2.f32 %v8429_v21 }
 0x151   : > { %v9985_v4 = vpop.eup %9984  ;;  %v1121_v55 = vmul.f32 %v9983_v60, %v9959_v32  ;;  %10004 = vtanh.f32 %v765_v13  ;;  %v1310_v5 = vpack.c.bf16 %v1168_v22, %v1167_v54  ;;  %v783_v13 = vadd.f32 %v12351_v61, %v293_v20  ;;  %v301_v20 = vld [vmem:[%s12226_s15 + $0x1e0] sm:$0xff] }
 0x152   : > { %v9987_v46 = vpop.eup %9986  ;;  %v1057_v45 = vadd.f32 1.0, %v9985_v4  ;;  %10006 = vpow2.f32 %v8442_v43  ;;  %v784_v54 = vadd.f32 %v12357_v6, %v294_v42  ;;  %v288_v6 = vld [vmem:[%s12226_s15 + $0x178] sm:$0xff] }
 0x153   : > { %v9989_v37 = vpop.eup %9988  ;;  %v12429_v57 = vadd.f32 %v1121_v55, %v1105_v51  ;;  %v1122_v10 = vmul.f32 %v9987_v46, %v9963_v58  ;;  %10008 = vtanh.f32 %v769_v47  ;;  %1561 = vmatmul.mubr.bf16.gmra.mrb[40].mxu0 %v1310_v5  ;;  %1674 = vmatmul.mubr.bf16.gmra.mrb[40].mxu1 %v1310_v5  ;;  %v8443_v58 = vmul.f32 -1.442695, %v770_v63  ;;  %v283_v55 = vld [vmem:[%s12226_s15 + $0x150] sm:$0xff] }
 0x154   : > { %v9991_v3 = vpop.eup %9990  ;;  %10010 = vrcp.f32 %v1057_v45  ;;  %v1058_v0 = vadd.f32 1.0, %v9989_v37  ;;  %1570 = vmatprep.mubr.bf16.mxu0 %v11988_v2  ;;  %1683 = vmatprep.mubr.bf16.mxu1 %v11988_v2  ;;  %v8430_v47 = vmul.f32 -1.442695, %v780_v36  ;;  %v774_v5 = vadd.f32 %v12330_v35, %v284_v53  ;;  %v287_v35 = vld [vmem:[%s12226_s15 + $0x170] sm:$0xff] }
 0x155   : > { %v9993_v32 = vpop.eup %9992  ;;  %10012 = vtanh.f32 %v12429_v57  ;;  %v12435_v52 = vadd.f32 %v1122_v10, %v1106_v23  ;;  %v853_v14 = vadd.f32 1.0, %v9991_v3  ;;  %v8415_v23 = vmul.f32 -1.442695, %v783_v13 }
 0x156   : > { %v9995_v11 = vpop.eup %9994  ;;  %10014 = vrcp.f32 %v1058_v0  ;;  %v1107_v27 = vmul.f32 0.0, %v9993_v32  ;;  %v8431_v10 = vmul.f32 -1.442695, %v784_v54  ;;  %v773_v0 = vadd.f32 %v12327_v33, %v283_v55 }
 0x157   : > { %v9997_v17 = vpop.eup %9996  ;;  %10016 = vtanh.f32 %v12435_v52  ;;  %v777_v33 = vadd.f32 %v12334_v40, %v287_v35 }
 0x158   : > { %v9999_v16 = vpop.eup %9998  ;;  %10018 = vrcp.f32 %v853_v14  ;;  %v1108_v60 = vmul.f32 0.0, %v9997_v17  ;;  %v8444_v14 = vmul.f32 -1.442695, %v774_v5 }
 0x159   : > { %v10001_v21 = vpop.eup %10000  ;;  %v949_v25 = vadd.f32 1.0, %v9999_v16  ;;  %10020 = vpow2.f32 %v8443_v58  ;;  %v778_v58 = vadd.f32 %v12341_v48, %v288_v6 }
 0x15a   : > { %v10003_v30 = vpop.eup %10002  ;;  %v854_v43 = vadd.f32 1.0, %v10001_v21  ;;  %10022 = vpow2.f32 %v8414_v12 }
 0x15b   : > { %v10005_v51 = vpop.eup %10004  ;;  %10024 = vrcp.f32 %v949_v25  ;;  %v950_v1 = vadd.f32 1.0, %v10003_v30  ;;  %v302_v30 = vld [vmem:[%s12226_s15 + $0x1e8] sm:$0xff] }
 0x15c   : > { %v10007_v22 = vpop.eup %10006  ;;  %10026 = vrcp.f32 %v854_v43  ;;  %v1123_v63 = vmul.f32 %v10005_v51, %v9981_v59  ;;  %v297_v59 = vld [vmem:[%s12226_s15 + $0x1c0] sm:$0xff] }
 0x15d   : > { %v10009_v4 = vpop.eup %10008  ;;  %10028 = vrcp.f32 %v950_v1  ;;  %v1059_v61 = vadd.f32 1.0, %v10007_v22  ;;  %v787_v36 = vadd.f32 %v12375_v34, %v297_v59  ;;  %v791_v34 = vadd.f32 %v12382_v50, %v301_v20 }
 0x15e   : > { %v10011_v46 = vpop.eup %10010  ;;  %v12446_v45 = vadd.f32 %v1123_v63, %v1107_v27  ;;  %v1124_v62 = vmul.f32 %v10009_v4, %v9995_v11  ;;  %10030 = vpow2.f32 %v8430_v47  ;;  %v298_v11 = vld [vmem:[%s12226_s15 + $0x1c8] sm:$0xff]  ;;  %v8445_v47 = vmul.f32 -1.442695, %v778_v58  ;;  %v292_v63 = vld [vmem:[%s12226_s15 + $0x198] sm:$0xff] }
 0x15f   : > { %v10013_v37 = vpop.eup %10012  ;;  %10032 = vrcp.f32 %v1059_v61  ;;  %v788_v13 = vadd.f32 %v12380_v44, %v298_v11  ;;  %v8416_v51 = vmul.f32 -1.442695, %v787_v36  ;;  %v792_v1 = vadd.f32 %v12387_v39, %v302_v30  ;;  %v291_v61 = vld [vmem:[%s12226_s15 + $0x190] sm:$0xff]  ;;  %v296_v36 = vld [vmem:[%s12226_s15 + $0x1b8] sm:$0xff] }
 0x160   : > { %v10015_v28 = vpop.eup %10014  ;;  %10034 = vtanh.f32 %v12446_v45  ;;  %v12451_v3 = vadd.f32 %v1124_v62, %v1108_v60  ;;  %v1169_v17 = vmul.f32 %v10013_v37, %v10011_v46  ;;  %v8417_v60 = vmul.f32 -1.442695, %v791_v34  ;;  %v295_v62 = vld [vmem:[%s12226_s15 + $0x1b0] sm:$0xff] }
 0x161   : > { %v10017_v32 = vpop.eup %10016  ;;  %10036 = vpow2.f32 %v8415_v23  ;;  %v8432_v54 = vmul.f32 -1.442695, %v788_v13  ;;  %v8433_v55 = vmul.f32 -1.442695, %v792_v1  ;;  %v782_v46 = vadd.f32 %v12371_v19, %v292_v63  ;;  %v299_v34 = vld [vmem:[%s12226_s15 + $0x1d0] sm:$0xff] }
 0x162   : > { %v10019_v12 = vpop.eup %10018  ;;  %10038 = vtanh.f32 %v12451_v3  ;;  %v1170_v16 = vmul.f32 %v10017_v32, %v10015_v28  ;;  %v785_v32 = vadd.f32 %v12373_v49, %v295_v62 }
 0x163   : > { %v10021_v42 = vpop.eup %10020  ;;  %10040 = vpow2.f32 %v8431_v10  ;;  %v781_v10 = vadd.f32 %v12365_v15, %v291_v61  ;;  %v8446_v11 = vmul.f32 -1.442695, %v782_v46 }
 0x164   : > { %v10023_v21 = vpop.eup %10022  ;;  %v1060_v25 = vadd.f32 1.0, %v10021_v42  ;;  %10042 = vtanh.f32 %v773_v0  ;;  %v1311_v48 = vpack.c.bf16 %v1170_v16, %v1169_v17 }
 0x165   : > { %v10025_v27 = vpop.eup %10024  ;;  %v855_v43 = vadd.f32 1.0, %v10023_v21  ;;  %10044 = vpow2.f32 %v8444_v14  ;;  %v300_v21 = vld [vmem:[%s12226_s15 + $0x1d8] sm:$0xff] }
 0x166   : > { %v10027_v53 = vpop.eup %10026  ;;  %10046 = vrcp.f32 %v1060_v25  ;;  %1571 = vmatmul.mubr.bf16.gmra.mrb[44].mxu0 %v1311_v48  ;;  %1684 = vmatmul.mubr.bf16.gmra.mrb[44].mxu1 %v1311_v48  ;;  %v1109_v37 = vmul.f32 0.0, %v10025_v27 }
 0x167   : > { %v10029_v40 = vpop.eup %10028  ;;  %10048 = vrcp.f32 %v855_v43  ;;  %1580 = vmatprep.mubr.bf16.mxu0 %v11988_v2  ;;  %1693 = vmatprep.mubr.bf16.mxu1 %v11988_v2 }
 0x168   : > { %v10031_v44 = vpop.eup %10030  ;;  %10050 = vtanh.f32 %v777_v33  ;;  %v1110_v58 = vmul.f32 0.0, %v10029_v40 }
 0x169   : > { %v10033_v50 = vpop.eup %10032  ;;  %v951_v22 = vadd.f32 1.0, %v10031_v44  ;;  %10052 = vpow2.f32 %v8445_v47 }
 0x16a   : > { %v10035_v4 = vpop.eup %10034  ;;  %10054 = vpow2.f32 %v8416_v51 }
 0x16b   : > { %v10037_v23 = vpop.eup %10036  ;;  %10056 = vrcp.f32 %v951_v22  ;;  %v1171_v15 = vmul.f32 %v10035_v4, %v10033_v50  ;;  %v303_v50 = vld [vmem:[%s12226_s15 + $0x1f0] sm:$0xff] }
 0x16c   : > { %v10039_v39 = vpop.eup %10038  ;;  %v856_v5 = vadd.f32 1.0, %v10037_v23  ;;  %10058 = vpow2.f32 %v8432_v54 }
 0x16d   : > { %v10041_v6 = vpop.eup %10040  ;;  %10060 = vpow2.f32 %v8417_v60  ;;  %v789_v60 = vadd.f32 %v12394_v9, %v299_v34 }
 0x16e   : > { %v10043_v59 = vpop.eup %10042  ;;  %10062 = vrcp.f32 %v856_v5  ;;  %v952_v28 = vadd.f32 1.0, %v10041_v6 }
 0x16f   : > { %v10045_v0 = vpop.eup %10044  ;;  %v1125_v35 = vmul.f32 %v10043_v59, %v10019_v12  ;;  %10064 = vpow2.f32 %v8433_v55  ;;  %v786_v12 = vadd.f32 %v12377_v56, %v296_v36  ;;  %v304_v56 = vld [vmem:[%s12226_s15 + $0x1f8] sm:$0xff] }
 0x170   : > { %v10047_v14 = vpop.eup %10046  ;;  %10066 = vrcp.f32 %v952_v28  ;;  %v1061_v19 = vadd.f32 1.0, %v10045_v0 }
 0x171   : > { %v10049_v20 = vpop.eup %10048  ;;  %v12474_v17 = vadd.f32 %v1125_v35, %v1109_v37  ;;  %10068 = vtanh.f32 %v781_v10  ;;  %v1172_v16 = vmul.f32 %v10047_v14, %v10039_v39  ;;  %v8447_v1 = vmul.f32 -1.442695, %v786_v12 }
 0x172   : > { %v10051_v42 = vpop.eup %10050  ;;  %10070 = vrcp.f32 %v1061_v19  ;;  %v793_v39 = vadd.f32 %v12405_v24, %v303_v50 }
 0x173   : > { %v10053_v33 = vpop.eup %10052  ;;  %10072 = vtanh.f32 %v12474_v17  ;;  %v1126_v49 = vmul.f32 %v10051_v42, %v10027_v53  ;;  %v1312_v25 = vpack.c.bf16 %v1172_v16, %v1171_v15  ;;  %v790_v53 = vadd.f32 %v12399_v18, %v300_v21 }
 0x174   : > { %v10055_v13 = vpop.eup %10054  ;;  %v1062_v30 = vadd.f32 1.0, %v10053_v33  ;;  %10074 = vpow2.f32 %v8446_v11  ;;  %v794_v18 = vadd.f32 %v12408_v31, %v304_v56 }
 0x175   : > { %v10057_v48 = vpop.eup %10056  ;;  %v12479_v27 = vadd.f32 %v1126_v49, %v1110_v58  ;;  %v857_v43 = vadd.f32 1.0, %v10055_v13  ;;  %10076 = vtanh.f32 %v785_v32  ;;  %1581 = vmatmul.mubr.bf16.gmra.mrb[48].mxu0 %v1312_v25  ;;  %1694 = vmatmul.mubr.bf16.gmra.mrb[48].mxu1 %v1312_v25  ;;  %v8448_v23 = vmul.f32 -1.442695, %v790_v53 }
 0x176   : > { %v10059_v47 = vpop.eup %10058  ;;  %10078 = vrcp.f32 %v1062_v30  ;;  %1590 = vmatprep.mubr.bf16.mxu0 %v11988_v2  ;;  %1703 = vmatprep.mubr.bf16.mxu1 %v11988_v2  ;;  %v1111_v4 = vmul.f32 0.0, %v10057_v48  ;;  %v8449_v9 = vmul.f32 -1.442695, %v794_v18 }
 0x177   : > { %v10061_v51 = vpop.eup %10060  ;;  %10080 = vtanh.f32 %v12479_v27  ;;  %v953_v40 = vadd.f32 1.0, %v10059_v47 }
 0x178   : > { %v10063_v44 = vpop.eup %10062  ;;  %10082 = vrcp.f32 %v857_v43  ;;  %v858_v54 = vadd.f32 1.0, %v10061_v51 }
 0x179   : > { %v10065_v22 = vpop.eup %10064  ;;  %10084 = vrcp.f32 %v953_v40 }
 0x17a   : > { %v10067_v63 = vpop.eup %10066  ;;  %10086 = vrcp.f32 %v858_v54  ;;  %v954_v61 = vadd.f32 1.0, %v10065_v22 }
 0x17b   : > { %v10069_v55 = vpop.eup %10068  ;;  %10088 = vpow2.f32 %v8447_v1  ;;  %v1112_v37 = vmul.f32 0.0, %v10067_v63 }
 0x17c   : > { %v10071_v5 = vpop.eup %10070  ;;  %10090 = vrcp.f32 %v954_v61  ;;  %v1127_v46 = vmul.f32 %v10069_v55, %v10049_v20  ;;  %v9580_v55 = vld [vmem:[%s14586_s1 + $0xc] ss:$16 sps:$4 sm:$0xff]  }
 0x17d   : > { %v10073_v62 = vpop.eup %10072  ;;  %10092 = vtanh.f32 %v789_v60  ;;  %2624 = vmatprep.subr.bf16.mxu1 %v9580_v55  ;;  %v8457_v55 = vld [vmem:[%s12226_s15 + $0x238] sm:$0xff] }
 0x17e   : > { %v10075_v6 = vpop.eup %10074  ;;  %v12491_v10 = vadd.f32 %v1127_v46, %v1111_v4  ;;  %10094 = vpow2.f32 %v8448_v23  ;;  %v1173_v24 = vmul.f32 %v10073_v62, %v10071_v5  ;;  %v9578_v23 = vld [vmem:[%s14586_s1 + $0x8] ss:$16 sps:$4 sm:$0xff]   ;;  %v9583_v5 = vld [vmem:[%s14586_s1 + $0x44] ss:$16 sps:$4 sm:$0xff]   ;;  %v9586_v62 = vld [vmem:[%s14586_s1 + $0x2c] ss:$16 sps:$4 sm:$0xff]  }
 0x17f   : > { %v10077_v31 = vpop.eup %10076  ;;  %10096 = vtanh.f32 %v793_v39  ;;  %v1063_v35 = vadd.f32 1.0, %v10075_v6  ;;  %v9581_v39 = vld [vmem:[%s14586_s1 + $0x40] ss:$16 sps:$4 sm:$0xff]   ;;  %2625 = vmatpush1.bf16.msra.mxu1 %v9578_v23  ;;  %2515 = vmatprep.subr.bf16.mxu0 %v9583_v5  ;;  %v9584_v46 = vld [vmem:[%s14586_s1 + $0x28] ss:$16 sps:$4 sm:$0xff]  }
 0x180   : > { %v10079_v59 = vpop.eup %10078  ;;  %v1128_v28 = vmul.f32 %v10077_v31, %v10063_v44  ;;  %10098 = vpow2.f32 %v8449_v9  ;;  %2516 = vmatpush1.bf16.msra.mxu0 %v9581_v39  ;;  %v9587_v6 = vld [vmem:[%s14586_s1 + $0x60] ss:$16 sps:$4 sm:$0xff]   ;;  %2626 = vmatprep.subr.bf16.mxu1 %v9586_v62  ;;  %v9590_v9 = vld [vmem:[%s14586_s1 + $0x48] ss:$16 sps:$4 sm:$0xff]   ;;  %v9592_v31 = vld [vmem:[%s14586_s1 + $0x4c] ss:$16 sps:$4 sm:$0xff]  }
 0x181   : > { %v10081_v0 = vpop.eup %10080  ;;  %10100 = vtanh.f32 %v12491_v10 }
 0x182   : > { %v10083_v32 = vpop.eup %10082  ;;  %v12493_v14 = vadd.f32 %v1128_v28, %v1112_v37  ;;  %v1174_v58 = vmul.f32 %v10081_v0, %v10079_v59  ;;  %10102 = vrcp.f32 %v1063_v35  ;;  %v9589_v37 = vld [vmem:[%s14586_s1 + $0x64] ss:$16 sps:$4 sm:$0xff]   ;;  %v9593_v59 = vld [vmem:[%s14586_s1 + $0x80] ss:$16 sps:$4 sm:$0xff]   ;;  %v9596_v0 = vld [vmem:[%s14586_s1 + $0x68] ss:$16 sps:$4 sm:$0xff]  }
 0x183   : > { %v10085_v19 = vpop.eup %10084  ;;  %2627 = vmatpush1.bf16.msra.mxu1 %v9584_v46  ;;  %2517 = vmatprep.subr.bf16.mxu0 %v9589_v37  ;;  %v9595_v28 = vld [vmem:[%s14586_s1 + $0x84] ss:$16 sps:$4 sm:$0xff]   ;;  %v9598_v35 = vld [vmem:[%s14586_s1 + $0x6c] ss:$16 sps:$4 sm:$0xff]  }
 0x184   : > { %v10087_v11 = vpop.eup %10086  ;;  %v1313_v36 = vpack.c.bf16 %v1174_v58, %v1173_v24  ;;  %v1113_v16 = vmul.f32 0.0, %v10085_v19  ;;  %10104 = vtanh.f32 %v12493_v14  ;;  %2518 = vmatpush1.bf16.msra.mxu0 %v9587_v6  ;;  %2628 = vmatprep.subr.bf16.mxu1 %v9592_v31  ;;  %v9601_v24 = vld [vmem:[%s14586_s1 + $0xa4] ss:$16 sps:$4 sm:$0xff]   ;;  %v9604_v58 = vld [vmem:[%s14586_s1 + $0x8c] ss:$16 sps:$4 sm:$0xff]  }
 0x185   : > { %v10089_v20 = vpop.eup %10088  ;;  %2519 = vmatprep.subr.bf16.mxu0 %v9595_v28  ;;  %v9602_v19 = vld [vmem:[%s14586_s1 + $0x88] ss:$16 sps:$4 sm:$0xff]   ;;  %v8452_v6 = vld [vmem:[%s12226_s15 + $0x210] sm:$0xff] }
 0x186   : > { %v10091_v15 = vpop.eup %10090  ;;  %v1064_v42 = vadd.f32 1.0, %v10089_v20  ;;  %1591 = vmatmul.mubr.bf16.gmra.mrb[52].mxu0 %v1313_v36  ;;  %1704 = vmatmul.mubr.bf16.gmra.mrb[52].mxu1 %v1313_v36  ;;  %v9608_v36 = vld [vmem:[%s14586_s1 + $0xa8] ss:$16 sps:$4 sm:$0xff]   ;;  %v9607_v20 = vld [vmem:[%s14586_s1 + $0xc4] ss:$16 sps:$4 sm:$0xff]  }
 0x187   : > { %v10093_v33 = vpop.eup %10092  ;;  %1600 = vmatprep.mubr.bf16.mxu0 %v11988_v2  ;;  %1713 = vmatprep.mubr.bf16.mxu1 %v11988_v2  ;;  %v1114_v12 = vmul.f32 0.0, %v10091_v15  ;;  %v9605_v15 = vld [vmem:[%s14586_s1 + $0xc0] ss:$16 sps:$4 sm:$0xff]  }
 0x188   : > { %v10095_v49 = vpop.eup %10094  ;;  %10106 = vrcp.f32 %v1064_v42  ;;  %v1129_v21 = vmul.f32 %v10093_v33, %v10083_v32  ;;  %2629 = vmatpush1.bf16.msra.mxu1 %v9590_v9  ;;  %2520 = vmatpush1.bf16.msra.mxu0 %v9593_v59  ;;  %v9599_v32 = vld [vmem:[%s14586_s1 + $0xa0] ss:$16 sps:$4 sm:$0xff]   ;;  %v9616_v42 = vld [vmem:[%s14586_s1 + $0xcc] ss:$16 sps:$4 sm:$0xff]   ;;  %v9613_v33 = vld [vmem:[%s14586_s1 + $0xe4] ss:$16 sps:$4 sm:$0xff]  }
 0x189   : > { %v10097_v25 = vpop.eup %10096  ;;  %v1065_v13 = vadd.f32 1.0, %v10095_v49  ;;  %2630 = vmatprep.subr.bf16.mxu1 %v9598_v35  ;;  %2521 = vmatprep.subr.bf16.mxu0 %v9601_v24  ;;  %v9619_v49 = vld [vmem:[%s14586_s1 + $0xec] ss:$16 sps:$4 sm:$0xff]   ;;  %v8456_v31 = vld [vmem:[%s12226_s15 + $0x230] sm:$0xff] }
 0x18a   : > { %v12499_v30 = vadd.f32 %v1129_v21, %v1113_v16  ;;  %v1130_v48 = vmul.f32 %v10097_v25, %v10087_v11  ;;  %v10099_v43 = vpop.eup %10098  ;;  %v9610_v11 = vld [vmem:[%s14586_s1 + $0xac] ss:$16 sps:$4 sm:$0xff]   ;;  %v9614_v16 = vld [vmem:[%s14586_s1 + $0xc8] ss:$16 sps:$4 sm:$0xff]   ;;  %v8450_v25 = vld [vmem:[%s12226_s15 + $0x200] sm:$0xff] }
 0x18b   : > { %10108 = vrcp.f32 %v1065_v13  ;;  %v1066_v34 = vadd.f32 1.0, %v10099_v43  ;;  %v10101_v53 = vpop.eup %10100  ;;  %v9617_v21 = vld [vmem:[%s14586_s1 + $0xe8] ss:$16 sps:$4 sm:$0xff]  }
 0x18c   : > { %v12501_v47 = vadd.f32 %v1130_v48, %v1114_v12  ;;  %10110 = vtanh.f32 %v12499_v30  ;;  %v10103_v56 = vpop.eup %10102  ;;  %2631 = vmatpush1.bf16.msra.mxu1 %v9596_v0  ;;  %2522 = vmatpush1.bf16.msra.mxu0 %v9599_v32  ;;  %v9611_v12 = vld [vmem:[%s14586_s1 + $0xe0] ss:$16 sps:$4 sm:$0xff]   ;;  %v8451_v13 = vld [vmem:[%s12226_s15 + $0x208] sm:$0xff] }
 0x18d   : > { %v1175_v1 = vmul.f32 %v10103_v56, %v10101_v53  ;;  %2632 = vmatprep.subr.bf16.mxu1 %v9604_v58  ;;  %2523 = vmatprep.subr.bf16.mxu0 %v9607_v20  ;;  %v8458_v32 = vld [vmem:[%s12226_s15 + $0x240] sm:$0xff]  ;;  %v8459_v58 = vld [vmem:[%s12226_s15 + $0x248] sm:$0xff] }
 0x18e   : > { %10112 = vtanh.f32 %v12501_v47  ;;  %v10105_v51 = vpop.eup %10104  ;;  %v8462_v20 = vld [vmem:[%s12226_s15 + $0x260] sm:$0xff] }
 0x18f   : > { %10114 = vrcp.f32 %v1066_v34  ;;  %v8454_v34 = vld [vmem:[%s12226_s15 + $0x220] sm:$0xff] }
 0x190   : > { %2633 = vmatpush1.bf16.msra.mxu1 %v9602_v19  ;;  %2524 = vmatpush1.bf16.msra.mxu0 %v9605_v15 }
 0x191   : > { %2634 = vmatprep.subr.bf16.mxu1 %v9610_v11  ;;  %2525 = vmatprep.subr.bf16.mxu0 %v9613_v33 }
 0x192   : > { %v10107_v40 = vpop.eup %10106 }
 0x193   : > { %v1176_v44 = vmul.f32 %v10107_v40, %v10105_v51  ;;  %v8453_v51 = vld [vmem:[%s12226_s15 + $0x218] sm:$0xff] }
 0x194   : > { %2635 = vmatpush1.bf16.msra.mxu1 %v9608_v36  ;;  %2526 = vmatpush1.bf16.msra.mxu0 %v9611_v12 }
 0x195   : > { %v1314_v54 = vpack.c.bf16 %v1176_v44, %v1175_v1  ;;  %v10109_v50 = vpop.eup %10108  ;;  %2636 = vmatprep.subr.bf16.mxu1 %v9616_v42  ;;  %v8455_v1 = vld [vmem:[%s12226_s15 + $0x228] sm:$0xff] }
 0x196   : > { %v10111_v22 = vpop.eup %10110 }
 0x197   : > { %1601 = vmatmul.mubr.bf16.gmra.mrb[56].mxu0 %v1314_v54  ;;  %1714 = vmatmul.mubr.bf16.gmra.mrb[56].mxu1 %v1314_v54  ;;  %v1177_v63 = vmul.f32 %v10111_v22, %v10109_v50 }
 0x198   : > { %v10113_v60 = vpop.eup %10112  ;;  %1610 = vmatprep.mubr.bf16.mxu0 %v11988_v2  ;;  %1723 = vmatprep.mubr.bf16.mxu1 %v11988_v2 }
 0x199   : > { %v10115_v18 = vpop.eup %10114  ;;  %2637 = vmatpush1.bf16.msra.mxu1 %v9614_v16 }
 0x19a   : > { %v1178_v4 = vmul.f32 %v10115_v18, %v10113_v60  ;;  %2638 = vmatprep.subr.bf16.mxu1 %v9619_v49 }
 0x19c   : > { %v1315_v61 = vpack.c.bf16 %v1178_v4, %v1177_v63 }
 0x19d   : > { %2639 = vmatpush1.bf16.msra.mxu1 %v9617_v21 }
 0x19f   : > { %1611 = vmatmul.mubr.bf16.gmra.mrb[60].mxu0 %v1315_v61  ;;  %1724 = vmatmul.mubr.bf16.gmra.mrb[60].mxu1 %v1315_v61 }
 0x1a0   : > { %2543 = vmatprep.mubr.bf16.mxu0 %v11988_v2  ;;  %2656 = vmatprep.mubr.bf16.mxu1 %v11988_v2 }
 0x209   : > { %v1542_v48 = vpop.f32.mrb[32].mxu0  ;;  %v1655_v43 = vpop.f32.mrb[32].mxu1 }
 0x20a   : > { %v1734_v53 = vadd.f32 %v8450_v25, %v1542_v48  ;;  %v1544_v56 = vpop.f32.mrb[33].mxu0  ;;  %v1657_v40 = vpop.f32.mrb[33].mxu1  ;;  %v1736_v9 = vadd.f32 %v8452_v6, %v1655_v43 }
 0x20b   : > { %v1735_v44 = vadd.f32 %v8451_v13, %v1544_v56  ;;  %v1546_v54 = vpop.f32.mrb[34].mxu0  ;;  %v1659_v50 = vpop.f32.mrb[34].mxu1  ;;  %v1737_v61 = vadd.f32 %v8453_v51, %v1657_v40  ;;  %v8463_v13 = vld [vmem:[%s12226_s15 + $0x268] sm:$0xff] }
 0x20c   : > { %v8546_v22 = vmul.f32 -1.442695, %v1734_v53  ;;  %v1738_v60 = vadd.f32 %v8454_v34, %v1546_v54  ;;  %v1548_v18 = vpop.f32.mrb[35].mxu0  ;;  %v1661_v63 = vpop.f32.mrb[35].mxu1  ;;  %v1740_v35 = vadd.f32 %v8456_v31, %v1659_v50  ;;  %v8465_v54 = vld [vmem:[%s12226_s15 + $0x278] sm:$0xff]  ;;  %v8460_v50 = vld [vmem:[%s12226_s15 + $0x250] sm:$0xff] }
 0x20d   : > { %v8562_v4 = vmul.f32 -1.442695, %v1735_v44  ;;  %v1739_v23 = vadd.f32 %v8455_v1, %v1548_v18  ;;  %v1741_v46 = vadd.f32 %v8457_v55, %v1661_v63  ;;  %v8578_v62 = vmul.f32 -1.442695, %v1737_v61  ;;  %v8461_v1 = vld [vmem:[%s12226_s15 + $0x258] sm:$0xff] }
 0x20e   : > { %10116 = vpow2.f32 %v8546_v22  ;;  %v8547_v39 = vmul.f32 -1.442695, %v1738_v60 }
 0x20f   : > { %10118 = vpow2.f32 %v8562_v4  ;;  %v8563_v5 = vmul.f32 -1.442695, %v1739_v23  ;;  %v8579_v37 = vmul.f32 -1.442695, %v1741_v46 }
 0x210   : > { %10120 = vpow2.f32 %v8547_v39  ;;  %v8466_v39 = vld [vmem:[%s12226_s15 + $0x280] sm:$0xff] }
 0x211   : > { %10122 = vpow2.f32 %v8563_v5 }
 0x212   : > { %10124 = vpow2.f32 %v8578_v62  ;;  %v8467_v62 = vld [vmem:[%s12226_s15 + $0x288] sm:$0xff] }
 0x213   : > { %10126 = vpow2.f32 %v8579_v37 }
 0x214   : > { %10128 = vtanh.f32 %v1736_v9 }
 0x218   : > { %v10117_v59 = vpop.eup %10116 }
 0x219   : > { %v10119_v28 = vpop.eup %10118  ;;  %v1846_v0 = vadd.f32 1.0, %v10117_v59 }
 0x21a   : > { %v1942_v24 = vadd.f32 1.0, %v10119_v28  ;;  %v10121_v19 = vpop.eup %10120 }
 0x21b   : > { %10130 = vrcp.f32 %v1846_v0  ;;  %v1552_v11 = vpop.f32.mrb[36].mxu0  ;;  %v1665_v36 = vpop.f32.mrb[36].mxu1  ;;  %v1847_v15 = vadd.f32 1.0, %v10121_v19 }
 0x21c   : > { %10132 = vrcp.f32 %v1942_v24  ;;  %v1742_v16 = vadd.f32 %v8458_v32, %v1552_v11  ;;  %v1554_v42 = vpop.f32.mrb[37].mxu0  ;;  %v1667_v33 = vpop.f32.mrb[37].mxu1  ;;  %v1744_v55 = vadd.f32 %v8460_v50, %v1665_v36 }
 0x21d   : > { %v10123_v49 = vpop.eup %10122  ;;  %10134 = vtanh.f32 %v1740_v35  ;;  %v1743_v12 = vadd.f32 %v8459_v58, %v1554_v42  ;;  %v1556_v21 = vpop.f32.mrb[38].mxu0  ;;  %v1745_v63 = vadd.f32 %v8461_v1, %v1667_v33 }
 0x21e   : > { %v12604_v25 = vpop.f32.mrb[38].mxu1  ;;  %10136 = vrcp.f32 %v1847_v15  ;;  %v1943_v48 = vadd.f32 1.0, %v10123_v49  ;;  %v8548_v43 = vmul.f32 -1.442695, %v1742_v16  ;;  %v1746_v34 = vadd.f32 %v8462_v20, %v1556_v21  ;;  %v1558_v53 = vpop.f32.mrb[39].mxu0 }
 0x21f   : > { %v1671_v56 = vpop.f32.mrb[39].mxu1  ;;  %v10125_v51 = vpop.eup %10124  ;;  %v8564_v40 = vmul.f32 -1.442695, %v1743_v12  ;;  %v1747_v44 = vadd.f32 %v8463_v13, %v1558_v53  ;;  %v8580_v9 = vmul.f32 -1.442695, %v1745_v63  ;;  %v8464_v13 = vld [vmem:[%s12226_s15 + $0x270] sm:$0xff] }
 0x220   : > { %10138 = vrcp.f32 %v1943_v48  ;;  %v8549_v22 = vmul.f32 -1.442695, %v1746_v34  ;;  %v10127_v60 = vpop.eup %10126  ;;  %v2054_v18 = vadd.f32 1.0, %v10125_v51  ;;  %v1749_v61 = vadd.f32 %v8465_v54, %v1671_v56  ;;  %v8470_v48 = vld [vmem:[%s12226_s15 + $0x2a0] sm:$0xff]  ;;  %v8469_v34 = vld [vmem:[%s12226_s15 + $0x298] sm:$0xff]  ;;  %v8468_v54 = vld [vmem:[%s12226_s15 + $0x290] sm:$0xff] }
 0x221   : > { %10140 = vpow2.f32 %v8548_v43  ;;  %v8565_v4 = vmul.f32 -1.442695, %v1747_v44  ;;  %v10129_v23 = vpop.eup %10128  ;;  %v2055_v46 = vadd.f32 1.0, %v10127_v60  ;;  %v1748_v44 = vadd.f32 %v8464_v13, %v12604_v25  ;;  %v9622_v25 = vld [vmem:[%s14586_s1 + $0x4] ss:$16 sps:$4 sm:$0xff]  }
 0x222   : > { %10142 = vpow2.f32 %v8564_v40  ;;  %v8581_v35 = vmul.f32 -1.442695, %v1749_v61  ;;  %v8471_v40 = vld [vmem:[%s12226_s15 + $0x2a8] sm:$0xff]  ;;  %3514 = vmatprep.subr.bf16.mxu0 %v9622_v25 }
 0x223   : > { %10144 = vpow2.f32 %v8549_v22 }
 0x224   : > { %10146 = vrcp.f32 %v2054_v18 }
 0x225   : > { %v10131_v5 = vpop.eup %10130  ;;  %10148 = vpow2.f32 %v8565_v4 }
 0x226   : > { %v10133_v6 = vpop.eup %10132  ;;  %v2118_v37 = vmul.f32 %v10131_v5, %v10129_v23  ;;  %v1562_v31 = vpop.f32.mrb[40].mxu0  ;;  %10150 = vtanh.f32 %v1744_v55 }
 0x227   : > { %v1675_v59 = vpop.f32.mrb[40].mxu1  ;;  %v10135_v28 = vpop.eup %10134  ;;  %v2102_v0 = vmul.f32 %v10133_v6, %v12273_v26  ;;  %v1750_v32 = vadd.f32 %v8466_v39, %v1562_v31  ;;  %10152 = vrcp.f32 %v2055_v46 }
 0x228   : > { %v1564_v24 = vpop.f32.mrb[41].mxu0  ;;  %v1677_v58 = vpop.f32.mrb[41].mxu1  ;;  %10154 = vpow2.f32 %v8580_v9  ;;  %v1752_v61 = vadd.f32 %v8468_v54, %v1675_v59 }
 0x229   : > { %v10137_v19 = vpop.eup %10136  ;;  %v1751_v11 = vadd.f32 %v8467_v62, %v1564_v24  ;;  %v1566_v36 = vpop.f32.mrb[42].mxu0  ;;  %v12615_v15 = vadd.f32 %v2118_v37, %v2102_v0  ;;  %v8550_v42 = vmul.f32 -1.442695, %v1750_v32  ;;  %10156 = vpow2.f32 %v8581_v35  ;;  %v8473_v37 = vld [vmem:[%s12226_s15 + $0x2b8] sm:$0xff]  ;;  %v8472_v35 = vld [vmem:[%s12226_s15 + $0x2b0] sm:$0xff]  ;;  %v8474_v24 = vld [vmem:[%s12226_s15 + $0x2c0] sm:$0xff] }
 0x22a   : > { %v12613_v20 = vpop.f32.mrb[42].mxu1  ;;  %v2119_v16 = vmul.f32 %v10137_v19, %v10135_v28  ;;  %v1568_v26 = vpop.f32.mrb[43].mxu0  ;;  %v1754_v50 = vadd.f32 %v8470_v48, %v1566_v36  ;;  %v1753_v22 = vadd.f32 %v8469_v34, %v1677_v58  ;;  %v8477_v48 = vld [vmem:[%s12226_s15 + $0x2d8] sm:$0xff] }
 0x22b   : > { %v1681_v33 = vpop.f32.mrb[43].mxu1  ;;  %v10139_v49 = vpop.eup %10138  ;;  %v8566_v12 = vmul.f32 -1.442695, %v1751_v11  ;;  %10158 = vpow2.f32 %v8550_v42  ;;  %v1755_v63 = vadd.f32 %v8471_v40, %v1568_v26  ;;  %v8475_v11 = vld [vmem:[%s12226_s15 + $0x2c8] sm:$0xff] }
 0x22c   : > { %v2103_v21 = vmul.f32 %v10139_v49, %v12287_v38  ;;  %v10141_v43 = vpop.eup %10140  ;;  %v8551_v39 = vmul.f32 -1.442695, %v1754_v50  ;;  %v8582_v46 = vmul.f32 -1.442695, %v1753_v22  ;;  %v1757_v32 = vadd.f32 %v8473_v37, %v1681_v33  ;;  %v8478_v49 = vld [vmem:[%s12226_s15 + $0x2e0] sm:$0xff] }
 0x22d   : > { %v10143_v53 = vpop.eup %10142  ;;  %v1848_v51 = vadd.f32 1.0, %v10141_v43  ;;  %10160 = vpow2.f32 %v8566_v12  ;;  %v8567_v6 = vmul.f32 -1.442695, %v1755_v63 }
 0x22e   : > { %v12621_v56 = vadd.f32 %v2119_v16, %v2103_v21  ;;  %10162 = vtanh.f32 %v12615_v15  ;;  %v1944_v1 = vadd.f32 1.0, %v10143_v53  ;;  %v10145_v38 = vpop.eup %10144  ;;  %v1756_v21 = vadd.f32 %v8472_v35, %v12613_v20 }
 0x22f   : > { %v12628_v60 = vpop.eup %10146  ;;  %v1849_v18 = vadd.f32 1.0, %v10145_v38 }
 0x230   : > { %10164 = vtanh.f32 %v12621_v56  ;;  %v10149_v4 = vpop.eup %10148 }
 0x231   : > { %10166 = vrcp.f32 %v1848_v51  ;;  %v10151_v23 = vpop.eup %10150  ;;  %v1945_v55 = vadd.f32 1.0, %v10149_v4  ;;  %v8583_v51 = vmul.f32 -1.442695, %v1757_v32 }
 0x232   : > { %10168 = vrcp.f32 %v1944_v1  ;;  %v10153_v5 = vpop.eup %10152 }
 0x233   : > { %10170 = vtanh.f32 %v1748_v44  ;;  %v10155_v62 = vpop.eup %10154 }
 0x234   : > { %10172 = vrcp.f32 %v1849_v18  ;;  %v10157_v9 = vpop.eup %10156  ;;  %v2056_v28 = vadd.f32 1.0, %v10155_v62  ;;  %v8479_v18 = vld [vmem:[%s12226_s15 + $0x2e8] sm:$0xff] }
 0x235   : > { %10174 = vrcp.f32 %v1945_v55  ;;  %v10159_v31 = vpop.eup %10158  ;;  %v2057_v16 = vadd.f32 1.0, %v10157_v9 }
 0x236   : > { %10176 = vtanh.f32 %v1752_v61  ;;  %v1850_v0 = vadd.f32 1.0, %v10159_v31 }
 0x237   : > { %10178 = vpow2.f32 %v8551_v39  ;;  %v10161_v59 = vpop.eup %10160 }
 0x238   : > { %10180 = vpow2.f32 %v8582_v46  ;;  %v10163_v58 = vpop.eup %10162  ;;  %v1946_v19 = vadd.f32 1.0, %v10161_v59  ;;  %v9620_v59 = vld [vmem:[%s14586_s1] ss:$16 sps:$4 sm:$0xff]  }
 0x239   : > { %10182 = vpow2.f32 %v8567_v6  ;;  %v1572_v42 = vpop.f32.mrb[44].mxu0  ;;  %v12637_v26 = vpop.f32.mrb[44].mxu1 }
 0x23a   : > { %v10165_v36 = vpop.eup %10164  ;;  %10184 = vrcp.f32 %v1850_v0  ;;  %v1758_v13 = vadd.f32 %v8474_v24, %v1572_v42  ;;  %v1574_v33 = vpop.f32.mrb[45].mxu0  ;;  %v9623_v42 = vld [vmem:[%s14586_s1 + $0x20] ss:$16 sps:$4 sm:$0xff]  }
 0x23b   : > { %v10167_v12 = vpop.eup %10166  ;;  %10186 = vrcp.f32 %v1946_v19  ;;  %v1687_v43 = vpop.f32.mrb[45].mxu1  ;;  %v1759_v40 = vadd.f32 %v8475_v11, %v1574_v33  ;;  %v2167_v4 = vmul.f32 %v10165_v36, %v10153_v5  ;;  %v8476_v11 = vld [vmem:[%s12226_s15 + $0x2d0] sm:$0xff] }
 0x23c   : > { %v10169_v34 = vpop.eup %10168  ;;  %v2120_v53 = vmul.f32 %v10167_v12, %v10151_v23  ;;  %10188 = vrcp.f32 %v2056_v28  ;;  %v1576_v1 = vpop.f32.mrb[46].mxu0  ;;  %v8552_v38 = vmul.f32 -1.442695, %v1758_v13  ;;  %v1761_v39 = vadd.f32 %v8477_v48, %v1687_v43  ;;  %v8481_v13 = vld [vmem:[%s12226_s15 + $0x2f8] sm:$0xff]  ;;  %v8480_v48 = vld [vmem:[%s12226_s15 + $0x2f0] sm:$0xff]  ;;  %v8482_v43 = vld [vmem:[%s12226_s15 + $0x300] sm:$0xff] }
 0x23d   : > { %v12642_v44 = vpop.f32.mrb[46].mxu1  ;;  %v10171_v54 = vpop.eup %10170  ;;  %v2104_v50 = vmul.f32 %v10169_v34, %v12325_v29  ;;  %v1762_v22 = vadd.f32 %v8478_v49, %v1576_v1  ;;  %10190 = vrcp.f32 %v2057_v16  ;;  %v8568_v55 = vmul.f32 -1.442695, %v1759_v40 }
 0x23e   : > { %v1578_v20 = vpop.f32.mrb[47].mxu0  ;;  %v1691_v63 = vpop.f32.mrb[47].mxu1  ;;  %v2166_v23 = vmul.f32 %v10163_v58, %v12628_v60  ;;  %10192 = vpow2.f32 %v8552_v38  ;;  %v8584_v24 = vmul.f32 -1.442695, %v1761_v39  ;;  %v1760_v33 = vadd.f32 %v8476_v11, %v12637_v26 }
 0x23f   : > { %v10173_v61 = vpop.eup %10172  ;;  %v12647_v46 = vadd.f32 %v2120_v53, %v2104_v50  ;;  %v8553_v6 = vmul.f32 -1.442695, %v1762_v22  ;;  %10194 = vpow2.f32 %v8568_v55  ;;  %v1763_v9 = vadd.f32 %v8479_v18, %v1578_v20  ;;  %v8486_v55 = vld [vmem:[%s12226_s15 + $0x320] sm:$0xff] }
 0x240   : > { %v10175_v25 = vpop.eup %10174  ;;  %v2121_v62 = vmul.f32 %v10173_v61, %v10171_v54  ;;  %10196 = vtanh.f32 %v1756_v21  ;;  %v2311_v5 = vpack.c.bf16 %v2167_v4, %v2166_v23  ;;  %v1765_v1 = vadd.f32 %v8481_v13, %v1691_v63  ;;  %v8489_v13 = vld [vmem:[%s12226_s15 + $0x338] sm:$0xff] }
 0x241   : > { %v10177_v37 = vpop.eup %10176  ;;  %v2105_v29 = vmul.f32 %v10175_v25, %v12359_v8  ;;  %10198 = vpow2.f32 %v8553_v6  ;;  %v8569_v35 = vmul.f32 -1.442695, %v1763_v9  ;;  %v9625_v8 = vld [vmem:[%s14586_s1 + $0x24] ss:$16 sps:$4 sm:$0xff]   ;;  %v1764_v38 = vadd.f32 %v8480_v48, %v12642_v44 }
 0x242   : > { %v10179_v31 = vpop.eup %10178  ;;  %10200 = vpow2.f32 %v8583_v51  ;;  %2544 = vmatmul.mubr.bf16.vlgmr.msra.gmra.mrb[64].mxu0 %v2311_v5  ;;  %2657 = vmatmul.mubr.bf16.vlgmr.msra.gmra.mrb[64].mxu1 %v2311_v5  ;;  %v8483_v51 = vld [vmem:[%s12226_s15 + $0x308] sm:$0xff]  ;;  %v8585_v9 = vmul.f32 -1.442695, %v1765_v1  ;;  %v8484_v48 = vld [vmem:[%s12226_s15 + $0x310] sm:$0xff] }
 0x243   : > { %v10181_v60 = vpop.eup %10180  ;;  %v12653_v28 = vadd.f32 %v2121_v62, %v2105_v29  ;;  %v1851_v0 = vadd.f32 1.0, %v10179_v31  ;;  %2553 = vmatprep.mubr.bf16.mxu0 %v11988_v2  ;;  %2666 = vmatprep.mubr.bf16.mxu1 %v11988_v2  ;;  %v8487_v31 = vld [vmem:[%s12226_s15 + $0x328] sm:$0xff] }
 0x244   : > { %v10183_v32 = vpop.eup %10182  ;;  %3515 = vmatpush1.bf16.msra.mxu0 %v9620_v59  ;;  %v2058_v21 = vadd.f32 1.0, %v10181_v60 }
 0x245   : > { %v10185_v58 = vpop.eup %10184  ;;  %10202 = vrcp.f32 %v1851_v0  ;;  %v1947_v19 = vadd.f32 1.0, %v10183_v32  ;;  %3516 = vmatprep.subr.bf16.mxu0 %v9625_v8 }
 0x246   : > { %v10187_v36 = vpop.eup %10186  ;;  %v2122_v16 = vmul.f32 %v10185_v58, %v10177_v37  ;;  %10204 = vpow2.f32 %v8569_v35 }
 0x247   : > { %v12664_v49 = vpop.eup %10188  ;;  %v2106_v12 = vmul.f32 %v10187_v36, %v12391_v7  ;;  %10206 = vrcp.f32 %v1947_v19  ;;  %v8485_v36 = vld [vmem:[%s12226_s15 + $0x318] sm:$0xff] }
 0x248   : > { %10208 = vpow2.f32 %v8584_v24  ;;  %v10191_v34 = vpop.eup %10190  ;;  %v1582_v54 = vpop.f32.mrb[48].mxu0  ;;  %3517 = vmatpush1.bf16.msra.mxu0 %v9623_v42 }
 0x249   : > { %v12671_v53 = vadd.f32 %v2122_v16, %v2106_v12  ;;  %10210 = vtanh.f32 %v12647_v46  ;;  %v10193_v40 = vpop.eup %10192  ;;  %v12675_v7 = vpop.f32.mrb[48].mxu1  ;;  %v1766_v22 = vadd.f32 %v8482_v43, %v1582_v54 }
 0x24a   : > { %10212 = vtanh.f32 %v12653_v28  ;;  %v10195_v50 = vpop.eup %10194  ;;  %v1852_v26 = vadd.f32 1.0, %v10193_v40  ;;  %v1584_v18 = vpop.f32.mrb[49].mxu0 }
 0x24b   : > { %10214 = vrcp.f32 %v2058_v21  ;;  %v1697_v20 = vpop.f32.mrb[49].mxu1  ;;  %v10197_v4 = vpop.eup %10196  ;;  %v1948_v61 = vadd.f32 1.0, %v10195_v50  ;;  %v1767_v63 = vadd.f32 %v8483_v51, %v1584_v18  ;;  %v8554_v62 = vmul.f32 -1.442695, %v1766_v22 }
 0x24c   : > { %10216 = vtanh.f32 %v1760_v33  ;;  %v1586_v39 = vpop.f32.mrb[50].mxu0  ;;  %v12680_v23 = vpop.f32.mrb[50].mxu1  ;;  %v1769_v43 = vadd.f32 %v8485_v36, %v1697_v20 }
 0x24d   : > { %v10199_v25 = vpop.eup %10198  ;;  %10218 = vrcp.f32 %v1852_v26  ;;  %v1588_v6 = vpop.f32.mrb[51].mxu0  ;;  %v1770_v59 = vadd.f32 %v8486_v55, %v1586_v39  ;;  %v8570_v35 = vmul.f32 -1.442695, %v1767_v63  ;;  %v8491_v55 = vld [vmem:[%s12226_s15 + $0x348] sm:$0xff] }
 0x24e   : > { %v1701_v37 = vpop.f32.mrb[51].mxu1  ;;  %v10201_v29 = vpop.eup %10200  ;;  %10220 = vrcp.f32 %v1948_v61  ;;  %v1853_v44 = vadd.f32 1.0, %v10199_v25  ;;  %v1771_v24 = vadd.f32 %v8487_v31, %v1588_v6  ;;  %v8490_v61 = vld [vmem:[%s12226_s15 + $0x340] sm:$0xff] }
 0x24f   : > { %v10203_v5 = vpop.eup %10202  ;;  %10222 = vtanh.f32 %v1764_v38  ;;  %v2059_v11 = vadd.f32 1.0, %v10201_v29  ;;  %v8555_v42 = vmul.f32 -1.442695, %v1770_v59  ;;  %v1773_v26 = vadd.f32 %v8489_v13, %v1701_v37 }
 0x250   : > { %v10205_v60 = vpop.eup %10204  ;;  %v2123_v0 = vmul.f32 %v10203_v5, %v10197_v4  ;;  %10224 = vrcp.f32 %v1853_v44  ;;  %v8571_v51 = vmul.f32 -1.442695, %v1771_v24  ;;  %v1768_v4 = vadd.f32 %v8484_v48, %v12675_v7  ;;  %v8493_v5 = vld [vmem:[%s12226_s15 + $0x358] sm:$0xff]  ;;  %v8495_v48 = vld [vmem:[%s12226_s15 + $0x368] sm:$0xff] }
 0x251   : > { %v10207_v8 = vpop.eup %10206  ;;  %v1949_v32 = vadd.f32 1.0, %v10205_v60  ;;  %10226 = vpow2.f32 %v8554_v62  ;;  %v8488_v62 = vld [vmem:[%s12226_s15 + $0x330] sm:$0xff] }
 0x252   : > { %v10209_v58 = vpop.eup %10208  ;;  %v2107_v19 = vmul.f32 %v10207_v8, %v12402_v41  ;;  %10228 = vpow2.f32 %v8585_v9 }
 0x253   : > { %v10211_v16 = vpop.eup %10210  ;;  %10230 = vrcp.f32 %v1949_v32  ;;  %v2060_v54 = vadd.f32 1.0, %v10209_v58 }
 0x254   : > { %v10213_v12 = vpop.eup %10212  ;;  %v12685_v21 = vadd.f32 %v2123_v0, %v2107_v19  ;;  %10232 = vpow2.f32 %v8570_v35  ;;  %v2168_v40 = vmul.f32 %v10211_v16, %v12664_v49  ;;  %v8494_v35 = vld [vmem:[%s12226_s15 + $0x360] sm:$0xff]  ;;  %v1772_v19 = vadd.f32 %v8488_v62, %v12680_v23  ;;  %v8492_v23 = vld [vmem:[%s12226_s15 + $0x350] sm:$0xff] }
 0x255   : > { %v12688_v33 = vpop.eup %10214  ;;  %v2169_v1 = vmul.f32 %v10213_v12, %v10191_v34  ;;  %10234 = vrcp.f32 %v2059_v11  ;;  %v8586_v34 = vmul.f32 -1.442695, %v1769_v43 }
 0x256   : > { %v10217_v41 = vpop.eup %10216  ;;  %10236 = vpow2.f32 %v8555_v42 }
 0x257   : > { %v10219_v50 = vpop.eup %10218  ;;  %v2312_v38 = vpack.c.bf16 %v2169_v1, %v2168_v40  ;;  %10238 = vtanh.f32 %v12671_v53  ;;  %v8497_v1 = vld [vmem:[%s12226_s15 + $0x378] sm:$0xff] }
 0x258   : > { %v10221_v22 = vpop.eup %10220  ;;  %v2124_v18 = vmul.f32 %v10219_v50, %v10217_v41  ;;  %10240 = vpow2.f32 %v8571_v51 }
 0x259   : > { %v10223_v20 = vpop.eup %10222  ;;  %v2108_v49 = vmul.f32 %v10221_v22, %v12429_v57  ;;  %2554 = vmatmul.mubr.bf16.gmra.mrb[68].mxu0 %v2312_v38  ;;  %2667 = vmatmul.mubr.bf16.gmra.mrb[68].mxu1 %v2312_v38  ;;  %10242 = vrcp.f32 %v2060_v54  ;;  %v8587_v57 = vmul.f32 -1.442695, %v1773_v26  ;;  %v1592_v6 = vpop.f32.mrb[52].mxu0 }
 0x25a   : > { %v10225_v63 = vpop.eup %10224  ;;  %2563 = vmatprep.mubr.bf16.mxu0 %v11988_v2  ;;  %2676 = vmatprep.mubr.bf16.mxu1 %v11988_v2  ;;  %v1705_v37 = vpop.f32.mrb[52].mxu1  ;;  %10244 = vtanh.f32 %v12685_v21  ;;  %v1774_v9 = vadd.f32 %v8490_v61, %v1592_v6 }
 0x25b   : > { %v10227_v7 = vpop.eup %10226  ;;  %v12699_v39 = vadd.f32 %v2124_v18, %v2108_v49  ;;  %v2125_v25 = vmul.f32 %v10225_v63, %v10223_v20  ;;  %10246 = vtanh.f32 %v1768_v4  ;;  %v1594_v31 = vpop.f32.mrb[53].mxu0 }
 0x25c   : > { %v10229_v29 = vpop.eup %10228  ;;  %v1854_v44 = vadd.f32 1.0, %v10227_v7  ;;  %v1707_v59 = vpop.f32.mrb[53].mxu1  ;;  %10248 = vpow2.f32 %v8586_v34  ;;  %v1775_v0 = vadd.f32 %v8491_v55, %v1594_v31  ;;  %v8556_v11 = vmul.f32 -1.442695, %v1774_v9 }
 0x25d   : > { %v10231_v60 = vpop.eup %10230  ;;  %v1596_v8 = vpop.f32.mrb[54].mxu0  ;;  %v1777_v13 = vadd.f32 %v8493_v5, %v1707_v59  ;;  %v1776_v34 = vadd.f32 %v8492_v23, %v1705_v37  ;;  %v2061_v31 = vadd.f32 1.0, %v10229_v29  ;;  %v8498_v5 = vld [vmem:[%s12226_s15 + $0x380] sm:$0xff] }
 0x25e   : > { %v12705_v32 = vpop.f32.mrb[54].mxu1  ;;  %v10233_v24 = vpop.eup %10232  ;;  %v2109_v58 = vmul.f32 %v10231_v60, %v12435_v52  ;;  %10250 = vrcp.f32 %v1854_v44  ;;  %v8572_v12 = vmul.f32 -1.442695, %v1775_v0  ;;  %v1778_v40 = vadd.f32 %v8494_v35, %v1596_v8  ;;  %v8499_v60 = vld [vmem:[%s12226_s15 + $0x388] sm:$0xff] }
 0x25f   : > { %v1598_v36 = vpop.f32.mrb[55].mxu0  ;;  %v1711_v16 = vpop.f32.mrb[55].mxu1  ;;  %v1950_v42 = vadd.f32 1.0, %v10233_v24  ;;  %10252 = vpow2.f32 %v8587_v57  ;;  %v8588_v38 = vmul.f32 -1.442695, %v1777_v13 }
 0x260   : > { %v10235_v43 = vpop.eup %10234  ;;  %v12710_v51 = vadd.f32 %v2125_v25, %v2109_v58  ;;  %10254 = vpow2.f32 %v8556_v11  ;;  %v1779_v50 = vadd.f32 %v8495_v48, %v1598_v36  ;;  %v1781_v22 = vadd.f32 %v8497_v1, %v1711_v16  ;;  %v8502_v58 = vld [vmem:[%s12226_s15 + $0x3a0] sm:$0xff]  ;;  %v8496_v36 = vld [vmem:[%s12226_s15 + $0x370] sm:$0xff] }
 0x261   : > { %v10237_v41 = vpop.eup %10236  ;;  %10256 = vrcp.f32 %v1950_v42  ;;  %v8557_v20 = vmul.f32 -1.442695, %v1778_v40 }
 0x262   : > { %v10239_v52 = vpop.eup %10238  ;;  %v1855_v54 = vadd.f32 1.0, %v10237_v41  ;;  %10258 = vpow2.f32 %v8572_v12  ;;  %v8573_v63 = vmul.f32 -1.442695, %v1779_v50  ;;  %v8589_v62 = vmul.f32 -1.442695, %v1781_v22  ;;  %v8503_v50 = vld [vmem:[%s12226_s15 + $0x3a8] sm:$0xff] }
 0x263   : > { %v10241_v26 = vpop.eup %10240  ;;  %10260 = vtanh.f32 %v1772_v19  ;;  %v2170_v55 = vmul.f32 %v10239_v52, %v12688_v33 }
 0x264   : > { %v12714_v18 = vpop.eup %10242  ;;  %10262 = vrcp.f32 %v1855_v54  ;;  %v1951_v4 = vadd.f32 1.0, %v10241_v26 }
 0x265   : > { %v10245_v49 = vpop.eup %10244  ;;  %10264 = vtanh.f32 %v12699_v39 }
 0x266   : > { %v10247_v61 = vpop.eup %10246  ;;  %10266 = vrcp.f32 %v1951_v4  ;;  %v2171_v7 = vmul.f32 %v10245_v49, %v10235_v43  ;;  %v1780_v4 = vadd.f32 %v8496_v36, %v12705_v32  ;;  %v8501_v49 = vld [vmem:[%s12226_s15 + $0x398] sm:$0xff] }
 0x267   : > { %v10249_v25 = vpop.eup %10248  ;;  %10268 = vpow2.f32 %v8588_v38 }
 0x268   : > { %v10251_v57 = vpop.eup %10250  ;;  %10270 = vpow2.f32 %v8557_v20  ;;  %v2313_v6 = vpack.c.bf16 %v2171_v7, %v2170_v55  ;;  %v2062_v8 = vadd.f32 1.0, %v10249_v25 }
 0x269   : > { %v10253_v44 = vpop.eup %10252  ;;  %v2126_v9 = vmul.f32 %v10251_v57, %v10247_v61  ;;  %10272 = vtanh.f32 %v1776_v34 }
 0x26a   : > { %v10255_v37 = vpop.eup %10254  ;;  %10274 = vpow2.f32 %v8573_v63  ;;  %2564 = vmatmul.mubr.bf16.gmra.mrb[72].mxu0 %v2313_v6  ;;  %2677 = vmatmul.mubr.bf16.gmra.mrb[72].mxu1 %v2313_v6  ;;  %v1602_v24 = vpop.f32.mrb[56].mxu0  ;;  %v2063_v43 = vadd.f32 1.0, %v10253_v44  ;;  %v8500_v63 = vld [vmem:[%s12226_s15 + $0x390] sm:$0xff] }
 0x26b   : > { %v10257_v59 = vpop.eup %10256  ;;  %v1856_v33 = vadd.f32 1.0, %v10255_v37  ;;  %10276 = vpow2.f32 %v8589_v62  ;;  %2573 = vmatprep.mubr.bf16.mxu0 %v11988_v2  ;;  %2686 = vmatprep.mubr.bf16.mxu1 %v11988_v2  ;;  %v1715_v29 = vpop.f32.mrb[56].mxu1  ;;  %v1782_v16 = vadd.f32 %v8498_v5, %v1602_v24  ;;  %v8506_v62 = vld [vmem:[%s12226_s15 + $0x3c0] sm:$0xff] }
 0x26c   : > { %v10259_v0 = vpop.eup %10258  ;;  %v2110_v35 = vmul.f32 %v10257_v59, %v12446_v45  ;;  %10278 = vtanh.f32 %v12710_v51  ;;  %v1604_v42 = vpop.f32.mrb[57].mxu0  ;;  %v1784_v37 = vadd.f32 %v8500_v63, %v1715_v29 }
 0x26d   : > { %v10261_v19 = vpop.eup %10260  ;;  %10280 = vrcp.f32 %v1856_v33  ;;  %v1952_v11 = vadd.f32 1.0, %v10259_v0  ;;  %v1717_v12 = vpop.f32.mrb[57].mxu1  ;;  %v1783_v45 = vadd.f32 %v8499_v60, %v1604_v42  ;;  %v8558_v54 = vmul.f32 -1.442695, %v1782_v16  ;;  %v8505_v16 = vld [vmem:[%s12226_s15 + $0x3b8] sm:$0xff] }
 0x26e   : > { %v10263_v13 = vpop.eup %10262  ;;  %10282 = vrcp.f32 %v2061_v31  ;;  %v12726_v48 = vadd.f32 %v2126_v9, %v2110_v35  ;;  %v1606_v40 = vpop.f32.mrb[58].mxu0  ;;  %v1785_v9 = vadd.f32 %v8501_v49, %v1717_v12 }
 0x26f   : > { %v12728_v1 = vpop.f32.mrb[58].mxu1  ;;  %v10265_v41 = vpop.eup %10264  ;;  %v2127_v52 = vmul.f32 %v10263_v13, %v10261_v19  ;;  %10284 = vrcp.f32 %v1952_v11  ;;  %v1786_v23 = vadd.f32 %v8502_v58, %v1606_v40  ;;  %v8574_v20 = vmul.f32 -1.442695, %v1783_v45 }
 0x270   : > { %v1608_v26 = vpop.f32.mrb[59].mxu0  ;;  %v1721_v38 = vpop.f32.mrb[59].mxu1  ;;  %10286 = vrcp.f32 %v2062_v8  ;;  %v8590_v36 = vmul.f32 -1.442695, %v1785_v9 }
 0x271   : > { %v10267_v22 = vpop.eup %10266  ;;  %10288 = vpow2.f32 %v8558_v54  ;;  %v8559_v7 = vmul.f32 -1.442695, %v1786_v23  ;;  %v1787_v25 = vadd.f32 %v8503_v50, %v1608_v26  ;;  %v2172_v50 = vmul.f32 %v10265_v41, %v12714_v18 }
 0x272   : > { %v10269_v34 = vpop.eup %10268  ;;  %v2111_v61 = vmul.f32 %v10267_v22, %v12451_v3  ;;  %10290 = vrcp.f32 %v2063_v43  ;;  %v1612_v31 = vpop.f32.mrb[60].mxu0  ;;  %v8507_v3 = vld [vmem:[%s12226_s15 + $0x3c8] sm:$0xff] }
 0x273   : > { %v10271_v55 = vpop.eup %10270  ;;  %10292 = vpow2.f32 %v8574_v20  ;;  %v12738_v5 = vpop.f32.mrb[60].mxu1  ;;  %v2064_v33 = vadd.f32 1.0, %v10269_v34  ;;  %v1790_v0 = vadd.f32 %v8506_v62, %v1612_v31  ;;  %v8575_v58 = vmul.f32 -1.442695, %v1787_v25 }
 0x274   : > { %v10273_v57 = vpop.eup %10272  ;;  %v12736_v6 = vadd.f32 %v2127_v52, %v2111_v61  ;;  %v1857_v44 = vadd.f32 1.0, %v10271_v55  ;;  %10294 = vtanh.f32 %v1780_v4  ;;  %v1614_v35 = vpop.f32.mrb[61].mxu0  ;;  %v8510_v52 = vld [vmem:[%s12226_s15 + $0x3e0] sm:$0xff]  ;;  %v8504_v4 = vld [vmem:[%s12226_s15 + $0x3b0] sm:$0xff]  ;;  %v1789_v20 = vadd.f32 %v8505_v16, %v1721_v38  ;;  %v8511_v55 = vld [vmem:[%s12226_s15 + $0x3e8] sm:$0xff] }
 0x275   : > { %v10275_v32 = vpop.eup %10274  ;;  %v1727_v8 = vpop.f32.mrb[61].mxu1  ;;  %v1791_v42 = vadd.f32 %v8507_v3, %v1614_v35  ;;  %v8560_v40 = vmul.f32 -1.442695, %v1790_v0 }
 0x276   : > { %v10277_v59 = vpop.eup %10276  ;;  %10296 = vrcp.f32 %v1857_v44  ;;  %v1953_v60 = vadd.f32 1.0, %v10275_v32  ;;  %v1616_v19 = vpop.f32.mrb[62].mxu0  ;;  %v8591_v9 = vmul.f32 -1.442695, %v1789_v20  ;;  %v8508_v32 = vld [vmem:[%s12226_s15 + $0x3d0] sm:$0xff] }
 0x277   : > { %v10279_v24 = vpop.eup %10278  ;;  %10298 = vpow2.f32 %v8559_v7  ;;  %v12741_v11 = vpop.f32.mrb[62].mxu1  ;;  %v2065_v23 = vadd.f32 1.0, %v10277_v59  ;;  %v8576_v61 = vmul.f32 -1.442695, %v1791_v42  ;;  %v1794_v63 = vadd.f32 %v8510_v52, %v1616_v19 }
 0x278   : > { %v10281_v29 = vpop.eup %10280  ;;  %10300 = vrcp.f32 %v1953_v60  ;;  %v1618_v12 = vpop.f32.mrb[63].mxu0  ;;  %v1792_v35 = vadd.f32 %v8508_v32, %v12738_v5 }
 0x279   : > { %v12744_v13 = vpop.f32.mrb[63].mxu1  ;;  %v10283_v43 = vpop.eup %10282  ;;  %v2128_v45 = vmul.f32 %v10281_v29, %v10273_v57  ;;  %10302 = vtanh.f32 %v1784_v37  ;;  %v8509_v57 = vld [vmem:[%s12226_s15 + $0x3d8] sm:$0xff]  ;;  %v1795_v37 = vadd.f32 %v8511_v55, %v1618_v12 }
 0x27a   : > { %v10285_v54 = vpop.eup %10284  ;;  %10304 = vrcp.f32 %v2064_v33  ;;  %v2173_v49 = vmul.f32 %v10283_v43, %v10279_v24  ;;  %v8561_v33 = vmul.f32 -1.442695, %v1794_v63  ;;  %v8513_v12 = vld [vmem:[%s12226_s15 + $0x3f8] sm:$0xff] }
 0x27b   : > { %v12748_v26 = vpop.eup %10286  ;;  %v2112_v22 = vmul.f32 %v10285_v54, %v12474_v17  ;;  %10306 = vpow2.f32 %v8575_v58  ;;  %v1788_v17 = vadd.f32 %v8504_v4, %v12728_v1  ;;  %v1793_v1 = vadd.f32 %v8509_v57, %v1727_v8 }
 0x27c   : > { %v10289_v34 = vpop.eup %10288  ;;  %10308 = vpow2.f32 %v8590_v36  ;;  %v2314_v41 = vpack.c.bf16 %v2173_v49, %v2172_v50  ;;  %v8577_v19 = vmul.f32 -1.442695, %v1795_v37  ;;  %v8512_v36 = vld [vmem:[%s12226_s15 + $0x3f0] sm:$0xff]  ;;  %v1797_v54 = vadd.f32 %v8513_v12, %v12744_v13 }
 0x27d   : > { %v12753_v7 = vpop.eup %10290  ;;  %v12755_v25 = vadd.f32 %v2128_v45, %v2112_v22  ;;  %v1858_v18 = vadd.f32 1.0, %v10289_v34  ;;  %10310 = vpow2.f32 %v8560_v40  ;;  %v8592_v8 = vmul.f32 -1.442695, %v1793_v1 }
 0x27e   : > { %v10293_v62 = vpop.eup %10292  ;;  %10312 = vrcp.f32 %v2065_v23  ;;  %2574 = vmatmul.mubr.bf16.gmra.mrb[76].mxu0 %v2314_v41  ;;  %2687 = vmatmul.mubr.bf16.gmra.mrb[76].mxu1 %v2314_v41  ;;  %v1796_v5 = vadd.f32 %v8512_v36, %v12741_v11 }
 0x27f   : > { %v10295_v38 = vpop.eup %10294  ;;  %10314 = vrcp.f32 %v1858_v18  ;;  %v1954_v44 = vadd.f32 1.0, %v10293_v62  ;;  %2583 = vmatprep.mubr.bf16.mxu0 %v11988_v2  ;;  %2696 = vmatprep.mubr.bf16.mxu1 %v11988_v2 }
 0x280   : > { %v10297_v31 = vpop.eup %10296  ;;  %10316 = vpow2.f32 %v8576_v61  ;;  %v8593_v61 = vmul.f32 -1.442695, %v1797_v54 }
 0x281   : > { %v10299_v3 = vpop.eup %10298  ;;  %v2129_v59 = vmul.f32 %v10297_v31, %v10295_v38  ;;  %10318 = vrcp.f32 %v1954_v44 }
 0x282   : > { %v10301_v60 = vpop.eup %10300  ;;  %v1859_v0 = vadd.f32 1.0, %v10299_v3  ;;  %10320 = vtanh.f32 %v1788_v17 }
 0x283   : > { %v10303_v24 = vpop.eup %10302  ;;  %v2113_v58 = vmul.f32 %v10301_v60, %v12479_v27  ;;  %10322 = vpow2.f32 %v8591_v9 }
 0x284   : > { %v12764_v29 = vpop.eup %10304  ;;  %10324 = vrcp.f32 %v1859_v0 }
 0x285   : > { %v10307_v16 = vpop.eup %10306  ;;  %v12767_v42 = vadd.f32 %v2129_v59, %v2113_v58  ;;  %10326 = vpow2.f32 %v8561_v33 }
 0x286   : > { %v10309_v43 = vpop.eup %10308  ;;  %v1955_v45 = vadd.f32 1.0, %v10307_v16  ;;  %10328 = vtanh.f32 %v1792_v35 }
 0x287   : > { %v10311_v40 = vpop.eup %10310  ;;  %10330 = vpow2.f32 %v8577_v19  ;;  %v2066_v18 = vadd.f32 1.0, %v10309_v43 }
 0x288   : > { %v10313_v27 = vpop.eup %10312  ;;  %10332 = vrcp.f32 %v1955_v45  ;;  %v1860_v52 = vadd.f32 1.0, %v10311_v40 }
 0x289   : > { %v10315_v23 = vpop.eup %10314  ;;  %10334 = vpow2.f32 %v8592_v8 }
 0x28a   : > { %v10317_v50 = vpop.eup %10316  ;;  %v2130_v22 = vmul.f32 %v10315_v23, %v10303_v24  ;;  %10336 = vrcp.f32 %v1860_v52 }
 0x28b   : > { %v10319_v4 = vpop.eup %10318  ;;  %v1956_v20 = vadd.f32 1.0, %v10317_v50  ;;  %10338 = vtanh.f32 %v1796_v5 }
 0x28c   : > { %v10321_v49 = vpop.eup %10320  ;;  %v2114_v34 = vmul.f32 %v10319_v4, %v12491_v10  ;;  %10340 = vtanh.f32 %v12726_v48 }
 0x28d   : > { %v10323_v11 = vpop.eup %10322  ;;  %10342 = vrcp.f32 %v1956_v20 }
 0x28e   : > { %v10325_v63 = vpop.eup %10324  ;;  %v12774_v55 = vadd.f32 %v2130_v22, %v2114_v34  ;;  %10344 = vtanh.f32 %v12736_v6  ;;  %v2067_v38 = vadd.f32 1.0, %v10323_v11 }
 0x28f   : > { %v10327_v13 = vpop.eup %10326  ;;  %v2131_v41 = vmul.f32 %v10325_v63, %v10321_v49  ;;  %10346 = vtanh.f32 %v12755_v25 }
 0x290   : > { %v10329_v62 = vpop.eup %10328  ;;  %v1861_v17 = vadd.f32 1.0, %v10327_v13  ;;  %10348 = vpow2.f32 %v8593_v61  ;;  %v9626_v13 = vld [vmem:[%s14586_s1 + $0x8] ss:$16 sps:$4 sm:$0xff]  }
 0x291   : > { %v10331_v57 = vpop.eup %10330  ;;  %10350 = vtanh.f32 %v12767_v42 }
 0x292   : > { %v10333_v10 = vpop.eup %10332  ;;  %10352 = vrcp.f32 %v1861_v17  ;;  %v1957_v44 = vadd.f32 1.0, %v10331_v57  ;;  %v9632_v17 = vld [vmem:[%s14586_s1 + $0x28] ss:$16 sps:$4 sm:$0xff]   ;;  %v9634_v57 = vld [vmem:[%s14586_s1 + $0x2c] ss:$16 sps:$4 sm:$0xff]  }
 0x293   : > { %v10335_v9 = vpop.eup %10334  ;;  %10354 = vrcp.f32 %v2066_v18  ;;  %v2115_v32 = vmul.f32 %v10333_v10, %v12493_v14  ;;  %v9628_v18 = vld [vmem:[%s14586_s1 + $0xc] ss:$16 sps:$4 sm:$0xff]   ;;  %v9635_v10 = vld [vmem:[%s14586_s1 + $0x60] ss:$16 sps:$4 sm:$0xff]  }
 0x294   : > { %v10337_v37 = vpop.eup %10336  ;;  %10356 = vrcp.f32 %v1957_v44  ;;  %v2068_v12 = vadd.f32 1.0, %v10335_v9  ;;  %3627 = vmatprep.subr.bf16.mxu1 %v9628_v18  ;;  %v9638_v44 = vld [vmem:[%s14586_s1 + $0x48] ss:$16 sps:$4 sm:$0xff]   ;;  %v9640_v9 = vld [vmem:[%s14586_s1 + $0x4c] ss:$16 sps:$4 sm:$0xff]  }
 0x295   : > { %v10339_v31 = vpop.eup %10338  ;;  %v12780_v3 = vadd.f32 %v2131_v41, %v2115_v32  ;;  %v2132_v59 = vmul.f32 %v10337_v37, %v10329_v62  ;;  %10358 = vtanh.f32 %v12774_v55  ;;  %v9629_v41 = vld [vmem:[%s14586_s1 + $0x40] ss:$16 sps:$4 sm:$0xff]   ;;  %v9631_v62 = vld [vmem:[%s14586_s1 + $0x44] ss:$16 sps:$4 sm:$0xff]   ;;  %3628 = vmatpush1.bf16.msra.mxu1 %v9626_v13  ;;  %v8601_v18 = vld [vmem:[%s12226_s15 + $0x438] sm:$0xff] }
 0x296   : > { %v10341_v1 = vpop.eup %10340  ;;  %10360 = vrcp.f32 %v2067_v38  ;;  %3518 = vmatprep.subr.bf16.mxu0 %v9631_v62  ;;  %3629 = vmatprep.subr.bf16.mxu1 %v9634_v57  ;;  %v9637_v38 = vld [vmem:[%s14586_s1 + $0x64] ss:$16 sps:$4 sm:$0xff]   ;;  %v9641_v32 = vld [vmem:[%s14586_s1 + $0x80] ss:$16 sps:$4 sm:$0xff]  }
 0x297   : > { %v10343_v33 = vpop.eup %10342  ;;  %10362 = vtanh.f32 %v12780_v3  ;;  %v2174_v24 = vmul.f32 %v10341_v1, %v12748_v26  ;;  %3519 = vmatpush1.bf16.msra.mxu0 %v9629_v41  ;;  %v9643_v37 = vld [vmem:[%s14586_s1 + $0x84] ss:$16 sps:$4 sm:$0xff]   ;;  %v9652_v1 = vld [vmem:[%s14586_s1 + $0x8c] ss:$16 sps:$4 sm:$0xff]  }
 0x298   : > { %v10345_v60 = vpop.eup %10344  ;;  %v2116_v0 = vmul.f32 %v10343_v33, %v12499_v30  ;;  %10364 = vrcp.f32 %v2068_v12  ;;  %3520 = vmatprep.subr.bf16.mxu0 %v9637_v38  ;;  %v9650_v33 = vld [vmem:[%s14586_s1 + $0x88] ss:$16 sps:$4 sm:$0xff]   ;;  %v8596_v57 = vld [vmem:[%s12226_s15 + $0x410] sm:$0xff] }
 0x299   : > { %v10347_v35 = vpop.eup %10346  ;;  %v2175_v14 = vmul.f32 %v10345_v60, %v12753_v7  ;;  %3630 = vmatpush1.bf16.msra.mxu1 %v9632_v17  ;;  %v9647_v60 = vld [vmem:[%s14586_s1 + $0xa0] ss:$16 sps:$4 sm:$0xff]   ;;  %v9662_v12 = vld [vmem:[%s14586_s1 + $0xc8] ss:$16 sps:$4 sm:$0xff]  }
 0x29a   : > { %v10349_v58 = vpop.eup %10348  ;;  %v12787_v19 = vadd.f32 %v2132_v59, %v2116_v0  ;;  %v2176_v43 = vmul.f32 %v10347_v35, %v12764_v29  ;;  %3631 = vmatprep.subr.bf16.mxu1 %v9640_v9  ;;  %v9644_v59 = vld [vmem:[%s14586_s1 + $0x68] ss:$16 sps:$4 sm:$0xff]   ;;  %v9649_v0 = vld [vmem:[%s14586_s1 + $0xa4] ss:$16 sps:$4 sm:$0xff]   ;;  %v9658_v35 = vld [vmem:[%s14586_s1 + $0xac] ss:$16 sps:$4 sm:$0xff]  }
 0x29b   : > { %v10351_v36 = vpop.eup %10350  ;;  %v2315_v16 = vpack.c.bf16 %v2175_v14, %v2174_v24  ;;  %v2069_v52 = vadd.f32 1.0, %v10349_v58  ;;  %3521 = vmatpush1.bf16.msra.mxu0 %v9635_v10  ;;  %v9656_v24 = vld [vmem:[%s14586_s1 + $0xa8] ss:$16 sps:$4 sm:$0xff]   ;;  %v9655_v14 = vld [vmem:[%s14586_s1 + $0xc4] ss:$16 sps:$4 sm:$0xff]  }
 0x29c   : > { %v10353_v8 = vpop.eup %10352  ;;  %v2177_v45 = vmul.f32 %v10351_v36, %v10313_v27  ;;  %10366 = vtanh.f32 %v12787_v19  ;;  %3522 = vmatprep.subr.bf16.mxu0 %v9643_v37  ;;  %v9653_v58 = vld [vmem:[%s14586_s1 + $0xc0] ss:$16 sps:$4 sm:$0xff]   ;;  %v9661_v36 = vld [vmem:[%s14586_s1 + $0xe4] ss:$16 sps:$4 sm:$0xff]  }
 0x29d   : > { %v10355_v40 = vpop.eup %10354  ;;  %v2133_v5 = vmul.f32 %v10353_v8, %v10339_v31  ;;  %2584 = vmatmul.mubr.bf16.gmra.mrb[80].mxu0 %v2315_v16  ;;  %2697 = vmatmul.mubr.bf16.gmra.mrb[80].mxu1 %v2315_v16  ;;  %10368 = vrcp.f32 %v2069_v52  ;;  %v9646_v31 = vld [vmem:[%s14586_s1 + $0x6c] ss:$16 sps:$4 sm:$0xff]   ;;  %v9659_v16 = vld [vmem:[%s14586_s1 + $0xe0] ss:$16 sps:$4 sm:$0xff]  }
 0x29e   : > { %v10357_v30 = vpop.eup %10356  ;;  %2593 = vmatprep.mubr.bf16.mxu0 %v11988_v2  ;;  %2706 = vmatprep.mubr.bf16.mxu1 %v11988_v2  ;;  %v2316_v26 = vpack.c.bf16 %v2177_v45, %v2176_v43  ;;  %v9664_v8 = vld [vmem:[%s14586_s1 + $0xcc] ss:$16 sps:$4 sm:$0xff]   ;;  %v9665_v45 = vld [vmem:[%s14586_s1 + $0xe8] ss:$16 sps:$4 sm:$0xff]   ;;  %v8600_v9 = vld [vmem:[%s12226_s15 + $0x430] sm:$0xff] }
 0x29f   : > { %v10359_v7 = vpop.eup %10358  ;;  %v2117_v54 = vmul.f32 %v10357_v30, %v12501_v47  ;;  %3632 = vmatpush1.bf16.msra.mxu1 %v9638_v44  ;;  %3523 = vmatpush1.bf16.msra.mxu0 %v9641_v32  ;;  %v9667_v43 = vld [vmem:[%s14586_s1 + $0xec] ss:$16 sps:$4 sm:$0xff]  }
 0x2a0   : > { %v10361_v23 = vpop.eup %10360  ;;  %v2178_v29 = vmul.f32 %v10359_v7, %v10355_v40  ;;  %3633 = vmatprep.subr.bf16.mxu1 %v9646_v31  ;;  %3524 = vmatprep.subr.bf16.mxu0 %v9649_v0  ;;  %v8594_v40 = vld [vmem:[%s12226_s15 + $0x400] sm:$0xff] }
 0x2a1   : > { %v10363_v50 = vpop.eup %10362  ;;  %v12793_v22 = vadd.f32 %v2133_v5, %v2117_v54  ;;  %v8595_v5 = vld [vmem:[%s12226_s15 + $0x408] sm:$0xff]  ;;  %v8602_v0 = vld [vmem:[%s12226_s15 + $0x440] sm:$0xff] }
 0x2a2   : > { %v2179_v27 = vmul.f32 %v10363_v50, %v10361_v23  ;;  %v10365_v47 = vpop.eup %10364  ;;  %v8599_v50 = vld [vmem:[%s12226_s15 + $0x428] sm:$0xff] }
 0x2a3   : > { %10370 = vtanh.f32 %v12793_v22  ;;  %3634 = vmatpush1.bf16.msra.mxu1 %v9644_v59  ;;  %3525 = vmatpush1.bf16.msra.mxu0 %v9647_v60 }
 0x2a4   : > { %v2317_v4 = vpack.c.bf16 %v2179_v27, %v2178_v29  ;;  %3635 = vmatprep.subr.bf16.mxu1 %v9652_v1  ;;  %3526 = vmatprep.subr.bf16.mxu0 %v9655_v14 }
 0x2a5   : > { %2594 = vmatmul.mubr.bf16.gmra.mrb[84].mxu0 %v2316_v26  ;;  %2707 = vmatmul.mubr.bf16.gmra.mrb[84].mxu1 %v2316_v26  ;;  %v8598_v26 = vld [vmem:[%s12226_s15 + $0x420] sm:$0xff] }
 0x2a6   : > { %2603 = vmatprep.mubr.bf16.mxu0 %v11988_v2  ;;  %2716 = vmatprep.mubr.bf16.mxu1 %v11988_v2  ;;  %v10367_v20 = vpop.eup %10366 }
 0x2a7   : > { %v10369_v49 = vpop.eup %10368  ;;  %v2180_v61 = vmul.f32 %v10367_v20, %v10365_v47  ;;  %3636 = vmatpush1.bf16.msra.mxu1 %v9650_v33  ;;  %3527 = vmatpush1.bf16.msra.mxu0 %v9653_v58 }
 0x2a8   : > { %3637 = vmatprep.subr.bf16.mxu1 %v9658_v35  ;;  %3528 = vmatprep.subr.bf16.mxu0 %v9661_v36 }
 0x2ab   : > { %3638 = vmatpush1.bf16.msra.mxu1 %v9656_v24  ;;  %3529 = vmatpush1.bf16.msra.mxu0 %v9659_v16  ;;  %v8603_v24 = vld [vmem:[%s12226_s15 + $0x448] sm:$0xff]  ;;  %v8606_v16 = vld [vmem:[%s12226_s15 + $0x460] sm:$0xff] }
 0x2ac   : > { %3639 = vmatprep.subr.bf16.mxu1 %v9664_v8 }
 0x2ad   : > { %v10371_v34 = vpop.eup %10370  ;;  %2604 = vmatmul.mubr.bf16.gmra.mrb[88].mxu0 %v2317_v4  ;;  %2717 = vmatmul.mubr.bf16.gmra.mrb[88].mxu1 %v2317_v4 }
 0x2ae   : > { %2613 = vmatprep.mubr.bf16.mxu0 %v11988_v2  ;;  %2726 = vmatprep.mubr.bf16.mxu1 %v11988_v2  ;;  %v2181_v11 = vmul.f32 %v10371_v34, %v10369_v49 }
 0x2af   : > { %3640 = vmatpush1.bf16.msra.mxu1 %v9662_v12 }
 0x2b0   : > { %v2318_v63 = vpack.c.bf16 %v2181_v11, %v2180_v61  ;;  %3641 = vmatprep.subr.bf16.mxu1 %v9667_v43  ;;  %v8597_v11 = vld [vmem:[%s12226_s15 + $0x418] sm:$0xff] }
 0x2b3   : > { %3642 = vmatpush1.bf16.msra.mxu1 %v9665_v45  ;;  %v8607_v45 = vld [vmem:[%s12226_s15 + $0x468] sm:$0xff] }
 0x2b5   : > { %2614 = vmatmul.mubr.bf16.gmra.mrb[92].mxu0 %v2318_v63  ;;  %2727 = vmatmul.mubr.bf16.gmra.mrb[92].mxu1 %v2318_v63 }
 0x2b6   : > { %3546 = vmatprep.mubr.bf16.mxu0 %v11988_v2  ;;  %3659 = vmatprep.mubr.bf16.mxu1 %v11988_v2 }
 0x315   : > { %v2545_v30 = vpop.f32.mrb[64].mxu0  ;;  %v2658_v52 = vpop.f32.mrb[64].mxu1 }
 0x316   : > { %v2737_v7 = vadd.f32 %v8594_v40, %v2545_v30  ;;  %v2547_v54 = vpop.f32.mrb[65].mxu0  ;;  %v2660_v23 = vpop.f32.mrb[65].mxu1  ;;  %v2739_v44 = vadd.f32 %v8596_v57, %v2658_v52 }
 0x317   : > { %v2738_v29 = vadd.f32 %v8595_v5, %v2547_v54  ;;  %v2549_v27 = vpop.f32.mrb[66].mxu0  ;;  %v2662_v4 = vpop.f32.mrb[66].mxu1  ;;  %v2740_v62 = vadd.f32 %v8597_v11, %v2660_v23  ;;  %v8605_v5 = vld [vmem:[%s12226_s15 + $0x458] sm:$0xff] }
 0x318   : > { %v8690_v47 = vmul.f32 -1.442695, %v2737_v7  ;;  %v2741_v20 = vadd.f32 %v8598_v26, %v2549_v27  ;;  %v2551_v49 = vpop.f32.mrb[67].mxu0  ;;  %v2664_v34 = vpop.f32.mrb[67].mxu1  ;;  %v2743_v59 = vadd.f32 %v8600_v9, %v2662_v4  ;;  %v8609_v23 = vld [vmem:[%s12226_s15 + $0x478] sm:$0xff] }
 0x319   : > { %v8706_v61 = vmul.f32 -1.442695, %v2738_v29  ;;  %v2742_v63 = vadd.f32 %v8599_v50, %v2551_v49  ;;  %v2744_v17 = vadd.f32 %v8601_v18, %v2664_v34  ;;  %v8722_v10 = vmul.f32 -1.442695, %v2740_v62 }
 0x31a   : > { %10372 = vpow2.f32 %v8690_v47  ;;  %v8691_v13 = vmul.f32 -1.442695, %v2741_v20 }
 0x31b   : > { %10374 = vpow2.f32 %v8706_v61  ;;  %v8707_v41 = vmul.f32 -1.442695, %v2742_v63  ;;  %v8723_v38 = vmul.f32 -1.442695, %v2744_v17 }
 0x31c   : > { %10376 = vpow2.f32 %v8691_v13 }
 0x31d   : > { %10378 = vpow2.f32 %v8707_v41 }
 0x31e   : > { %10380 = vpow2.f32 %v8722_v10  ;;  %v8604_v10 = vld [vmem:[%s12226_s15 + $0x450] sm:$0xff] }
 0x31f   : > { %10382 = vpow2.f32 %v8723_v38 }
 0x320   : > { %10384 = vtanh.f32 %v2739_v44 }
 0x324   : > { %v10373_v32 = vpop.eup %10372 }
 0x325   : > { %v10375_v37 = vpop.eup %10374  ;;  %v2849_v31 = vadd.f32 1.0, %v10373_v32 }
 0x326   : > { %v2945_v1 = vadd.f32 1.0, %v10375_v37  ;;  %v10377_v33 = vpop.eup %10376 }
 0x327   : > { %10386 = vrcp.f32 %v2849_v31  ;;  %v2850_v60 = vadd.f32 1.0, %v10377_v33  ;;  %v10379_v35 = vpop.eup %10378  ;;  %v8608_v33 = vld [vmem:[%s12226_s15 + $0x470] sm:$0xff] }
 0x328   : > { %10388 = vrcp.f32 %v2945_v1  ;;  %v2946_v14 = vadd.f32 1.0, %v10379_v35  ;;  %v10381_v29 = vpop.eup %10380 }
 0x329   : > { %10390 = vtanh.f32 %v2743_v59  ;;  %v10383_v47 = vpop.eup %10382  ;;  %v3057_v13 = vadd.f32 1.0, %v10381_v29 }
 0x32a   : > { %10392 = vrcp.f32 %v2850_v60  ;;  %v10385_v34 = vpop.eup %10384  ;;  %v3058_v62 = vadd.f32 1.0, %v10383_v47 }
 0x32b   : > { %10394 = vrcp.f32 %v2946_v14 }
 0x32c   : > { %v2555_v58 = vpop.f32.mrb[68].mxu0  ;;  %v2668_v36 = vpop.f32.mrb[68].mxu1 }
 0x32d   : > { %v2745_v8 = vadd.f32 %v8602_v0, %v2555_v58  ;;  %v2557_v12 = vpop.f32.mrb[69].mxu0  ;;  %v2670_v43 = vpop.f32.mrb[69].mxu1  ;;  %v2747_v59 = vadd.f32 %v8604_v10, %v2668_v36  ;;  %v8610_v0 = vld [vmem:[%s12226_s15 + $0x480] sm:$0xff]  ;;  %v8611_v58 = vld [vmem:[%s12226_s15 + $0x488] sm:$0xff]  ;;  %v8617_v10 = vld [vmem:[%s12226_s15 + $0x4b8] sm:$0xff] }
 0x32e   : > { %v2746_v40 = vadd.f32 %v8603_v24, %v2557_v12  ;;  %v2559_v30 = vpop.f32.mrb[70].mxu0  ;;  %v2672_v52 = vpop.f32.mrb[70].mxu1  ;;  %v2748_v20 = vadd.f32 %v8605_v5, %v2670_v43 }
 0x32f   : > { %v8692_v26 = vmul.f32 -1.442695, %v2745_v8  ;;  %v2749_v7 = vadd.f32 %v8606_v16, %v2559_v30  ;;  %v2561_v54 = vpop.f32.mrb[71].mxu0  ;;  %v2674_v50 = vpop.f32.mrb[71].mxu1  ;;  %v2751_v14 = vadd.f32 %v8608_v33, %v2672_v52  ;;  %v8614_v8 = vld [vmem:[%s12226_s15 + $0x4a0] sm:$0xff]  ;;  %v8615_v52 = vld [vmem:[%s12226_s15 + $0x4a8] sm:$0xff] }
 0x330   : > { %v8708_v27 = vmul.f32 -1.442695, %v2746_v40  ;;  %v2750_v4 = vadd.f32 %v8607_v45, %v2561_v54  ;;  %v2752_v11 = vadd.f32 %v8609_v23, %v2674_v50  ;;  %v8724_v38 = vmul.f32 -1.442695, %v2748_v20 }
 0x331   : > { %10396 = vpow2.f32 %v8692_v26  ;;  %v8693_v49 = vmul.f32 -1.442695, %v2749_v7  ;;  %v10387_v63 = vpop.eup %10386 }
 0x332   : > { %10398 = vpow2.f32 %v8708_v27  ;;  %v8709_v61 = vmul.f32 -1.442695, %v2750_v4  ;;  %v10389_v18 = vpop.eup %10388  ;;  %v3121_v41 = vmul.f32 %v10387_v63, %v10385_v34  ;;  %v8725_v9 = vmul.f32 -1.442695, %v2752_v11  ;;  %v8613_v11 = vld [vmem:[%s12226_s15 + $0x498] sm:$0xff] }
 0x333   : > { %10400 = vpow2.f32 %v8693_v49  ;;  %v10391_v17 = vpop.eup %10390  ;;  %v3105_v57 = vmul.f32 %v10389_v18, %v12615_v15 }
 0x334   : > { %v10393_v44 = vpop.eup %10392  ;;  %10402 = vpow2.f32 %v8709_v61 }
 0x335   : > { %v12903_v32 = vadd.f32 %v3121_v41, %v3105_v57  ;;  %10404 = vrcp.f32 %v3057_v13  ;;  %v3122_v37 = vmul.f32 %v10393_v44, %v10391_v17  ;;  %v10395_v31 = vpop.eup %10394 }
 0x336   : > { %10406 = vrcp.f32 %v3058_v62  ;;  %v3106_v1 = vmul.f32 %v10395_v31, %v12621_v56  ;;  %v8612_v62 = vld [vmem:[%s12226_s15 + $0x490] sm:$0xff] }
 0x337   : > { %10408 = vpow2.f32 %v8724_v38 }
 0x338   : > { %10410 = vpow2.f32 %v8725_v9  ;;  %v12908_v60 = vadd.f32 %v3122_v37, %v3106_v1 }
 0x339   : > { %10412 = vtanh.f32 %v12903_v32 }
 0x33a   : > { %10414 = vtanh.f32 %v2747_v59 }
 0x33b   : > { %v10397_v15 = vpop.eup %10396  ;;  %10416 = vtanh.f32 %v12908_v60 }
 0x33c   : > { %v10399_v35 = vpop.eup %10398  ;;  %v2851_v24 = vadd.f32 1.0, %v10397_v15 }
 0x33d   : > { %v2947_v36 = vadd.f32 1.0, %v10399_v35  ;;  %v2565_v56 = vpop.f32.mrb[72].mxu0  ;;  %v2678_v16 = vpop.f32.mrb[72].mxu1 }
 0x33e   : > { %v10401_v12 = vpop.eup %10400  ;;  %10418 = vrcp.f32 %v2851_v24  ;;  %v2753_v43 = vadd.f32 %v8610_v0, %v2565_v56  ;;  %v2567_v45 = vpop.f32.mrb[73].mxu0  ;;  %v2755_v15 = vadd.f32 %v8612_v62, %v2678_v16 }
 0x33f   : > { %v2680_v40 = vpop.f32.mrb[73].mxu1  ;;  %10420 = vrcp.f32 %v2947_v36  ;;  %v2852_v5 = vadd.f32 1.0, %v10401_v12  ;;  %v2754_v30 = vadd.f32 %v8611_v58, %v2567_v45  ;;  %v2569_v26 = vpop.f32.mrb[74].mxu0  ;;  %v8616_v45 = vld [vmem:[%s12226_s15 + $0x4b0] sm:$0xff] }
 0x340   : > { %v12914_v7 = vpop.f32.mrb[74].mxu1  ;;  %v10403_v54 = vpop.eup %10402  ;;  %10422 = vtanh.f32 %v2751_v14  ;;  %v8694_v23 = vmul.f32 -1.442695, %v2753_v43  ;;  %v2757_v50 = vadd.f32 %v8614_v8, %v2569_v26  ;;  %v2756_v17 = vadd.f32 %v8613_v11, %v2680_v40  ;;  %v8623_v11 = vld [vmem:[%s12226_s15 + $0x4e8] sm:$0xff] }
 0x341   : > { %v2571_v29 = vpop.f32.mrb[75].mxu0  ;;  %v2684_v27 = vpop.f32.mrb[75].mxu1  ;;  %10424 = vrcp.f32 %v2852_v5  ;;  %v2948_v47 = vadd.f32 1.0, %v10403_v54  ;;  %v8710_v49 = vmul.f32 -1.442695, %v2754_v30  ;;  %v8618_v5 = vld [vmem:[%s12226_s15 + $0x4c0] sm:$0xff] }
 0x342   : > { %v10405_v4 = vpop.eup %10404  ;;  %10426 = vpow2.f32 %v8694_v23  ;;  %v2758_v34 = vadd.f32 %v8615_v52, %v2571_v29  ;;  %v8695_v13 = vmul.f32 -1.442695, %v2757_v50  ;;  %v2760_v0 = vadd.f32 %v8617_v10, %v2684_v27  ;;  %v8619_v54 = vld [vmem:[%s12226_s15 + $0x4c8] sm:$0xff]  ;;  %v8622_v27 = vld [vmem:[%s12226_s15 + $0x4e0] sm:$0xff] }
 0x343   : > { %v10407_v20 = vpop.eup %10406  ;;  %10428 = vrcp.f32 %v2948_v47  ;;  %v8726_v14 = vmul.f32 -1.442695, %v2756_v17  ;;  %v2759_v52 = vadd.f32 %v8616_v45, %v12914_v7  ;;  %v9671_v45 = vld [vmem:[%s14586_s1 + $0x20] ss:$16 sps:$4 sm:$0xff]  }
 0x344   : > { %v10409_v61 = vpop.eup %10408  ;;  %10430 = vpow2.f32 %v8710_v49  ;;  %v8711_v57 = vmul.f32 -1.442695, %v2758_v34  ;;  %v8727_v40 = vmul.f32 -1.442695, %v2760_v0  ;;  %v9668_v0 = vld [vmem:[%s14586_s1] ss:$16 sps:$4 sm:$0xff]  }
 0x345   : > { %v10411_v63 = vpop.eup %10410  ;;  %v3059_v44 = vadd.f32 1.0, %v10409_v61  ;;  %10432 = vpow2.f32 %v8695_v13 }
 0x346   : > { %v10413_v18 = vpop.eup %10412  ;;  %v3060_v37 = vadd.f32 1.0, %v10411_v63  ;;  %10434 = vpow2.f32 %v8711_v57 }
 0x347   : > { %v10415_v41 = vpop.eup %10414  ;;  %v3169_v31 = vmul.f32 %v10413_v18, %v10405_v4  ;;  %10436 = vrcp.f32 %v3059_v44  ;;  %v8621_v18 = vld [vmem:[%s12226_s15 + $0x4d8] sm:$0xff] }
 0x348   : > { %v10417_v38 = vpop.eup %10416  ;;  %10438 = vrcp.f32 %v3060_v37 }
 0x349   : > { %v10419_v9 = vpop.eup %10418  ;;  %v3170_v59 = vmul.f32 %v10417_v38, %v10407_v20  ;;  %10440 = vtanh.f32 %v2755_v15  ;;  %v8625_v38 = vld [vmem:[%s12226_s15 + $0x4f8] sm:$0xff] }
 0x34a   : > { %v10421_v1 = vpop.eup %10420  ;;  %v3123_v33 = vmul.f32 %v10419_v9, %v10415_v41  ;;  %10442 = vpow2.f32 %v8726_v14  ;;  %v9673_v14 = vld [vmem:[%s14586_s1 + $0x24] ss:$16 sps:$4 sm:$0xff]  }
 0x34b   : > { %v10423_v35 = vpop.eup %10422  ;;  %v3107_v24 = vmul.f32 %v10421_v1, %v12647_v46  ;;  %v3314_v58 = vpack.c.bf16 %v3170_v59, %v3169_v31 }
 0x34c   : > { %v10425_v36 = vpop.eup %10424 }
 0x34d   : > { %v10427_v56 = vpop.eup %10426  ;;  %v12921_v8 = vadd.f32 %v3123_v33, %v3107_v24  ;;  %v3124_v12 = vmul.f32 %v10425_v36, %v10423_v35  ;;  %3547 = vmatmul.mubr.bf16.vlgmr.msra.gmra.mrb[96].mxu0 %v3314_v58  ;;  %3660 = vmatmul.mubr.bf16.vlgmr.msra.gmra.mrb[96].mxu1 %v3314_v58  ;;  %v9670_v35 = vld [vmem:[%s14586_s1 + $0x4] ss:$16 sps:$4 sm:$0xff]  }
 0x34e   : > { %v10429_v16 = vpop.eup %10428  ;;  %v2853_v43 = vadd.f32 1.0, %v10427_v56  ;;  %3556 = vmatprep.mubr.bf16.mxu0 %v11988_v2  ;;  %3669 = vmatprep.mubr.bf16.mxu1 %v11988_v2 }
 0x34f   : > { %v3108_v46 = vmul.f32 %v10429_v16, %v12653_v28  ;;  %v10431_v30 = vpop.eup %10430  ;;  %4517 = vmatprep.subr.bf16.mxu0 %v9670_v35  ;;  %v8620_v16 = vld [vmem:[%s12226_s15 + $0x4d0] sm:$0xff] }
 0x350   : > { %10444 = vrcp.f32 %v2853_v43  ;;  %v2949_v23 = vadd.f32 1.0, %v10431_v30  ;;  %v10433_v4 = vpop.eup %10432  ;;  %4518 = vmatpush1.bf16.msra.mxu0 %v9668_v0  ;;  %v8629_v0 = vld [vmem:[%s12226_s15 + $0x518] sm:$0xff] }
 0x351   : > { %v12928_v26 = vadd.f32 %v3124_v12, %v3108_v46  ;;  %10446 = vtanh.f32 %v12921_v8  ;;  %v2575_v50 = vpop.f32.mrb[76].mxu0  ;;  %v2688_v29 = vpop.f32.mrb[76].mxu1  ;;  %v2854_v49 = vadd.f32 1.0, %v10433_v4  ;;  %4519 = vmatprep.subr.bf16.mxu0 %v9673_v14 }
 0x352   : > { %10448 = vpow2.f32 %v8727_v40  ;;  %v2761_v28 = vadd.f32 %v8618_v5, %v2575_v50  ;;  %v2577_v47 = vpop.f32.mrb[77].mxu0  ;;  %v2690_v20 = vpop.f32.mrb[77].mxu1 }
 0x353   : > { %10450 = vtanh.f32 %v12928_v26  ;;  %v2762_v7 = vadd.f32 %v8619_v54, %v2577_v47  ;;  %v2579_v34 = vpop.f32.mrb[78].mxu0  ;;  %v12935_v61 = vpop.f32.mrb[78].mxu1  ;;  %v2764_v59 = vadd.f32 %v8621_v18, %v2690_v20 }
 0x354   : > { %10452 = vrcp.f32 %v2949_v23  ;;  %v10435_v63 = vpop.eup %10434  ;;  %v8696_v13 = vmul.f32 -1.442695, %v2761_v28  ;;  %v2765_v41 = vadd.f32 %v8622_v27, %v2579_v34  ;;  %v2581_v62 = vpop.f32.mrb[79].mxu0  ;;  %v2763_v27 = vadd.f32 %v8620_v16, %v2688_v29  ;;  %4520 = vmatpush1.bf16.msra.mxu0 %v9671_v45  ;;  %v8631_v45 = vld [vmem:[%s12226_s15 + $0x528] sm:$0xff] }
 0x355   : > { %10454 = vtanh.f32 %v2759_v52  ;;  %v2694_v17 = vpop.f32.mrb[79].mxu1  ;;  %v10437_v57 = vpop.eup %10436  ;;  %v2950_v10 = vadd.f32 1.0, %v10435_v63  ;;  %v8712_v9 = vmul.f32 -1.442695, %v2762_v7  ;;  %v2766_v37 = vadd.f32 %v8623_v11, %v2581_v62  ;;  %v8624_v63 = vld [vmem:[%s12226_s15 + $0x4f0] sm:$0xff] }
 0x356   : > { %10456 = vrcp.f32 %v2854_v49  ;;  %v10439_v44 = vpop.eup %10438  ;;  %v8697_v33 = vmul.f32 -1.442695, %v2765_v41  ;;  %v2768_v15 = vadd.f32 %v8625_v38, %v2694_v17  ;;  %v8728_v43 = vmul.f32 -1.442695, %v2764_v59  ;;  %v8626_v59 = vld [vmem:[%s12226_s15 + $0x500] sm:$0xff] }
 0x357   : > { %10458 = vpow2.f32 %v8696_v13  ;;  %v10441_v31 = vpop.eup %10440  ;;  %v8713_v56 = vmul.f32 -1.442695, %v2766_v37  ;;  %v2767_v18 = vadd.f32 %v8624_v63, %v12935_v61 }
 0x358   : > { %10460 = vrcp.f32 %v2950_v10  ;;  %v10443_v1 = vpop.eup %10442  ;;  %v8729_v46 = vmul.f32 -1.442695, %v2768_v15  ;;  %v8627_v15 = vld [vmem:[%s12226_s15 + $0x508] sm:$0xff] }
 0x359   : > { %10462 = vpow2.f32 %v8712_v9  ;;  %v3061_v30 = vadd.f32 1.0, %v10443_v1 }
 0x35a   : > { %v10445_v24 = vpop.eup %10444  ;;  %10464 = vpow2.f32 %v8697_v33 }
 0x35b   : > { %v10447_v58 = vpop.eup %10446  ;;  %v3125_v36 = vmul.f32 %v10445_v24, %v10441_v31  ;;  %10466 = vpow2.f32 %v8713_v56 }
 0x35c   : > { %v10449_v12 = vpop.eup %10448  ;;  %v3171_v52 = vmul.f32 %v10447_v58, %v10437_v57  ;;  %10468 = vpow2.f32 %v8728_v43  ;;  %v8630_v58 = vld [vmem:[%s12226_s15 + $0x520] sm:$0xff] }
 0x35d   : > { %v10451_v40 = vpop.eup %10450  ;;  %v3062_v7 = vadd.f32 1.0, %v10449_v12  ;;  %10470 = vpow2.f32 %v8729_v46  ;;  %v8628_v12 = vld [vmem:[%s12226_s15 + $0x510] sm:$0xff] }
 0x35e   : > { %v10453_v5 = vpop.eup %10452  ;;  %v3172_v54 = vmul.f32 %v10451_v40, %v10439_v44  ;;  %10472 = vrcp.f32 %v3061_v30 }
 0x35f   : > { %v10455_v23 = vpop.eup %10454  ;;  %v3109_v50 = vmul.f32 %v10453_v5, %v12671_v53  ;;  %10474 = vtanh.f32 %v2763_v27 }
 0x360   : > { %v10457_v4 = vpop.eup %10456  ;;  %v3315_v28 = vpack.c.bf16 %v3172_v54, %v3171_v52 }
 0x361   : > { %v10459_v47 = vpop.eup %10458  ;;  %v12954_v20 = vadd.f32 %v3125_v36, %v3109_v50  ;;  %v3126_v49 = vmul.f32 %v10457_v4, %v10455_v23 }
 0x362   : > { %v10461_v34 = vpop.eup %10460  ;;  %v2855_v11 = vadd.f32 1.0, %v10459_v47  ;;  %3557 = vmatmul.mubr.bf16.gmra.mrb[100].mxu0 %v3315_v28  ;;  %3670 = vmatmul.mubr.bf16.gmra.mrb[100].mxu1 %v3315_v28  ;;  %v8633_v47 = vld [vmem:[%s12226_s15 + $0x538] sm:$0xff] }
 0x363   : > { %v3110_v53 = vmul.f32 %v10461_v34, %v12685_v21  ;;  %3566 = vmatprep.mubr.bf16.mxu0 %v11988_v2  ;;  %3679 = vmatprep.mubr.bf16.mxu1 %v11988_v2  ;;  %v10463_v29 = vpop.eup %10462 }
 0x364   : > { %10476 = vrcp.f32 %v2855_v11  ;;  %v2951_v41 = vadd.f32 1.0, %v10463_v29  ;;  %v10465_v62 = vpop.eup %10464 }
 0x365   : > { %v12960_v13 = vadd.f32 %v3126_v49, %v3110_v53  ;;  %10478 = vrcp.f32 %v3062_v7  ;;  %v2856_v21 = vadd.f32 1.0, %v10465_v62  ;;  %v10467_v17 = vpop.eup %10466  ;;  %v8632_v62 = vld [vmem:[%s12226_s15 + $0x530] sm:$0xff] }
 0x366   : > { %10480 = vtanh.f32 %v12954_v20  ;;  %v10469_v57 = vpop.eup %10468  ;;  %v2952_v10 = vadd.f32 1.0, %v10467_v17 }
 0x367   : > { %10482 = vtanh.f32 %v12960_v13  ;;  %v10471_v38 = vpop.eup %10470  ;;  %v3063_v9 = vadd.f32 1.0, %v10469_v57 }
 0x368   : > { %10484 = vrcp.f32 %v2951_v41  ;;  %v10473_v44 = vpop.eup %10472  ;;  %v3064_v31 = vadd.f32 1.0, %v10471_v38 }
 0x369   : > { %10486 = vtanh.f32 %v2767_v18  ;;  %v10475_v61 = vpop.eup %10474 }
 0x36a   : > { %10488 = vrcp.f32 %v2856_v21 }
 0x36b   : > { %10490 = vrcp.f32 %v2952_v10  ;;  %v8634_v10 = vld [vmem:[%s12226_s15 + $0x540] sm:$0xff] }
 0x36c   : > { %10492 = vrcp.f32 %v3063_v9  ;;  %v8637_v9 = vld [vmem:[%s12226_s15 + $0x558] sm:$0xff] }
 0x36d   : > { %10494 = vrcp.f32 %v3064_v31 }
 0x36e   : > { %v10477_v37 = vpop.eup %10476 }
 0x36f   : > { %v10479_v1 = vpop.eup %10478  ;;  %v3127_v33 = vmul.f32 %v10477_v37, %v10475_v61  ;;  %v8635_v61 = vld [vmem:[%s12226_s15 + $0x548] sm:$0xff] }
 0x370   : > { %v10481_v35 = vpop.eup %10480  ;;  %v2585_v24 = vpop.f32.mrb[80].mxu0 }
 0x371   : > { %v2698_v14 = vpop.f32.mrb[80].mxu1  ;;  %v10483_v36 = vpop.eup %10482  ;;  %v2769_v56 = vadd.f32 %v8626_v59, %v2585_v24  ;;  %v3173_v7 = vmul.f32 %v10481_v35, %v10473_v44 }
 0x372   : > { %v2587_v16 = vpop.f32.mrb[81].mxu0  ;;  %v2700_v43 = vpop.f32.mrb[81].mxu1  ;;  %v3174_v54 = vmul.f32 %v10483_v36, %v10479_v1  ;;  %v2771_v11 = vadd.f32 %v8628_v12, %v2698_v14 }
 0x373   : > { %v10485_v40 = vpop.eup %10484  ;;  %v2770_v46 = vadd.f32 %v8627_v15, %v2587_v16  ;;  %v2772_v5 = vadd.f32 %v8629_v0, %v2700_v43  ;;  %v2589_v30 = vpop.f32.mrb[82].mxu0  ;;  %v8698_v27 = vmul.f32 -1.442695, %v2769_v56 }
 0x374   : > { %v2702_v52 = vpop.f32.mrb[82].mxu1  ;;  %v10487_v23 = vpop.eup %10486  ;;  %v3111_v50 = vmul.f32 %v10485_v40, %v12699_v39  ;;  %v2773_v4 = vadd.f32 %v8630_v58, %v2589_v30  ;;  %v3316_v38 = vpack.c.bf16 %v3174_v54, %v3173_v7 }
 0x375   : > { %v2591_v28 = vpop.f32.mrb[83].mxu0  ;;  %v2704_v49 = vpop.f32.mrb[83].mxu1  ;;  %v8714_v63 = vmul.f32 -1.442695, %v2770_v46  ;;  %v8730_v53 = vmul.f32 -1.442695, %v2772_v5  ;;  %10496 = vpow2.f32 %v8698_v27  ;;  %v2775_v37 = vadd.f32 %v8632_v62, %v2702_v52 }
 0x376   : > { %v10489_v34 = vpop.eup %10488  ;;  %v2774_v29 = vadd.f32 %v8631_v45, %v2591_v28  ;;  %v12973_v18 = vadd.f32 %v3127_v33, %v3111_v50  ;;  %v8699_v39 = vmul.f32 -1.442695, %v2773_v4  ;;  %v2776_v57 = vadd.f32 %v8633_v47, %v2704_v49  ;;  %v8638_v33 = vld [vmem:[%s12226_s15 + $0x560] sm:$0xff]  ;;  %3567 = vmatmul.mubr.bf16.gmra.mrb[104].mxu0 %v3316_v38  ;;  %3680 = vmatmul.mubr.bf16.gmra.mrb[104].mxu1 %v3316_v38  ;;  %v8639_v45 = vld [vmem:[%s12226_s15 + $0x568] sm:$0xff]  ;;  %v8640_v50 = vld [vmem:[%s12226_s15 + $0x570] sm:$0xff] }
 0x377   : > { %v3128_v41 = vmul.f32 %v10489_v34, %v10487_v23  ;;  %v10491_v21 = vpop.eup %10490  ;;  %10498 = vpow2.f32 %v8714_v63  ;;  %3576 = vmatprep.mubr.bf16.mxu0 %v11988_v2  ;;  %3689 = vmatprep.mubr.bf16.mxu1 %v11988_v2  ;;  %v8641_v4 = vld [vmem:[%s12226_s15 + $0x578] sm:$0xff] }
 0x378   : > { %v8715_v17 = vmul.f32 -1.442695, %v2774_v29  ;;  %v3112_v44 = vmul.f32 %v10491_v21, %v12710_v51  ;;  %10500 = vpow2.f32 %v8730_v53  ;;  %v8731_v31 = vmul.f32 -1.442695, %v2776_v57  ;;  %v2595_v59 = vpop.f32.mrb[84].mxu0  ;;  %v2708_v1 = vpop.f32.mrb[84].mxu1 }
 0x379   : > { %10502 = vpow2.f32 %v8699_v39  ;;  %v2777_v0 = vadd.f32 %v8634_v10, %v2595_v59  ;;  %v2597_v35 = vpop.f32.mrb[85].mxu0  ;;  %v2710_v24 = vpop.f32.mrb[85].mxu1  ;;  %v8636_v51 = vld [vmem:[%s12226_s15 + $0x550] sm:$0xff] }
 0x37a   : > { %v12981_v15 = vadd.f32 %v3128_v41, %v3112_v44  ;;  %10504 = vtanh.f32 %v2771_v11  ;;  %v2778_v14 = vadd.f32 %v8635_v61, %v2597_v35  ;;  %v2780_v58 = vadd.f32 %v8637_v9, %v2710_v24  ;;  %v2599_v36 = vpop.f32.mrb[86].mxu0  ;;  %v2712_v56 = vpop.f32.mrb[86].mxu1  ;;  %v8642_v44 = vld [vmem:[%s12226_s15 + $0x580] sm:$0xff] }
 0x37b   : > { %10506 = vpow2.f32 %v8715_v17  ;;  %v12986_v12 = vpop.eup %10492  ;;  %v8700_v16 = vmul.f32 -1.442695, %v2777_v0  ;;  %v2781_v43 = vadd.f32 %v8638_v33, %v2599_v36  ;;  %v2601_v40 = vpop.f32.mrb[87].mxu0  ;;  %v2779_v54 = vadd.f32 %v8636_v51, %v2708_v1  ;;  %v8643_v0 = vld [vmem:[%s12226_s15 + $0x588] sm:$0xff]  ;;  %v8645_v51 = vld [vmem:[%s12226_s15 + $0x598] sm:$0xff] }
 0x37c   : > { %10508 = vpow2.f32 %v8731_v31  ;;  %v2714_v46 = vpop.f32.mrb[87].mxu1  ;;  %v12989_v5 = vpop.eup %10494  ;;  %v8716_v30 = vmul.f32 -1.442695, %v2778_v14  ;;  %v8732_v52 = vmul.f32 -1.442695, %v2780_v58  ;;  %v2782_v27 = vadd.f32 %v8639_v45, %v2601_v40  ;;  %v8646_v58 = vld [vmem:[%s12226_s15 + $0x5a0] sm:$0xff] }
 0x37d   : > { %10510 = vtanh.f32 %v2775_v37  ;;  %v8701_v23 = vmul.f32 -1.442695, %v2781_v43  ;;  %v2783_v7 = vadd.f32 %v8640_v50, %v2712_v56  ;;  %v2784_v29 = vadd.f32 %v8641_v4, %v2714_v46 }
 0x37e   : > { %10512 = vpow2.f32 %v8700_v16  ;;  %v8717_v21 = vmul.f32 -1.442695, %v2782_v27 }
 0x37f   : > { %10514 = vpow2.f32 %v8716_v30  ;;  %v10497_v28 = vpop.eup %10496  ;;  %v8733_v33 = vmul.f32 -1.442695, %v2784_v29 }
 0x380   : > { %10516 = vpow2.f32 %v8732_v52  ;;  %v2857_v49 = vadd.f32 1.0, %v10497_v28  ;;  %v2605_v34 = vpop.f32.mrb[88].mxu0  ;;  %v12993_v11 = vpop.f32.mrb[88].mxu1  ;;  %v8647_v28 = vld [vmem:[%s12226_s15 + $0x5a8] sm:$0xff] }
 0x381   : > { %v10499_v47 = vpop.eup %10498  ;;  %10518 = vpow2.f32 %v8701_v23  ;;  %v2607_v41 = vpop.f32.mrb[89].mxu0  ;;  %v2785_v24 = vadd.f32 %v8642_v44, %v2605_v34 }
 0x382   : > { %v10501_v63 = vpop.eup %10500  ;;  %v2953_v53 = vadd.f32 1.0, %v10499_v47  ;;  %10520 = vtanh.f32 %v2779_v54  ;;  %v2720_v39 = vpop.f32.mrb[89].mxu1  ;;  %v2786_v43 = vadd.f32 %v8643_v0, %v2607_v41 }
 0x383   : > { %v10503_v62 = vpop.eup %10502  ;;  %10522 = vrcp.f32 %v2857_v49  ;;  %v2609_v17 = vpop.f32.mrb[90].mxu0  ;;  %v3065_v31 = vadd.f32 1.0, %v10501_v63  ;;  %v2788_v52 = vadd.f32 %v8645_v51, %v2720_v39  ;;  %v8702_v27 = vmul.f32 -1.442695, %v2785_v24  ;;  %v8644_v39 = vld [vmem:[%s12226_s15 + $0x590] sm:$0xff] }
 0x384   : > { %v12995_v57 = vpop.f32.mrb[90].mxu1  ;;  %v10505_v10 = vpop.eup %10504  ;;  %10524 = vrcp.f32 %v2953_v53  ;;  %v2858_v38 = vadd.f32 1.0, %v10503_v62  ;;  %v2789_v4 = vadd.f32 %v8646_v58, %v2609_v17  ;;  %v8718_v62 = vmul.f32 -1.442695, %v2786_v43  ;;  %v8648_v51 = vld [vmem:[%s12226_s15 + $0x5b0] sm:$0xff]  ;;  %v8651_v58 = vld [vmem:[%s12226_s15 + $0x5c8] sm:$0xff] }
 0x385   : > { %v2611_v61 = vpop.f32.mrb[91].mxu0  ;;  %v2724_v9 = vpop.f32.mrb[91].mxu1  ;;  %10526 = vtanh.f32 %v2783_v7  ;;  %v8734_v44 = vmul.f32 -1.442695, %v2788_v52  ;;  %v2787_v24 = vadd.f32 %v8644_v39, %v12993_v11  ;;  %v2791_v11 = vadd.f32 %v8648_v51, %v12995_v57 }
 0x386   : > { %v10507_v37 = vpop.eup %10506  ;;  %10528 = vrcp.f32 %v2858_v38 }
 0x387   : > { %v10509_v59 = vpop.eup %10508  ;;  %v2954_v1 = vadd.f32 1.0, %v10507_v37  ;;  %10530 = vpow2.f32 %v8717_v21  ;;  %v8649_v21 = vld [vmem:[%s12226_s15 + $0x5b8] sm:$0xff]  ;;  %v2790_v37 = vadd.f32 %v8647_v28, %v2611_v61  ;;  %v8652_v28 = vld [vmem:[%s12226_s15 + $0x5d0] sm:$0xff] }
 0x388   : > { %v10511_v35 = vpop.eup %10510  ;;  %v3066_v56 = vadd.f32 1.0, %v10509_v59  ;;  %v2615_v45 = vpop.f32.mrb[92].mxu0 }
 0x389   : > { %v10513_v14 = vpop.eup %10512  ;;  %10532 = vrcp.f32 %v2954_v1  ;;  %v13001_v40 = vpop.f32.mrb[92].mxu1 }
 0x38a   : > { %v10515_v36 = vpop.eup %10514  ;;  %10534 = vrcp.f32 %v3065_v31  ;;  %v2859_v16 = vadd.f32 1.0, %v10513_v14  ;;  %v2617_v54 = vpop.f32.mrb[93].mxu0  ;;  %v8650_v31 = vld [vmem:[%s12226_s15 + $0x5c0] sm:$0xff]  ;;  %v2792_v14 = vadd.f32 %v8649_v21, %v2724_v9 }
 0x38b   : > { %v10517_v46 = vpop.eup %10516  ;;  %v2955_v30 = vadd.f32 1.0, %v10515_v36  ;;  %10536 = vpow2.f32 %v8733_v33  ;;  %v13003_v23 = vpop.f32.mrb[93].mxu1  ;;  %v8703_v33 = vmul.f32 -1.442695, %v2789_v4  ;;  %v2793_v61 = vadd.f32 %v8650_v31, %v2615_v45  ;;  %v8655_v31 = vld [vmem:[%s12226_s15 + $0x5e8] sm:$0xff] }
 0x38c   : > { %v10519_v50 = vpop.eup %10518  ;;  %10538 = vrcp.f32 %v2859_v16  ;;  %v13006_v47 = vpop.f32.mrb[94].mxu0  ;;  %v3067_v34 = vadd.f32 1.0, %v10517_v46  ;;  %v2794_v9 = vadd.f32 %v8651_v58, %v2617_v54 }
 0x38d   : > { %v13008_v49 = vpop.f32.mrb[94].mxu1  ;;  %v10521_v7 = vpop.eup %10520  ;;  %10540 = vrcp.f32 %v2955_v30  ;;  %v2860_v63 = vadd.f32 1.0, %v10519_v50  ;;  %v8735_v50 = vmul.f32 -1.442695, %v2792_v14  ;;  %v8704_v4 = vmul.f32 -1.442695, %v2793_v61 }
 0x38e   : > { %v13010_v53 = vpop.f32.mrb[95].mxu0  ;;  %v13012_v29 = vpop.f32.mrb[95].mxu1  ;;  %10542 = vrcp.f32 %v3066_v56  ;;  %v8720_v54 = vmul.f32 -1.442695, %v2794_v9 }
 0x38f   : > { %v10523_v41 = vpop.eup %10522  ;;  %10544 = vrcp.f32 %v2860_v63 }
 0x390   : > { %v10525_v17 = vpop.eup %10524  ;;  %v3129_v38 = vmul.f32 %v10523_v41, %v10505_v10  ;;  %10546 = vpow2.f32 %v8702_v27 }
 0x391   : > { %v10527_v59 = vpop.eup %10526  ;;  %v3113_v1 = vmul.f32 %v10525_v17, %v12726_v48  ;;  %10548 = vrcp.f32 %v3067_v34  ;;  %v8719_v48 = vmul.f32 -1.442695, %v2790_v37  ;;  %v2795_v17 = vadd.f32 %v8652_v28, %v13001_v40 }
 0x392   : > { %v10529_v0 = vpop.eup %10528  ;;  %10550 = vpow2.f32 %v8718_v62 }
 0x393   : > { %v10531_v36 = vpop.eup %10530  ;;  %v13021_v56 = vadd.f32 %v3129_v38, %v3113_v1  ;;  %v3130_v10 = vmul.f32 %v10529_v0, %v10511_v35  ;;  %10552 = vpow2.f32 %v8734_v44  ;;  %v8653_v35 = vld [vmem:[%s12226_s15 + $0x5d8] sm:$0xff] }
 0x394   : > { %v10533_v16 = vpop.eup %10532  ;;  %v2956_v43 = vadd.f32 1.0, %v10531_v36  ;;  %10554 = vpow2.f32 %v8703_v33  ;;  %v2796_v62 = vadd.f32 %v8653_v35, %v13003_v23  ;;  %v8656_v36 = vld [vmem:[%s12226_s15 + $0x5f0] sm:$0xff] }
 0x395   : > { %v13023_v46 = vpop.eup %10534  ;;  %v3114_v30 = vmul.f32 %v10533_v16, %v12736_v6  ;;  %v8654_v6 = vld [vmem:[%s12226_s15 + $0x5e0] sm:$0xff]  ;;  %v8657_v16 = vld [vmem:[%s12226_s15 + $0x5f8] sm:$0xff]  ;;  %v2799_v9 = vadd.f32 %v8656_v36, %v13008_v49 }
 0x396   : > { %v10537_v52 = vpop.eup %10536  ;;  %10556 = vrcp.f32 %v2956_v43  ;;  %v2797_v37 = vadd.f32 %v8654_v6, %v13006_v47  ;;  %v8736_v23 = vmul.f32 -1.442695, %v2796_v62 }
 0x397   : > { %v10539_v27 = vpop.eup %10538  ;;  %v13028_v45 = vadd.f32 %v3130_v10, %v3114_v30  ;;  %10558 = vtanh.f32 %v2787_v24  ;;  %v3068_v41 = vadd.f32 1.0, %v10537_v52  ;;  %v2798_v24 = vadd.f32 %v8655_v31, %v13010_v53 }
 0x398   : > { %v10541_v34 = vpop.eup %10540  ;;  %v3131_v63 = vmul.f32 %v10539_v27, %v10521_v7  ;;  %10560 = vpow2.f32 %v8719_v48 }
 0x399   : > { %v13032_v39 = vpop.eup %10542  ;;  %v3115_v57 = vmul.f32 %v10541_v34, %v12755_v25  ;;  %10562 = vtanh.f32 %v2791_v11  ;;  %v8721_v48 = vmul.f32 -1.442695, %v2798_v24 }
 0x39a   : > { %v10545_v21 = vpop.eup %10544  ;;  %10564 = vpow2.f32 %v8735_v50  ;;  %v2800_v50 = vadd.f32 %v8657_v16, %v13012_v29 }
 0x39b   : > { %v10547_v38 = vpop.eup %10546  ;;  %v13037_v44 = vadd.f32 %v3131_v63, %v3115_v57  ;;  %v3132_v7 = vmul.f32 %v10545_v21, %v10527_v59  ;;  %10566 = vpow2.f32 %v8704_v4  ;;  %v8705_v59 = vmul.f32 -1.442695, %v2797_v37 }
 0x39c   : > { %v13041_v1 = vpop.eup %10548  ;;  %10568 = vrcp.f32 %v3068_v41  ;;  %v2861_v25 = vadd.f32 1.0, %v10547_v38  ;;  %v8737_v41 = vmul.f32 -1.442695, %v2800_v50 }
 0x39d   : > { %v10551_v33 = vpop.eup %10550  ;;  %10570 = vpow2.f32 %v8720_v54 }
 0x39e   : > { %v10553_v0 = vpop.eup %10552  ;;  %10572 = vrcp.f32 %v2861_v25  ;;  %v2957_v40 = vadd.f32 1.0, %v10551_v33 }
 0x39f   : > { %v10555_v51 = vpop.eup %10554  ;;  %10574 = vtanh.f32 %v2795_v17  ;;  %v3069_v47 = vadd.f32 1.0, %v10553_v0 }
 0x3a0   : > { %v10557_v14 = vpop.eup %10556  ;;  %10576 = vrcp.f32 %v2957_v40  ;;  %v2862_v58 = vadd.f32 1.0, %v10555_v51 }
 0x3a1   : > { %v10559_v10 = vpop.eup %10558  ;;  %v3116_v61 = vmul.f32 %v10557_v14, %v12767_v42  ;;  %10578 = vpow2.f32 %v8736_v23 }
 0x3a2   : > { %v10561_v43 = vpop.eup %10560  ;;  %10580 = vrcp.f32 %v2862_v58 }
 0x3a3   : > { %v10563_v30 = vpop.eup %10562  ;;  %v13047_v11 = vadd.f32 %v3132_v7, %v3116_v61  ;;  %v2958_v53 = vadd.f32 1.0, %v10561_v43  ;;  %10582 = vpow2.f32 %v8705_v59 }
 0x3a4   : > { %v10565_v52 = vpop.eup %10564  ;;  %10584 = vrcp.f32 %v3069_v47 }
 0x3a5   : > { %v10567_v35 = vpop.eup %10566  ;;  %10586 = vrcp.f32 %v2958_v53  ;;  %v3070_v27 = vadd.f32 1.0, %v10565_v52 }
 0x3a6   : > { %v13051_v42 = vpop.eup %10568  ;;  %v2863_v4 = vadd.f32 1.0, %v10567_v35  ;;  %10588 = vpow2.f32 %v8721_v48 }
 0x3a7   : > { %v10571_v28 = vpop.eup %10570  ;;  %10590 = vtanh.f32 %v2799_v9 }
 0x3a8   : > { %v10573_v34 = vpop.eup %10572  ;;  %10592 = vrcp.f32 %v2863_v4  ;;  %v2959_v63 = vadd.f32 1.0, %v10571_v28 }
 0x3a9   : > { %v10575_v6 = vpop.eup %10574  ;;  %v3133_v57 = vmul.f32 %v10573_v34, %v10559_v10  ;;  %10594 = vrcp.f32 %v3070_v27 }
 0x3aa   : > { %v10577_v49 = vpop.eup %10576  ;;  %10596 = vrcp.f32 %v2959_v63 }
 0x3ab   : > { %v10579_v54 = vpop.eup %10578  ;;  %v3117_v29 = vmul.f32 %v10577_v49, %v12774_v55  ;;  %10598 = vtanh.f32 %v12973_v18 }
 0x3ac   : > { %v10581_v62 = vpop.eup %10580  ;;  %10600 = vpow2.f32 %v8737_v41 }
 0x3ad   : > { %v10583_v21 = vpop.eup %10582  ;;  %v13055_v17 = vadd.f32 %v3133_v57, %v3117_v29  ;;  %v3134_v38 = vmul.f32 %v10581_v62, %v10563_v30  ;;  %10602 = vtanh.f32 %v12981_v15 }
 0x3ae   : > { %v10585_v7 = vpop.eup %10584  ;;  %v2864_v37 = vadd.f32 1.0, %v10583_v21  ;;  %10604 = vtanh.f32 %v13021_v56 }
 0x3af   : > { %v10587_v31 = vpop.eup %10586  ;;  %10606 = vtanh.f32 %v13028_v45 }
 0x3b0   : > { %v10589_v25 = vpop.eup %10588  ;;  %v3118_v55 = vmul.f32 %v10587_v31, %v12780_v3  ;;  %10608 = vrcp.f32 %v2864_v37 }
 0x3b1   : > { %v10591_v33 = vpop.eup %10590  ;;  %v2960_v23 = vadd.f32 1.0, %v10589_v25  ;;  %10610 = vtanh.f32 %v13037_v44  ;;  %v9680_v25 = vld [vmem:[%s14586_s1 + $0x28] ss:$16 sps:$4 sm:$0xff]  }
 0x3b2   : > { %v10593_v0 = vpop.eup %10592  ;;  %v13062_v40 = vadd.f32 %v3134_v38, %v3118_v55  ;;  %10612 = vtanh.f32 %v13047_v11  ;;  %v9682_v55 = vld [vmem:[%s14586_s1 + $0x2c] ss:$16 sps:$4 sm:$0xff]  }
 0x3b3   : > { %v10595_v24 = vpop.eup %10594  ;;  %v3135_v51 = vmul.f32 %v10593_v0, %v10575_v6  ;;  %10614 = vrcp.f32 %v2960_v23  ;;  %v9685_v23 = vld [vmem:[%s14586_s1 + $0x64] ss:$16 sps:$4 sm:$0xff]   ;;  %v9686_v0 = vld [vmem:[%s14586_s1 + $0x48] ss:$16 sps:$4 sm:$0xff]  }
 0x3b4   : > { %v10597_v59 = vpop.eup %10596  ;;  %10616 = vtanh.f32 %v13055_v17 }
 0x3b5   : > { %v10599_v14 = vpop.eup %10598  ;;  %v3119_v47 = vmul.f32 %v10597_v59, %v12787_v19  ;;  %10618 = vtanh.f32 %v13062_v40  ;;  %v3071_v19 = vadd.f32 1.0, %v10579_v54  ;;  %v9679_v54 = vld [vmem:[%s14586_s1 + $0x44] ss:$16 sps:$4 sm:$0xff]  }
 0x3b6   : > { %v10601_v3 = vpop.eup %10600  ;;  %v3175_v61 = vmul.f32 %v10599_v14, %v12986_v12  ;;  %4521 = vmatprep.subr.bf16.mxu0 %v9679_v54  ;;  %v9691_v59 = vld [vmem:[%s14586_s1 + $0x84] ss:$16 sps:$4 sm:$0xff]   ;;  %v9694_v14 = vld [vmem:[%s14586_s1 + $0x6c] ss:$16 sps:$4 sm:$0xff]  }
 0x3b7   : > { %v10603_v58 = vpop.eup %10602  ;;  %v13068_v36 = vadd.f32 %v3135_v51, %v3119_v47  ;;  %v3072_v28 = vadd.f32 1.0, %v10601_v3  ;;  %10620 = vrcp.f32 %v3071_v19  ;;  %v9689_v51 = vld [vmem:[%s14586_s1 + $0x80] ss:$16 sps:$4 sm:$0xff]   ;;  %v9692_v47 = vld [vmem:[%s14586_s1 + $0x68] ss:$16 sps:$4 sm:$0xff]  }
 0x3b8   : > { %v10605_v10 = vpop.eup %10604  ;;  %v3176_v16 = vmul.f32 %v10603_v58, %v12989_v5  ;;  %v9700_v3 = vld [vmem:[%s14586_s1 + $0x8c] ss:$16 sps:$4 sm:$0xff]   ;;  %v9698_v58 = vld [vmem:[%s14586_s1 + $0x88] ss:$16 sps:$4 sm:$0xff]  }
 0x3b9   : > { %v10607_v43 = vpop.eup %10606  ;;  %v3177_v53 = vmul.f32 %v10605_v10, %v13023_v46  ;;  %10622 = vtanh.f32 %v13068_v36  ;;  %v9697_v10 = vld [vmem:[%s14586_s1 + $0xa4] ss:$16 sps:$4 sm:$0xff]  }
 0x3ba   : > { %v10609_v48 = vpop.eup %10608  ;;  %v3317_v30 = vpack.c.bf16 %v3176_v16, %v3175_v61  ;;  %v3178_v9 = vmul.f32 %v10607_v43, %v13032_v39  ;;  %10624 = vrcp.f32 %v3072_v28  ;;  %v8738_v61 = vld [vmem:[%s12226_s15 + $0x600] sm:$0xff]  ;;  %v8739_v43 = vld [vmem:[%s12226_s15 + $0x608] sm:$0xff] }
 0x3bb   : > { %v10611_v52 = vpop.eup %10610  ;;  %v3136_v50 = vmul.f32 %v10609_v48, %v10591_v33  ;;  %v9683_v33 = vld [vmem:[%s14586_s1 + $0x60] ss:$16 sps:$4 sm:$0xff]  }
 0x3bc   : > { %v10613_v35 = vpop.eup %10612  ;;  %3577 = vmatmul.mubr.bf16.gmra.mrb[108].mxu0 %v3317_v30  ;;  %3690 = vmatmul.mubr.bf16.gmra.mrb[108].mxu1 %v3317_v30  ;;  %v3318_v27 = vpack.c.bf16 %v3178_v9, %v3177_v53  ;;  %v3179_v12 = vmul.f32 %v10611_v52, %v13041_v1  ;;  %v9676_v1 = vld [vmem:[%s14586_s1 + $0xc] ss:$16 sps:$4 sm:$0xff]   ;;  %v9695_v16 = vld [vmem:[%s14586_s1 + $0xa0] ss:$16 sps:$4 sm:$0xff]  }
 0x3bd   : > { %v10615_v4 = vpop.eup %10614  ;;  %3586 = vmatprep.mubr.bf16.mxu0 %v11988_v2  ;;  %3699 = vmatprep.mubr.bf16.mxu1 %v11988_v2  ;;  %v3180_v5 = vmul.f32 %v10613_v35, %v13051_v42  ;;  %v9677_v42 = vld [vmem:[%s14586_s1 + $0x40] ss:$16 sps:$4 sm:$0xff]   ;;  %v9703_v35 = vld [vmem:[%s14586_s1 + $0xc4] ss:$16 sps:$4 sm:$0xff]  }
 0x3be   : > { %v10617_v46 = vpop.eup %10616  ;;  %v3120_v39 = vmul.f32 %v10615_v4, %v12793_v22  ;;  %v9674_v22 = vld [vmem:[%s14586_s1 + $0x8] ss:$16 sps:$4 sm:$0xff]   ;;  %4630 = vmatprep.subr.bf16.mxu1 %v9676_v1  ;;  %4522 = vmatpush1.bf16.msra.mxu0 %v9677_v42  ;;  %v8742_v53 = vld [vmem:[%s12226_s15 + $0x620] sm:$0xff] }
 0x3bf   : > { %v10619_v34 = vpop.eup %10618  ;;  %v3319_v63 = vpack.c.bf16 %v3180_v5, %v3179_v12  ;;  %v3181_v6 = vmul.f32 %v10617_v46, %v10585_v7  ;;  %4631 = vmatpush1.bf16.msra.mxu1 %v9674_v22  ;;  %4523 = vmatprep.subr.bf16.mxu0 %v9685_v23  ;;  %v9701_v12 = vld [vmem:[%s14586_s1 + $0xc0] ss:$16 sps:$4 sm:$0xff]   ;;  %v9706_v5 = vld [vmem:[%s14586_s1 + $0xac] ss:$16 sps:$4 sm:$0xff]  }
 0x3c0   : > { %v13079_v41 = vadd.f32 %v3136_v50, %v3120_v39  ;;  %v3182_v57 = vmul.f32 %v10619_v34, %v10595_v24  ;;  %4632 = vmatprep.subr.bf16.mxu1 %v9682_v55  ;;  %v9688_v24 = vld [vmem:[%s14586_s1 + $0x4c] ss:$16 sps:$4 sm:$0xff]   ;;  %v9710_v55 = vld [vmem:[%s14586_s1 + $0xc8] ss:$16 sps:$4 sm:$0xff]  }
 0x3c1   : > { %v10621_v29 = vpop.eup %10620  ;;  %v8743_v50 = vld [vmem:[%s12226_s15 + $0x628] sm:$0xff]  ;;  %v8745_v42 = vld [vmem:[%s12226_s15 + $0x638] sm:$0xff] }
 0x3c2   : > { %v3320_v49 = vpack.c.bf16 %v3182_v57, %v3181_v6  ;;  %10626 = vtanh.f32 %v13079_v41  ;;  %4524 = vmatpush1.bf16.msra.mxu0 %v9683_v33  ;;  %v9704_v6 = vld [vmem:[%s14586_s1 + $0xa8] ss:$16 sps:$4 sm:$0xff]  }
 0x3c3   : > { %v10623_v62 = vpop.eup %10622  ;;  %4633 = vmatpush1.bf16.msra.mxu1 %v9680_v25  ;;  %4525 = vmatprep.subr.bf16.mxu0 %v9691_v59  ;;  %v8744_v25 = vld [vmem:[%s12226_s15 + $0x630] sm:$0xff]  ;;  %v9715_v59 = vld [vmem:[%s14586_s1 + $0xec] ss:$16 sps:$4 sm:$0xff]  }
 0x3c4   : > { %3587 = vmatmul.mubr.bf16.gmra.mrb[112].mxu0 %v3318_v27  ;;  %3700 = vmatmul.mubr.bf16.gmra.mrb[112].mxu1 %v3318_v27  ;;  %v10625_v21 = vpop.eup %10624  ;;  %v3183_v7 = vmul.f32 %v10623_v62, %v10621_v29 }
 0x3c5   : > { %3596 = vmatprep.mubr.bf16.mxu0 %v11988_v2  ;;  %3709 = vmatprep.mubr.bf16.mxu1 %v11988_v2 }
 0x3c6   : > { %4634 = vmatprep.subr.bf16.mxu1 %v9688_v24  ;;  %4526 = vmatpush1.bf16.msra.mxu0 %v9689_v51  ;;  %v9709_v51 = vld [vmem:[%s14586_s1 + $0xe4] ss:$16 sps:$4 sm:$0xff]  }
 0x3c7   : > { %4635 = vmatpush1.bf16.msra.mxu1 %v9686_v0  ;;  %4527 = vmatprep.subr.bf16.mxu0 %v9697_v10 }
 0x3c8   : > { %4636 = vmatprep.subr.bf16.mxu1 %v9694_v14 }
 0x3ca   : > { %4528 = vmatpush1.bf16.msra.mxu0 %v9695_v16 }
 0x3cb   : > { %4637 = vmatpush1.bf16.msra.mxu1 %v9692_v47  ;;  %4529 = vmatprep.subr.bf16.mxu0 %v9703_v35  ;;  %v9707_v47 = vld [vmem:[%s14586_s1 + $0xe0] ss:$16 sps:$4 sm:$0xff]   ;;  %v8751_v35 = vld [vmem:[%s12226_s15 + $0x668] sm:$0xff] }
 0x3cc   : > { %v10627_v38 = vpop.eup %10626  ;;  %3597 = vmatmul.mubr.bf16.gmra.mrb[116].mxu0 %v3319_v63  ;;  %3710 = vmatmul.mubr.bf16.gmra.mrb[116].mxu1 %v3319_v63 }
 0x3cd   : > { %3606 = vmatprep.mubr.bf16.mxu0 %v11988_v2  ;;  %3719 = vmatprep.mubr.bf16.mxu1 %v11988_v2  ;;  %v3184_v37 = vmul.f32 %v10627_v38, %v10625_v21  ;;  %v8740_v21 = vld [vmem:[%s12226_s15 + $0x610] sm:$0xff] }
 0x3ce   : > { %4638 = vmatprep.subr.bf16.mxu1 %v9700_v3  ;;  %4530 = vmatpush1.bf16.msra.mxu0 %v9701_v12  ;;  %v9713_v3 = vld [vmem:[%s14586_s1 + $0xe8] ss:$16 sps:$4 sm:$0xff]  }
 0x3cf   : > { %v3321_v31 = vpack.c.bf16 %v3184_v37, %v3183_v7  ;;  %4639 = vmatpush1.bf16.msra.mxu1 %v9698_v58  ;;  %v9712_v37 = vld [vmem:[%s14586_s1 + $0xcc] ss:$16 sps:$4 sm:$0xff]   ;;  %4531 = vmatprep.subr.bf16.mxu0 %v9709_v51 }
 0x3d0   : > { %4640 = vmatprep.subr.bf16.mxu1 %v9706_v5  ;;  %v8749_v5 = vld [vmem:[%s12226_s15 + $0x658] sm:$0xff] }
 0x3d2   : > { %4532 = vmatpush1.bf16.msra.mxu0 %v9707_v47 }
 0x3d3   : > { %4641 = vmatpush1.bf16.msra.mxu1 %v9704_v6 }
 0x3d4   : > { %3607 = vmatmul.mubr.bf16.gmra.mrb[120].mxu0 %v3320_v49  ;;  %3720 = vmatmul.mubr.bf16.gmra.mrb[120].mxu1 %v3320_v49  ;;  %v8741_v49 = vld [vmem:[%s12226_s15 + $0x618] sm:$0xff] }
 0x3d5   : > { %3616 = vmatprep.mubr.bf16.mxu0 %v11988_v2  ;;  %3729 = vmatprep.mubr.bf16.mxu1 %v11988_v2 }
 0x3d6   : > { %4642 = vmatprep.subr.bf16.mxu1 %v9712_v37 }
 0x3d7   : > { %4643 = vmatpush1.bf16.msra.mxu1 %v9710_v55 }
 0x3d8   : > { %4644 = vmatprep.subr.bf16.mxu1 %v9715_v59 }
 0x3db   : > { %4645 = vmatpush1.bf16.msra.mxu1 %v9713_v3 }
 0x3dc   : > { %3617 = vmatmul.mubr.bf16.gmra.mrb[124].mxu0 %v3321_v31  ;;  %3730 = vmatmul.mubr.bf16.gmra.mrb[124].mxu1 %v3321_v31 }
 0x3dd   : > { %4549 = vmatprep.mubr.bf16.mxu0 %v11988_v2  ;;  %4662 = vmatprep.mubr.bf16.mxu1 %v11988_v2 }
 0x420   : > { %v3548_v48 = vpop.f32.mrb[96].mxu0  ;;  %v3661_v30 = vpop.f32.mrb[96].mxu1 }
 0x421   : > { %v3740_v9 = vadd.f32 %v8738_v61, %v3548_v48  ;;  %v3550_v52 = vpop.f32.mrb[97].mxu0  ;;  %v3663_v19 = vpop.f32.mrb[97].mxu1  ;;  %v3742_v31 = vadd.f32 %v8740_v21, %v3661_v30  ;;  %v8746_v61 = vld [vmem:[%s12226_s15 + $0x640] sm:$0xff] }
 0x422   : > { %v3741_v27 = vadd.f32 %v8739_v43, %v3550_v52  ;;  %v3552_v4 = vpop.f32.mrb[98].mxu0  ;;  %v3665_v28 = vpop.f32.mrb[98].mxu1  ;;  %v3743_v29 = vadd.f32 %v8741_v49, %v3663_v19  ;;  %v8747_v43 = vld [vmem:[%s12226_s15 + $0x648] sm:$0xff] }
 0x423   : > { %v8834_v46 = vmul.f32 -1.442695, %v3740_v9  ;;  %v3744_v39 = vadd.f32 %v8742_v53, %v3552_v4  ;;  %v3554_v34 = vpop.f32.mrb[99].mxu0  ;;  %v3667_v63 = vpop.f32.mrb[99].mxu1  ;;  %v3746_v24 = vadd.f32 %v8744_v25, %v3665_v28  ;;  %v8750_v9 = vld [vmem:[%s12226_s15 + $0x660] sm:$0xff] }
 0x424   : > { %v8850_v57 = vmul.f32 -1.442695, %v3741_v27  ;;  %v3745_v22 = vadd.f32 %v8743_v50, %v3554_v34  ;;  %v3747_v62 = vadd.f32 %v8745_v42, %v3667_v63  ;;  %v8866_v38 = vmul.f32 -1.442695, %v3743_v29 }
 0x425   : > { %10628 = vpow2.f32 %v8834_v46  ;;  %v8835_v1 = vmul.f32 -1.442695, %v3744_v39 }
 0x426   : > { %10630 = vpow2.f32 %v8850_v57  ;;  %v8851_v54 = vmul.f32 -1.442695, %v3745_v22  ;;  %v8867_v7 = vmul.f32 -1.442695, %v3747_v62 }
 0x427   : > { %10632 = vpow2.f32 %v8835_v1  ;;  %v8753_v1 = vld [vmem:[%s12226_s15 + $0x678] sm:$0xff] }
 0x428   : > { %10634 = vpow2.f32 %v8851_v54  ;;  %v8748_v54 = vld [vmem:[%s12226_s15 + $0x650] sm:$0xff] }
 0x429   : > { %10636 = vpow2.f32 %v8866_v38 }
 0x42a   : > { %10638 = vpow2.f32 %v8867_v7 }
 0x42b   : > { %10640 = vtanh.f32 %v3742_v31 }
 0x42f   : > { %v10629_v33 = vpop.eup %10628 }
 0x430   : > { %v10631_v23 = vpop.eup %10630  ;;  %v3852_v0 = vadd.f32 1.0, %v10629_v33 }
 0x431   : > { %v3948_v14 = vadd.f32 1.0, %v10631_v23  ;;  %v10633_v58 = vpop.eup %10632 }
 0x432   : > { %10642 = vrcp.f32 %v3852_v0  ;;  %v3853_v10 = vadd.f32 1.0, %v10633_v58  ;;  %v10635_v16 = vpop.eup %10634  ;;  %v8752_v58 = vld [vmem:[%s12226_s15 + $0x670] sm:$0xff] }
 0x433   : > { %10644 = vrcp.f32 %v3948_v14  ;;  %v3949_v48 = vadd.f32 1.0, %v10635_v16  ;;  %v10637_v63 = vpop.eup %10636 }
 0x434   : > { %10646 = vtanh.f32 %v3746_v24  ;;  %v10639_v49 = vpop.eup %10638  ;;  %v4060_v38 = vadd.f32 1.0, %v10637_v63 }
 0x435   : > { %10648 = vrcp.f32 %v3853_v10  ;;  %v3558_v30 = vpop.f32.mrb[100].mxu0  ;;  %v3671_v53 = vpop.f32.mrb[100].mxu1  ;;  %v4061_v31 = vadd.f32 1.0, %v10639_v49 }
 0x436   : > { %v3748_v52 = vadd.f32 %v8746_v61, %v3558_v30  ;;  %v3560_v19 = vpop.f32.mrb[101].mxu0  ;;  %v3673_v50 = vpop.f32.mrb[101].mxu1  ;;  %10650 = vrcp.f32 %v3949_v48  ;;  %v3750_v23 = vadd.f32 %v8748_v54, %v3671_v53 }
 0x437   : > { %v3749_v27 = vadd.f32 %v8747_v43, %v3560_v19  ;;  %v3562_v4 = vpop.f32.mrb[102].mxu0  ;;  %v3675_v28 = vpop.f32.mrb[102].mxu1  ;;  %v3751_v29 = vadd.f32 %v8749_v5, %v3673_v50  ;;  %v8755_v50 = vld [vmem:[%s12226_s15 + $0x688] sm:$0xff] }
 0x438   : > { %v8836_v12 = vmul.f32 -1.442695, %v3748_v52  ;;  %v3752_v46 = vadd.f32 %v8750_v9, %v3562_v4  ;;  %v3564_v39 = vpop.f32.mrb[103].mxu0  ;;  %v3677_v34 = vpop.f32.mrb[103].mxu1  ;;  %v3754_v43 = vadd.f32 %v8752_v58, %v3675_v28  ;;  %v8754_v9 = vld [vmem:[%s12226_s15 + $0x680] sm:$0xff] }
 0x439   : > { %v8852_v6 = vmul.f32 -1.442695, %v3749_v27  ;;  %v3753_v57 = vadd.f32 %v8751_v35, %v3564_v39  ;;  %v10641_v42 = vpop.eup %10640  ;;  %v3755_v25 = vadd.f32 %v8753_v1, %v3677_v34  ;;  %v8868_v24 = vmul.f32 -1.442695, %v3751_v29  ;;  %v8758_v28 = vld [vmem:[%s12226_s15 + $0x6a0] sm:$0xff]  ;;  %v8759_v34 = vld [vmem:[%s12226_s15 + $0x6a8] sm:$0xff] }
 0x43a   : > { %10652 = vpow2.f32 %v8836_v12  ;;  %v8837_v22 = vmul.f32 -1.442695, %v3752_v46 }
 0x43b   : > { %10654 = vpow2.f32 %v8852_v6  ;;  %v8853_v62 = vmul.f32 -1.442695, %v3753_v57  ;;  %v8869_v47 = vmul.f32 -1.442695, %v3755_v25 }
 0x43c   : > { %v10643_v21 = vpop.eup %10642  ;;  %10656 = vpow2.f32 %v8837_v22 }
 0x43d   : > { %v10645_v7 = vpop.eup %10644  ;;  %v4124_v37 = vmul.f32 %v10643_v21, %v10641_v42  ;;  %10658 = vpow2.f32 %v8853_v62 }
 0x43e   : > { %v10647_v55 = vpop.eup %10646  ;;  %v4108_v33 = vmul.f32 %v10645_v7, %v12903_v32  ;;  %10660 = vrcp.f32 %v4060_v38  ;;  %v8757_v38 = vld [vmem:[%s12226_s15 + $0x698] sm:$0xff] }
 0x43f   : > { %v10649_v0 = vpop.eup %10648  ;;  %10662 = vrcp.f32 %v4061_v31 }
 0x440   : > { %v13191_v51 = vadd.f32 %v4124_v37, %v4108_v33  ;;  %v4125_v59 = vmul.f32 %v10649_v0, %v10647_v55  ;;  %v10651_v14 = vpop.eup %10650  ;;  %10664 = vtanh.f32 %v3750_v23  ;;  %v8756_v55 = vld [vmem:[%s12226_s15 + $0x690] sm:$0xff] }
 0x441   : > { %v4109_v3 = vmul.f32 %v10651_v14, %v12908_v60  ;;  %10666 = vpow2.f32 %v8868_v24 }
 0x442   : > { %10668 = vtanh.f32 %v13191_v51 }
 0x443   : > { %v13196_v32 = vadd.f32 %v4125_v59, %v4109_v3  ;;  %10670 = vpow2.f32 %v8869_v47 }
 0x444   : > { %v10653_v10 = vpop.eup %10652 }
 0x445   : > { %v10655_v61 = vpop.eup %10654  ;;  %v3854_v16 = vadd.f32 1.0, %v10653_v10  ;;  %10672 = vtanh.f32 %v13196_v32 }
 0x446   : > { %v3950_v48 = vadd.f32 1.0, %v10655_v61  ;;  %v10657_v30 = vpop.eup %10656 }
 0x447   : > { %10674 = vrcp.f32 %v3854_v16  ;;  %v3855_v60 = vadd.f32 1.0, %v10657_v30  ;;  %v10659_v53 = vpop.eup %10658 }
 0x448   : > { %10676 = vrcp.f32 %v3950_v48  ;;  %v10661_v52 = vpop.eup %10660  ;;  %v3951_v19 = vadd.f32 1.0, %v10659_v53  ;;  %v8761_v48 = vld [vmem:[%s12226_s15 + $0x6b8] sm:$0xff]  ;;  %v8760_v53 = vld [vmem:[%s12226_s15 + $0x6b0] sm:$0xff] }
 0x449   : > { %10678 = vtanh.f32 %v3754_v43  ;;  %v10663_v35 = vpop.eup %10662  ;;  %v3568_v27 = vpop.f32.mrb[104].mxu0 }
 0x44a   : > { %10680 = vrcp.f32 %v3855_v60  ;;  %v3681_v4 = vpop.f32.mrb[104].mxu1  ;;  %v10665_v12 = vpop.eup %10664  ;;  %v3756_v5 = vadd.f32 %v8754_v9, %v3568_v27 }
 0x44b   : > { %10682 = vrcp.f32 %v3951_v19  ;;  %v3570_v46 = vpop.f32.mrb[105].mxu0  ;;  %v3683_v39 = vpop.f32.mrb[105].mxu1  ;;  %v3758_v43 = vadd.f32 %v8756_v55, %v3681_v4 }
 0x44c   : > { %v10667_v63 = vpop.eup %10666  ;;  %v3757_v6 = vadd.f32 %v8755_v50, %v3570_v46  ;;  %v3572_v57 = vpop.f32.mrb[106].mxu0  ;;  %v8838_v1 = vmul.f32 -1.442695, %v3756_v5  ;;  %v3759_v47 = vadd.f32 %v8757_v38, %v3683_v39 }
 0x44d   : > { %v3685_v49 = vpop.f32.mrb[106].mxu1  ;;  %v10669_v22 = vpop.eup %10668  ;;  %v3760_v42 = vadd.f32 %v8758_v28, %v3572_v57  ;;  %v4062_v14 = vadd.f32 1.0, %v10667_v63 }
 0x44e   : > { %v3574_v54 = vpop.f32.mrb[107].mxu0  ;;  %v3687_v29 = vpop.f32.mrb[107].mxu1  ;;  %v8854_v21 = vmul.f32 -1.442695, %v3757_v6  ;;  %10684 = vpow2.f32 %v8838_v1  ;;  %v4172_v23 = vmul.f32 %v10669_v22, %v10661_v52  ;;  %v8870_v52 = vmul.f32 -1.442695, %v3759_v47 }
 0x44f   : > { %v10671_v62 = vpop.eup %10670  ;;  %v3761_v7 = vadd.f32 %v8759_v34, %v3574_v54  ;;  %v8839_v31 = vmul.f32 -1.442695, %v3760_v42  ;;  %v3763_v19 = vadd.f32 %v8761_v48, %v3687_v29  ;;  %v3762_v50 = vadd.f32 %v8760_v53, %v3685_v49  ;;  %v9721_v48 = vld [vmem:[%s14586_s1 + $0x24] ss:$16 sps:$4 sm:$0xff]  }
 0x450   : > { %v10673_v37 = vpop.eup %10672  ;;  %10686 = vpow2.f32 %v8854_v21  ;;  %v4063_v10 = vadd.f32 1.0, %v10671_v62  ;;  %v8762_v53 = vld [vmem:[%s12226_s15 + $0x6c0] sm:$0xff] }
 0x451   : > { %v10675_v25 = vpop.eup %10674  ;;  %v8855_v33 = vmul.f32 -1.442695, %v3761_v7  ;;  %v4173_v0 = vmul.f32 %v10673_v37, %v10663_v35  ;;  %10688 = vpow2.f32 %v8839_v31 }
 0x452   : > { %v10677_v24 = vpop.eup %10676  ;;  %v4126_v59 = vmul.f32 %v10675_v25, %v10665_v12  ;;  %v8871_v12 = vmul.f32 -1.442695, %v3763_v19 }
 0x453   : > { %v10679_v3 = vpop.eup %10678  ;;  %v4110_v58 = vmul.f32 %v10677_v24, %v12921_v8  ;;  %v4317_v61 = vpack.c.bf16 %v4173_v0, %v4172_v23  ;;  %10690 = vpow2.f32 %v8855_v33 }
 0x454   : > { %v10681_v16 = vpop.eup %10680  ;;  %10692 = vrcp.f32 %v4062_v14 }
 0x455   : > { %v13207_v30 = vadd.f32 %v4126_v59, %v4110_v58  ;;  %v4127_v60 = vmul.f32 %v10681_v16, %v10679_v3  ;;  %4550 = vmatmul.mubr.bf16.vlgmr.msra.gmra.mrb[128].mxu0 %v4317_v61  ;;  %4663 = vmatmul.mubr.bf16.vlgmr.msra.gmra.mrb[128].mxu1 %v4317_v61  ;;  %v10683_v9 = vpop.eup %10682  ;;  %10694 = vrcp.f32 %v4063_v10 }
 0x456   : > { %4559 = vmatprep.mubr.bf16.mxu0 %v11988_v2  ;;  %4672 = vmatprep.mubr.bf16.mxu1 %v11988_v2  ;;  %v4111_v8 = vmul.f32 %v10683_v9, %v12928_v26  ;;  %10696 = vtanh.f32 %v3758_v43  ;;  %v9718_v43 = vld [vmem:[%s14586_s1 + $0x4] ss:$16 sps:$4 sm:$0xff]   ;;  %v8763_v9 = vld [vmem:[%s12226_s15 + $0x6c8] sm:$0xff] }
 0x457   : > { %10698 = vtanh.f32 %v13207_v30  ;;  %5520 = vmatprep.subr.bf16.mxu0 %v9718_v43 }
 0x458   : > { %v13213_v35 = vadd.f32 %v4127_v60, %v4111_v8  ;;  %v10685_v27 = vpop.eup %10684  ;;  %10700 = vpow2.f32 %v8870_v52  ;;  %v9719_v60 = vld [vmem:[%s14586_s1 + $0x20] ss:$16 sps:$4 sm:$0xff]   ;;  %v8765_v52 = vld [vmem:[%s12226_s15 + $0x6d8] sm:$0xff] }
 0x459   : > { %v3856_v28 = vadd.f32 1.0, %v10685_v27 }
 0x45a   : > { %v10687_v4 = vpop.eup %10686  ;;  %10702 = vtanh.f32 %v13213_v35 }
 0x45b   : > { %v3952_v5 = vadd.f32 1.0, %v10687_v4  ;;  %10704 = vtanh.f32 %v3762_v50  ;;  %v10689_v46 = vpop.eup %10688  ;;  %v8766_v50 = vld [vmem:[%s12226_s15 + $0x6e0] sm:$0xff] }
 0x45c   : > { %10706 = vrcp.f32 %v3856_v28  ;;  %v3857_v26 = vadd.f32 1.0, %v10689_v46 }
 0x45d   : > { %10708 = vrcp.f32 %v3952_v5  ;;  %v10691_v39 = vpop.eup %10690  ;;  %v8769_v5 = vld [vmem:[%s12226_s15 + $0x6f8] sm:$0xff] }
 0x45e   : > { %10710 = vpow2.f32 %v8871_v12  ;;  %v10693_v34 = vpop.eup %10692  ;;  %v3953_v63 = vadd.f32 1.0, %v10691_v39  ;;  %v8767_v12 = vld [vmem:[%s12226_s15 + $0x6e8] sm:$0xff] }
 0x45f   : > { %10712 = vrcp.f32 %v3857_v26  ;;  %v10695_v6 = vpop.eup %10694 }
 0x460   : > { %v10697_v57 = vpop.eup %10696  ;;  %10714 = vrcp.f32 %v3953_v63 }
 0x461   : > { %v10699_v49 = vpop.eup %10698 }
 0x462   : > { %v10701_v22 = vpop.eup %10700  ;;  %v4174_v54 = vmul.f32 %v10699_v49, %v10693_v34 }
 0x463   : > { %v4064_v55 = vadd.f32 1.0, %v10701_v22  ;;  %v8764_v22 = vld [vmem:[%s12226_s15 + $0x6d0] sm:$0xff] }
 0x464   : > { %v10703_v1 = vpop.eup %10702 }
 0x465   : > { %v10705_v42 = vpop.eup %10704  ;;  %v4175_v29 = vmul.f32 %v10703_v1, %v10695_v6  ;;  %10716 = vrcp.f32 %v4064_v55 }
 0x466   : > { %v10707_v62 = vpop.eup %10706 }
 0x467   : > { %v10709_v21 = vpop.eup %10708  ;;  %v4128_v38 = vmul.f32 %v10707_v62, %v10697_v57  ;;  %v4318_v7 = vpack.c.bf16 %v4175_v29, %v4174_v54 }
 0x468   : > { %v10711_v37 = vpop.eup %10710  ;;  %v4112_v31 = vmul.f32 %v10709_v21, %v12954_v20 }
 0x469   : > { %v10713_v25 = vpop.eup %10712  ;;  %4560 = vmatmul.mubr.bf16.gmra.mrb[132].mxu0 %v4318_v7  ;;  %4673 = vmatmul.mubr.bf16.gmra.mrb[132].mxu1 %v4318_v7  ;;  %v4065_v24 = vadd.f32 1.0, %v10711_v37  ;;  %v8771_v37 = vld [vmem:[%s12226_s15 + $0x708] sm:$0xff] }
 0x46a   : > { %v13218_v33 = vadd.f32 %v4128_v38, %v4112_v31  ;;  %v4129_v23 = vmul.f32 %v10713_v25, %v10705_v42  ;;  %4569 = vmatprep.mubr.bf16.mxu0 %v11988_v2  ;;  %4682 = vmatprep.mubr.bf16.mxu1 %v11988_v2  ;;  %v10715_v0 = vpop.eup %10714  ;;  %v8770_v38 = vld [vmem:[%s12226_s15 + $0x700] sm:$0xff]  ;;  %v8773_v31 = vld [vmem:[%s12226_s15 + $0x718] sm:$0xff]  ;;  %v8768_v25 = vld [vmem:[%s12226_s15 + $0x6f0] sm:$0xff] }
 0x46b   : > { %v4113_v59 = vmul.f32 %v10715_v0, %v12960_v13  ;;  %v9716_v13 = vld [vmem:[%s14586_s1] ss:$16 sps:$4 sm:$0xff]  }
 0x46c   : > { %10718 = vtanh.f32 %v13218_v33  ;;  %5521 = vmatpush1.bf16.msra.mxu0 %v9716_v13 }
 0x46d   : > { %v13223_v14 = vadd.f32 %v4129_v23, %v4113_v59  ;;  %10720 = vrcp.f32 %v4065_v24  ;;  %5522 = vmatprep.subr.bf16.mxu0 %v9721_v48  ;;  %v8774_v24 = vld [vmem:[%s12226_s15 + $0x720] sm:$0xff]  ;;  %v8775_v48 = vld [vmem:[%s12226_s15 + $0x728] sm:$0xff] }
 0x46f   : > { %10722 = vtanh.f32 %v13223_v14  ;;  %v10717_v20 = vpop.eup %10716 }
 0x470   : > { %5523 = vmatpush1.bf16.msra.mxu0 %v9719_v60 }
 0x476   : > { %v10719_v47 = vpop.eup %10718 }
 0x477   : > { %v10721_v3 = vpop.eup %10720  ;;  %v4176_v10 = vmul.f32 %v10719_v47, %v10717_v20 }
 0x479   : > { %v10723_v58 = vpop.eup %10722 }
 0x47a   : > { %v4177_v61 = vmul.f32 %v10723_v58, %v10721_v3 }
 0x47c   : > { %v4319_v16 = vpack.c.bf16 %v4177_v61, %v4176_v10 }
 0x47e   : > { %4570 = vmatmul.mubr.bf16.gmra.mrb[136].mxu0 %v4319_v16  ;;  %4683 = vmatmul.mubr.bf16.gmra.mrb[136].mxu1 %v4319_v16 }
 0x47f   : > { %4579 = vmatprep.mubr.bf16.mxu0 %v11988_v2  ;;  %4692 = vmatprep.mubr.bf16.mxu1 %v11988_v2 }
 0x48f   : > { %v3578_v8 = vpop.f32.mrb[108].mxu0  ;;  %v3691_v19 = vpop.f32.mrb[108].mxu1 }
 0x490   : > { %v3764_v27 = vadd.f32 %v8762_v53, %v3578_v8  ;;  %v3580_v4 = vpop.f32.mrb[109].mxu0  ;;  %v3693_v28 = vpop.f32.mrb[109].mxu1  ;;  %v3766_v7 = vadd.f32 %v8764_v22, %v3691_v19 }
 0x491   : > { %v3765_v46 = vadd.f32 %v8763_v9, %v3580_v4  ;;  %v3767_v26 = vadd.f32 %v8765_v52, %v3693_v28  ;;  %v3582_v39 = vpop.f32.mrb[110].mxu0  ;;  %v3695_v34 = vpop.f32.mrb[110].mxu1  ;;  %v8772_v52 = vld [vmem:[%s12226_s15 + $0x710] sm:$0xff] }
 0x492   : > { %v8840_v63 = vmul.f32 -1.442695, %v3764_v27  ;;  %v3768_v6 = vadd.f32 %v8766_v50, %v3582_v39  ;;  %v3584_v57 = vpop.f32.mrb[111].mxu0  ;;  %v3697_v49 = vpop.f32.mrb[111].mxu1  ;;  %v3770_v16 = vadd.f32 %v8768_v25, %v3695_v34  ;;  %v8776_v34 = vld [vmem:[%s12226_s15 + $0x730] sm:$0xff] }
 0x493   : > { %v8856_v1 = vmul.f32 -1.442695, %v3765_v46  ;;  %v8872_v42 = vmul.f32 -1.442695, %v3767_v26  ;;  %v3769_v54 = vadd.f32 %v8767_v12, %v3584_v57  ;;  %v3771_v29 = vadd.f32 %v8769_v5, %v3697_v49 }
 0x494   : > { %10724 = vpow2.f32 %v8840_v63  ;;  %v8841_v62 = vmul.f32 -1.442695, %v3768_v6  ;;  %v8777_v63 = vld [vmem:[%s12226_s15 + $0x738] sm:$0xff] }
 0x495   : > { %10726 = vpow2.f32 %v8856_v1  ;;  %v8857_v21 = vmul.f32 -1.442695, %v3769_v54  ;;  %v8873_v55 = vmul.f32 -1.442695, %v3771_v29  ;;  %v8778_v29 = vld [vmem:[%s12226_s15 + $0x740] sm:$0xff] }
 0x496   : > { %10728 = vpow2.f32 %v8872_v42 }
 0x497   : > { %10730 = vpow2.f32 %v8841_v62  ;;  %v3588_v23 = vpop.f32.mrb[112].mxu0  ;;  %v3701_v0 = vpop.f32.mrb[112].mxu1 }
 0x498   : > { %v3772_v59 = vadd.f32 %v8770_v38, %v3588_v23  ;;  %v3590_v20 = vpop.f32.mrb[113].mxu0  ;;  %v3703_v47 = vpop.f32.mrb[113].mxu1  ;;  %10732 = vpow2.f32 %v8857_v21  ;;  %v3774_v12 = vadd.f32 %v8772_v52, %v3701_v0  ;;  %v8779_v23 = vld [vmem:[%s12226_s15 + $0x748] sm:$0xff] }
 0x499   : > { %v3773_v3 = vadd.f32 %v8771_v37, %v3590_v20  ;;  %v3775_v58 = vadd.f32 %v8773_v31, %v3703_v47  ;;  %v3592_v10 = vpop.f32.mrb[114].mxu0  ;;  %v3705_v61 = vpop.f32.mrb[114].mxu1  ;;  %10734 = vtanh.f32 %v3766_v7  ;;  %v8782_v47 = vld [vmem:[%s12226_s15 + $0x760] sm:$0xff] }
 0x49a   : > { %v8842_v13 = vmul.f32 -1.442695, %v3772_v59  ;;  %v3776_v43 = vadd.f32 %v8774_v24, %v3592_v10  ;;  %v3594_v60 = vpop.f32.mrb[115].mxu0  ;;  %v3707_v53 = vpop.f32.mrb[115].mxu1  ;;  %10736 = vpow2.f32 %v8873_v55  ;;  %v3778_v7 = vadd.f32 %v8776_v34, %v3705_v61  ;;  %v8781_v59 = vld [vmem:[%s12226_s15 + $0x758] sm:$0xff] }
 0x49b   : > { %v8858_v9 = vmul.f32 -1.442695, %v3773_v3  ;;  %v8874_v8 = vmul.f32 -1.442695, %v3775_v58  ;;  %v3777_v50 = vadd.f32 %v8775_v48, %v3594_v60  ;;  %v3779_v37 = vadd.f32 %v8777_v63, %v3707_v53 }
 0x49c   : > { %10738 = vpow2.f32 %v8842_v13  ;;  %v8843_v19 = vmul.f32 -1.442695, %v3776_v43 }
 0x49d   : > { %10740 = vpow2.f32 %v8858_v9  ;;  %v8859_v22 = vmul.f32 -1.442695, %v3777_v50  ;;  %v8875_v10 = vmul.f32 -1.442695, %v3779_v37  ;;  %v8783_v50 = vld [vmem:[%s12226_s15 + $0x768] sm:$0xff] }
 0x49e   : > { %v10725_v27 = vpop.eup %10724  ;;  %10742 = vtanh.f32 %v3770_v16 }
 0x49f   : > { %v10727_v4 = vpop.eup %10726  ;;  %v3858_v28 = vadd.f32 1.0, %v10725_v27  ;;  %10744 = vpow2.f32 %v8843_v19  ;;  %v3598_v5 = vpop.f32.mrb[116].mxu0 }
 0x4a0   : > { %v13255_v46 = vpop.f32.mrb[116].mxu1  ;;  %v10729_v26 = vpop.eup %10728  ;;  %v3954_v39 = vadd.f32 1.0, %v10727_v4  ;;  %10746 = vpow2.f32 %v8874_v8  ;;  %v3780_v24 = vadd.f32 %v8778_v29, %v3598_v5 }
 0x4a1   : > { %v3600_v6 = vpop.f32.mrb[117].mxu0  ;;  %v3713_v57 = vpop.f32.mrb[117].mxu1  ;;  %10748 = vrcp.f32 %v3858_v28  ;;  %v4066_v25 = vadd.f32 1.0, %v10729_v26 }
 0x4a2   : > { %v10731_v49 = vpop.eup %10730  ;;  %v3602_v1 = vpop.f32.mrb[118].mxu0  ;;  %10750 = vrcp.f32 %v3954_v39  ;;  %v3781_v16 = vadd.f32 %v8779_v23, %v3600_v6  ;;  %v3783_v60 = vadd.f32 %v8781_v59, %v3713_v57  ;;  %v8844_v8 = vmul.f32 -1.442695, %v3780_v24  ;;  %v8785_v6 = vld [vmem:[%s12226_s15 + $0x778] sm:$0xff]  ;;  %v8786_v57 = vld [vmem:[%s12226_s15 + $0x780] sm:$0xff] }
 0x4a3   : > { %v13259_v42 = vpop.f32.mrb[118].mxu1  ;;  %v3859_v54 = vadd.f32 1.0, %v10731_v49  ;;  %v3604_v62 = vpop.f32.mrb[119].mxu0  ;;  %10752 = vtanh.f32 %v3774_v12  ;;  %v3784_v19 = vadd.f32 %v8782_v47, %v3602_v1 }
 0x4a4   : > { %v3717_v21 = vpop.f32.mrb[119].mxu1  ;;  %v10733_v38 = vpop.eup %10732  ;;  %v8860_v63 = vmul.f32 -1.442695, %v3781_v16  ;;  %v8876_v1 = vmul.f32 -1.442695, %v3783_v60  ;;  %v8784_v60 = vld [vmem:[%s12226_s15 + $0x770] sm:$0xff] }
 0x4a5   : > { %v10735_v31 = vpop.eup %10734  ;;  %10754 = vrcp.f32 %v3859_v54  ;;  %v3955_v55 = vadd.f32 1.0, %v10733_v38  ;;  %v3785_v54 = vadd.f32 %v8783_v50, %v3604_v62 }
 0x4a6   : > { %v10737_v0 = vpop.eup %10736  ;;  %10756 = vpow2.f32 %v8859_v22 }
 0x4a7   : > { %v10739_v20 = vpop.eup %10738  ;;  %10758 = vrcp.f32 %v3955_v55  ;;  %v3608_v61 = vpop.f32.mrb[120].mxu0  ;;  %v4067_v12 = vadd.f32 1.0, %v10737_v0  ;;  %v3787_v55 = vadd.f32 %v8785_v6, %v3717_v21  ;;  %v8787_v0 = vld [vmem:[%s12226_s15 + $0x788] sm:$0xff] }
 0x4a8   : > { %v10741_v3 = vpop.eup %10740  ;;  %v3860_v58 = vadd.f32 1.0, %v10739_v20  ;;  %10760 = vtanh.f32 %v3778_v7  ;;  %v13265_v13 = vpop.f32.mrb[120].mxu1  ;;  %v8845_v7 = vmul.f32 -1.442695, %v3784_v19  ;;  %v3788_v23 = vadd.f32 %v8786_v57, %v3608_v61 }
 0x4a9   : > { %v10743_v43 = vpop.eup %10742  ;;  %10762 = vrcp.f32 %v4066_v25  ;;  %v3956_v48 = vadd.f32 1.0, %v10741_v3  ;;  %v3610_v53 = vpop.f32.mrb[121].mxu0  ;;  %v8780_v25 = vld [vmem:[%s12226_s15 + $0x750] sm:$0xff] }
 0x4aa   : > { %v13267_v9 = vpop.f32.mrb[121].mxu1  ;;  %v10745_v52 = vpop.eup %10744  ;;  %10764 = vrcp.f32 %v3860_v58  ;;  %v8861_v58 = vmul.f32 -1.442695, %v3785_v54 }
 0x4ab   : > { %v13270_v27 = vpop.f32.mrb[122].mxu0  ;;  %v13272_v4 = vpop.f32.mrb[122].mxu1  ;;  %10766 = vrcp.f32 %v3956_v48  ;;  %v3861_v5 = vadd.f32 1.0, %v10745_v52  ;;  %v3789_v52 = vadd.f32 %v8787_v0, %v3610_v53  ;;  %v8790_v53 = vld [vmem:[%s12226_s15 + $0x7a0] sm:$0xff] }
 0x4ac   : > { %v10747_v28 = vpop.eup %10746  ;;  %v13274_v26 = vpop.f32.mrb[123].mxu0  ;;  %10768 = vpow2.f32 %v8875_v10  ;;  %v8789_v10 = vld [vmem:[%s12226_s15 + $0x798] sm:$0xff] }
 0x4ad   : > { %v13276_v39 = vpop.f32.mrb[123].mxu1  ;;  %v10749_v34 = vpop.eup %10748  ;;  %10770 = vrcp.f32 %v3861_v5  ;;  %v8862_v54 = vmul.f32 -1.442695, %v3789_v52 }
 0x4ae   : > { %v10751_v49 = vpop.eup %10750  ;;  %v4130_v22 = vmul.f32 %v10749_v34, %v10735_v31  ;;  %10772 = vpow2.f32 %v8844_v8  ;;  %v4068_v31 = vadd.f32 1.0, %v10747_v28  ;;  %v8877_v28 = vmul.f32 -1.442695, %v3787_v55 }
 0x4af   : > { %v10753_v29 = vpop.eup %10752  ;;  %v4114_v38 = vmul.f32 %v10751_v49, %v12973_v18  ;;  %10774 = vrcp.f32 %v4067_v12  ;;  %v13285_v62 = vpop.f32.mrb[124].mxu0  ;;  %v3786_v49 = vadd.f32 %v8784_v60, %v13259_v42 }
 0x4b0   : > { %v10755_v37 = vpop.eup %10754  ;;  %10776 = vpow2.f32 %v8860_v63  ;;  %v13287_v47 = vpop.f32.mrb[124].mxu1  ;;  %v3791_v63 = vadd.f32 %v8789_v10, %v13267_v9 }
 0x4b1   : > { %v10757_v24 = vpop.eup %10756  ;;  %v13283_v59 = vadd.f32 %v4130_v22, %v4114_v38  ;;  %v4131_v20 = vmul.f32 %v10755_v37, %v10743_v43  ;;  %10778 = vpow2.f32 %v8876_v1  ;;  %v13290_v16 = vpop.f32.mrb[125].mxu0  ;;  %v3782_v43 = vadd.f32 %v8780_v25, %v13255_v46 }
 0x4b2   : > { %v10759_v18 = vpop.eup %10758  ;;  %v3957_v3 = vadd.f32 1.0, %v10757_v24  ;;  %v13292_v21 = vpop.f32.mrb[125].mxu1  ;;  %10780 = vpow2.f32 %v8845_v7  ;;  %v8846_v46 = vmul.f32 -1.442695, %v3788_v23  ;;  %v3792_v7 = vadd.f32 %v8790_v53, %v13270_v27  ;;  %v8788_v24 = vld [vmem:[%s12226_s15 + $0x790] sm:$0xff] }
 0x4b3   : > { %v10761_v61 = vpop.eup %10760  ;;  %v4115_v48 = vmul.f32 %v10759_v18, %v12981_v15  ;;  %v13297_v8 = vpop.f32.mrb[126].mxu0  ;;  %v8878_v55 = vmul.f32 -1.442695, %v3791_v63 }
 0x4b4   : > { %v13299_v19 = vpop.f32.mrb[126].mxu1  ;;  %v13301_v50 = vpop.eup %10762  ;;  %10782 = vrcp.f32 %v3957_v3  ;;  %v8847_v3 = vmul.f32 -1.442695, %v3792_v7  ;;  %v8798_v7 = vld [vmem:[%s12226_s15 + $0x7e0] sm:$0xff] }
 0x4b5   : > { %v13303_v12 = vpop.f32.mrb[127].mxu0  ;;  %v13305_v5 = vpop.f32.mrb[127].mxu1  ;;  %v13307_v15 = vadd.f32 %v4131_v20, %v4115_v48  ;;  %10784 = vrcp.f32 %v4068_v31  ;;  %v3790_v48 = vadd.f32 %v8788_v24, %v13265_v13  ;;  %v8795_v13 = vld [vmem:[%s12226_s15 + $0x7c8] sm:$0xff]  ;;  %v3800_v24 = vadd.f32 %v8798_v7, %v13297_v8 }
 0x4b6   : > { %v10765_v34 = vpop.eup %10764  ;;  %10786 = vpow2.f32 %v8861_v58  ;;  %v8794_v58 = vld [vmem:[%s12226_s15 + $0x7c0] sm:$0xff] }
 0x4b7   : > { %v10767_v6 = vpop.eup %10766  ;;  %v4132_v57 = vmul.f32 %v10765_v34, %v10753_v29  ;;  %10788 = vtanh.f32 %v3782_v43  ;;  %v8791_v29 = vld [vmem:[%s12226_s15 + $0x7a8] sm:$0xff]  ;;  %v8793_v34 = vld [vmem:[%s12226_s15 + $0x7b8] sm:$0xff] }
 0x4b8   : > { %v10769_v22 = vpop.eup %10768  ;;  %v4116_v1 = vmul.f32 %v10767_v6, %v13021_v56  ;;  %10790 = vpow2.f32 %v8877_v28  ;;  %v3793_v31 = vadd.f32 %v8791_v29, %v13274_v26  ;;  %v8792_v28 = vld [vmem:[%s12226_s15 + $0x7b0] sm:$0xff] }
 0x4b9   : > { %v10771_v38 = vpop.eup %10770  ;;  %10792 = vpow2.f32 %v8846_v46  ;;  %v4069_v0 = vadd.f32 1.0, %v10769_v22  ;;  %v3796_v46 = vadd.f32 %v8794_v58, %v13285_v62  ;;  %v3797_v62 = vadd.f32 %v8795_v13, %v13290_v16  ;;  %v8796_v58 = vld [vmem:[%s12226_s15 + $0x7d0] sm:$0xff] }
 0x4ba   : > { %v10773_v37 = vpop.eup %10772  ;;  %v13314_v25 = vadd.f32 %v4132_v57, %v4116_v1  ;;  %v4133_v9 = vmul.f32 %v10771_v38, %v10761_v61  ;;  %10794 = vtanh.f32 %v3786_v49  ;;  %v8863_v26 = vmul.f32 -1.442695, %v3793_v31 }
 0x4bb   : > { %v13317_v42 = vpop.eup %10774  ;;  %v3862_v23 = vadd.f32 1.0, %v10773_v37  ;;  %10796 = vpow2.f32 %v8862_v54  ;;  %v3795_v1 = vadd.f32 %v8793_v34, %v13276_v39  ;;  %v8864_v16 = vmul.f32 -1.442695, %v3797_v62 }
 0x4bc   : > { %v10777_v56 = vpop.eup %10776 }
 0x4bd   : > { %v10779_v20 = vpop.eup %10778  ;;  %10798 = vrcp.f32 %v3862_v23  ;;  %v3958_v27 = vadd.f32 1.0, %v10777_v56  ;;  %v8879_v39 = vmul.f32 -1.442695, %v3795_v1 }
 0x4be   : > { %v10781_v18 = vpop.eup %10780  ;;  %10800 = vpow2.f32 %v8878_v55  ;;  %v4070_v6 = vadd.f32 1.0, %v10779_v20  ;;  %v8799_v20 = vld [vmem:[%s12226_s15 + $0x7e8] sm:$0xff] }
 0x4bf   : > { %v10783_v10 = vpop.eup %10782  ;;  %10802 = vrcp.f32 %v3958_v27  ;;  %v3863_v61 = vadd.f32 1.0, %v10781_v18 }
 0x4c0   : > { %v13323_v43 = vpop.eup %10784  ;;  %v4117_v60 = vmul.f32 %v10783_v10, %v13028_v45  ;;  %10804 = vrcp.f32 %v4069_v0  ;;  %v3794_v45 = vadd.f32 %v8792_v28, %v13272_v4  ;;  %v8797_v0 = vld [vmem:[%s12226_s15 + $0x7d8] sm:$0xff]  ;;  %v8849_v28 = vmul.f32 -1.442695, %v3800_v24 }
 0x4c1   : > { %v10787_v52 = vpop.eup %10786  ;;  %10806 = vrcp.f32 %v3863_v61  ;;  %v3799_v61 = vadd.f32 %v8797_v0, %v13292_v21 }
 0x4c2   : > { %v10789_v63 = vpop.eup %10788  ;;  %v13329_v53 = vadd.f32 %v4133_v9, %v4117_v60  ;;  %v3959_v57 = vadd.f32 1.0, %v10787_v52  ;;  %10808 = vpow2.f32 %v8847_v3  ;;  %v8848_v9 = vmul.f32 -1.442695, %v3796_v46 }
 0x4c3   : > { %v10791_v49 = vpop.eup %10790  ;;  %10810 = vtanh.f32 %v3790_v48  ;;  %v3801_v48 = vadd.f32 %v8799_v20, %v13303_v12  ;;  %v8880_v12 = vmul.f32 -1.442695, %v3799_v61 }
 0x4c4   : > { %v10793_v22 = vpop.eup %10792  ;;  %10812 = vrcp.f32 %v3959_v57  ;;  %v4071_v29 = vadd.f32 1.0, %v10791_v49 }
 0x4c5   : > { %v10795_v54 = vpop.eup %10794  ;;  %v3864_v38 = vadd.f32 1.0, %v10793_v22  ;;  %10814 = vpow2.f32 %v8863_v26  ;;  %v8865_v57 = vmul.f32 -1.442695, %v3801_v48  ;;  %v8801_v22 = vld [vmem:[%s12226_s15 + $0x7f8] sm:$0xff] }
 0x4c6   : > { %v10797_v37 = vpop.eup %10796  ;;  %10816 = vrcp.f32 %v4070_v6 }
 0x4c7   : > { %v10799_v55 = vpop.eup %10798  ;;  %10818 = vrcp.f32 %v3864_v38  ;;  %v3960_v23 = vadd.f32 1.0, %v10797_v37  ;;  %v9725_v38 = vld [vmem:[%s14586_s1 + $0x40] ss:$16 sps:$4 sm:$0xff]   ;;  %v9727_v37 = vld [vmem:[%s14586_s1 + $0x44] ss:$16 sps:$4 sm:$0xff]  }
 0x4c8   : > { %v10801_v56 = vpop.eup %10800  ;;  %v4134_v4 = vmul.f32 %v10799_v55, %v10789_v63  ;;  %10820 = vtanh.f32 %v3794_v45  ;;  %v8800_v63 = vld [vmem:[%s12226_s15 + $0x7f0] sm:$0xff]  ;;  %v9722_v45 = vld [vmem:[%s14586_s1 + $0x8] ss:$16 sps:$4 sm:$0xff]   ;;  %v3803_v55 = vadd.f32 %v8801_v22, %v13305_v5  ;;  %5524 = vmatprep.subr.bf16.mxu0 %v9727_v37 }
 0x4c9   : > { %v10803_v27 = vpop.eup %10802  ;;  %10822 = vrcp.f32 %v3960_v23  ;;  %v4072_v3 = vadd.f32 1.0, %v10801_v56  ;;  %5525 = vmatpush1.bf16.msra.mxu0 %v9725_v38 }
 0x4ca   : > { %v13339_v31 = vpop.eup %10804  ;;  %v4118_v18 = vmul.f32 %v10803_v27, %v13037_v44  ;;  %10824 = vpow2.f32 %v8848_v9  ;;  %v3798_v44 = vadd.f32 %v8796_v58, %v13287_v47  ;;  %v9724_v47 = vld [vmem:[%s14586_s1 + $0xc] ss:$16 sps:$4 sm:$0xff]   ;;  %v8881_v24 = vmul.f32 -1.442695, %v3803_v55 }
 0x4cb   : > { %v10807_v10 = vpop.eup %10806  ;;  %10826 = vrcp.f32 %v4071_v29  ;;  %5633 = vmatprep.subr.bf16.mxu1 %v9724_v47 }
 0x4cc   : > { %v10809_v60 = vpop.eup %10808  ;;  %v13345_v8 = vadd.f32 %v4134_v4, %v4118_v18  ;;  %v4135_v52 = vmul.f32 %v10807_v10, %v10795_v54  ;;  %10828 = vpow2.f32 %v8879_v39  ;;  %5634 = vmatpush1.bf16.msra.mxu1 %v9722_v45 }
 0x4cd   : > { %v10811_v26 = vpop.eup %10810  ;;  %v3865_v34 = vadd.f32 1.0, %v10809_v60  ;;  %10830 = vpow2.f32 %v8864_v16 }
 0x4ce   : > { %v10813_v46 = vpop.eup %10812  ;;  %10832 = vrcp.f32 %v4072_v3 }
 0x4cf   : > { %v10815_v6 = vpop.eup %10814  ;;  %v4119_v21 = vmul.f32 %v10813_v46, %v13047_v11  ;;  %10834 = vrcp.f32 %v3865_v34  ;;  %v3802_v11 = vadd.f32 %v8800_v63, %v13299_v19 }
 0x4d0   : > { %v13350_v13 = vpop.eup %10816  ;;  %v3961_v49 = vadd.f32 1.0, %v10815_v6  ;;  %10836 = vpow2.f32 %v8849_v28 }
 0x4d1   : > { %v10819_v1 = vpop.eup %10818  ;;  %v13359_v54 = vadd.f32 %v4135_v52, %v4119_v21  ;;  %10838 = vtanh.f32 %v3798_v44 }
 0x4d2   : > { %v10821_v62 = vpop.eup %10820  ;;  %v4136_v7 = vmul.f32 %v10819_v1, %v10811_v26  ;;  %10840 = vrcp.f32 %v3961_v49  ;;  %v9731_v1 = vld [vmem:[%s14586_s1 + $0x60] ss:$16 sps:$4 sm:$0xff]  }
 0x4d3   : > { %v10823_v9 = vpop.eup %10822  ;;  %10842 = vpow2.f32 %v8865_v57  ;;  %v9730_v57 = vld [vmem:[%s14586_s1 + $0x2c] ss:$16 sps:$4 sm:$0xff]  }
 0x4d4   : > { %v10825_v29 = vpop.eup %10824  ;;  %v4120_v19 = vmul.f32 %v10823_v9, %v13055_v17  ;;  %10844 = vpow2.f32 %v8880_v12  ;;  %v9728_v12 = vld [vmem:[%s14586_s1 + $0x28] ss:$16 sps:$4 sm:$0xff]   ;;  %5635 = vmatprep.subr.bf16.mxu1 %v9730_v57 }
 0x4d5   : > { %v13370_v23 = vpop.eup %10826  ;;  %v3866_v56 = vadd.f32 1.0, %v10825_v29  ;;  %10846 = vtanh.f32 %v3802_v11  ;;  %5636 = vmatpush1.bf16.msra.mxu1 %v9728_v12  ;;  %v8887_v57 = vld [vmem:[%s12226_s15 + $0x828] sm:$0xff] }
 0x4d6   : > { %v10829_v4 = vpop.eup %10828  ;;  %v13372_v39 = vadd.f32 %v4136_v7, %v4120_v19  ;;  %10848 = vtanh.f32 %v13283_v59 }
 0x4d7   : > { %v10831_v0 = vpop.eup %10830  ;;  %10850 = vrcp.f32 %v3866_v56  ;;  %v4073_v48 = vadd.f32 1.0, %v10829_v4 }
 0x4d8   : > { %v13375_v5 = vpop.eup %10832  ;;  %v3962_v20 = vadd.f32 1.0, %v10831_v0  ;;  %10852 = vtanh.f32 %v13307_v15 }
 0x4d9   : > { %v10835_v17 = vpop.eup %10834  ;;  %10854 = vtanh.f32 %v13314_v25 }
 0x4da   : > { %v10837_v27 = vpop.eup %10836  ;;  %v4137_v16 = vmul.f32 %v10835_v17, %v10821_v62  ;;  %10856 = vrcp.f32 %v3962_v20 }
 0x4db   : > { %v10839_v18 = vpop.eup %10838  ;;  %v3867_v3 = vadd.f32 1.0, %v10837_v27  ;;  %10858 = vpow2.f32 %v8881_v24 }
 0x4dc   : > { %v10841_v58 = vpop.eup %10840  ;;  %10860 = vtanh.f32 %v13329_v53 }
 0x4dd   : > { %v10843_v10 = vpop.eup %10842  ;;  %v4121_v61 = vmul.f32 %v10841_v58, %v13062_v40  ;;  %10862 = vrcp.f32 %v3867_v3  ;;  %v9734_v58 = vld [vmem:[%s14586_s1 + $0x48] ss:$16 sps:$4 sm:$0xff]  }
 0x4de   : > { %v10845_v60 = vpop.eup %10844  ;;  %v3963_v52 = vadd.f32 1.0, %v10843_v10  ;;  %10864 = vtanh.f32 %v13345_v8  ;;  %v9736_v10 = vld [vmem:[%s14586_s1 + $0x4c] ss:$16 sps:$4 sm:$0xff]  }
 0x4df   : > { %v10847_v28 = vpop.eup %10846  ;;  %v13382_v26 = vadd.f32 %v4137_v16, %v4121_v61  ;;  %10866 = vtanh.f32 %v13359_v54  ;;  %v4074_v37 = vadd.f32 1.0, %v10845_v60  ;;  %v9737_v60 = vld [vmem:[%s14586_s1 + $0x80] ss:$16 sps:$4 sm:$0xff]   ;;  %5637 = vmatprep.subr.bf16.mxu1 %v9736_v10 }
 0x4e0   : > { %v10849_v34 = vpop.eup %10848  ;;  %10868 = vrcp.f32 %v3963_v52  ;;  %v9739_v52 = vld [vmem:[%s14586_s1 + $0x84] ss:$16 sps:$4 sm:$0xff]   ;;  %5638 = vmatpush1.bf16.msra.mxu1 %v9734_v58 }
 0x4e1   : > { %v10851_v44 = vpop.eup %10850  ;;  %10870 = vrcp.f32 %v4073_v48  ;;  %v4178_v6 = vmul.f32 %v10849_v34, %v13301_v50  ;;  %v9733_v50 = vld [vmem:[%s14586_s1 + $0x64] ss:$16 sps:$4 sm:$0xff]  }
 0x4e2   : > { %v10853_v46 = vpop.eup %10852  ;;  %v4138_v63 = vmul.f32 %v10851_v44, %v10839_v18  ;;  %10872 = vtanh.f32 %v13372_v39  ;;  %5526 = vmatprep.subr.bf16.mxu0 %v9733_v50  ;;  %v8882_v34 = vld [vmem:[%s12226_s15 + $0x800] sm:$0xff]  ;;  %v8883_v44 = vld [vmem:[%s12226_s15 + $0x808] sm:$0xff] }
 0x4e3   : > { %v10855_v40 = vpop.eup %10854  ;;  %v4179_v21 = vmul.f32 %v10853_v46, %v13317_v42  ;;  %10874 = vtanh.f32 %v13382_v26  ;;  %5527 = vmatpush1.bf16.msra.mxu0 %v9731_v1 }
 0x4e4   : > { %v10857_v49 = vpop.eup %10856  ;;  %v4180_v62 = vmul.f32 %v10855_v40, %v13323_v43  ;;  %10876 = vrcp.f32 %v4074_v37  ;;  %5528 = vmatprep.subr.bf16.mxu0 %v9739_v52  ;;  %v8886_v40 = vld [vmem:[%s12226_s15 + $0x820] sm:$0xff]  ;;  %v8884_v37 = vld [vmem:[%s12226_s15 + $0x810] sm:$0xff] }
 0x4e5   : > { %v10859_v22 = vpop.eup %10858  ;;  %v4122_v45 = vmul.f32 %v10857_v49, %v13068_v36  ;;  %v4320_v47 = vpack.c.bf16 %v4179_v21, %v4178_v6 }
 0x4e6   : > { %v10861_v42 = vpop.eup %10860  ;;  %v4075_v56 = vadd.f32 1.0, %v10859_v22 }
 0x4e7   : > { %v10863_v11 = vpop.eup %10862  ;;  %v13402_v38 = vadd.f32 %v4138_v63, %v4122_v45  ;;  %4580 = vmatmul.mubr.bf16.gmra.mrb[140].mxu0 %v4320_v47  ;;  %4693 = vmatmul.mubr.bf16.gmra.mrb[140].mxu1 %v4320_v47  ;;  %v4181_v36 = vmul.f32 %v10861_v42, %v13339_v31 }
 0x4e8   : > { %v10865_v7 = vpop.eup %10864  ;;  %v4139_v9 = vmul.f32 %v10863_v11, %v10847_v28  ;;  %4589 = vmatprep.mubr.bf16.mxu0 %v11988_v2  ;;  %4702 = vmatprep.mubr.bf16.mxu1 %v11988_v2 }
 0x4e9   : > { %v10867_v55 = vpop.eup %10866  ;;  %v4321_v29 = vpack.c.bf16 %v4181_v36, %v4180_v62  ;;  %v4182_v4 = vmul.f32 %v10865_v7, %v13350_v13  ;;  %10878 = vtanh.f32 %v13402_v38  ;;  %5529 = vmatpush1.bf16.msra.mxu0 %v9737_v60 }
 0x4ea   : > { %v10869_v19 = vpop.eup %10868  ;;  %v4183_v0 = vmul.f32 %v10867_v55, %v13370_v23  ;;  %10880 = vrcp.f32 %v4075_v56  ;;  %v8888_v55 = vld [vmem:[%s12226_s15 + $0x830] sm:$0xff] }
 0x4eb   : > { %v10871_v43 = vpop.eup %10870  ;;  %v4123_v31 = vmul.f32 %v10869_v19, %v13079_v41 }
 0x4ec   : > { %v10873_v24 = vpop.eup %10872  ;;  %v4322_v20 = vpack.c.bf16 %v4183_v0, %v4182_v4 }
 0x4ed   : > { %v10875_v17 = vpop.eup %10874  ;;  %v13411_v27 = vadd.f32 %v4139_v9, %v4123_v31  ;;  %v4184_v16 = vmul.f32 %v10873_v24, %v13375_v5  ;;  %v8889_v24 = vld [vmem:[%s12226_s15 + $0x838] sm:$0xff] }
 0x4ee   : > { %v4185_v18 = vmul.f32 %v10875_v17, %v10871_v43  ;;  %v10877_v13 = vpop.eup %10876  ;;  %v9742_v17 = vld [vmem:[%s14586_s1 + $0x6c] ss:$16 sps:$4 sm:$0xff]  }
 0x4ef   : > { %4590 = vmatmul.mubr.bf16.gmra.mrb[144].mxu0 %v4321_v29  ;;  %4703 = vmatmul.mubr.bf16.gmra.mrb[144].mxu1 %v4321_v29  ;;  %10882 = vtanh.f32 %v13411_v27  ;;  %v8885_v29 = vld [vmem:[%s12226_s15 + $0x818] sm:$0xff] }
 0x4f0   : > { %4599 = vmatprep.mubr.bf16.mxu0 %v11988_v2  ;;  %4712 = vmatprep.mubr.bf16.mxu1 %v11988_v2  ;;  %v4323_v41 = vpack.c.bf16 %v4185_v18, %v4184_v16  ;;  %v8890_v18 = vld [vmem:[%s12226_s15 + $0x840] sm:$0xff] }
 0x4f1   : > { %5639 = vmatprep.subr.bf16.mxu1 %v9742_v17 }
 0x4f3   : > { %v10879_v23 = vpop.eup %10878 }
 0x4f4   : > { %v10881_v3 = vpop.eup %10880  ;;  %v4186_v61 = vmul.f32 %v10879_v23, %v10877_v13 }
 0x4f7   : > { %4600 = vmatmul.mubr.bf16.gmra.mrb[148].mxu0 %v4322_v20  ;;  %4713 = vmatmul.mubr.bf16.gmra.mrb[148].mxu1 %v4322_v20 }
 0x4f8   : > { %4609 = vmatprep.mubr.bf16.mxu0 %v11988_v2  ;;  %4722 = vmatprep.mubr.bf16.mxu1 %v11988_v2 }
 0x4f9   : > { %v10883_v5 = vpop.eup %10882 }
 0x4fa   : > { %v4187_v48 = vmul.f32 %v10883_v5, %v10881_v3  ;;  %v8891_v3 = vld [vmem:[%s12226_s15 + $0x848] sm:$0xff] }
 0x4fc   : > { %v4324_v28 = vpack.c.bf16 %v4187_v48, %v4186_v61  ;;  %v8894_v48 = vld [vmem:[%s12226_s15 + $0x860] sm:$0xff] }
 0x4ff   : > { %4610 = vmatmul.mubr.bf16.gmra.mrb[152].mxu0 %v4323_v41  ;;  %4723 = vmatmul.mubr.bf16.gmra.mrb[152].mxu1 %v4323_v41  ;;  %v9740_v41 = vld [vmem:[%s14586_s1 + $0x68] ss:$16 sps:$4 sm:$0xff]  }
 0x500   : > { %4619 = vmatprep.mubr.bf16.mxu0 %v11988_v2  ;;  %4732 = vmatprep.mubr.bf16.mxu1 %v11988_v2 }
 0x501   : > { %5640 = vmatpush1.bf16.msra.mxu1 %v9740_v41 }
 0x507   : > { %4620 = vmatmul.mubr.bf16.gmra.mrb[156].mxu0 %v4324_v28  ;;  %4733 = vmatmul.mubr.bf16.gmra.mrb[156].mxu1 %v4324_v28 }
 0x508   : > { %5552 = vmatprep.mubr.bf16.mxu0 %v11988_v2  ;;  %5665 = vmatprep.mubr.bf16.mxu1 %v11988_v2 }
 0x528   : > { %v4551_v46 = vpop.f32.mrb[128].mxu0  ;;  %v4664_v63 = vpop.f32.mrb[128].mxu1 }
 0x529   : > { %v4743_v6 = vadd.f32 %v8882_v34, %v4551_v46  ;;  %v4553_v21 = vpop.f32.mrb[129].mxu0  ;;  %v4666_v12 = vpop.f32.mrb[129].mxu1  ;;  %v4745_v9 = vadd.f32 %v8884_v37, %v4664_v63  ;;  %v8895_v34 = vld [vmem:[%s12226_s15 + $0x868] sm:$0xff] }
 0x52a   : > { %v4744_v49 = vadd.f32 %v8883_v44, %v4553_v21  ;;  %v4555_v22 = vpop.f32.mrb[130].mxu0  ;;  %v4668_v45 = vpop.f32.mrb[130].mxu1  ;;  %v4746_v31 = vadd.f32 %v8885_v29, %v4666_v12  ;;  %v9745_v29 = vld [vmem:[%s14586_s1 + $0xa4] ss:$16 sps:$4 sm:$0xff]  }
 0x52b   : > { %v8978_v47 = vmul.f32 -1.442695, %v4743_v6  ;;  %v4747_v50 = vadd.f32 %v8886_v40, %v4555_v22  ;;  %v4557_v42 = vpop.f32.mrb[131].mxu0  ;;  %v4670_v1 = vpop.f32.mrb[131].mxu1  ;;  %v4749_v0 = vadd.f32 %v8888_v55, %v4668_v45  ;;  %v8893_v22 = vld [vmem:[%s12226_s15 + $0x858] sm:$0xff]  ;;  %5530 = vmatprep.subr.bf16.mxu0 %v9745_v29 }
 0x52c   : > { %v8994_v11 = vmul.f32 -1.442695, %v4744_v49  ;;  %v4748_v62 = vadd.f32 %v8887_v57, %v4557_v42  ;;  %v4750_v23 = vadd.f32 %v8889_v24, %v4670_v1  ;;  %v9010_v5 = vmul.f32 -1.442695, %v4746_v31  ;;  %v9748_v42 = vld [vmem:[%s14586_s1 + $0x8c] ss:$16 sps:$4 sm:$0xff]  }
 0x52d   : > { %10884 = vpow2.f32 %v8978_v47  ;;  %v8979_v36 = vmul.f32 -1.442695, %v4747_v50  ;;  %v9746_v50 = vld [vmem:[%s14586_s1 + $0x88] ss:$16 sps:$4 sm:$0xff]   ;;  %5641 = vmatprep.subr.bf16.mxu1 %v9748_v42 }
 0x52e   : > { %10886 = vpow2.f32 %v8994_v11  ;;  %v8995_v7 = vmul.f32 -1.442695, %v4748_v62  ;;  %v9011_v40 = vmul.f32 -1.442695, %v4750_v23  ;;  %v8897_v62 = vld [vmem:[%s12226_s15 + $0x878] sm:$0xff]  ;;  %5642 = vmatpush1.bf16.msra.mxu1 %v9746_v50  ;;  %v8903_v42 = vld [vmem:[%s12226_s15 + $0x8a8] sm:$0xff] }
 0x52f   : > { %10888 = vpow2.f32 %v8979_v36 }
 0x530   : > { %10890 = vpow2.f32 %v8995_v7  ;;  %v8892_v7 = vld [vmem:[%s12226_s15 + $0x850] sm:$0xff] }
 0x531   : > { %10892 = vtanh.f32 %v4745_v9 }
 0x537   : > { %v10885_v19 = vpop.eup %10884 }
 0x538   : > { %v10887_v56 = vpop.eup %10886  ;;  %v4855_v4 = vadd.f32 1.0, %v10885_v19 }
 0x539   : > { %v4951_v43 = vadd.f32 1.0, %v10887_v56  ;;  %v10889_v20 = vpop.eup %10888 }
 0x53a   : > { %10894 = vrcp.f32 %v4855_v4  ;;  %v4856_v16 = vadd.f32 1.0, %v10889_v20  ;;  %v10891_v13 = vpop.eup %10890  ;;  %v8896_v4 = vld [vmem:[%s12226_s15 + $0x870] sm:$0xff] }
 0x53b   : > { %10896 = vrcp.f32 %v4951_v43  ;;  %v4952_v58 = vadd.f32 1.0, %v10891_v13  ;;  %v10893_v1 = vpop.eup %10892  ;;  %v9743_v43 = vld [vmem:[%s14586_s1 + $0xa0] ss:$16 sps:$4 sm:$0xff]  }
 0x53c   : > { %10898 = vtanh.f32 %v4749_v0  ;;  %v4561_v10 = vpop.f32.mrb[132].mxu0  ;;  %v4674_v61 = vpop.f32.mrb[132].mxu1  ;;  %5531 = vmatpush1.bf16.msra.mxu0 %v9743_v43  ;;  %v8901_v43 = vld [vmem:[%s12226_s15 + $0x898] sm:$0xff] }
 0x53d   : > { %10900 = vrcp.f32 %v4856_v16  ;;  %v4751_v60 = vadd.f32 %v8890_v18, %v4561_v10  ;;  %v4563_v52 = vpop.f32.mrb[133].mxu0  ;;  %v4676_v28 = vpop.f32.mrb[133].mxu1  ;;  %v4753_v24 = vadd.f32 %v8892_v7, %v4674_v61  ;;  %v9752_v10 = vld [vmem:[%s14586_s1 + $0xa8] ss:$16 sps:$4 sm:$0xff]  }
 0x53e   : > { %10902 = vrcp.f32 %v4952_v58  ;;  %v4752_v44 = vadd.f32 %v8891_v3, %v4563_v52  ;;  %v4565_v46 = vpop.f32.mrb[134].mxu0  ;;  %v4678_v63 = vpop.f32.mrb[134].mxu1  ;;  %v4754_v37 = vadd.f32 %v8893_v22, %v4676_v28  ;;  %v9749_v3 = vld [vmem:[%s14586_s1 + $0xc0] ss:$16 sps:$4 sm:$0xff]  }
 0x53f   : > { %v8980_v6 = vmul.f32 -1.442695, %v4751_v60  ;;  %v4755_v21 = vadd.f32 %v8894_v48, %v4565_v46  ;;  %v4567_v12 = vpop.f32.mrb[135].mxu0  ;;  %v4680_v57 = vpop.f32.mrb[135].mxu1  ;;  %10904 = vpow2.f32 %v9010_v5  ;;  %v4757_v41 = vadd.f32 %v8896_v4, %v4678_v63  ;;  %v9754_v5 = vld [vmem:[%s14586_s1 + $0xac] ss:$16 sps:$4 sm:$0xff]  }
 0x540   : > { %v8996_v49 = vmul.f32 -1.442695, %v4752_v44  ;;  %v4756_v45 = vadd.f32 %v8895_v34, %v4567_v12  ;;  %v4758_v0 = vadd.f32 %v8897_v62, %v4680_v57  ;;  %v9012_v16 = vmul.f32 -1.442695, %v4754_v37  ;;  %5643 = vmatprep.subr.bf16.mxu1 %v9754_v5  ;;  %v8899_v12 = vld [vmem:[%s12226_s15 + $0x888] sm:$0xff]  ;;  %v8902_v22 = vld [vmem:[%s12226_s15 + $0x8a0] sm:$0xff] }
 0x541   : > { %10906 = vpow2.f32 %v8980_v6  ;;  %v8981_v47 = vmul.f32 -1.442695, %v4755_v21  ;;  %5644 = vmatpush1.bf16.msra.mxu1 %v9752_v10  ;;  %v9758_v37 = vld [vmem:[%s14586_s1 + $0xc8] ss:$16 sps:$4 sm:$0xff]  }
 0x542   : > { %10908 = vpow2.f32 %v8996_v49  ;;  %v8997_v11 = vmul.f32 -1.442695, %v4756_v45  ;;  %v9013_v23 = vmul.f32 -1.442695, %v4758_v0 }
 0x543   : > { %10910 = vpow2.f32 %v9011_v40  ;;  %v8898_v40 = vld [vmem:[%s12226_s15 + $0x880] sm:$0xff] }
 0x544   : > { %v10895_v36 = vpop.eup %10894  ;;  %10912 = vpow2.f32 %v8981_v47 }
 0x545   : > { %v10897_v9 = vpop.eup %10896  ;;  %v5127_v55 = vmul.f32 %v10895_v36, %v10893_v1  ;;  %10914 = vpow2.f32 %v8997_v11  ;;  %v9760_v1 = vld [vmem:[%s14586_s1 + $0xcc] ss:$16 sps:$4 sm:$0xff]  }
 0x546   : > { %v10899_v19 = vpop.eup %10898  ;;  %v5111_v56 = vmul.f32 %v10897_v9, %v13191_v51  ;;  %v9751_v51 = vld [vmem:[%s14586_s1 + $0xc4] ss:$16 sps:$4 sm:$0xff]   ;;  %10916 = vtanh.f32 %v4753_v24  ;;  %5645 = vmatprep.subr.bf16.mxu1 %v9760_v1 }
 0x547   : > { %v10901_v31 = vpop.eup %10900  ;;  %5532 = vmatprep.subr.bf16.mxu0 %v9751_v51  ;;  %10918 = vpow2.f32 %v9012_v16  ;;  %5646 = vmatpush1.bf16.msra.mxu1 %v9758_v37  ;;  %v9757_v16 = vld [vmem:[%s14586_s1 + $0xe4] ss:$16 sps:$4 sm:$0xff]  }
 0x548   : > { %v13471_v20 = vadd.f32 %v5127_v55, %v5111_v56  ;;  %v5128_v17 = vmul.f32 %v10901_v31, %v10899_v19  ;;  %v10903_v18 = vpop.eup %10902  ;;  %5533 = vmatpush1.bf16.msra.mxu0 %v9749_v3  ;;  %10920 = vtanh.f32 %v4757_v41  ;;  %v8900_v51 = vld [vmem:[%s12226_s15 + $0x890] sm:$0xff] }
 0x549   : > { %v5112_v13 = vmul.f32 %v10903_v18, %v13196_v32  ;;  %v10905_v58 = vpop.eup %10904  ;;  %10922 = vpow2.f32 %v9013_v23  ;;  %v9763_v18 = vld [vmem:[%s14586_s1 + $0xec] ss:$16 sps:$4 sm:$0xff]   ;;  %v9755_v23 = vld [vmem:[%s14586_s1 + $0xe0] ss:$16 sps:$4 sm:$0xff]   ;;  %5534 = vmatprep.subr.bf16.mxu0 %v9757_v16 }
 0x54a   : > { %v5063_v63 = vadd.f32 1.0, %v10905_v58  ;;  %5647 = vmatprep.subr.bf16.mxu1 %v9763_v18 }
 0x54b   : > { %v10907_v61 = vpop.eup %10906  ;;  %v13486_v48 = vadd.f32 %v5128_v17, %v5112_v13 }
 0x54c   : > { %v10909_v32 = vpop.eup %10908  ;;  %v4857_v60 = vadd.f32 1.0, %v10907_v61  ;;  %v9761_v61 = vld [vmem:[%s14586_s1 + $0xe8] ss:$16 sps:$4 sm:$0xff]   ;;  %5535 = vmatpush1.bf16.msra.mxu0 %v9755_v23 }
 0x54d   : > { %v10911_v52 = vpop.eup %10910  ;;  %v4953_v28 = vadd.f32 1.0, %v10909_v32  ;;  %5648 = vmatpush1.bf16.msra.mxu1 %v9761_v61 }
 0x54e   : > { %v10913_v34 = vpop.eup %10912  ;;  %10924 = vrcp.f32 %v4857_v60  ;;  %v5064_v6 = vadd.f32 1.0, %v10911_v52 }
 0x54f   : > { %10926 = vrcp.f32 %v4953_v28  ;;  %v4858_v44 = vadd.f32 1.0, %v10913_v34  ;;  %v10915_v46 = vpop.eup %10914 }
 0x550   : > { %10928 = vtanh.f32 %v13471_v20  ;;  %v4954_v21 = vadd.f32 1.0, %v10915_v46  ;;  %v10917_v11 = vpop.eup %10916 }
 0x551   : > { %10930 = vrcp.f32 %v4858_v44  ;;  %v4571_v57 = vpop.f32.mrb[136].mxu0  ;;  %v4684_v49 = vpop.f32.mrb[136].mxu1  ;;  %v8905_v44 = vld [vmem:[%s12226_s15 + $0x8b8] sm:$0xff] }
 0x552   : > { %10932 = vtanh.f32 %v13486_v48  ;;  %v4759_v45 = vadd.f32 %v8898_v40, %v4571_v57  ;;  %v4573_v47 = vpop.f32.mrb[137].mxu0  ;;  %v4686_v50 = vpop.f32.mrb[137].mxu1  ;;  %v4761_v34 = vadd.f32 %v8900_v51, %v4684_v49 }
 0x553   : > { %10934 = vrcp.f32 %v4954_v21  ;;  %v4760_v62 = vadd.f32 %v8899_v12, %v4573_v47  ;;  %v4575_v36 = vpop.f32.mrb[138].mxu0  ;;  %v4688_v7 = vpop.f32.mrb[138].mxu1  ;;  %v4762_v10 = vadd.f32 %v8901_v43, %v4686_v50 }
 0x554   : > { %10936 = vrcp.f32 %v5063_v63  ;;  %v10919_v9 = vpop.eup %10918  ;;  %v8982_v55 = vmul.f32 -1.442695, %v4759_v45  ;;  %v4763_v29 = vadd.f32 %v8902_v22, %v4575_v36  ;;  %v4577_v19 = vpop.f32.mrb[139].mxu0 }
 0x555   : > { %10938 = vrcp.f32 %v5064_v6  ;;  %v4690_v56 = vpop.f32.mrb[139].mxu1  ;;  %v10921_v4 = vpop.eup %10920  ;;  %v8998_v0 = vmul.f32 -1.442695, %v4760_v62  ;;  %v4764_v31 = vadd.f32 %v8903_v42, %v4577_v19  ;;  %v5065_v58 = vadd.f32 1.0, %v10919_v9  ;;  %v8904_v6 = vld [vmem:[%s12226_s15 + $0x8b0] sm:$0xff] }
 0x556   : > { %v10923_v24 = vpop.eup %10922  ;;  %10940 = vpow2.f32 %v8982_v55  ;;  %v8983_v17 = vmul.f32 -1.442695, %v4763_v29  ;;  %v9014_v12 = vmul.f32 -1.442695, %v4762_v10  ;;  %v4765_v47 = vadd.f32 %v8904_v6, %v4688_v7 }
 0x557   : > { %10942 = vpow2.f32 %v8998_v0  ;;  %v8999_v13 = vmul.f32 -1.442695, %v4764_v31  ;;  %v5066_v52 = vadd.f32 1.0, %v10923_v24 }
 0x558   : > { %v10925_v41 = vpop.eup %10924  ;;  %10944 = vpow2.f32 %v8983_v17 }
 0x559   : > { %v10927_v3 = vpop.eup %10926  ;;  %v5129_v5 = vmul.f32 %v10925_v41, %v10917_v11  ;;  %10946 = vpow2.f32 %v8999_v13 }
 0x55a   : > { %v10929_v32 = vpop.eup %10928  ;;  %v5113_v60 = vmul.f32 %v10927_v3, %v13207_v30  ;;  %10948 = vrcp.f32 %v5065_v58  ;;  %v4766_v30 = vadd.f32 %v8905_v44, %v4690_v56 }
 0x55b   : > { %v10931_v28 = vpop.eup %10930  ;;  %10950 = vrcp.f32 %v5066_v52 }
 0x55c   : > { %v10933_v46 = vpop.eup %10932  ;;  %v13516_v63 = vadd.f32 %v5129_v5, %v5113_v60  ;;  %v5130_v40 = vmul.f32 %v10931_v28, %v10921_v4  ;;  %10952 = vtanh.f32 %v4761_v34  ;;  %v9015_v36 = vmul.f32 -1.442695, %v4766_v30  ;;  %v8906_v30 = vld [vmem:[%s12226_s15 + $0x8c0] sm:$0xff] }
 0x55d   : > { %v10935_v21 = vpop.eup %10934 }
 0x55e   : > { %v10937_v57 = vpop.eup %10936  ;;  %v5114_v22 = vmul.f32 %v10935_v21, %v13213_v35  ;;  %10954 = vtanh.f32 %v13516_v63 }
 0x55f   : > { %v10939_v45 = vpop.eup %10938  ;;  %v5175_v50 = vmul.f32 %v10937_v57, %v10929_v32  ;;  %10956 = vpow2.f32 %v9014_v12  ;;  %v9766_v12 = vld [vmem:[%s14586_s1 + $0x4] ss:$16 sps:$4 sm:$0xff]  }
 0x560   : > { %v13520_v49 = vadd.f32 %v5130_v40, %v5114_v22  ;;  %v5176_v42 = vmul.f32 %v10939_v45, %v10933_v46  ;;  %v10941_v1 = vpop.eup %10940  ;;  %v9769_v57 = vld [vmem:[%s14586_s1 + $0x24] ss:$16 sps:$4 sm:$0xff]   ;;  %6523 = vmatprep.subr.bf16.mxu0 %v9766_v12  ;;  %v9767_v22 = vld [vmem:[%s14586_s1 + $0x20] ss:$16 sps:$4 sm:$0xff]   ;;  %v8907_v45 = vld [vmem:[%s12226_s15 + $0x8c8] sm:$0xff] }
 0x561   : > { %v10943_v11 = vpop.eup %10942  ;;  %v4859_v62 = vadd.f32 1.0, %v10941_v1  ;;  %v8910_v1 = vld [vmem:[%s12226_s15 + $0x8e0] sm:$0xff] }
 0x562   : > { %v5320_v37 = vpack.c.bf16 %v5176_v42, %v5175_v50  ;;  %10958 = vtanh.f32 %v13520_v49  ;;  %v4955_v35 = vadd.f32 1.0, %v10943_v11  ;;  %v10945_v9 = vpop.eup %10944 }
 0x563   : > { %10960 = vtanh.f32 %v4765_v47  ;;  %v4860_v7 = vadd.f32 1.0, %v10945_v9  ;;  %v10947_v55 = vpop.eup %10946  ;;  %v8909_v47 = vld [vmem:[%s12226_s15 + $0x8d8] sm:$0xff] }
 0x564   : > { %10962 = vrcp.f32 %v4859_v62  ;;  %5553 = vmatmul.mubr.bf16.vlgmr.msra.gmra.mrb[160].mxu0 %v5320_v37  ;;  %5666 = vmatmul.mubr.bf16.vlgmr.msra.gmra.mrb[160].mxu1 %v5320_v37  ;;  %v10949_v29 = vpop.eup %10948  ;;  %v4956_v19 = vadd.f32 1.0, %v10947_v55  ;;  %v8911_v37 = vld [vmem:[%s12226_s15 + $0x8e8] sm:$0xff] }
 0x565   : > { %10964 = vrcp.f32 %v4955_v35  ;;  %5562 = vmatprep.mubr.bf16.mxu0 %v11988_v2  ;;  %5675 = vmatprep.mubr.bf16.mxu1 %v11988_v2  ;;  %v10951_v56 = vpop.eup %10950  ;;  %v8913_v35 = vld [vmem:[%s12226_s15 + $0x8f8] sm:$0xff] }
 0x566   : > { %10966 = vpow2.f32 %v9015_v36  ;;  %v10953_v4 = vpop.eup %10952 }
 0x567   : > { %10968 = vrcp.f32 %v4860_v7 }
 0x568   : > { %10970 = vrcp.f32 %v4956_v19  ;;  %v10955_v0 = vpop.eup %10954 }
 0x569   : > { %v10957_v43 = vpop.eup %10956  ;;  %v5177_v17 = vmul.f32 %v10955_v0, %v10949_v29 }
 0x56a   : > { %v5067_v58 = vadd.f32 1.0, %v10957_v43  ;;  %v8908_v43 = vld [vmem:[%s12226_s15 + $0x8d0] sm:$0xff] }
 0x56c   : > { %v10959_v31 = vpop.eup %10958  ;;  %10972 = vrcp.f32 %v5067_v58 }
 0x56d   : > { %v10961_v24 = vpop.eup %10960  ;;  %v5178_v16 = vmul.f32 %v10959_v31, %v10951_v56 }
 0x56e   : > { %v10963_v18 = vpop.eup %10962 }
 0x56f   : > { %v10965_v41 = vpop.eup %10964  ;;  %v5131_v51 = vmul.f32 %v10963_v18, %v10953_v4  ;;  %v5321_v13 = vpack.c.bf16 %v5178_v16, %v5177_v17 }
 0x570   : > { %v10967_v23 = vpop.eup %10966  ;;  %v5115_v3 = vmul.f32 %v10965_v41, %v13218_v33 }
 0x571   : > { %v10969_v5 = vpop.eup %10968  ;;  %5563 = vmatmul.mubr.bf16.gmra.mrb[164].mxu0 %v5321_v13  ;;  %5676 = vmatmul.mubr.bf16.gmra.mrb[164].mxu1 %v5321_v13  ;;  %v5068_v60 = vadd.f32 1.0, %v10967_v23  ;;  %v8915_v23 = vld [vmem:[%s12226_s15 + $0x908] sm:$0xff] }
 0x572   : > { %v13527_v10 = vadd.f32 %v5131_v51, %v5115_v3  ;;  %v5132_v61 = vmul.f32 %v10969_v5, %v10961_v24  ;;  %5572 = vmatprep.mubr.bf16.mxu0 %v11988_v2  ;;  %5685 = vmatprep.mubr.bf16.mxu1 %v11988_v2  ;;  %v10971_v32 = vpop.eup %10970  ;;  %v8914_v51 = vld [vmem:[%s12226_s15 + $0x900] sm:$0xff]  ;;  %v8917_v3 = vld [vmem:[%s12226_s15 + $0x918] sm:$0xff]  ;;  %v8912_v5 = vld [vmem:[%s12226_s15 + $0x8f0] sm:$0xff] }
 0x573   : > { %v5116_v52 = vmul.f32 %v10971_v32, %v13223_v14  ;;  %v9764_v14 = vld [vmem:[%s14586_s1] ss:$16 sps:$4 sm:$0xff]  }
 0x574   : > { %10974 = vtanh.f32 %v13527_v10  ;;  %6524 = vmatpush1.bf16.msra.mxu0 %v9764_v14 }
 0x575   : > { %v13532_v28 = vadd.f32 %v5132_v61, %v5116_v52  ;;  %10976 = vrcp.f32 %v5068_v60  ;;  %6525 = vmatprep.subr.bf16.mxu0 %v9769_v57  ;;  %v8918_v60 = vld [vmem:[%s12226_s15 + $0x920] sm:$0xff]  ;;  %v8919_v57 = vld [vmem:[%s12226_s15 + $0x928] sm:$0xff] }
 0x576   : > { %v10973_v33 = vpop.eup %10972 }
 0x577   : > { %10978 = vtanh.f32 %v13532_v28 }
 0x578   : > { %6526 = vmatpush1.bf16.msra.mxu0 %v9767_v22 }
 0x57e   : > { %v10975_v34 = vpop.eup %10974 }
 0x57f   : > { %v10977_v44 = vpop.eup %10976  ;;  %v5179_v40 = vmul.f32 %v10975_v34, %v10973_v33 }
 0x581   : > { %v10979_v46 = vpop.eup %10978 }
 0x582   : > { %v5180_v6 = vmul.f32 %v10979_v46, %v10977_v44 }
 0x584   : > { %v5322_v21 = vpack.c.bf16 %v5180_v6, %v5179_v40 }
 0x586   : > { %5573 = vmatmul.mubr.bf16.gmra.mrb[168].mxu0 %v5322_v21  ;;  %5686 = vmatmul.mubr.bf16.gmra.mrb[168].mxu1 %v5322_v21 }
 0x587   : > { %5582 = vmatprep.mubr.bf16.mxu0 %v11988_v2  ;;  %5695 = vmatprep.mubr.bf16.mxu1 %v11988_v2 }
 0x5ba   : > { %v4581_v50 = vpop.f32.mrb[140].mxu0  ;;  %v4694_v42 = vpop.f32.mrb[140].mxu1 }
 0x5bb   : > { %v4767_v11 = vadd.f32 %v8906_v30, %v4581_v50  ;;  %v4583_v62 = vpop.f32.mrb[141].mxu0  ;;  %v4696_v36 = vpop.f32.mrb[141].mxu1  ;;  %v4769_v13 = vadd.f32 %v8908_v43, %v4694_v42 }
 0x5bc   : > { %v4768_v9 = vadd.f32 %v8907_v45, %v4583_v62  ;;  %v4770_v7 = vadd.f32 %v8909_v47, %v4696_v36  ;;  %v4585_v55 = vpop.f32.mrb[142].mxu0  ;;  %v4698_v29 = vpop.f32.mrb[142].mxu1  ;;  %v8916_v47 = vld [vmem:[%s12226_s15 + $0x910] sm:$0xff] }
 0x5bd   : > { %v8984_v19 = vmul.f32 -1.442695, %v4767_v11  ;;  %v4771_v56 = vadd.f32 %v8910_v1, %v4585_v55  ;;  %v4587_v4 = vpop.f32.mrb[143].mxu0  ;;  %v4700_v0 = vpop.f32.mrb[143].mxu1  ;;  %v4773_v21 = vadd.f32 %v8912_v5, %v4698_v29  ;;  %v8920_v29 = vld [vmem:[%s12226_s15 + $0x930] sm:$0xff] }
 0x5be   : > { %v9000_v31 = vmul.f32 -1.442695, %v4768_v9  ;;  %v9016_v24 = vmul.f32 -1.442695, %v4770_v7  ;;  %v4772_v17 = vadd.f32 %v8911_v37, %v4587_v4  ;;  %v4774_v16 = vadd.f32 %v8913_v35, %v4700_v0 }
 0x5bf   : > { %10980 = vpow2.f32 %v8984_v19  ;;  %v8985_v18 = vmul.f32 -1.442695, %v4771_v56  ;;  %v8921_v19 = vld [vmem:[%s12226_s15 + $0x938] sm:$0xff] }
 0x5c0   : > { %10982 = vpow2.f32 %v9000_v31  ;;  %v9001_v41 = vmul.f32 -1.442695, %v4772_v17  ;;  %v9017_v58 = vmul.f32 -1.442695, %v4774_v16  ;;  %v8922_v16 = vld [vmem:[%s12226_s15 + $0x940] sm:$0xff] }
 0x5c1   : > { %10984 = vpow2.f32 %v9016_v24 }
 0x5c2   : > { %10986 = vpow2.f32 %v8985_v18  ;;  %v4591_v61 = vpop.f32.mrb[144].mxu0  ;;  %v4704_v32 = vpop.f32.mrb[144].mxu1 }
 0x5c3   : > { %v4775_v52 = vadd.f32 %v8914_v51, %v4591_v61  ;;  %v4593_v33 = vpop.f32.mrb[145].mxu0  ;;  %v4706_v34 = vpop.f32.mrb[145].mxu1  ;;  %10988 = vpow2.f32 %v9001_v41  ;;  %v4777_v37 = vadd.f32 %v8916_v47, %v4704_v32  ;;  %v8923_v61 = vld [vmem:[%s12226_s15 + $0x948] sm:$0xff] }
 0x5c4   : > { %v4776_v44 = vadd.f32 %v8915_v23, %v4593_v33  ;;  %v4778_v46 = vadd.f32 %v8917_v3, %v4706_v34  ;;  %v4595_v40 = vpop.f32.mrb[146].mxu0  ;;  %v4708_v6 = vpop.f32.mrb[146].mxu1  ;;  %10990 = vtanh.f32 %v4769_v13  ;;  %v8926_v34 = vld [vmem:[%s12226_s15 + $0x960] sm:$0xff] }
 0x5c5   : > { %v8986_v14 = vmul.f32 -1.442695, %v4775_v52  ;;  %v4779_v12 = vadd.f32 %v8918_v60, %v4595_v40  ;;  %v4597_v22 = vpop.f32.mrb[147].mxu0  ;;  %v4710_v30 = vpop.f32.mrb[147].mxu1  ;;  %10992 = vpow2.f32 %v9017_v58  ;;  %v4781_v13 = vadd.f32 %v8920_v29, %v4708_v6  ;;  %v8925_v52 = vld [vmem:[%s12226_s15 + $0x958] sm:$0xff] }
 0x5c6   : > { %v9002_v45 = vmul.f32 -1.442695, %v4776_v44  ;;  %v9018_v50 = vmul.f32 -1.442695, %v4778_v46  ;;  %v4780_v1 = vadd.f32 %v8919_v57, %v4597_v22  ;;  %v4782_v23 = vadd.f32 %v8921_v19, %v4710_v30 }
 0x5c7   : > { %10994 = vpow2.f32 %v8986_v14  ;;  %v8987_v42 = vmul.f32 -1.442695, %v4779_v12 }
 0x5c8   : > { %10996 = vpow2.f32 %v9002_v45  ;;  %v9003_v43 = vmul.f32 -1.442695, %v4780_v1  ;;  %v9019_v40 = vmul.f32 -1.442695, %v4782_v23  ;;  %v8927_v1 = vld [vmem:[%s12226_s15 + $0x968] sm:$0xff] }
 0x5c9   : > { %v10981_v11 = vpop.eup %10980  ;;  %10998 = vtanh.f32 %v4773_v21 }
 0x5ca   : > { %v10983_v62 = vpop.eup %10982  ;;  %v4861_v36 = vadd.f32 1.0, %v10981_v11  ;;  %11000 = vpow2.f32 %v8987_v42  ;;  %v4601_v35 = vpop.f32.mrb[148].mxu0 }
 0x5cb   : > { %v13564_v9 = vpop.f32.mrb[148].mxu1  ;;  %v10985_v7 = vpop.eup %10984  ;;  %v4957_v55 = vadd.f32 1.0, %v10983_v62  ;;  %11002 = vpow2.f32 %v9018_v50  ;;  %v4783_v60 = vadd.f32 %v8922_v16, %v4601_v35 }
 0x5cc   : > { %v4603_v56 = vpop.f32.mrb[149].mxu0  ;;  %v4716_v4 = vpop.f32.mrb[149].mxu1  ;;  %11004 = vrcp.f32 %v4861_v36  ;;  %v5069_v5 = vadd.f32 1.0, %v10985_v7 }
 0x5cd   : > { %v10987_v0 = vpop.eup %10986  ;;  %v4605_v31 = vpop.f32.mrb[150].mxu0  ;;  %11006 = vrcp.f32 %v4957_v55  ;;  %v4784_v21 = vadd.f32 %v8923_v61, %v4603_v56  ;;  %v4786_v22 = vadd.f32 %v8925_v52, %v4716_v4  ;;  %v8988_v50 = vmul.f32 -1.442695, %v4783_v60  ;;  %v8929_v56 = vld [vmem:[%s12226_s15 + $0x978] sm:$0xff]  ;;  %v8930_v4 = vld [vmem:[%s12226_s15 + $0x980] sm:$0xff] }
 0x5ce   : > { %v13568_v24 = vpop.f32.mrb[150].mxu1  ;;  %v4862_v17 = vadd.f32 1.0, %v10987_v0  ;;  %v4607_v18 = vpop.f32.mrb[151].mxu0  ;;  %11008 = vtanh.f32 %v4777_v37  ;;  %v4787_v42 = vadd.f32 %v8926_v34, %v4605_v31 }
 0x5cf   : > { %v4720_v41 = vpop.f32.mrb[151].mxu1  ;;  %v10989_v51 = vpop.eup %10988  ;;  %v9004_v19 = vmul.f32 -1.442695, %v4784_v21  ;;  %v9020_v31 = vmul.f32 -1.442695, %v4786_v22  ;;  %v8928_v22 = vld [vmem:[%s12226_s15 + $0x970] sm:$0xff] }
 0x5d0   : > { %v10991_v3 = vpop.eup %10990  ;;  %11010 = vrcp.f32 %v4862_v17  ;;  %v4958_v58 = vadd.f32 1.0, %v10989_v51  ;;  %v4788_v17 = vadd.f32 %v8927_v1, %v4607_v18 }
 0x5d1   : > { %v10993_v32 = vpop.eup %10992  ;;  %11012 = vpow2.f32 %v9003_v43 }
 0x5d2   : > { %v10995_v33 = vpop.eup %10994  ;;  %11014 = vrcp.f32 %v4958_v58  ;;  %v4611_v6 = vpop.f32.mrb[152].mxu0  ;;  %v5070_v37 = vadd.f32 1.0, %v10993_v32  ;;  %v4790_v58 = vadd.f32 %v8929_v56, %v4720_v41  ;;  %v8931_v32 = vld [vmem:[%s12226_s15 + $0x988] sm:$0xff] }
 0x5d3   : > { %v10997_v44 = vpop.eup %10996  ;;  %v4863_v46 = vadd.f32 1.0, %v10995_v33  ;;  %11016 = vtanh.f32 %v4781_v13  ;;  %v13574_v14 = vpop.f32.mrb[152].mxu1  ;;  %v8989_v13 = vmul.f32 -1.442695, %v4787_v42  ;;  %v4791_v61 = vadd.f32 %v8930_v4, %v4611_v6 }
 0x5d4   : > { %v10999_v12 = vpop.eup %10998  ;;  %11018 = vrcp.f32 %v5069_v5  ;;  %v4959_v57 = vadd.f32 1.0, %v10997_v44  ;;  %v4613_v30 = vpop.f32.mrb[153].mxu0  ;;  %v8924_v5 = vld [vmem:[%s12226_s15 + $0x950] sm:$0xff] }
 0x5d5   : > { %v13576_v45 = vpop.f32.mrb[153].mxu1  ;;  %v11001_v47 = vpop.eup %11000  ;;  %11020 = vrcp.f32 %v4863_v46  ;;  %v9005_v46 = vmul.f32 -1.442695, %v4788_v17 }
 0x5d6   : > { %v13579_v11 = vpop.f32.mrb[154].mxu0  ;;  %v13581_v62 = vpop.f32.mrb[154].mxu1  ;;  %11022 = vrcp.f32 %v4959_v57  ;;  %v4864_v35 = vadd.f32 1.0, %v11001_v47  ;;  %v4792_v47 = vadd.f32 %v8931_v32, %v4613_v30  ;;  %v8934_v30 = vld [vmem:[%s12226_s15 + $0x9a0] sm:$0xff] }
 0x5d7   : > { %v11003_v36 = vpop.eup %11002  ;;  %v13583_v7 = vpop.f32.mrb[155].mxu0  ;;  %11024 = vpow2.f32 %v9019_v40  ;;  %v8933_v40 = vld [vmem:[%s12226_s15 + $0x998] sm:$0xff]  ;;  %v9775_v32 = vld [vmem:[%s14586_s1 + $0x44] ss:$16 sps:$4 sm:$0xff]  }
 0x5d8   : > { %v13585_v55 = vpop.f32.mrb[155].mxu1  ;;  %v11005_v29 = vpop.eup %11004  ;;  %11026 = vrcp.f32 %v4864_v35  ;;  %v9006_v17 = vmul.f32 -1.442695, %v4792_v47  ;;  %6527 = vmatprep.subr.bf16.mxu0 %v9775_v32 }
 0x5d9   : > { %v11007_v0 = vpop.eup %11006  ;;  %v5133_v43 = vmul.f32 %v11005_v29, %v10991_v3  ;;  %11028 = vpow2.f32 %v8988_v50  ;;  %v5071_v3 = vadd.f32 1.0, %v11003_v36  ;;  %v9021_v36 = vmul.f32 -1.442695, %v4790_v58 }
 0x5da   : > { %v11009_v16 = vpop.eup %11008  ;;  %v5117_v51 = vmul.f32 %v11007_v0, %v13283_v59  ;;  %11030 = vrcp.f32 %v5070_v37  ;;  %v13594_v18 = vpop.f32.mrb[156].mxu0  ;;  %v4789_v0 = vadd.f32 %v8928_v22, %v13568_v24  ;;  %v9773_v24 = vld [vmem:[%s14586_s1 + $0x40] ss:$16 sps:$4 sm:$0xff]  }
 0x5db   : > { %v11011_v23 = vpop.eup %11010  ;;  %11032 = vpow2.f32 %v9004_v19  ;;  %v13596_v34 = vpop.f32.mrb[156].mxu1  ;;  %v4794_v19 = vadd.f32 %v8933_v40, %v13576_v45  ;;  %v9772_v45 = vld [vmem:[%s14586_s1 + $0xc] ss:$16 sps:$4 sm:$0xff]   ;;  %6528 = vmatpush1.bf16.msra.mxu0 %v9773_v24 }
 0x5dc   : > { %v11013_v60 = vpop.eup %11012  ;;  %v13592_v52 = vadd.f32 %v5133_v43, %v5117_v51  ;;  %v5134_v33 = vmul.f32 %v11011_v23, %v10999_v12  ;;  %11034 = vpow2.f32 %v9020_v31  ;;  %v13599_v21 = vpop.f32.mrb[157].mxu0  ;;  %v4785_v12 = vadd.f32 %v8924_v5, %v13564_v9  ;;  %v9770_v51 = vld [vmem:[%s14586_s1 + $0x8] ss:$16 sps:$4 sm:$0xff]   ;;  %6636 = vmatprep.subr.bf16.mxu1 %v9772_v45 }
 0x5dd   : > { %v11015_v59 = vpop.eup %11014  ;;  %v4960_v44 = vadd.f32 1.0, %v11013_v60  ;;  %v13601_v41 = vpop.f32.mrb[157].mxu1  ;;  %11036 = vpow2.f32 %v8989_v13  ;;  %v8990_v9 = vmul.f32 -1.442695, %v4791_v61  ;;  %v9022_v58 = vmul.f32 -1.442695, %v4794_v19  ;;  %6637 = vmatpush1.bf16.msra.mxu1 %v9770_v51 }
 0x5de   : > { %v11017_v6 = vpop.eup %11016  ;;  %v5118_v57 = vmul.f32 %v11015_v59, %v13307_v15  ;;  %v13606_v50 = vpop.f32.mrb[158].mxu0  ;;  %v8935_v61 = vld [vmem:[%s12226_s15 + $0x9a8] sm:$0xff]  ;;  %v8932_v59 = vld [vmem:[%s12226_s15 + $0x990] sm:$0xff] }
 0x5df   : > { %v13608_v42 = vpop.f32.mrb[158].mxu1  ;;  %v13610_v1 = vpop.eup %11018  ;;  %11038 = vrcp.f32 %v4960_v44  ;;  %v4796_v40 = vadd.f32 %v8935_v61, %v13583_v7  ;;  %v8936_v7 = vld [vmem:[%s12226_s15 + $0x9b0] sm:$0xff] }
 0x5e0   : > { %v13612_v37 = vpop.f32.mrb[159].mxu0  ;;  %v13614_v35 = vpop.f32.mrb[159].mxu1  ;;  %v13616_v15 = vadd.f32 %v5134_v33, %v5118_v57  ;;  %11040 = vrcp.f32 %v5071_v3 }
 0x5e1   : > { %v11021_v29 = vpop.eup %11020  ;;  %11042 = vpow2.f32 %v9005_v46 }
 0x5e2   : > { %v11023_v56 = vpop.eup %11022  ;;  %v5135_v4 = vmul.f32 %v11021_v29, %v11009_v16  ;;  %11044 = vtanh.f32 %v4785_v12  ;;  %v4795_v16 = vadd.f32 %v8934_v30, %v13579_v11  ;;  %v8938_v12 = vld [vmem:[%s12226_s15 + $0x9c0] sm:$0xff]  ;;  %v9007_v30 = vmul.f32 -1.442695, %v4796_v40 }
 0x5e3   : > { %v11025_v43 = vpop.eup %11024  ;;  %v5119_v31 = vmul.f32 %v11023_v56, %v13314_v25  ;;  %11046 = vpow2.f32 %v9021_v36  ;;  %v4793_v36 = vadd.f32 %v8932_v59, %v13574_v14  ;;  %v8937_v56 = vld [vmem:[%s12226_s15 + $0x9b8] sm:$0xff]  ;;  %v8939_v14 = vld [vmem:[%s12226_s15 + $0x9c8] sm:$0xff] }
 0x5e4   : > { %v11027_v13 = vpop.eup %11026  ;;  %11048 = vpow2.f32 %v8990_v9  ;;  %v5072_v3 = vadd.f32 1.0, %v11025_v43  ;;  %v8991_v57 = vmul.f32 -1.442695, %v4795_v16 }
 0x5e5   : > { %v11029_v25 = vpop.eup %11028  ;;  %v13632_v23 = vadd.f32 %v5135_v4, %v5119_v31  ;;  %v5136_v5 = vmul.f32 %v11027_v13, %v11017_v6  ;;  %11050 = vtanh.f32 %v4789_v0  ;;  %v4799_v4 = vadd.f32 %v8938_v12, %v13594_v18  ;;  %v8940_v12 = vld [vmem:[%s12226_s15 + $0x9d0] sm:$0xff] }
 0x5e6   : > { %v13638_v60 = vpop.eup %11030  ;;  %v4865_v11 = vadd.f32 1.0, %v11029_v25  ;;  %11052 = vpow2.f32 %v9006_v17  ;;  %v4798_v13 = vadd.f32 %v8937_v56, %v13585_v55  ;;  %v4800_v18 = vadd.f32 %v8939_v14, %v13599_v21  ;;  %v8942_v25 = vld [vmem:[%s12226_s15 + $0x9e0] sm:$0xff] }
 0x5e7   : > { %v11033_v33 = vpop.eup %11032  ;;  %v4803_v59 = vadd.f32 %v8942_v25, %v13606_v50 }
 0x5e8   : > { %v11035_v44 = vpop.eup %11034  ;;  %11054 = vrcp.f32 %v4865_v11  ;;  %v4961_v46 = vadd.f32 1.0, %v11033_v33  ;;  %v9023_v55 = vmul.f32 -1.442695, %v4798_v13  ;;  %v9008_v21 = vmul.f32 -1.442695, %v4800_v18 }
 0x5e9   : > { %v11037_v6 = vpop.eup %11036  ;;  %11056 = vpow2.f32 %v9022_v58  ;;  %v5073_v31 = vadd.f32 1.0, %v11035_v44  ;;  %v8992_v58 = vmul.f32 -1.442695, %v4799_v4  ;;  %v8943_v44 = vld [vmem:[%s12226_s15 + $0x9e8] sm:$0xff]  ;;  %v8993_v56 = vmul.f32 -1.442695, %v4803_v59 }
 0x5ea   : > { %v11039_v22 = vpop.eup %11038  ;;  %11058 = vrcp.f32 %v4961_v46  ;;  %v4866_v47 = vadd.f32 1.0, %v11037_v6  ;;  %v9781_v4 = vld [vmem:[%s14586_s1 + $0x64] ss:$16 sps:$4 sm:$0xff]  }
 0x5eb   : > { %v13644_v29 = vpop.eup %11040  ;;  %v5120_v9 = vmul.f32 %v11039_v22, %v13329_v53  ;;  %11060 = vrcp.f32 %v5072_v3  ;;  %v4797_v53 = vadd.f32 %v8936_v7, %v13581_v62  ;;  %v8941_v3 = vld [vmem:[%s12226_s15 + $0x9d8] sm:$0xff]  ;;  %6529 = vmatprep.subr.bf16.mxu0 %v9781_v4 }
 0x5ec   : > { %v11043_v19 = vpop.eup %11042  ;;  %11062 = vrcp.f32 %v4866_v47  ;;  %v9776_v22 = vld [vmem:[%s14586_s1 + $0x28] ss:$16 sps:$4 sm:$0xff]   ;;  %v9778_v47 = vld [vmem:[%s14586_s1 + $0x2c] ss:$16 sps:$4 sm:$0xff]  }
 0x5ed   : > { %v11045_v0 = vpop.eup %11044  ;;  %v13650_v43 = vadd.f32 %v5136_v5, %v5120_v9  ;;  %v4962_v17 = vadd.f32 1.0, %v11043_v19  ;;  %11064 = vpow2.f32 %v8991_v57  ;;  %v4804_v9 = vadd.f32 %v8943_v44, %v13612_v37  ;;  %6638 = vmatprep.subr.bf16.mxu1 %v9778_v47 }
 0x5ee   : > { %v11047_v51 = vpop.eup %11046  ;;  %11066 = vtanh.f32 %v4793_v36  ;;  %v4802_v36 = vadd.f32 %v8941_v3, %v13601_v41  ;;  %v4801_v37 = vadd.f32 %v8940_v12, %v13596_v34  ;;  %6639 = vmatpush1.bf16.msra.mxu1 %v9776_v22 }
 0x5ef   : > { %v11049_v45 = vpop.eup %11048  ;;  %11068 = vrcp.f32 %v4962_v17  ;;  %v5074_v32 = vadd.f32 1.0, %v11047_v51  ;;  %v8944_v17 = vld [vmem:[%s12226_s15 + $0x9f0] sm:$0xff] }
 0x5f0   : > { %v11051_v16 = vpop.eup %11050  ;;  %v4867_v24 = vadd.f32 1.0, %v11049_v45  ;;  %11070 = vpow2.f32 %v9007_v30  ;;  %v9009_v45 = vmul.f32 -1.442695, %v4804_v9  ;;  %v4805_v25 = vadd.f32 %v8944_v17, %v13608_v42 }
 0x5f1   : > { %v11053_v5 = vpop.eup %11052  ;;  %11072 = vrcp.f32 %v5073_v31 }
 0x5f2   : > { %v11055_v61 = vpop.eup %11054  ;;  %11074 = vrcp.f32 %v4867_v24  ;;  %v4963_v11 = vadd.f32 1.0, %v11053_v5  ;;  %v8945_v24 = vld [vmem:[%s12226_s15 + $0x9f8] sm:$0xff] }
 0x5f3   : > { %v11057_v33 = vpop.eup %11056  ;;  %v5137_v62 = vmul.f32 %v11055_v61, %v11045_v0  ;;  %11076 = vtanh.f32 %v4797_v53 }
 0x5f4   : > { %v11059_v46 = vpop.eup %11058  ;;  %11078 = vrcp.f32 %v4963_v11  ;;  %v5075_v57 = vadd.f32 1.0, %v11057_v33 }
 0x5f5   : > { %v13660_v40 = vpop.eup %11060  ;;  %v5121_v6 = vmul.f32 %v11059_v46, %v13345_v8  ;;  %11080 = vpow2.f32 %v8992_v58  ;;  %v9779_v8 = vld [vmem:[%s14586_s1 + $0x60] ss:$16 sps:$4 sm:$0xff]  }
 0x5f6   : > { %v11063_v50 = vpop.eup %11062  ;;  %11082 = vrcp.f32 %v5074_v32  ;;  %6530 = vmatpush1.bf16.msra.mxu0 %v9779_v8  ;;  %v9782_v8 = vld [vmem:[%s14586_s1 + $0x48] ss:$16 sps:$4 sm:$0xff]  }
 0x5f7   : > { %v11065_v19 = vpop.eup %11064  ;;  %v13675_v7 = vadd.f32 %v5137_v62, %v5121_v6  ;;  %v5138_v30 = vmul.f32 %v11063_v50, %v11051_v16  ;;  %11084 = vpow2.f32 %v9023_v55  ;;  %v9024_v16 = vmul.f32 -1.442695, %v4802_v36 }
 0x5f8   : > { %v11067_v0 = vpop.eup %11066  ;;  %v4868_v41 = vadd.f32 1.0, %v11065_v19  ;;  %11086 = vpow2.f32 %v9008_v21  ;;  %v9784_v19 = vld [vmem:[%s14586_s1 + $0x4c] ss:$16 sps:$4 sm:$0xff]  }
 0x5f9   : > { %v11069_v31 = vpop.eup %11068  ;;  %11088 = vrcp.f32 %v5075_v57  ;;  %6640 = vmatprep.subr.bf16.mxu1 %v9784_v19  ;;  %v9030_v19 = vld [vmem:[%s12226_s15 + $0xa20] sm:$0xff] }
 0x5fa   : > { %v11071_v14 = vpop.eup %11070  ;;  %v5122_v51 = vmul.f32 %v11069_v31, %v13359_v54  ;;  %11090 = vrcp.f32 %v4868_v41  ;;  %v4806_v54 = vadd.f32 %v8945_v24, %v13614_v35  ;;  %6641 = vmatpush1.bf16.msra.mxu1 %v9782_v8 }
 0x5fb   : > { %v13683_v53 = vpop.eup %11072  ;;  %v4964_v13 = vadd.f32 1.0, %v11071_v14  ;;  %11092 = vpow2.f32 %v8993_v56 }
 0x5fc   : > { %v11075_v34 = vpop.eup %11074  ;;  %v13686_v18 = vadd.f32 %v5138_v30, %v5122_v51  ;;  %11094 = vtanh.f32 %v4801_v37  ;;  %v9025_v59 = vmul.f32 -1.442695, %v4806_v54 }
 0x5fd   : > { %v11077_v5 = vpop.eup %11076  ;;  %v5139_v58 = vmul.f32 %v11075_v34, %v11067_v0  ;;  %11096 = vrcp.f32 %v4964_v13  ;;  %v9787_v0 = vld [vmem:[%s14586_s1 + $0x84] ss:$16 sps:$4 sm:$0xff]  }
 0x5fe   : > { %v11079_v61 = vpop.eup %11078  ;;  %11098 = vpow2.f32 %v9009_v45  ;;  %6531 = vmatprep.subr.bf16.mxu0 %v9787_v0  ;;  %v9031_v0 = vld [vmem:[%s12226_s15 + $0xa28] sm:$0xff] }
 0x5ff   : > { %v11081_v32 = vpop.eup %11080  ;;  %v5123_v11 = vmul.f32 %v11079_v61, %v13372_v39  ;;  %11100 = vpow2.f32 %v9024_v16 }
 0x600   : > { %v13691_v33 = vpop.eup %11082  ;;  %v4869_v62 = vadd.f32 1.0, %v11081_v32  ;;  %11102 = vtanh.f32 %v4805_v25 }
 0x601   : > { %v11085_v55 = vpop.eup %11084  ;;  %v13693_v3 = vadd.f32 %v5139_v58, %v5123_v11  ;;  %11104 = vtanh.f32 %v13592_v52 }
 0x602   : > { %v11087_v42 = vpop.eup %11086  ;;  %11106 = vrcp.f32 %v4869_v62  ;;  %v5076_v50 = vadd.f32 1.0, %v11085_v55 }
 0x603   : > { %v13696_v44 = vpop.eup %11088  ;;  %v4965_v46 = vadd.f32 1.0, %v11087_v42  ;;  %11108 = vtanh.f32 %v13616_v15 }
 0x604   : > { %v11091_v35 = vpop.eup %11090  ;;  %11110 = vtanh.f32 %v13632_v23 }
 0x605   : > { %v11093_v39 = vpop.eup %11092  ;;  %v5140_v21 = vmul.f32 %v11091_v35, %v11077_v5  ;;  %11112 = vrcp.f32 %v4965_v46 }
 0x606   : > { %v11095_v6 = vpop.eup %11094  ;;  %v4870_v57 = vadd.f32 1.0, %v11093_v39  ;;  %11114 = vpow2.f32 %v9025_v59 }
 0x607   : > { %v11097_v12 = vpop.eup %11096  ;;  %11116 = vtanh.f32 %v13650_v43 }
 0x608   : > { %v11099_v22 = vpop.eup %11098  ;;  %v5124_v47 = vmul.f32 %v11097_v12, %v13382_v26  ;;  %11118 = vrcp.f32 %v4870_v57  ;;  %v9785_v26 = vld [vmem:[%s14586_s1 + $0x80] ss:$16 sps:$4 sm:$0xff]  }
 0x609   : > { %v11101_v36 = vpop.eup %11100  ;;  %v4966_v9 = vadd.f32 1.0, %v11099_v22  ;;  %11120 = vtanh.f32 %v13675_v7  ;;  %6532 = vmatpush1.bf16.msra.mxu0 %v9785_v26 }
 0x60a   : > { %v11103_v30 = vpop.eup %11102  ;;  %v13709_v56 = vadd.f32 %v5140_v21, %v5124_v47  ;;  %11122 = vtanh.f32 %v13686_v18 }
 0x60b   : > { %v11105_v4 = vpop.eup %11104  ;;  %11124 = vrcp.f32 %v4966_v9 }
 0x60c   : > { %v11107_v41 = vpop.eup %11106  ;;  %11126 = vrcp.f32 %v5076_v50  ;;  %v5181_v14 = vmul.f32 %v11105_v4, %v13610_v1  ;;  %v9026_v50 = vld [vmem:[%s12226_s15 + $0xa00] sm:$0xff] }
 0x60d   : > { %v11109_v37 = vpop.eup %11108  ;;  %v5141_v31 = vmul.f32 %v11107_v41, %v11095_v6  ;;  %11128 = vtanh.f32 %v13693_v3 }
 0x60e   : > { %v11111_v17 = vpop.eup %11110  ;;  %v5182_v51 = vmul.f32 %v11109_v37, %v13638_v60  ;;  %11130 = vtanh.f32 %v13709_v56  ;;  %v5077_v60 = vadd.f32 1.0, %v11101_v36  ;;  %v9027_v36 = vld [vmem:[%s12226_s15 + $0xa08] sm:$0xff] }
 0x60f   : > { %v11113_v45 = vpop.eup %11112  ;;  %v5183_v58 = vmul.f32 %v11111_v17, %v13644_v29 }
 0x610   : > { %v11115_v13 = vpop.eup %11114  ;;  %v5125_v16 = vmul.f32 %v11113_v45, %v13402_v38  ;;  %v5323_v24 = vpack.c.bf16 %v5182_v51, %v5181_v14  ;;  %11132 = vrcp.f32 %v5077_v60 }
 0x611   : > { %v11117_v34 = vpop.eup %11116  ;;  %v5078_v62 = vadd.f32 1.0, %v11115_v13 }
 0x612   : > { %v11119_v25 = vpop.eup %11118  ;;  %v13723_v5 = vadd.f32 %v5141_v31, %v5125_v16  ;;  %5583 = vmatmul.mubr.bf16.gmra.mrb[172].mxu0 %v5323_v24  ;;  %5696 = vmatmul.mubr.bf16.gmra.mrb[172].mxu1 %v5323_v24  ;;  %v5184_v1 = vmul.f32 %v11117_v34, %v13660_v40 }
 0x613   : > { %v11121_v61 = vpop.eup %11120  ;;  %v5142_v54 = vmul.f32 %v11119_v25, %v11103_v30  ;;  %5592 = vmatprep.mubr.bf16.mxu0 %v11988_v2  ;;  %5705 = vmatprep.mubr.bf16.mxu1 %v11988_v2  ;;  %v9028_v25 = vld [vmem:[%s12226_s15 + $0xa10] sm:$0xff] }
 0x614   : > { %v11123_v32 = vpop.eup %11122  ;;  %v5324_v38 = vpack.c.bf16 %v5184_v1, %v5183_v58  ;;  %v5185_v55 = vmul.f32 %v11121_v61, %v13683_v53  ;;  %11134 = vtanh.f32 %v13723_v5  ;;  %v9034_v58 = vld [vmem:[%s12226_s15 + $0xa40] sm:$0xff]  ;;  %v9032_v61 = vld [vmem:[%s12226_s15 + $0xa30] sm:$0xff] }
 0x615   : > { %v11125_v11 = vpop.eup %11124  ;;  %v5186_v42 = vmul.f32 %v11123_v32, %v13691_v33  ;;  %11136 = vrcp.f32 %v5078_v62 }
 0x616   : > { %v11127_v59 = vpop.eup %11126  ;;  %v5126_v29 = vmul.f32 %v11125_v11, %v13411_v27 }
 0x617   : > { %v11129_v46 = vpop.eup %11128  ;;  %v5325_v40 = vpack.c.bf16 %v5186_v42, %v5185_v55 }
 0x618   : > { %v11131_v35 = vpop.eup %11130  ;;  %v13732_v39 = vadd.f32 %v5142_v54, %v5126_v29  ;;  %v5187_v21 = vmul.f32 %v11129_v46, %v13696_v44 }
 0x619   : > { %v5188_v6 = vmul.f32 %v11131_v35, %v11127_v59  ;;  %v9038_v35 = vld [vmem:[%s12226_s15 + $0xa60] sm:$0xff] }
 0x61a   : > { %5593 = vmatmul.mubr.bf16.gmra.mrb[176].mxu0 %v5324_v38  ;;  %5706 = vmatmul.mubr.bf16.gmra.mrb[176].mxu1 %v5324_v38  ;;  %11138 = vtanh.f32 %v13732_v39  ;;  %v11133_v53 = vpop.eup %11132  ;;  %v9035_v38 = vld [vmem:[%s12226_s15 + $0xa48] sm:$0xff] }
 0x61b   : > { %5602 = vmatprep.mubr.bf16.mxu0 %v11988_v2  ;;  %5715 = vmatprep.mubr.bf16.mxu1 %v11988_v2  ;;  %v5326_v27 = vpack.c.bf16 %v5188_v6, %v5187_v21 }
 0x61e   : > { %v11135_v33 = vpop.eup %11134 }
 0x61f   : > { %v11137_v57 = vpop.eup %11136  ;;  %v5189_v12 = vmul.f32 %v11135_v33, %v11133_v53 }
 0x622   : > { %5603 = vmatmul.mubr.bf16.gmra.mrb[180].mxu0 %v5325_v40  ;;  %5716 = vmatmul.mubr.bf16.gmra.mrb[180].mxu1 %v5325_v40 }
 0x623   : > { %5612 = vmatprep.mubr.bf16.mxu0 %v11988_v2  ;;  %5725 = vmatprep.mubr.bf16.mxu1 %v11988_v2 }
 0x624   : > { %v11139_v44 = vpop.eup %11138 }
 0x625   : > { %v5190_v22 = vmul.f32 %v11139_v44, %v11137_v57  ;;  %v9039_v44 = vld [vmem:[%s12226_s15 + $0xa68] sm:$0xff] }
 0x627   : > { %v5327_v47 = vpack.c.bf16 %v5190_v22, %v5189_v12 }
 0x62a   : > { %5613 = vmatmul.mubr.bf16.gmra.mrb[184].mxu0 %v5326_v27  ;;  %5726 = vmatmul.mubr.bf16.gmra.mrb[184].mxu1 %v5326_v27 }
 0x62b   : > { %5622 = vmatprep.mubr.bf16.mxu0 %v11988_v2  ;;  %5735 = vmatprep.mubr.bf16.mxu1 %v11988_v2 }
 0x632   : > { %5623 = vmatmul.mubr.bf16.gmra.mrb[188].mxu0 %v5327_v47  ;;  %5736 = vmatmul.mubr.bf16.gmra.mrb[188].mxu1 %v5327_v47 }
 0x633   : > { %6555 = vmatprep.mubr.bf16.mxu0 %v11988_v2  ;;  %6668 = vmatprep.mubr.bf16.mxu1 %v11988_v2 }
 0x637   : > { %v5554_v9 = vpop.f32.mrb[160].mxu0  ;;  %v5667_v8 = vpop.f32.mrb[160].mxu1 }
 0x638   : > { %v5746_v30 = vadd.f32 %v9026_v50, %v5554_v9  ;;  %v5556_v26 = vpop.f32.mrb[161].mxu0  ;;  %v13748_v4 = vpop.f32.mrb[161].mxu1  ;;  %v5748_v1 = vadd.f32 %v9028_v25, %v5667_v8 }
 0x639   : > { %v5747_v41 = vadd.f32 %v9027_v36, %v5556_v26  ;;  %v5558_v37 = vpop.f32.mrb[162].mxu0  ;;  %v5671_v31 = vpop.f32.mrb[162].mxu1  ;;  %v9036_v26 = vld [vmem:[%s12226_s15 + $0xa50] sm:$0xff] }
 0x63a   : > { %v9122_v17 = vmul.f32 -1.442695, %v5746_v30  ;;  %v5750_v14 = vadd.f32 %v9030_v19, %v5558_v37  ;;  %v5560_v51 = vpop.f32.mrb[163].mxu0  ;;  %v13751_v45 = vpop.f32.mrb[163].mxu1  ;;  %v5752_v40 = vadd.f32 %v9032_v61, %v5671_v31 }
 0x63b   : > { %v9138_v13 = vmul.f32 -1.442695, %v5747_v41  ;;  %v5751_v16 = vadd.f32 %v9031_v0, %v5560_v51 }
 0x63c   : > { %11140 = vpow2.f32 %v9122_v17  ;;  %v9123_v24 = vmul.f32 -1.442695, %v5750_v14 }
 0x63d   : > { %11142 = vpow2.f32 %v9138_v13  ;;  %v9139_v34 = vmul.f32 -1.442695, %v5751_v16 }
 0x63e   : > { %11144 = vpow2.f32 %v9123_v24 }
 0x63f   : > { %11146 = vpow2.f32 %v9139_v34 }
 0x640   : > { %11148 = vtanh.f32 %v5748_v1  ;;  %v9042_v1 = vld [vmem:[%s12226_s15 + $0xa80] sm:$0xff] }
 0x644   : > { %v5564_v60 = vpop.f32.mrb[164].mxu0  ;;  %v5677_v54 = vpop.f32.mrb[164].mxu1 }
 0x645   : > { %v5754_v32 = vadd.f32 %v9034_v58, %v5564_v60  ;;  %v5566_v11 = vpop.f32.mrb[165].mxu0  ;;  %v13757_v62 = vpop.f32.mrb[165].mxu1  ;;  %v5756_v14 = vadd.f32 %v9036_v26, %v5677_v54  ;;  %v9040_v58 = vld [vmem:[%s12226_s15 + $0xa70] sm:$0xff]  ;;  %v9788_v26 = vld [vmem:[%s14586_s1 + $0x68] ss:$16 sps:$4 sm:$0xff]  }
 0x646   : > { %v11141_v55 = vpop.eup %11140  ;;  %v5568_v42 = vpop.f32.mrb[166].mxu0  ;;  %v5755_v53 = vadd.f32 %v9035_v38, %v5566_v11  ;;  %v9043_v38 = vld [vmem:[%s12226_s15 + $0xa88] sm:$0xff] }
 0x647   : > { %v5681_v59 = vpop.f32.mrb[166].mxu1  ;;  %v11143_v29 = vpop.eup %11142  ;;  %v5858_v46 = vadd.f32 1.0, %v11141_v55  ;;  %v9124_v57 = vmul.f32 -1.442695, %v5754_v32  ;;  %v5758_v22 = vadd.f32 %v9038_v35, %v5568_v42  ;;  %v9046_v35 = vld [vmem:[%s12226_s15 + $0xaa0] sm:$0xff] }
 0x648   : > { %v5570_v21 = vpop.f32.mrb[167].mxu0  ;;  %v13760_v6 = vpop.f32.mrb[167].mxu1  ;;  %v5954_v27 = vadd.f32 1.0, %v11143_v29  ;;  %v9140_v36 = vmul.f32 -1.442695, %v5755_v53  ;;  %v5760_v55 = vadd.f32 %v9040_v58, %v5681_v59 }
 0x649   : > { %v11145_v33 = vpop.eup %11144  ;;  %11150 = vrcp.f32 %v5858_v46  ;;  %v5759_v9 = vadd.f32 %v9039_v44, %v5570_v21  ;;  %v9125_v8 = vmul.f32 -1.442695, %v5758_v22  ;;  %v9047_v22 = vld [vmem:[%s12226_s15 + $0xaa8] sm:$0xff] }
 0x64a   : > { %11152 = vrcp.f32 %v5954_v27  ;;  %v5859_v12 = vadd.f32 1.0, %v11145_v33  ;;  %v11147_v47 = vpop.eup %11146  ;;  %v9029_v27 = vld [vmem:[%s12226_s15 + $0xa18] sm:$0xff] }
 0x64b   : > { %11154 = vtanh.f32 %v5752_v40  ;;  %v5955_v50 = vadd.f32 1.0, %v11147_v47  ;;  %v9141_v19 = vmul.f32 -1.442695, %v5759_v9  ;;  %v11149_v30 = vpop.eup %11148  ;;  %v9033_v9 = vld [vmem:[%s12226_s15 + $0xa38] sm:$0xff] }
 0x64c   : > { %11156 = vrcp.f32 %v5859_v12  ;;  %v9794_v58 = vld [vmem:[%s14586_s1 + $0x88] ss:$16 sps:$4 sm:$0xff]  }
 0x64d   : > { %11158 = vpow2.f32 %v9124_v57 }
 0x64e   : > { %11160 = vrcp.f32 %v5955_v50 }
 0x64f   : > { %11162 = vpow2.f32 %v9140_v36  ;;  %v5749_v36 = vadd.f32 %v9029_v27, %v13748_v4 }
 0x650   : > { %11164 = vpow2.f32 %v9125_v8 }
 0x651   : > { %11166 = vpow2.f32 %v9141_v19 }
 0x652   : > { %11168 = vtanh.f32 %v5756_v14 }
 0x653   : > { %v11151_v0 = vpop.eup %11150 }
 0x654   : > { %v11153_v41 = vpop.eup %11152  ;;  %v6130_v37 = vmul.f32 %v11151_v0, %v11149_v30  ;;  %v9790_v30 = vld [vmem:[%s14586_s1 + $0x6c] ss:$16 sps:$4 sm:$0xff]  }
 0x655   : > { %v11155_v31 = vpop.eup %11154  ;;  %v6114_v17 = vmul.f32 %v11153_v41, %v13471_v20  ;;  %v5753_v41 = vadd.f32 %v9033_v9, %v13751_v45  ;;  %6642 = vmatprep.subr.bf16.mxu1 %v9790_v30  ;;  %v9796_v45 = vld [vmem:[%s14586_s1 + $0x8c] ss:$16 sps:$4 sm:$0xff]  }
 0x656   : > { %v11157_v51 = vpop.eup %11156  ;;  %6643 = vmatpush1.bf16.msra.mxu1 %v9788_v26  ;;  %v9049_v30 = vld [vmem:[%s12226_s15 + $0xab8] sm:$0xff] }
 0x657   : > { %v11159_v13 = vpop.eup %11158  ;;  %v13765_v16 = vadd.f32 %v6130_v37, %v6114_v17  ;;  %v6131_v24 = vmul.f32 %v11157_v51, %v11155_v31  ;;  %v9154_v31 = vmul.f32 -1.442695, %v5749_v36  ;;  %v9155_v51 = vmul.f32 -1.442695, %v5753_v41  ;;  %6644 = vmatprep.subr.bf16.mxu1 %v9796_v45  ;;  %v9800_v36 = vld [vmem:[%s14586_s1 + $0xa8] ss:$16 sps:$4 sm:$0xff]  }
 0x658   : > { %v11161_v34 = vpop.eup %11160  ;;  %v5860_v25 = vadd.f32 1.0, %v11159_v13 }
 0x659   : > { %v6115_v61 = vmul.f32 %v11161_v34, %v13486_v48  ;;  %v11163_v60 = vpop.eup %11162  ;;  %v5574_v32 = vpop.f32.mrb[168].mxu0 }
 0x65a   : > { %11170 = vrcp.f32 %v5860_v25  ;;  %v5687_v20 = vpop.f32.mrb[168].mxu1  ;;  %v5956_v11 = vadd.f32 1.0, %v11163_v60  ;;  %v5762_v42 = vadd.f32 %v9042_v1, %v5574_v32  ;;  %v5576_v29 = vpop.f32.mrb[169].mxu0  ;;  %6645 = vmatpush1.bf16.msra.mxu1 %v9794_v58 }
 0x65b   : > { %v13771_v54 = vadd.f32 %v6131_v24, %v6115_v61  ;;  %v13773_v46 = vpop.f32.mrb[169].mxu1  ;;  %v11165_v40 = vpop.eup %11164  ;;  %v5763_v33 = vadd.f32 %v9043_v38, %v5576_v29  ;;  %v9044_v24 = vld [vmem:[%s12226_s15 + $0xa90] sm:$0xff]  ;;  %v9037_v61 = vld [vmem:[%s12226_s15 + $0xa58] sm:$0xff] }
 0x65c   : > { %v5578_v48 = vpop.f32.mrb[170].mxu0  ;;  %v13776_v21 = vpop.f32.mrb[170].mxu1  ;;  %v5861_v53 = vadd.f32 1.0, %v11165_v40  ;;  %11172 = vrcp.f32 %v5956_v11  ;;  %v9126_v47 = vmul.f32 -1.442695, %v5762_v42  ;;  %v5764_v11 = vadd.f32 %v9044_v24, %v5687_v20  ;;  %v9041_v42 = vld [vmem:[%s12226_s15 + $0xa78] sm:$0xff] }
 0x65d   : > { %v5580_v57 = vpop.f32.mrb[171].mxu0  ;;  %v13779_v44 = vpop.f32.mrb[171].mxu1  ;;  %11174 = vtanh.f32 %v5760_v55  ;;  %v5766_v50 = vadd.f32 %v9046_v35, %v5578_v48  ;;  %v9142_v8 = vmul.f32 -1.442695, %v5763_v33  ;;  %v9048_v29 = vld [vmem:[%s12226_s15 + $0xab0] sm:$0xff]  ;;  %v5757_v35 = vadd.f32 %v9037_v61, %v13757_v62 }
 0x65e   : > { %v11167_v12 = vpop.eup %11166  ;;  %11176 = vrcp.f32 %v5861_v53  ;;  %v5767_v19 = vadd.f32 %v9047_v22, %v5580_v57  ;;  %v9791_v48 = vld [vmem:[%s14586_s1 + $0xa0] ss:$16 sps:$4 sm:$0xff]   ;;  %v5768_v33 = vadd.f32 %v9048_v29, %v13776_v21  ;;  %v9799_v62 = vld [vmem:[%s14586_s1 + $0xc4] ss:$16 sps:$4 sm:$0xff]   ;;  %v9045_v21 = vld [vmem:[%s12226_s15 + $0xa98] sm:$0xff] }
 0x65f   : > { %v5957_v59 = vadd.f32 1.0, %v11167_v12  ;;  %v11169_v0 = vpop.eup %11168  ;;  %v9127_v37 = vmul.f32 -1.442695, %v5766_v50  ;;  %v9156_v22 = vmul.f32 -1.442695, %v5757_v35  ;;  %v5765_v41 = vadd.f32 %v9045_v21, %v13773_v46 }
 0x660   : > { %v9143_v14 = vmul.f32 -1.442695, %v5767_v19  ;;  %v9808_v24 = vld [vmem:[%s14586_s1 + $0xcc] ss:$16 sps:$4 sm:$0xff]  }
 0x661   : > { %11178 = vrcp.f32 %v5957_v59  ;;  %v9797_v59 = vld [vmem:[%s14586_s1 + $0xc0] ss:$16 sps:$4 sm:$0xff]  }
 0x662   : > { %11180 = vpow2.f32 %v9126_v47 }
 0x663   : > { %11182 = vpow2.f32 %v9142_v8 }
 0x664   : > { %v11171_v4 = vpop.eup %11170  ;;  %11184 = vpow2.f32 %v9127_v37  ;;  %v5769_v37 = vadd.f32 %v9049_v30, %v13779_v44  ;;  %v9806_v44 = vld [vmem:[%s14586_s1 + $0xc8] ss:$16 sps:$4 sm:$0xff]  }
 0x665   : > { %v6132_v17 = vmul.f32 %v11171_v4, %v11169_v0  ;;  %11186 = vpow2.f32 %v9154_v31 }
 0x666   : > { %v11173_v13 = vpop.eup %11172  ;;  %11188 = vpow2.f32 %v9143_v14 }
 0x667   : > { %v11175_v34 = vpop.eup %11174  ;;  %v6116_v25 = vmul.f32 %v11173_v13, %v13516_v63  ;;  %11190 = vpow2.f32 %v9155_v51  ;;  %v9793_v63 = vld [vmem:[%s14586_s1 + $0xa4] ss:$16 sps:$4 sm:$0xff]   ;;  %v9159_v13 = vmul.f32 -1.442695, %v5769_v37 }
 0x668   : > { %v11177_v1 = vpop.eup %11176  ;;  %6533 = vmatprep.subr.bf16.mxu0 %v9793_v63  ;;  %11192 = vtanh.f32 %v5764_v11 }
 0x669   : > { %v13800_v32 = vadd.f32 %v6132_v17, %v6116_v25  ;;  %v6133_v38 = vmul.f32 %v11177_v1, %v11175_v34  ;;  %6534 = vmatpush1.bf16.msra.mxu0 %v9791_v48  ;;  %v9158_v17 = vmul.f32 -1.442695, %v5765_v41 }
 0x66a   : > { %6535 = vmatprep.subr.bf16.mxu0 %v9799_v62 }
 0x66b   : > { %v11179_v60 = vpop.eup %11178 }
 0x66c   : > { %v6117_v55 = vmul.f32 %v11179_v60, %v13520_v49  ;;  %v11181_v40 = vpop.eup %11180  ;;  %v5761_v49 = vadd.f32 %v9041_v42, %v13760_v6  ;;  %v9802_v6 = vld [vmem:[%s14586_s1 + $0xac] ss:$16 sps:$4 sm:$0xff]   ;;  %v9805_v60 = vld [vmem:[%s14586_s1 + $0xe4] ss:$16 sps:$4 sm:$0xff]  }
 0x66d   : > { %v5862_v53 = vadd.f32 1.0, %v11181_v40  ;;  %v11183_v20 = vpop.eup %11182  ;;  %6536 = vmatpush1.bf16.msra.mxu0 %v9797_v59  ;;  %6646 = vmatprep.subr.bf16.mxu1 %v9802_v6 }
 0x66e   : > { %v13812_v27 = vadd.f32 %v6133_v38, %v6117_v55  ;;  %v5958_v57 = vadd.f32 1.0, %v11183_v20  ;;  %v11185_v12 = vpop.eup %11184  ;;  %v9157_v8 = vmul.f32 -1.442695, %v5761_v49  ;;  %6647 = vmatpush1.bf16.msra.mxu1 %v9800_v36  ;;  %v9811_v38 = vld [vmem:[%s14586_s1 + $0xec] ss:$16 sps:$4 sm:$0xff]   ;;  %6537 = vmatprep.subr.bf16.mxu0 %v9805_v60 }
 0x66f   : > { %11194 = vrcp.f32 %v5862_v53  ;;  %v11187_v47 = vpop.eup %11186  ;;  %v5863_v50 = vadd.f32 1.0, %v11185_v12  ;;  %6648 = vmatprep.subr.bf16.mxu1 %v9808_v24  ;;  %v9809_v55 = vld [vmem:[%s14586_s1 + $0xe8] ss:$16 sps:$4 sm:$0xff]  }
 0x670   : > { %11196 = vrcp.f32 %v5958_v57  ;;  %v11189_v9 = vpop.eup %11188  ;;  %v6066_v0 = vadd.f32 1.0, %v11187_v47  ;;  %v9051_v24 = vld [vmem:[%s12226_s15 + $0xac8] sm:$0xff] }
 0x671   : > { %11198 = vtanh.f32 %v5768_v33  ;;  %v5959_v19 = vadd.f32 1.0, %v11189_v9  ;;  %v11191_v26 = vpop.eup %11190  ;;  %v9055_v60 = vld [vmem:[%s12226_s15 + $0xae8] sm:$0xff] }
 0x672   : > { %11200 = vrcp.f32 %v5863_v50  ;;  %v6067_v4 = vadd.f32 1.0, %v11191_v26  ;;  %v11193_v31 = vpop.eup %11192  ;;  %6649 = vmatpush1.bf16.msra.mxu1 %v9806_v44 }
 0x673   : > { %11202 = vpow2.f32 %v9156_v22  ;;  %6650 = vmatprep.subr.bf16.mxu1 %v9811_v38  ;;  %v9057_v38 = vld [vmem:[%s12226_s15 + $0xaf8] sm:$0xff] }
 0x674   : > { %11204 = vrcp.f32 %v5959_v19 }
 0x675   : > { %11206 = vpow2.f32 %v9157_v8 }
 0x676   : > { %11208 = vrcp.f32 %v6066_v0  ;;  %6651 = vmatpush1.bf16.msra.mxu1 %v9809_v55 }
 0x677   : > { %11210 = vtanh.f32 %v13765_v16 }
 0x678   : > { %11212 = vtanh.f32 %v13771_v54 }
 0x679   : > { %v11195_v14 = vpop.eup %11194  ;;  %11214 = vrcp.f32 %v6067_v4 }
 0x67a   : > { %v6134_v51 = vmul.f32 %v11195_v14, %v11193_v31  ;;  %v11197_v46 = vpop.eup %11196  ;;  %11216 = vpow2.f32 %v9158_v17  ;;  %v9812_v31 = vld [vmem:[%s14586_s1] ss:$16 sps:$4 sm:$0xff]   ;;  %v9814_v17 = vld [vmem:[%s14586_s1 + $0x4] ss:$16 sps:$4 sm:$0xff]  }
 0x67b   : > { %v11199_v45 = vpop.eup %11198  ;;  %v6118_v34 = vmul.f32 %v11197_v46, %v13527_v10  ;;  %11218 = vpow2.f32 %v9159_v13  ;;  %v9803_v10 = vld [vmem:[%s14586_s1 + $0xe0] ss:$16 sps:$4 sm:$0xff]   ;;  %v9817_v14 = vld [vmem:[%s14586_s1 + $0x24] ss:$16 sps:$4 sm:$0xff]   ;;  %v9053_v46 = vld [vmem:[%s12226_s15 + $0xad8] sm:$0xff] }
 0x67c   : > { %v11201_v25 = vpop.eup %11200  ;;  %6538 = vmatpush1.bf16.msra.mxu0 %v9803_v10  ;;  %v9050_v13 = vld [vmem:[%s12226_s15 + $0xac0] sm:$0xff] }
 0x67d   : > { %v11203_v58 = vpop.eup %11202  ;;  %v13841_v1 = vadd.f32 %v6134_v51, %v6118_v34  ;;  %v6135_v61 = vmul.f32 %v11201_v25, %v11199_v45  ;;  %7526 = vmatprep.subr.bf16.mxu0 %v9814_v17  ;;  %v9815_v51 = vld [vmem:[%s14586_s1 + $0x20] ss:$16 sps:$4 sm:$0xff]  }
 0x67e   : > { %v11205_v11 = vpop.eup %11204  ;;  %v6068_v63 = vadd.f32 1.0, %v11203_v58  ;;  %v9054_v34 = vld [vmem:[%s12226_s15 + $0xae0] sm:$0xff] }
 0x67f   : > { %v11207_v42 = vpop.eup %11206  ;;  %v6119_v29 = vmul.f32 %v11205_v11, %v13532_v28 }
 0x680   : > { %v11209_v40 = vpop.eup %11208  ;;  %v6069_v53 = vadd.f32 1.0, %v11207_v42  ;;  %11220 = vrcp.f32 %v6068_v63 }
 0x681   : > { %v13856_v35 = vadd.f32 %v6135_v61, %v6119_v29  ;;  %v11211_v48 = vpop.eup %11210  ;;  %11222 = vtanh.f32 %v13800_v32 }
 0x682   : > { %v11213_v20 = vpop.eup %11212  ;;  %11224 = vrcp.f32 %v6069_v53  ;;  %v6178_v57 = vmul.f32 %v11211_v48, %v11209_v40  ;;  %v9052_v53 = vld [vmem:[%s12226_s15 + $0xad0] sm:$0xff] }
 0x683   : > { %v11215_v49 = vpop.eup %11214  ;;  %11226 = vtanh.f32 %v13812_v27 }
 0x684   : > { %v11217_v33 = vpop.eup %11216  ;;  %v6179_v62 = vmul.f32 %v11215_v49, %v11213_v20 }
 0x685   : > { %v11219_v28 = vpop.eup %11218  ;;  %v6070_v12 = vadd.f32 1.0, %v11217_v33 }
 0x686   : > { %v6323_v22 = vpack.c.bf16 %v6179_v62, %v6178_v57  ;;  %v6071_v59 = vadd.f32 1.0, %v11219_v28 }
 0x687   : > { %11228 = vrcp.f32 %v6070_v12  ;;  %v9058_v12 = vld [vmem:[%s12226_s15 + $0xb00] sm:$0xff] }
 0x688   : > { %6556 = vmatmul.mubr.bf16.vlgmr.msra.gmra.mrb[192].mxu0 %v6323_v22  ;;  %6669 = vmatmul.mubr.bf16.vlgmr.msra.gmra.mrb[192].mxu1 %v6323_v22  ;;  %11230 = vtanh.f32 %v13841_v1 }
 0x689   : > { %6565 = vmatprep.mubr.bf16.mxu0 %v11988_v2  ;;  %6678 = vmatprep.mubr.bf16.mxu1 %v11988_v2  ;;  %11232 = vrcp.f32 %v6071_v59  ;;  %v9059_v59 = vld [vmem:[%s12226_s15 + $0xb08] sm:$0xff] }
 0x68a   : > { %v11221_v6 = vpop.eup %11220  ;;  %11234 = vtanh.f32 %v13856_v35  ;;  %7527 = vmatpush1.bf16.msra.mxu0 %v9812_v31 }
 0x68b   : > { %v11223_v47 = vpop.eup %11222  ;;  %7528 = vmatprep.subr.bf16.mxu0 %v9817_v14  ;;  %v9063_v14 = vld [vmem:[%s12226_s15 + $0xb28] sm:$0xff] }
 0x68c   : > { %v11225_v21 = vpop.eup %11224  ;;  %v6180_v36 = vmul.f32 %v11223_v47, %v11221_v6  ;;  %v9061_v6 = vld [vmem:[%s12226_s15 + $0xb18] sm:$0xff]  ;;  %v9056_v47 = vld [vmem:[%s12226_s15 + $0xaf0] sm:$0xff] }
 0x68d   : > { %v11227_v50 = vpop.eup %11226 }
 0x68e   : > { %v6181_v9 = vmul.f32 %v11227_v50, %v11225_v21  ;;  %7529 = vmatpush1.bf16.msra.mxu0 %v9815_v51 }
 0x690   : > { %v6324_v8 = vpack.c.bf16 %v6181_v9, %v6180_v36  ;;  %v9062_v9 = vld [vmem:[%s12226_s15 + $0xb20] sm:$0xff] }
 0x691   : > { %v11229_v19 = vpop.eup %11228 }
 0x692   : > { %6566 = vmatmul.mubr.bf16.gmra.mrb[196].mxu0 %v6324_v8  ;;  %6679 = vmatmul.mubr.bf16.gmra.mrb[196].mxu1 %v6324_v8  ;;  %v11231_v30 = vpop.eup %11230 }
 0x693   : > { %6575 = vmatprep.mubr.bf16.mxu0 %v11988_v2  ;;  %6688 = vmatprep.mubr.bf16.mxu1 %v11988_v2  ;;  %v11233_v26 = vpop.eup %11232  ;;  %v6182_v41 = vmul.f32 %v11231_v30, %v11229_v19 }
 0x694   : > { %v11235_v0 = vpop.eup %11234 }
 0x695   : > { %v6183_v37 = vmul.f32 %v11235_v0, %v11233_v26 }
 0x697   : > { %v6325_v4 = vpack.c.bf16 %v6183_v37, %v6182_v41 }
 0x69a   : > { %6576 = vmatmul.mubr.bf16.gmra.mrb[200].mxu0 %v6325_v4  ;;  %6689 = vmatmul.mubr.bf16.gmra.mrb[200].mxu1 %v6325_v4 }
 0x69b   : > { %6585 = vmatprep.mubr.bf16.mxu0 %v11988_v2  ;;  %6698 = vmatprep.mubr.bf16.mxu1 %v11988_v2 }
 0x6e5   : > { %v5584_v44 = vpop.f32.mrb[172].mxu0  ;;  %v5697_v45 = vpop.f32.mrb[172].mxu1 }
 0x6e6   : > { %v5770_v25 = vadd.f32 %v9050_v13, %v5584_v44  ;;  %v5586_v58 = vpop.f32.mrb[173].mxu0  ;;  %v5699_v61 = vpop.f32.mrb[173].mxu1  ;;  %v5772_v22 = vadd.f32 %v9052_v53, %v5697_v45 }
 0x6e7   : > { %v5771_v11 = vadd.f32 %v9051_v24, %v5586_v58  ;;  %v5773_v10 = vadd.f32 %v9053_v46, %v5699_v61  ;;  %v5588_v55 = vpop.f32.mrb[174].mxu0  ;;  %v5701_v42 = vpop.f32.mrb[174].mxu1  ;;  %v9060_v46 = vld [vmem:[%s12226_s15 + $0xb10] sm:$0xff] }
 0x6e8   : > { %v9128_v29 = vmul.f32 -1.442695, %v5770_v25  ;;  %v5774_v63 = vadd.f32 %v9054_v34, %v5588_v55  ;;  %v5590_v40 = vpop.f32.mrb[175].mxu0  ;;  %v5703_v48 = vpop.f32.mrb[175].mxu1  ;;  %v5776_v4 = vadd.f32 %v9056_v47, %v5701_v42  ;;  %v9064_v42 = vld [vmem:[%s12226_s15 + $0xb30] sm:$0xff] }
 0x6e9   : > { %v9144_v20 = vmul.f32 -1.442695, %v5771_v11  ;;  %v9160_v49 = vmul.f32 -1.442695, %v5773_v10  ;;  %v5775_v33 = vadd.f32 %v9055_v60, %v5590_v40  ;;  %v5777_v57 = vadd.f32 %v9057_v38, %v5703_v48 }
 0x6ea   : > { %11236 = vpow2.f32 %v9128_v29  ;;  %v9129_v62 = vmul.f32 -1.442695, %v5774_v63  ;;  %v9065_v29 = vld [vmem:[%s12226_s15 + $0xb38] sm:$0xff] }
 0x6eb   : > { %11238 = vpow2.f32 %v9144_v20  ;;  %v9145_v28 = vmul.f32 -1.442695, %v5775_v33  ;;  %v9161_v21 = vmul.f32 -1.442695, %v5777_v57  ;;  %v9066_v57 = vld [vmem:[%s12226_s15 + $0xb40] sm:$0xff] }
 0x6ec   : > { %11240 = vpow2.f32 %v9160_v49 }
 0x6ed   : > { %11242 = vpow2.f32 %v9129_v62  ;;  %v5594_v50 = vpop.f32.mrb[176].mxu0  ;;  %v5707_v36 = vpop.f32.mrb[176].mxu1 }
 0x6ee   : > { %v5778_v8 = vadd.f32 %v9058_v12, %v5594_v50  ;;  %v5596_v19 = vpop.f32.mrb[177].mxu0  ;;  %v5709_v30 = vpop.f32.mrb[177].mxu1  ;;  %11244 = vpow2.f32 %v9145_v28  ;;  %v5780_v60 = vadd.f32 %v9060_v46, %v5707_v36  ;;  %v9067_v50 = vld [vmem:[%s12226_s15 + $0xb48] sm:$0xff] }
 0x6ef   : > { %v5779_v26 = vadd.f32 %v9059_v59, %v5596_v19  ;;  %v5781_v0 = vadd.f32 %v9061_v6, %v5709_v30  ;;  %v5598_v41 = vpop.f32.mrb[178].mxu0  ;;  %v5711_v37 = vpop.f32.mrb[178].mxu1  ;;  %11246 = vtanh.f32 %v5772_v22  ;;  %v9070_v30 = vld [vmem:[%s12226_s15 + $0xb60] sm:$0xff] }
 0x6f0   : > { %v9130_v31 = vmul.f32 -1.442695, %v5778_v8  ;;  %v5782_v17 = vadd.f32 %v9062_v9, %v5598_v41  ;;  %v5600_v51 = vpop.f32.mrb[179].mxu0  ;;  %v5713_v13 = vpop.f32.mrb[179].mxu1  ;;  %11248 = vpow2.f32 %v9161_v21  ;;  %v5784_v22 = vadd.f32 %v9064_v42, %v5711_v37  ;;  %v9069_v8 = vld [vmem:[%s12226_s15 + $0xb58] sm:$0xff] }
 0x6f1   : > { %v9146_v24 = vmul.f32 -1.442695, %v5779_v26  ;;  %v9162_v44 = vmul.f32 -1.442695, %v5781_v0  ;;  %v5783_v34 = vadd.f32 %v9063_v14, %v5600_v51  ;;  %v5785_v59 = vadd.f32 %v9065_v29, %v5713_v13 }
 0x6f2   : > { %11250 = vpow2.f32 %v9130_v31  ;;  %v9131_v45 = vmul.f32 -1.442695, %v5782_v17 }
 0x6f3   : > { %11252 = vpow2.f32 %v9146_v24  ;;  %v9147_v53 = vmul.f32 -1.442695, %v5783_v34  ;;  %v9163_v41 = vmul.f32 -1.442695, %v5785_v59  ;;  %v9071_v34 = vld [vmem:[%s12226_s15 + $0xb68] sm:$0xff] }
 0x6f4   : > { %v11237_v25 = vpop.eup %11236  ;;  %11254 = vtanh.f32 %v5776_v4 }
 0x6f5   : > { %v11239_v58 = vpop.eup %11238  ;;  %v5864_v61 = vadd.f32 1.0, %v11237_v25  ;;  %11256 = vpow2.f32 %v9131_v45  ;;  %v5604_v38 = vpop.f32.mrb[180].mxu0 }
 0x6f6   : > { %v13894_v11 = vpop.f32.mrb[180].mxu1  ;;  %v11241_v10 = vpop.eup %11240  ;;  %v5960_v55 = vadd.f32 1.0, %v11239_v58  ;;  %11258 = vpow2.f32 %v9162_v44  ;;  %v5786_v9 = vadd.f32 %v9066_v57, %v5604_v38 }
 0x6f7   : > { %v5606_v63 = vpop.f32.mrb[181].mxu0  ;;  %v5719_v40 = vpop.f32.mrb[181].mxu1  ;;  %11260 = vrcp.f32 %v5864_v61  ;;  %v6072_v47 = vadd.f32 1.0, %v11241_v10 }
 0x6f8   : > { %v11243_v48 = vpop.eup %11242  ;;  %v5608_v20 = vpop.f32.mrb[182].mxu0  ;;  %11262 = vrcp.f32 %v5960_v55  ;;  %v5787_v4 = vadd.f32 %v9067_v50, %v5606_v63  ;;  %v5789_v51 = vadd.f32 %v9069_v8, %v5719_v40  ;;  %v9132_v44 = vmul.f32 -1.442695, %v5786_v9  ;;  %v9073_v63 = vld [vmem:[%s12226_s15 + $0xb78] sm:$0xff]  ;;  %v9074_v40 = vld [vmem:[%s12226_s15 + $0xb80] sm:$0xff] }
 0x6f9   : > { %v13898_v49 = vpop.f32.mrb[182].mxu1  ;;  %v5865_v33 = vadd.f32 1.0, %v11243_v48  ;;  %v5610_v62 = vpop.f32.mrb[183].mxu0  ;;  %11264 = vtanh.f32 %v5780_v60  ;;  %v5790_v45 = vadd.f32 %v9070_v30, %v5608_v20 }
 0x6fa   : > { %v5723_v28 = vpop.f32.mrb[183].mxu1  ;;  %v11245_v12 = vpop.eup %11244  ;;  %v9148_v29 = vmul.f32 -1.442695, %v5787_v4  ;;  %v9164_v20 = vmul.f32 -1.442695, %v5789_v51  ;;  %v9072_v51 = vld [vmem:[%s12226_s15 + $0xb70] sm:$0xff] }
 0x6fb   : > { %v11247_v6 = vpop.eup %11246  ;;  %11266 = vrcp.f32 %v5865_v33  ;;  %v5961_v21 = vadd.f32 1.0, %v11245_v12  ;;  %v5791_v33 = vadd.f32 %v9071_v34, %v5610_v62 }
 0x6fc   : > { %v11249_v36 = vpop.eup %11248  ;;  %11268 = vpow2.f32 %v9147_v53 }
 0x6fd   : > { %v11251_v19 = vpop.eup %11250  ;;  %11270 = vrcp.f32 %v5961_v21  ;;  %v5614_v37 = vpop.f32.mrb[184].mxu0  ;;  %v6073_v60 = vadd.f32 1.0, %v11249_v36  ;;  %v5793_v21 = vadd.f32 %v9073_v63, %v5723_v28  ;;  %v9075_v36 = vld [vmem:[%s12226_s15 + $0xb88] sm:$0xff] }
 0x6fe   : > { %v11253_v26 = vpop.eup %11252  ;;  %v5866_v0 = vadd.f32 1.0, %v11251_v19  ;;  %11272 = vtanh.f32 %v5784_v22  ;;  %v13904_v31 = vpop.f32.mrb[184].mxu1  ;;  %v9133_v22 = vmul.f32 -1.442695, %v5790_v45  ;;  %v5794_v50 = vadd.f32 %v9074_v40, %v5614_v37 }
 0x6ff   : > { %v11255_v17 = vpop.eup %11254  ;;  %11274 = vrcp.f32 %v6072_v47  ;;  %v5962_v14 = vadd.f32 1.0, %v11253_v26  ;;  %v5616_v13 = vpop.f32.mrb[185].mxu0  ;;  %v9068_v47 = vld [vmem:[%s12226_s15 + $0xb50] sm:$0xff] }
 0x700   : > { %v13906_v24 = vpop.f32.mrb[185].mxu1  ;;  %v11257_v46 = vpop.eup %11256  ;;  %11276 = vrcp.f32 %v5866_v0  ;;  %v9149_v0 = vmul.f32 -1.442695, %v5791_v33 }
 0x701   : > { %v13909_v25 = vpop.f32.mrb[186].mxu0  ;;  %v13911_v58 = vpop.f32.mrb[186].mxu1  ;;  %11278 = vrcp.f32 %v5962_v14  ;;  %v5867_v38 = vadd.f32 1.0, %v11257_v46  ;;  %v5795_v46 = vadd.f32 %v9075_v36, %v5616_v13  ;;  %v9078_v13 = vld [vmem:[%s12226_s15 + $0xba0] sm:$0xff] }
 0x702   : > { %v11259_v61 = vpop.eup %11258  ;;  %v13913_v10 = vpop.f32.mrb[187].mxu0  ;;  %11280 = vpow2.f32 %v9163_v41  ;;  %v9077_v41 = vld [vmem:[%s12226_s15 + $0xb98] sm:$0xff]  ;;  %v9823_v36 = vld [vmem:[%s14586_s1 + $0x44] ss:$16 sps:$4 sm:$0xff]  }
 0x703   : > { %v13915_v55 = vpop.f32.mrb[187].mxu1  ;;  %v11261_v42 = vpop.eup %11260  ;;  %11282 = vrcp.f32 %v5867_v38  ;;  %v9150_v33 = vmul.f32 -1.442695, %v5795_v46  ;;  %7530 = vmatprep.subr.bf16.mxu0 %v9823_v36 }
 0x704   : > { %v11263_v48 = vpop.eup %11262  ;;  %v6136_v53 = vmul.f32 %v11261_v42, %v11247_v6  ;;  %11284 = vpow2.f32 %v9132_v44  ;;  %v6074_v6 = vadd.f32 1.0, %v11259_v61  ;;  %v9165_v61 = vmul.f32 -1.442695, %v5793_v21 }
 0x705   : > { %v11265_v57 = vpop.eup %11264  ;;  %v6120_v12 = vmul.f32 %v11263_v48, %v13592_v52  ;;  %11286 = vrcp.f32 %v6073_v60  ;;  %v13924_v62 = vpop.f32.mrb[188].mxu0  ;;  %v5792_v48 = vadd.f32 %v9072_v51, %v13898_v49  ;;  %v9821_v49 = vld [vmem:[%s14586_s1 + $0x40] ss:$16 sps:$4 sm:$0xff]  }
 0x706   : > { %v11267_v59 = vpop.eup %11266  ;;  %11288 = vpow2.f32 %v9148_v29  ;;  %v13926_v30 = vpop.f32.mrb[188].mxu1  ;;  %v5797_v29 = vadd.f32 %v9077_v41, %v13906_v24  ;;  %v9820_v24 = vld [vmem:[%s14586_s1 + $0xc] ss:$16 sps:$4 sm:$0xff]   ;;  %7531 = vmatpush1.bf16.msra.mxu0 %v9821_v49 }
 0x707   : > { %v11269_v9 = vpop.eup %11268  ;;  %v13922_v8 = vadd.f32 %v6136_v53, %v6120_v12  ;;  %v6137_v19 = vmul.f32 %v11267_v59, %v11255_v17  ;;  %11290 = vpow2.f32 %v9164_v20  ;;  %v13929_v4 = vpop.f32.mrb[189].mxu0  ;;  %v5788_v17 = vadd.f32 %v9068_v47, %v13894_v11  ;;  %v9818_v12 = vld [vmem:[%s14586_s1 + $0x8] ss:$16 sps:$4 sm:$0xff]   ;;  %7639 = vmatprep.subr.bf16.mxu1 %v9820_v24 }
 0x708   : > { %v11271_v52 = vpop.eup %11270  ;;  %v5963_v26 = vadd.f32 1.0, %v11269_v9  ;;  %v13931_v28 = vpop.f32.mrb[189].mxu1  ;;  %11292 = vpow2.f32 %v9133_v22  ;;  %v9134_v11 = vmul.f32 -1.442695, %v5794_v50  ;;  %v9166_v21 = vmul.f32 -1.442695, %v5797_v29  ;;  %7640 = vmatpush1.bf16.msra.mxu1 %v9818_v12 }
 0x709   : > { %v11273_v37 = vpop.eup %11272  ;;  %v6121_v14 = vmul.f32 %v11271_v52, %v13616_v15  ;;  %v13936_v44 = vpop.f32.mrb[190].mxu0  ;;  %v9079_v50 = vld [vmem:[%s12226_s15 + $0xba8] sm:$0xff]  ;;  %v9076_v52 = vld [vmem:[%s12226_s15 + $0xb90] sm:$0xff] }
 0x70a   : > { %v13938_v45 = vpop.f32.mrb[190].mxu1  ;;  %v13940_v34 = vpop.eup %11274  ;;  %11294 = vrcp.f32 %v5963_v26  ;;  %v5799_v41 = vadd.f32 %v9079_v50, %v13913_v10  ;;  %v9080_v10 = vld [vmem:[%s12226_s15 + $0xbb0] sm:$0xff]  ;;  %v9824_v50 = vld [vmem:[%s14586_s1 + $0x28] ss:$16 sps:$4 sm:$0xff]  }
 0x70b   : > { %v13942_v60 = vpop.f32.mrb[191].mxu0  ;;  %v13944_v38 = vpop.f32.mrb[191].mxu1  ;;  %v13946_v15 = vadd.f32 %v6137_v19, %v6121_v14  ;;  %11296 = vrcp.f32 %v6074_v6 }
 0x70c   : > { %v11277_v42 = vpop.eup %11276  ;;  %11298 = vpow2.f32 %v9149_v0 }
 0x70d   : > { %v11279_v63 = vpop.eup %11278  ;;  %v6138_v40 = vmul.f32 %v11277_v42, %v11265_v57  ;;  %11300 = vtanh.f32 %v5788_v17  ;;  %v5798_v57 = vadd.f32 %v9078_v13, %v13909_v25  ;;  %v9082_v17 = vld [vmem:[%s12226_s15 + $0xbc0] sm:$0xff]  ;;  %v9151_v13 = vmul.f32 -1.442695, %v5799_v41 }
 0x70e   : > { %v11281_v53 = vpop.eup %11280  ;;  %v6122_v20 = vmul.f32 %v11279_v63, %v13632_v23  ;;  %11302 = vpow2.f32 %v9165_v61  ;;  %v5796_v61 = vadd.f32 %v9076_v52, %v13904_v31  ;;  %v9081_v63 = vld [vmem:[%s12226_s15 + $0xbb8] sm:$0xff]  ;;  %v9083_v31 = vld [vmem:[%s12226_s15 + $0xbc8] sm:$0xff] }
 0x70f   : > { %v11283_v22 = vpop.eup %11282  ;;  %11304 = vpow2.f32 %v9134_v11  ;;  %v6075_v6 = vadd.f32 1.0, %v11281_v53  ;;  %v9135_v14 = vmul.f32 -1.442695, %v5798_v57  ;;  %v9085_v52 = vld [vmem:[%s12226_s15 + $0xbd8] sm:$0xff] }
 0x710   : > { %v11285_v23 = vpop.eup %11284  ;;  %v13962_v59 = vadd.f32 %v6138_v40, %v6122_v20  ;;  %v6139_v47 = vmul.f32 %v11283_v22, %v11273_v37  ;;  %11306 = vtanh.f32 %v5792_v48  ;;  %v5802_v40 = vadd.f32 %v9082_v17, %v13924_v62  ;;  %v9829_v17 = vld [vmem:[%s14586_s1 + $0x64] ss:$16 sps:$4 sm:$0xff]  }
 0x711   : > { %v13968_v9 = vpop.eup %11286  ;;  %v5868_v25 = vadd.f32 1.0, %v11285_v23  ;;  %11308 = vpow2.f32 %v9150_v33  ;;  %v5801_v22 = vadd.f32 %v9081_v63, %v13915_v55  ;;  %v5803_v62 = vadd.f32 %v9083_v31, %v13929_v4  ;;  %v9086_v23 = vld [vmem:[%s12226_s15 + $0xbe0] sm:$0xff]  ;;  %7532 = vmatprep.subr.bf16.mxu0 %v9829_v17 }
 0x712   : > { %v11289_v19 = vpop.eup %11288 }
 0x713   : > { %v11291_v26 = vpop.eup %11290  ;;  %11310 = vrcp.f32 %v5868_v25  ;;  %v5964_v0 = vadd.f32 1.0, %v11289_v19  ;;  %v9167_v4 = vmul.f32 -1.442695, %v5801_v22 }
 0x714   : > { %v11293_v37 = vpop.eup %11292  ;;  %11312 = vpow2.f32 %v9166_v21  ;;  %v6076_v20 = vadd.f32 1.0, %v11291_v26  ;;  %v9136_v21 = vmul.f32 -1.442695, %v5802_v40  ;;  %v5806_v26 = vadd.f32 %v9086_v23, %v13936_v44  ;;  %v9084_v44 = vld [vmem:[%s12226_s15 + $0xbd0] sm:$0xff] }
 0x715   : > { %v11295_v51 = vpop.eup %11294  ;;  %11314 = vrcp.f32 %v5964_v0  ;;  %v5869_v46 = vadd.f32 1.0, %v11293_v37  ;;  %v9087_v0 = vld [vmem:[%s12226_s15 + $0xbe8] sm:$0xff]  ;;  %v9152_v37 = vmul.f32 -1.442695, %v5803_v62 }
 0x716   : > { %v13974_v42 = vpop.eup %11296  ;;  %v6123_v11 = vmul.f32 %v11295_v51, %v13650_v43  ;;  %11316 = vrcp.f32 %v6075_v6  ;;  %v5800_v43 = vadd.f32 %v9080_v10, %v13911_v58  ;;  %v9826_v58 = vld [vmem:[%s14586_s1 + $0x2c] ss:$16 sps:$4 sm:$0xff]   ;;  %v5807_v10 = vadd.f32 %v9087_v0, %v13942_v60 }
 0x717   : > { %v11299_v29 = vpop.eup %11298  ;;  %11318 = vrcp.f32 %v5869_v46  ;;  %7641 = vmatprep.subr.bf16.mxu1 %v9826_v58 }
 0x718   : > { %v11301_v48 = vpop.eup %11300  ;;  %v13980_v53 = vadd.f32 %v6139_v47, %v6123_v11  ;;  %v5965_v33 = vadd.f32 1.0, %v11299_v29  ;;  %11320 = vpow2.f32 %v9135_v14  ;;  %v9827_v14 = vld [vmem:[%s14586_s1 + $0x60] ss:$16 sps:$4 sm:$0xff]   ;;  %7642 = vmatpush1.bf16.msra.mxu1 %v9824_v50  ;;  %v5805_v29 = vadd.f32 %v9085_v52, %v13931_v28 }
 0x719   : > { %v11303_v12 = vpop.eup %11302  ;;  %11322 = vtanh.f32 %v5796_v61  ;;  %7533 = vmatpush1.bf16.msra.mxu0 %v9827_v14 }
 0x71a   : > { %v11305_v24 = vpop.eup %11304  ;;  %11324 = vrcp.f32 %v5965_v33  ;;  %v6077_v36 = vadd.f32 1.0, %v11303_v12  ;;  %v5804_v33 = vadd.f32 %v9084_v44, %v13926_v30  ;;  %v9088_v12 = vld [vmem:[%s12226_s15 + $0xbf0] sm:$0xff] }
 0x71b   : > { %v11307_v57 = vpop.eup %11306  ;;  %v5870_v49 = vadd.f32 1.0, %v11305_v24  ;;  %11326 = vpow2.f32 %v9151_v13  ;;  %v9153_v24 = vmul.f32 -1.442695, %v5807_v10  ;;  %v5808_v30 = vadd.f32 %v9088_v12, %v13938_v45  ;;  %v9833_v45 = vld [vmem:[%s14586_s1 + $0x80] ss:$16 sps:$4 sm:$0xff]  }
 0x71c   : > { %v11309_v47 = vpop.eup %11308  ;;  %11328 = vrcp.f32 %v6076_v20 }
 0x71d   : > { %v11311_v55 = vpop.eup %11310  ;;  %11330 = vrcp.f32 %v5870_v49  ;;  %v5966_v25 = vadd.f32 1.0, %v11309_v47  ;;  %v9089_v49 = vld [vmem:[%s12226_s15 + $0xbf8] sm:$0xff] }
 0x71e   : > { %v11313_v19 = vpop.eup %11312  ;;  %v6140_v6 = vmul.f32 %v11311_v55, %v11301_v48  ;;  %11332 = vtanh.f32 %v5800_v43  ;;  %v9137_v48 = vmul.f32 -1.442695, %v5806_v26  ;;  %v9830_v47 = vld [vmem:[%s14586_s1 + $0x48] ss:$16 sps:$4 sm:$0xff]   ;;  %v5809_v55 = vadd.f32 %v9089_v49, %v13944_v38 }
 0x71f   : > { %v11315_v41 = vpop.eup %11314  ;;  %11334 = vrcp.f32 %v5966_v25  ;;  %v6078_v61 = vadd.f32 1.0, %v11313_v19 }
 0x720   : > { %v14002_v51 = vpop.eup %11316  ;;  %v6124_v46 = vmul.f32 %v11315_v41, %v13675_v7  ;;  %11336 = vpow2.f32 %v9136_v21  ;;  %v9169_v0 = vmul.f32 -1.442695, %v5809_v55 }
 0x721   : > { %v11319_v11 = vpop.eup %11318  ;;  %11338 = vrcp.f32 %v6077_v36  ;;  %v9835_v36 = vld [vmem:[%s14586_s1 + $0x84] ss:$16 sps:$4 sm:$0xff]  }
 0x722   : > { %v11321_v13 = vpop.eup %11320  ;;  %v14008_v63 = vadd.f32 %v6140_v6, %v6124_v46  ;;  %v6141_v40 = vmul.f32 %v11319_v11, %v11307_v57  ;;  %11340 = vpow2.f32 %v9167_v4  ;;  %v9168_v57 = vmul.f32 -1.442695, %v5805_v29  ;;  %7534 = vmatprep.subr.bf16.mxu0 %v9835_v36 }
 0x723   : > { %v11323_v7 = vpop.eup %11322  ;;  %v5871_v20 = vadd.f32 1.0, %v11321_v13  ;;  %11342 = vpow2.f32 %v9152_v37  ;;  %7535 = vmatpush1.bf16.msra.mxu0 %v9833_v45 }
 0x724   : > { %v11325_v31 = vpop.eup %11324  ;;  %11344 = vrcp.f32 %v6078_v61 }
 0x725   : > { %v11327_v28 = vpop.eup %11326  ;;  %v6125_v60 = vmul.f32 %v11325_v31, %v13686_v18  ;;  %11346 = vrcp.f32 %v5871_v20  ;;  %v9832_v18 = vld [vmem:[%s14586_s1 + $0x4c] ss:$16 sps:$4 sm:$0xff]  }
 0x726   : > { %v14013_v43 = vpop.eup %11328  ;;  %v5967_v22 = vadd.f32 1.0, %v11327_v28  ;;  %11348 = vpow2.f32 %v9137_v48  ;;  %7643 = vmatprep.subr.bf16.mxu1 %v9832_v18 }
 0x727   : > { %v11331_v62 = vpop.eup %11330  ;;  %v14016_v23 = vadd.f32 %v6141_v40, %v6125_v60  ;;  %11350 = vtanh.f32 %v5804_v33  ;;  %7644 = vmatpush1.bf16.msra.mxu1 %v9830_v47 }
 0x728   : > { %v11333_v21 = vpop.eup %11332  ;;  %v6142_v50 = vmul.f32 %v11331_v62, %v11323_v7  ;;  %11352 = vrcp.f32 %v5967_v22 }
 0x729   : > { %v11335_v58 = vpop.eup %11334  ;;  %11354 = vpow2.f32 %v9153_v24 }
 0x72a   : > { %v11337_v25 = vpop.eup %11336  ;;  %v6126_v19 = vmul.f32 %v11335_v58, %v13693_v3  ;;  %11356 = vpow2.f32 %v9168_v57 }
 0x72b   : > { %v14033_v6 = vpop.eup %11338  ;;  %v5872_v4 = vadd.f32 1.0, %v11337_v25  ;;  %11358 = vtanh.f32 %v5808_v30 }
 0x72c   : > { %v11341_v38 = vpop.eup %11340  ;;  %v14035_v52 = vadd.f32 %v6142_v50, %v6126_v19  ;;  %11360 = vtanh.f32 %v13922_v8 }
 0x72d   : > { %v11343_v26 = vpop.eup %11342  ;;  %11362 = vrcp.f32 %v5872_v4  ;;  %v6079_v10 = vadd.f32 1.0, %v11341_v38 }
 0x72e   : > { %v14038_v41 = vpop.eup %11344  ;;  %v5968_v37 = vadd.f32 1.0, %v11343_v26  ;;  %11364 = vtanh.f32 %v13946_v15 }
 0x72f   : > { %v11347_v3 = vpop.eup %11346  ;;  %11366 = vtanh.f32 %v13962_v59 }
 0x730   : > { %v11349_v14 = vpop.eup %11348  ;;  %v6143_v17 = vmul.f32 %v11347_v3, %v11333_v21  ;;  %11368 = vrcp.f32 %v5968_v37 }
 0x731   : > { %v11351_v46 = vpop.eup %11350  ;;  %v5873_v61 = vadd.f32 1.0, %v11349_v14  ;;  %11370 = vpow2.f32 %v9169_v0 }
 0x732   : > { %v11353_v44 = vpop.eup %11352  ;;  %11372 = vtanh.f32 %v13980_v53 }
 0x733   : > { %v11355_v11 = vpop.eup %11354  ;;  %v6127_v29 = vmul.f32 %v11353_v44, %v13709_v56  ;;  %11374 = vrcp.f32 %v5873_v61  ;;  %v9170_v61 = vld [vmem:[%s12226_s15 + $0xc00] sm:$0xff]  ;;  %v9171_v44 = vld [vmem:[%s12226_s15 + $0xc08] sm:$0xff] }
 0x734   : > { %v11357_v13 = vpop.eup %11356  ;;  %v5969_v40 = vadd.f32 1.0, %v11355_v11  ;;  %11376 = vtanh.f32 %v14008_v63 }
 0x735   : > { %v11359_v48 = vpop.eup %11358  ;;  %v14045_v7 = vadd.f32 %v6143_v17, %v6127_v29  ;;  %11378 = vtanh.f32 %v14016_v23  ;;  %v6080_v50 = vadd.f32 1.0, %v11357_v13 }
 0x736   : > { %v11361_v20 = vpop.eup %11360  ;;  %11380 = vrcp.f32 %v5969_v40 }
 0x737   : > { %v11363_v33 = vpop.eup %11362  ;;  %11382 = vrcp.f32 %v6079_v10  ;;  %v6184_v28 = vmul.f32 %v11361_v20, %v13940_v34  ;;  %v9174_v10 = vld [vmem:[%s12226_s15 + $0xc20] sm:$0xff]  ;;  %v9175_v20 = vld [vmem:[%s12226_s15 + $0xc28] sm:$0xff] }
 0x738   : > { %v11365_v31 = vpop.eup %11364  ;;  %v6144_v12 = vmul.f32 %v11363_v33, %v11351_v46  ;;  %11384 = vtanh.f32 %v14035_v52 }
 0x739   : > { %v11367_v56 = vpop.eup %11366  ;;  %v6185_v60 = vmul.f32 %v11365_v31, %v13968_v9  ;;  %11386 = vtanh.f32 %v14045_v7 }
 0x73a   : > { %v11369_v24 = vpop.eup %11368  ;;  %v6186_v18 = vmul.f32 %v11367_v56, %v13974_v42  ;;  %11388 = vrcp.f32 %v6080_v50 }
 0x73b   : > { %v11371_v22 = vpop.eup %11370  ;;  %v6128_v57 = vmul.f32 %v11369_v24, %v13723_v5  ;;  %v6326_v49 = vpack.c.bf16 %v6185_v60, %v6184_v28 }
 0x73c   : > { %v11373_v62 = vpop.eup %11372  ;;  %v6081_v45 = vadd.f32 1.0, %v11371_v22 }
 0x73d   : > { %v11375_v30 = vpop.eup %11374  ;;  %v14053_v47 = vadd.f32 %v6144_v12, %v6128_v57  ;;  %6586 = vmatmul.mubr.bf16.gmra.mrb[204].mxu0 %v6326_v49  ;;  %6699 = vmatmul.mubr.bf16.gmra.mrb[204].mxu1 %v6326_v49  ;;  %v6187_v21 = vmul.f32 %v11373_v62, %v14002_v51 }
 0x73e   : > { %v11377_v34 = vpop.eup %11376  ;;  %v6145_v9 = vmul.f32 %v11375_v30, %v11359_v48  ;;  %6595 = vmatprep.mubr.bf16.mxu0 %v11988_v2  ;;  %6708 = vmatprep.mubr.bf16.mxu1 %v11988_v2  ;;  %v9172_v30 = vld [vmem:[%s12226_s15 + $0xc10] sm:$0xff] }
 0x73f   : > { %v11379_v58 = vpop.eup %11378  ;;  %v6327_v5 = vpack.c.bf16 %v6187_v21, %v6186_v18  ;;  %v6188_v36 = vmul.f32 %v11377_v34, %v14013_v43  ;;  %11390 = vtanh.f32 %v14053_v47  ;;  %v9178_v18 = vld [vmem:[%s12226_s15 + $0xc40] sm:$0xff]  ;;  %v9179_v21 = vld [vmem:[%s12226_s15 + $0xc48] sm:$0xff] }
 0x740   : > { %v11381_v55 = vpop.eup %11380  ;;  %v6189_v25 = vmul.f32 %v11379_v58, %v14033_v6  ;;  %11392 = vrcp.f32 %v6081_v45  ;;  %v9176_v58 = vld [vmem:[%s12226_s15 + $0xc30] sm:$0xff] }
 0x741   : > { %v11383_v19 = vpop.eup %11382  ;;  %v6129_v42 = vmul.f32 %v11381_v55, %v13732_v39 }
 0x742   : > { %v11385_v4 = vpop.eup %11384  ;;  %v6328_v51 = vpack.c.bf16 %v6189_v25, %v6188_v36 }
 0x743   : > { %v11387_v38 = vpop.eup %11386  ;;  %v14062_v26 = vadd.f32 %v6145_v9, %v6129_v42  ;;  %v6190_v0 = vmul.f32 %v11385_v4, %v14038_v41 }
 0x744   : > { %v6191_v37 = vmul.f32 %v11387_v38, %v11383_v19  ;;  %v11389_v43 = vpop.eup %11388 }
 0x745   : > { %6596 = vmatmul.mubr.bf16.gmra.mrb[208].mxu0 %v6327_v5  ;;  %6709 = vmatmul.mubr.bf16.gmra.mrb[208].mxu1 %v6327_v5  ;;  %11394 = vtanh.f32 %v14062_v26 }
 0x746   : > { %6605 = vmatprep.mubr.bf16.mxu0 %v11988_v2  ;;  %6718 = vmatprep.mubr.bf16.mxu1 %v11988_v2  ;;  %v6329_v39 = vpack.c.bf16 %v6191_v37, %v6190_v0 }
 0x749   : > { %v11391_v6 = vpop.eup %11390 }
 0x74a   : > { %v11393_v3 = vpop.eup %11392  ;;  %v6192_v14 = vmul.f32 %v11391_v6, %v11389_v43 }
 0x74d   : > { %6606 = vmatmul.mubr.bf16.gmra.mrb[212].mxu0 %v6328_v51  ;;  %6719 = vmatmul.mubr.bf16.gmra.mrb[212].mxu1 %v6328_v51  ;;  %v9182_v51 = vld [vmem:[%s12226_s15 + $0xc60] sm:$0xff] }
 0x74e   : > { %6615 = vmatprep.mubr.bf16.mxu0 %v11988_v2  ;;  %6728 = vmatprep.mubr.bf16.mxu1 %v11988_v2 }
 0x74f   : > { %v11395_v41 = vpop.eup %11394 }
 0x750   : > { %v6193_v17 = vmul.f32 %v11395_v41, %v11393_v3  ;;  %v9183_v3 = vld [vmem:[%s12226_s15 + $0xc68] sm:$0xff] }
 0x752   : > { %v6330_v46 = vpack.c.bf16 %v6193_v17, %v6192_v14 }
 0x755   : > { %6616 = vmatmul.mubr.bf16.gmra.mrb[216].mxu0 %v6329_v39  ;;  %6729 = vmatmul.mubr.bf16.gmra.mrb[216].mxu1 %v6329_v39 }
 0x756   : > { %6625 = vmatprep.mubr.bf16.mxu0 %v11988_v2  ;;  %6738 = vmatprep.mubr.bf16.mxu1 %v11988_v2 }
 0x75b   : > { %v6557_v11 = vpop.f32.mrb[192].mxu0  ;;  %v6670_v29 = vpop.f32.mrb[192].mxu1 }
 0x75c   : > { %v6749_v13 = vadd.f32 %v9170_v61, %v6557_v11  ;;  %v6559_v40 = vpop.f32.mrb[193].mxu0  ;;  %v14078_v48 = vpop.f32.mrb[193].mxu1  ;;  %v6751_v34 = vadd.f32 %v9172_v30, %v6670_v29  ;;  %v9186_v11 = vld [vmem:[%s12226_s15 + $0xc80] sm:$0xff] }
 0x75d   : > { %6626 = vmatmul.mubr.bf16.gmra.mrb[220].mxu0 %v6330_v46  ;;  %6739 = vmatmul.mubr.bf16.gmra.mrb[220].mxu1 %v6330_v46  ;;  %v6750_v33 = vadd.f32 %v9171_v44, %v6559_v40  ;;  %v6561_v31 = vpop.f32.mrb[194].mxu0  ;;  %v6674_v12 = vpop.f32.mrb[194].mxu1 }
 0x75e   : > { %7558 = vmatprep.mubr.bf16.mxu0 %v11988_v2  ;;  %7671 = vmatprep.mubr.bf16.mxu1 %v11988_v2  ;;  %v9266_v56 = vmul.f32 -1.442695, %v6749_v13  ;;  %v6753_v28 = vadd.f32 %v9174_v10, %v6561_v31  ;;  %v6563_v60 = vpop.f32.mrb[195].mxu0  ;;  %v14081_v24 = vpop.f32.mrb[195].mxu1  ;;  %v6755_v43 = vadd.f32 %v9176_v58, %v6674_v12  ;;  %v9187_v12 = vld [vmem:[%s12226_s15 + $0xc88] sm:$0xff] }
 0x75f   : > { %v9282_v22 = vmul.f32 -1.442695, %v6750_v33  ;;  %v6754_v57 = vadd.f32 %v9175_v20, %v6563_v60  ;;  %v9180_v33 = vld [vmem:[%s12226_s15 + $0xc50] sm:$0xff] }
 0x760   : > { %11396 = vpow2.f32 %v9266_v56  ;;  %v9267_v49 = vmul.f32 -1.442695, %v6753_v28 }
 0x761   : > { %11398 = vpow2.f32 %v9282_v22  ;;  %v9283_v62 = vmul.f32 -1.442695, %v6754_v57 }
 0x762   : > { %11400 = vpow2.f32 %v9267_v49 }
 0x763   : > { %11402 = vpow2.f32 %v9283_v62 }
 0x764   : > { %11404 = vtanh.f32 %v6751_v34 }
 0x765   : > { %v6567_v50 = vpop.f32.mrb[196].mxu0  ;;  %v6680_v9 = vpop.f32.mrb[196].mxu1 }
 0x766   : > { %v6757_v5 = vadd.f32 %v9178_v18, %v6567_v50  ;;  %v6569_v55 = vpop.f32.mrb[197].mxu0  ;;  %v14087_v45 = vpop.f32.mrb[197].mxu1  ;;  %v6759_v62 = vadd.f32 %v9180_v33, %v6680_v9 }
 0x767   : > { %v6758_v36 = vadd.f32 %v9179_v21, %v6569_v55  ;;  %v6571_v25 = vpop.f32.mrb[198].mxu0  ;;  %v14089_v19 = vpop.f32.mrb[198].mxu1  ;;  %v9190_v21 = vld [vmem:[%s12226_s15 + $0xca0] sm:$0xff] }
 0x768   : > { %v9268_v4 = vmul.f32 -1.442695, %v6757_v5  ;;  %v6573_v38 = vpop.f32.mrb[199].mxu0  ;;  %v14092_v0 = vpop.f32.mrb[199].mxu1  ;;  %v6761_v17 = vadd.f32 %v9182_v51, %v6571_v25 }
 0x769   : > { %v9284_v14 = vmul.f32 -1.442695, %v6758_v36  ;;  %v6762_v44 = vadd.f32 %v9183_v3, %v6573_v38 }
 0x76a   : > { %v11397_v42 = vpop.eup %11396  ;;  %11406 = vpow2.f32 %v9268_v4  ;;  %v9269_v31 = vmul.f32 -1.442695, %v6761_v17  ;;  %v9191_v17 = vld [vmem:[%s12226_s15 + $0xca8] sm:$0xff] }
 0x76b   : > { %v11399_v37 = vpop.eup %11398  ;;  %v6861_v39 = vadd.f32 1.0, %v11397_v42  ;;  %v9285_v49 = vmul.f32 -1.442695, %v6762_v44  ;;  %v9188_v44 = vld [vmem:[%s12226_s15 + $0xc90] sm:$0xff] }
 0x76c   : > { %v6957_v6 = vadd.f32 1.0, %v11399_v37  ;;  %v11401_v41 = vpop.eup %11400 }
 0x76d   : > { %11408 = vrcp.f32 %v6861_v39  ;;  %v6862_v46 = vadd.f32 1.0, %v11401_v41  ;;  %v11403_v61 = vpop.eup %11402  ;;  %v6577_v29 = vpop.f32.mrb[200].mxu0 }
 0x76e   : > { %11410 = vrcp.f32 %v6957_v6  ;;  %v6690_v10 = vpop.f32.mrb[200].mxu1  ;;  %v6958_v13 = vadd.f32 1.0, %v11403_v61  ;;  %v6579_v40 = vpop.f32.mrb[201].mxu0  ;;  %v6765_v60 = vadd.f32 %v9186_v11, %v6577_v29  ;;  %v9173_v11 = vld [vmem:[%s12226_s15 + $0xc18] sm:$0xff] }
 0x76f   : > { %11412 = vtanh.f32 %v6755_v43  ;;  %v14096_v20 = vpop.f32.mrb[201].mxu1  ;;  %v6581_v56 = vpop.f32.mrb[202].mxu0  ;;  %v6766_v30 = vadd.f32 %v9187_v12, %v6579_v40  ;;  %v9184_v43 = vld [vmem:[%s12226_s15 + $0xc70] sm:$0xff]  ;;  %v6767_v12 = vadd.f32 %v9188_v44, %v6690_v10  ;;  %v9836_v10 = vld [vmem:[%s14586_s1 + $0x68] ss:$16 sps:$4 sm:$0xff]  }
 0x770   : > { %11414 = vrcp.f32 %v6862_v46  ;;  %v14100_v28 = vpop.f32.mrb[202].mxu1  ;;  %v6583_v22 = vpop.f32.mrb[203].mxu0  ;;  %v9270_v50 = vmul.f32 -1.442695, %v6765_v60  ;;  %v6769_v42 = vadd.f32 %v9190_v21, %v6581_v56  ;;  %v6752_v56 = vadd.f32 %v9173_v11, %v14078_v48  ;;  %v9177_v60 = vld [vmem:[%s12226_s15 + $0xc38] sm:$0xff] }
 0x771   : > { %11416 = vpow2.f32 %v9284_v14  ;;  %v14102_v57 = vpop.f32.mrb[203].mxu1  ;;  %v11405_v18 = vpop.eup %11404  ;;  %v9286_v25 = vmul.f32 -1.442695, %v6766_v30  ;;  %v6756_v48 = vadd.f32 %v9177_v60, %v14081_v24 }
 0x772   : > { %11418 = vrcp.f32 %v6958_v13  ;;  %v9271_v41 = vmul.f32 -1.442695, %v6769_v42  ;;  %v6770_v13 = vadd.f32 %v9191_v17, %v6583_v22  ;;  %v9838_v22 = vld [vmem:[%s14586_s1 + $0x6c] ss:$16 sps:$4 sm:$0xff]  }
 0x773   : > { %11420 = vpow2.f32 %v9269_v31  ;;  %7645 = vmatprep.subr.bf16.mxu1 %v9838_v22 }
 0x774   : > { %v11407_v34 = vpop.eup %11406  ;;  %11422 = vpow2.f32 %v9285_v49  ;;  %7646 = vmatpush1.bf16.msra.mxu1 %v9836_v10 }
 0x775   : > { %v6863_v5 = vadd.f32 1.0, %v11407_v34  ;;  %11424 = vtanh.f32 %v6759_v62  ;;  %v9287_v62 = vmul.f32 -1.442695, %v6770_v13  ;;  %v9298_v34 = vmul.f32 -1.442695, %v6752_v56 }
 0x777   : > { %v11409_v58 = vpop.eup %11408  ;;  %11426 = vrcp.f32 %v6863_v5 }
 0x778   : > { %v11411_v55 = vpop.eup %11410  ;;  %v7133_v36 = vmul.f32 %v11409_v58, %v11405_v18  ;;  %11428 = vpow2.f32 %v9270_v50  ;;  %v9192_v18 = vld [vmem:[%s12226_s15 + $0xcb0] sm:$0xff] }
 0x779   : > { %v11413_v4 = vpop.eup %11412  ;;  %v7117_v51 = vmul.f32 %v11411_v55, %v13765_v16  ;;  %11430 = vpow2.f32 %v9286_v25  ;;  %v6763_v16 = vadd.f32 %v9184_v43, %v14089_v19  ;;  %v6771_v5 = vadd.f32 %v9192_v18, %v14100_v28 }
 0x77a   : > { %v11415_v9 = vpop.eup %11414  ;;  %v9299_v25 = vmul.f32 -1.442695, %v6756_v48 }
 0x77b   : > { %v11417_v38 = vpop.eup %11416  ;;  %v14106_v37 = vadd.f32 %v7133_v36, %v7117_v51  ;;  %v7134_v39 = vmul.f32 %v11415_v9, %v11413_v4  ;;  %v9844_v51 = vld [vmem:[%s14586_s1 + $0x8c] ss:$16 sps:$4 sm:$0xff]  }
 0x77c   : > { %v11419_v6 = vpop.eup %11418  ;;  %v6959_v3 = vadd.f32 1.0, %v11417_v38  ;;  %v9181_v38 = vld [vmem:[%s12226_s15 + $0xc58] sm:$0xff]  ;;  %7647 = vmatprep.subr.bf16.mxu1 %v9844_v51 }
 0x77d   : > { %v7118_v14 = vmul.f32 %v11419_v6, %v13771_v54  ;;  %v11421_v46 = vpop.eup %11420  ;;  %v6760_v17 = vadd.f32 %v9181_v38, %v14087_v45  ;;  %v9847_v45 = vld [vmem:[%s14586_s1 + $0xc4] ss:$16 sps:$4 sm:$0xff]  }
 0x77e   : > { %11432 = vrcp.f32 %v6959_v3  ;;  %v6864_v29 = vadd.f32 1.0, %v11421_v46  ;;  %v11423_v40 = vpop.eup %11422  ;;  %v9185_v3 = vld [vmem:[%s12226_s15 + $0xc78] sm:$0xff]  ;;  %v9839_v46 = vld [vmem:[%s14586_s1 + $0xa0] ss:$16 sps:$4 sm:$0xff]  }
 0x77f   : > { %v14112_v61 = vadd.f32 %v7134_v39, %v7118_v14  ;;  %11434 = vpow2.f32 %v9271_v41  ;;  %v11425_v33 = vpop.eup %11424  ;;  %v6960_v31 = vadd.f32 1.0, %v11423_v40  ;;  %v9841_v41 = vld [vmem:[%s14586_s1 + $0xa4] ss:$16 sps:$4 sm:$0xff]  }
 0x780   : > { %11436 = vtanh.f32 %v6763_v16  ;;  %7536 = vmatprep.subr.bf16.mxu0 %v9841_v41 }
 0x781   : > { %v11427_v54 = vpop.eup %11426  ;;  %11438 = vrcp.f32 %v6864_v29  ;;  %v6764_v29 = vadd.f32 %v9185_v3, %v14092_v0  ;;  %7537 = vmatpush1.bf16.msra.mxu0 %v9839_v46  ;;  %v9850_v0 = vld [vmem:[%s14586_s1 + $0xac] ss:$16 sps:$4 sm:$0xff]  }
 0x782   : > { %v11429_v19 = vpop.eup %11428  ;;  %v7135_v49 = vmul.f32 %v11427_v54, %v11425_v33  ;;  %11440 = vrcp.f32 %v6960_v31  ;;  %v9300_v31 = vmul.f32 -1.442695, %v6760_v17  ;;  %7538 = vmatprep.subr.bf16.mxu0 %v9847_v45 }
 0x783   : > { %v6865_v30 = vadd.f32 1.0, %v11429_v19  ;;  %v11431_v21 = vpop.eup %11430  ;;  %11442 = vtanh.f32 %v6767_v12  ;;  %v9845_v12 = vld [vmem:[%s14586_s1 + $0xc0] ss:$16 sps:$4 sm:$0xff]   ;;  %v9848_v19 = vld [vmem:[%s14586_s1 + $0xa8] ss:$16 sps:$4 sm:$0xff]  }
 0x784   : > { %v6961_v50 = vadd.f32 1.0, %v11431_v21 }
 0x785   : > { %11444 = vrcp.f32 %v6865_v30  ;;  %7539 = vmatpush1.bf16.msra.mxu0 %v9845_v12  ;;  %v9193_v30 = vld [vmem:[%s12226_s15 + $0xcb8] sm:$0xff] }
 0x786   : > { %11446 = vpow2.f32 %v9287_v62  ;;  %v6772_v10 = vadd.f32 %v9193_v30, %v14102_v57  ;;  %v9197_v30 = vld [vmem:[%s12226_s15 + $0xcd8] sm:$0xff] }
 0x787   : > { %11448 = vrcp.f32 %v6961_v50 }
 0x788   : > { %v11433_v58 = vpop.eup %11432  ;;  %11450 = vpow2.f32 %v9298_v34 }
 0x789   : > { %v7119_v55 = vmul.f32 %v11433_v58, %v13800_v32  ;;  %v11435_v36 = vpop.eup %11434  ;;  %11452 = vtanh.f32 %v6771_v5  ;;  %v9842_v32 = vld [vmem:[%s14586_s1 + $0x88] ss:$16 sps:$4 sm:$0xff]   ;;  %v9303_v58 = vmul.f32 -1.442695, %v6772_v10  ;;  %v9856_v5 = vld [vmem:[%s14586_s1 + $0xcc] ss:$16 sps:$4 sm:$0xff]  }
 0x78a   : > { %v6866_v4 = vadd.f32 1.0, %v11435_v36  ;;  %v11437_v24 = vpop.eup %11436  ;;  %7648 = vmatpush1.bf16.msra.mxu1 %v9842_v32 }
 0x78b   : > { %v14128_v42 = vadd.f32 %v7135_v49, %v7119_v55  ;;  %v11439_v28 = vpop.eup %11438  ;;  %v9301_v49 = vmul.f32 -1.442695, %v6764_v29  ;;  %7649 = vmatprep.subr.bf16.mxu1 %v9850_v0 }
 0x78c   : > { %11454 = vrcp.f32 %v6866_v4  ;;  %v11441_v9 = vpop.eup %11440  ;;  %v7136_v39 = vmul.f32 %v11439_v28, %v11437_v24  ;;  %v9859_v4 = vld [vmem:[%s14586_s1 + $0xec] ss:$16 sps:$4 sm:$0xff]   ;;  %v9857_v24 = vld [vmem:[%s14586_s1 + $0xe8] ss:$16 sps:$4 sm:$0xff]  }
 0x78d   : > { %11456 = vpow2.f32 %v9299_v25  ;;  %v7120_v43 = vmul.f32 %v11441_v9, %v13812_v27  ;;  %v11443_v6 = vpop.eup %11442  ;;  %v9853_v25 = vld [vmem:[%s14586_s1 + $0xe4] ss:$16 sps:$4 sm:$0xff]  }
 0x78e   : > { %7650 = vmatpush1.bf16.msra.mxu1 %v9848_v19  ;;  %7540 = vmatprep.subr.bf16.mxu0 %v9853_v25 }
 0x78f   : > { %v11445_v14 = vpop.eup %11444  ;;  %v14143_v16 = vadd.f32 %v7136_v39, %v7120_v43  ;;  %7651 = vmatprep.subr.bf16.mxu1 %v9856_v5 }
 0x790   : > { %v11447_v44 = vpop.eup %11446  ;;  %v7137_v11 = vmul.f32 %v11445_v14, %v11443_v6 }
 0x791   : > { %v11449_v27 = vpop.eup %11448  ;;  %v6962_v13 = vadd.f32 1.0, %v11447_v44 }
 0x792   : > { %v7121_v40 = vmul.f32 %v11449_v27, %v13841_v1  ;;  %v11451_v33 = vpop.eup %11450  ;;  %v9189_v1 = vld [vmem:[%s12226_s15 + $0xc98] sm:$0xff] }
 0x793   : > { %11458 = vrcp.f32 %v6962_v13  ;;  %v11453_v54 = vpop.eup %11452  ;;  %v7069_v22 = vadd.f32 1.0, %v11451_v33  ;;  %v6768_v21 = vadd.f32 %v9189_v1, %v14096_v20  ;;  %v9854_v20 = vld [vmem:[%s14586_s1 + $0xc8] ss:$16 sps:$4 sm:$0xff]  }
 0x794   : > { %v14159_v56 = vadd.f32 %v7137_v11, %v7121_v40  ;;  %11460 = vpow2.f32 %v9300_v31  ;;  %7652 = vmatpush1.bf16.msra.mxu1 %v9854_v20 }
 0x795   : > { %11462 = vpow2.f32 %v9301_v49  ;;  %v9302_v48 = vmul.f32 -1.442695, %v6768_v21  ;;  %7653 = vmatprep.subr.bf16.mxu1 %v9859_v4  ;;  %v9194_v49 = vld [vmem:[%s12226_s15 + $0xcc0] sm:$0xff] }
 0x796   : > { %v11455_v60 = vpop.eup %11454  ;;  %11464 = vrcp.f32 %v7069_v22  ;;  %v9198_v21 = vld [vmem:[%s12226_s15 + $0xce0] sm:$0xff] }
 0x797   : > { %v7138_v62 = vmul.f32 %v11455_v60, %v11453_v54  ;;  %v11457_v18 = vpop.eup %11456  ;;  %11466 = vtanh.f32 %v14106_v37 }
 0x798   : > { %v7070_v34 = vadd.f32 1.0, %v11457_v18  ;;  %11468 = vtanh.f32 %v14112_v61  ;;  %7654 = vmatpush1.bf16.msra.mxu1 %v9857_v24 }
 0x79a   : > { %11470 = vrcp.f32 %v7070_v34 }
 0x79b   : > { %11472 = vpow2.f32 %v9302_v48 }
 0x79c   : > { %11474 = vpow2.f32 %v9303_v58  ;;  %v9201_v58 = vld [vmem:[%s12226_s15 + $0xcf8] sm:$0xff] }
 0x79d   : > { %v11459_v50 = vpop.eup %11458 }
 0x79e   : > { %v7122_v55 = vmul.f32 %v11459_v50, %v13856_v35  ;;  %v11461_v36 = vpop.eup %11460  ;;  %v9851_v35 = vld [vmem:[%s14586_s1 + $0xe0] ss:$16 sps:$4 sm:$0xff]   ;;  %v9199_v50 = vld [vmem:[%s12226_s15 + $0xce8] sm:$0xff] }
 0x79f   : > { %v11463_v51 = vpop.eup %11462  ;;  %v7071_v28 = vadd.f32 1.0, %v11461_v36  ;;  %7541 = vmatpush1.bf16.msra.mxu0 %v9851_v35 }
 0x7a0   : > { %v14177_v57 = vadd.f32 %v7138_v62, %v7122_v55  ;;  %v11465_v32 = vpop.eup %11464  ;;  %v7072_v38 = vadd.f32 1.0, %v11463_v51  ;;  %v9195_v62 = vld [vmem:[%s12226_s15 + $0xcc8] sm:$0xff]  ;;  %v9196_v51 = vld [vmem:[%s12226_s15 + $0xcd0] sm:$0xff] }
 0x7a1   : > { %v11467_v9 = vpop.eup %11466  ;;  %11476 = vrcp.f32 %v7071_v28 }
 0x7a2   : > { %v11469_v39 = vpop.eup %11468  ;;  %11478 = vtanh.f32 %v14128_v42  ;;  %v7181_v3 = vmul.f32 %v11467_v9, %v11465_v32 }
 0x7a3   : > { %11480 = vrcp.f32 %v7072_v38 }
 0x7a4   : > { %v11471_v43 = vpop.eup %11470  ;;  %11482 = vtanh.f32 %v14143_v16 }
 0x7a5   : > { %v11473_v6 = vpop.eup %11472  ;;  %v7182_v41 = vmul.f32 %v11471_v43, %v11469_v39 }
 0x7a6   : > { %v11475_v14 = vpop.eup %11474  ;;  %v7073_v17 = vadd.f32 1.0, %v11473_v6  ;;  %v9202_v6 = vld [vmem:[%s12226_s15 + $0xd00] sm:$0xff] }
 0x7a7   : > { %v7326_v46 = vpack.c.bf16 %v7182_v41, %v7181_v3  ;;  %v7074_v44 = vadd.f32 1.0, %v11475_v14  ;;  %v9203_v41 = vld [vmem:[%s12226_s15 + $0xd08] sm:$0xff]  ;;  %v9205_v14 = vld [vmem:[%s12226_s15 + $0xd18] sm:$0xff] }
 0x7a8   : > { %11484 = vrcp.f32 %v7073_v17  ;;  %v9200_v17 = vld [vmem:[%s12226_s15 + $0xcf0] sm:$0xff] }
 0x7a9   : > { %7559 = vmatmul.mubr.bf16.vlgmr.msra.gmra.mrb[224].mxu0 %v7326_v46  ;;  %7672 = vmatmul.mubr.bf16.vlgmr.msra.gmra.mrb[224].mxu1 %v7326_v46  ;;  %11486 = vtanh.f32 %v14159_v56 }
 0x7aa   : > { %7568 = vmatprep.mubr.bf16.mxu0 %v11988_v2  ;;  %7681 = vmatprep.mubr.bf16.mxu1 %v11988_v2  ;;  %11488 = vrcp.f32 %v7074_v44 }
 0x7ab   : > { %v11477_v11 = vpop.eup %11476  ;;  %11490 = vtanh.f32 %v14177_v57 }
 0x7ac   : > { %v11479_v27 = vpop.eup %11478 }
 0x7ad   : > { %v11481_v29 = vpop.eup %11480  ;;  %v7183_v40 = vmul.f32 %v11479_v27, %v11477_v11  ;;  %v9206_v27 = vld [vmem:[%s12226_s15 + $0xd20] sm:$0xff] }
 0x7ae   : > { %v11483_v13 = vpop.eup %11482 }
 0x7af   : > { %v7184_v45 = vmul.f32 %v11483_v13, %v11481_v29 }
 0x7b1   : > { %v7327_v33 = vpack.c.bf16 %v7184_v45, %v7183_v40 }
 0x7b2   : > { %v11485_v31 = vpop.eup %11484 }
 0x7b3   : > { %7569 = vmatmul.mubr.bf16.gmra.mrb[228].mxu0 %v7327_v33  ;;  %7682 = vmatmul.mubr.bf16.gmra.mrb[228].mxu1 %v7327_v33  ;;  %v11487_v12 = vpop.eup %11486 }
 0x7b4   : > { %7578 = vmatprep.mubr.bf16.mxu0 %v11988_v2  ;;  %7691 = vmatprep.mubr.bf16.mxu1 %v11988_v2  ;;  %v11489_v0 = vpop.eup %11488  ;;  %v7185_v1 = vmul.f32 %v11487_v12, %v11485_v31 }
 0x7b5   : > { %v11491_v54 = vpop.eup %11490 }
 0x7b6   : > { %v7186_v19 = vmul.f32 %v11491_v54, %v11489_v0 }
 0x7b8   : > { %v7328_v60 = vpack.c.bf16 %v7186_v19, %v7185_v1  ;;  %v9207_v19 = vld [vmem:[%s12226_s15 + $0xd28] sm:$0xff] }
 0x7bb   : > { %7579 = vmatmul.mubr.bf16.gmra.mrb[232].mxu0 %v7328_v60  ;;  %7692 = vmatmul.mubr.bf16.gmra.mrb[232].mxu1 %v7328_v60 }
 0x7bc   : > { %7588 = vmatprep.mubr.bf16.mxu0 %v11988_v2  ;;  %7701 = vmatprep.mubr.bf16.mxu1 %v11988_v2 }
 0x810   : > { %v6587_v18 = vpop.f32.mrb[204].mxu0  ;;  %v6700_v22 = vpop.f32.mrb[204].mxu1 }
 0x811   : > { %v6773_v10 = vadd.f32 %v9194_v49, %v6587_v18  ;;  %v6589_v34 = vpop.f32.mrb[205].mxu0  ;;  %v6702_v48 = vpop.f32.mrb[205].mxu1  ;;  %v6775_v3 = vadd.f32 %v9196_v51, %v6700_v22 }
 0x812   : > { %v6774_v5 = vadd.f32 %v9195_v62, %v6589_v34  ;;  %v6776_v55 = vadd.f32 %v9197_v30, %v6702_v48  ;;  %v6591_v20 = vpop.f32.mrb[206].mxu0  ;;  %v6704_v36 = vpop.f32.mrb[206].mxu1  ;;  %v9204_v30 = vld [vmem:[%s12226_s15 + $0xd10] sm:$0xff] }
 0x813   : > { %v9272_v25 = vmul.f32 -1.442695, %v6773_v10  ;;  %v6777_v4 = vadd.f32 %v9198_v21, %v6591_v20  ;;  %v6593_v35 = vpop.f32.mrb[207].mxu0  ;;  %v6706_v24 = vpop.f32.mrb[207].mxu1  ;;  %v6779_v0 = vadd.f32 %v9200_v17, %v6704_v36  ;;  %v9208_v36 = vld [vmem:[%s12226_s15 + $0xd30] sm:$0xff] }
 0x814   : > { %v9288_v28 = vmul.f32 -1.442695, %v6774_v5  ;;  %v9304_v32 = vmul.f32 -1.442695, %v6776_v55  ;;  %v6778_v9 = vadd.f32 %v9199_v50, %v6593_v35  ;;  %v6780_v38 = vadd.f32 %v9201_v58, %v6706_v24 }
 0x815   : > { %11492 = vpow2.f32 %v9272_v25  ;;  %v9273_v39 = vmul.f32 -1.442695, %v6777_v4  ;;  %v9209_v25 = vld [vmem:[%s12226_s15 + $0xd38] sm:$0xff] }
 0x816   : > { %11494 = vpow2.f32 %v9288_v28  ;;  %v9289_v43 = vmul.f32 -1.442695, %v6778_v9  ;;  %v9305_v46 = vmul.f32 -1.442695, %v6780_v38  ;;  %v9210_v38 = vld [vmem:[%s12226_s15 + $0xd40] sm:$0xff] }
 0x817   : > { %11496 = vpow2.f32 %v9304_v32 }
 0x818   : > { %11498 = vpow2.f32 %v9273_v39  ;;  %v6597_v44 = vpop.f32.mrb[208].mxu0  ;;  %v6710_v11 = vpop.f32.mrb[208].mxu1 }
 0x819   : > { %v6781_v29 = vadd.f32 %v9202_v6, %v6597_v44  ;;  %v6599_v13 = vpop.f32.mrb[209].mxu0  ;;  %v6712_v40 = vpop.f32.mrb[209].mxu1  ;;  %11500 = vpow2.f32 %v9289_v43  ;;  %v6783_v50 = vadd.f32 %v9204_v30, %v6710_v11  ;;  %v9211_v44 = vld [vmem:[%s12226_s15 + $0xd48] sm:$0xff] }
 0x81a   : > { %v6782_v45 = vadd.f32 %v9203_v41, %v6599_v13  ;;  %v6784_v33 = vadd.f32 %v9205_v14, %v6712_v40  ;;  %v6601_v31 = vpop.f32.mrb[210].mxu0  ;;  %v6714_v12 = vpop.f32.mrb[210].mxu1  ;;  %11502 = vtanh.f32 %v6775_v3  ;;  %v9214_v40 = vld [vmem:[%s12226_s15 + $0xd60] sm:$0xff] }
 0x81b   : > { %v9274_v54 = vmul.f32 -1.442695, %v6781_v29  ;;  %v6785_v1 = vadd.f32 %v9206_v27, %v6601_v31  ;;  %v6603_v60 = vpop.f32.mrb[211].mxu0  ;;  %v6716_v49 = vpop.f32.mrb[211].mxu1  ;;  %11504 = vpow2.f32 %v9305_v46  ;;  %v6787_v3 = vadd.f32 %v9208_v36, %v6714_v12  ;;  %v9213_v29 = vld [vmem:[%s12226_s15 + $0xd58] sm:$0xff] }
 0x81c   : > { %v9290_v62 = vmul.f32 -1.442695, %v6782_v45  ;;  %v9306_v18 = vmul.f32 -1.442695, %v6784_v33  ;;  %v6786_v21 = vadd.f32 %v9207_v19, %v6603_v60  ;;  %v6788_v41 = vadd.f32 %v9209_v25, %v6716_v49 }
 0x81d   : > { %11506 = vpow2.f32 %v9274_v54  ;;  %v9275_v22 = vmul.f32 -1.442695, %v6785_v1 }
 0x81e   : > { %11508 = vpow2.f32 %v9290_v62  ;;  %v9291_v51 = vmul.f32 -1.442695, %v6786_v21  ;;  %v9307_v31 = vmul.f32 -1.442695, %v6788_v41  ;;  %v9215_v21 = vld [vmem:[%s12226_s15 + $0xd68] sm:$0xff] }
 0x81f   : > { %v11493_v10 = vpop.eup %11492  ;;  %11510 = vtanh.f32 %v6779_v0 }
 0x820   : > { %v11495_v34 = vpop.eup %11494  ;;  %v6867_v48 = vadd.f32 1.0, %v11493_v10  ;;  %11512 = vpow2.f32 %v9275_v22  ;;  %v6607_v58 = vpop.f32.mrb[212].mxu0 }
 0x821   : > { %v14215_v5 = vpop.f32.mrb[212].mxu1  ;;  %v11497_v55 = vpop.eup %11496  ;;  %v6963_v20 = vadd.f32 1.0, %v11495_v34  ;;  %11514 = vpow2.f32 %v9306_v18  ;;  %v6789_v27 = vadd.f32 %v9210_v38, %v6607_v58 }
 0x822   : > { %v6609_v4 = vpop.f32.mrb[213].mxu0  ;;  %v6722_v35 = vpop.f32.mrb[213].mxu1  ;;  %11516 = vrcp.f32 %v6867_v48  ;;  %v7075_v17 = vadd.f32 1.0, %v11497_v55 }
 0x823   : > { %v11499_v24 = vpop.eup %11498  ;;  %v6611_v28 = vpop.f32.mrb[214].mxu0  ;;  %11518 = vrcp.f32 %v6963_v20  ;;  %v6790_v0 = vadd.f32 %v9211_v44, %v6609_v4  ;;  %v6792_v60 = vadd.f32 %v9213_v29, %v6722_v35  ;;  %v9276_v18 = vmul.f32 -1.442695, %v6789_v27  ;;  %v9217_v4 = vld [vmem:[%s12226_s15 + $0xd78] sm:$0xff]  ;;  %v9218_v35 = vld [vmem:[%s12226_s15 + $0xd80] sm:$0xff] }
 0x824   : > { %v14219_v32 = vpop.f32.mrb[214].mxu1  ;;  %v6868_v9 = vadd.f32 1.0, %v11499_v24  ;;  %v6613_v39 = vpop.f32.mrb[215].mxu0  ;;  %11520 = vtanh.f32 %v6783_v50  ;;  %v6793_v22 = vadd.f32 %v9214_v40, %v6611_v28 }
 0x825   : > { %v6726_v43 = vpop.f32.mrb[215].mxu1  ;;  %v11501_v6 = vpop.eup %11500  ;;  %v9292_v25 = vmul.f32 -1.442695, %v6790_v0  ;;  %v9308_v28 = vmul.f32 -1.442695, %v6792_v60  ;;  %v9216_v60 = vld [vmem:[%s12226_s15 + $0xd70] sm:$0xff] }
 0x826   : > { %v11503_v14 = vpop.eup %11502  ;;  %11522 = vrcp.f32 %v6868_v9  ;;  %v6964_v46 = vadd.f32 1.0, %v11501_v6  ;;  %v6794_v9 = vadd.f32 %v9215_v21, %v6613_v39 }
 0x827   : > { %v11505_v11 = vpop.eup %11504  ;;  %11524 = vpow2.f32 %v9291_v51 }
 0x828   : > { %v11507_v13 = vpop.eup %11506  ;;  %11526 = vrcp.f32 %v6964_v46  ;;  %v6617_v12 = vpop.f32.mrb[216].mxu0  ;;  %v7076_v50 = vadd.f32 1.0, %v11505_v11  ;;  %v6796_v46 = vadd.f32 %v9217_v4, %v6726_v43  ;;  %v9219_v11 = vld [vmem:[%s12226_s15 + $0xd88] sm:$0xff] }
 0x829   : > { %v11509_v45 = vpop.eup %11508  ;;  %v6869_v33 = vadd.f32 1.0, %v11507_v13  ;;  %11528 = vtanh.f32 %v6787_v3  ;;  %v14225_v54 = vpop.f32.mrb[216].mxu1  ;;  %v9277_v3 = vmul.f32 -1.442695, %v6793_v22  ;;  %v6797_v44 = vadd.f32 %v9218_v35, %v6617_v12 }
 0x82a   : > { %v11511_v1 = vpop.eup %11510  ;;  %11530 = vrcp.f32 %v7075_v17  ;;  %v6965_v19 = vadd.f32 1.0, %v11509_v45  ;;  %v6619_v49 = vpop.f32.mrb[217].mxu0  ;;  %v9212_v17 = vld [vmem:[%s12226_s15 + $0xd50] sm:$0xff] }
 0x82b   : > { %v14227_v62 = vpop.f32.mrb[217].mxu1  ;;  %v11513_v30 = vpop.eup %11512  ;;  %11532 = vrcp.f32 %v6869_v33  ;;  %v9293_v33 = vmul.f32 -1.442695, %v6794_v9 }
 0x82c   : > { %v14230_v10 = vpop.f32.mrb[218].mxu0  ;;  %v14232_v34 = vpop.f32.mrb[218].mxu1  ;;  %11534 = vrcp.f32 %v6965_v19  ;;  %v6870_v58 = vadd.f32 1.0, %v11513_v30  ;;  %v6798_v30 = vadd.f32 %v9219_v11, %v6619_v49  ;;  %v9222_v49 = vld [vmem:[%s12226_s15 + $0xda0] sm:$0xff] }
 0x82d   : > { %v11515_v48 = vpop.eup %11514  ;;  %v14234_v55 = vpop.f32.mrb[219].mxu0  ;;  %11536 = vpow2.f32 %v9307_v31  ;;  %v9221_v31 = vld [vmem:[%s12226_s15 + $0xd98] sm:$0xff] }
 0x82e   : > { %v14236_v20 = vpop.f32.mrb[219].mxu1  ;;  %v11517_v36 = vpop.eup %11516  ;;  %11538 = vrcp.f32 %v6870_v58  ;;  %v9294_v9 = vmul.f32 -1.442695, %v6798_v30 }
 0x82f   : > { %v11519_v24 = vpop.eup %11518  ;;  %v7139_v51 = vmul.f32 %v11517_v36, %v11503_v14  ;;  %11540 = vpow2.f32 %v9276_v18  ;;  %v7077_v14 = vadd.f32 1.0, %v11515_v48  ;;  %v9309_v48 = vmul.f32 -1.442695, %v6796_v46 }
 0x830   : > { %v11521_v38 = vpop.eup %11520  ;;  %v7123_v6 = vmul.f32 %v11519_v24, %v13922_v8  ;;  %11542 = vrcp.f32 %v7076_v50  ;;  %v14245_v39 = vpop.f32.mrb[220].mxu0  ;;  %v6795_v24 = vadd.f32 %v9216_v60, %v14219_v32 }
 0x831   : > { %v11523_v41 = vpop.eup %11522  ;;  %11544 = vpow2.f32 %v9292_v25  ;;  %v14247_v40 = vpop.f32.mrb[220].mxu1  ;;  %v6800_v25 = vadd.f32 %v9221_v31, %v14227_v62 }
 0x832   : > { %v11525_v27 = vpop.eup %11524  ;;  %v14243_v29 = vadd.f32 %v7139_v51, %v7123_v6  ;;  %v7140_v13 = vmul.f32 %v11523_v41, %v11511_v1  ;;  %11546 = vpow2.f32 %v9308_v28  ;;  %v14250_v0 = vpop.f32.mrb[221].mxu0  ;;  %v6791_v1 = vadd.f32 %v9212_v17, %v14215_v5 }
 0x833   : > { %v11527_v8 = vpop.eup %11526  ;;  %v6966_v45 = vadd.f32 1.0, %v11525_v27  ;;  %v14252_v43 = vpop.f32.mrb[221].mxu1  ;;  %11548 = vpow2.f32 %v9277_v3  ;;  %v9278_v5 = vmul.f32 -1.442695, %v6797_v44  ;;  %v6801_v3 = vadd.f32 %v9222_v49, %v14230_v10  ;;  %v9220_v27 = vld [vmem:[%s12226_s15 + $0xd90] sm:$0xff] }
 0x834   : > { %v11529_v12 = vpop.eup %11528  ;;  %v7124_v19 = vmul.f32 %v11527_v8, %v13946_v15  ;;  %v14257_v18 = vpop.f32.mrb[222].mxu0  ;;  %v9310_v46 = vmul.f32 -1.442695, %v6800_v25 }
 0x835   : > { %v14259_v22 = vpop.f32.mrb[222].mxu1  ;;  %v14261_v21 = vpop.eup %11530  ;;  %11550 = vrcp.f32 %v6966_v45  ;;  %v9279_v45 = vmul.f32 -1.442695, %v6801_v3  ;;  %v9230_v3 = vld [vmem:[%s12226_s15 + $0xde0] sm:$0xff] }
 0x836   : > { %v14263_v50 = vpop.f32.mrb[223].mxu0  ;;  %v14265_v58 = vpop.f32.mrb[223].mxu1  ;;  %v14267_v15 = vadd.f32 %v7140_v13, %v7124_v19  ;;  %11552 = vrcp.f32 %v7077_v14  ;;  %v6799_v19 = vadd.f32 %v9220_v27, %v14225_v54  ;;  %v9227_v54 = vld [vmem:[%s12226_s15 + $0xdc8] sm:$0xff]  ;;  %v6809_v27 = vadd.f32 %v9230_v3, %v14257_v18 }
 0x837   : > { %v11533_v36 = vpop.eup %11532  ;;  %11554 = vpow2.f32 %v9293_v33  ;;  %v9226_v33 = vld [vmem:[%s12226_s15 + $0xdc0] sm:$0xff] }
 0x838   : > { %v11535_v4 = vpop.eup %11534  ;;  %v7141_v35 = vmul.f32 %v11533_v36, %v11521_v38  ;;  %11556 = vtanh.f32 %v6791_v1  ;;  %v9223_v38 = vld [vmem:[%s12226_s15 + $0xda8] sm:$0xff]  ;;  %v9225_v36 = vld [vmem:[%s12226_s15 + $0xdb8] sm:$0xff] }
 0x839   : > { %v11537_v51 = vpop.eup %11536  ;;  %v7125_v28 = vmul.f32 %v11535_v4, %v13962_v59  ;;  %11558 = vpow2.f32 %v9309_v48  ;;  %v6802_v14 = vadd.f32 %v9223_v38, %v14234_v55  ;;  %v9224_v48 = vld [vmem:[%s12226_s15 + $0xdb0] sm:$0xff] }
 0x83a   : > { %v11539_v6 = vpop.eup %11538  ;;  %11560 = vpow2.f32 %v9278_v5  ;;  %v7078_v11 = vadd.f32 1.0, %v11537_v51  ;;  %v6805_v5 = vadd.f32 %v9226_v33, %v14245_v39  ;;  %v6806_v39 = vadd.f32 %v9227_v54, %v14250_v0  ;;  %v9228_v33 = vld [vmem:[%s12226_s15 + $0xdd0] sm:$0xff] }
 0x83b   : > { %v11541_v41 = vpop.eup %11540  ;;  %v14274_v17 = vadd.f32 %v7141_v35, %v7125_v28  ;;  %v7142_v62 = vmul.f32 %v11539_v6, %v11529_v12  ;;  %11562 = vtanh.f32 %v6795_v24  ;;  %v9295_v55 = vmul.f32 -1.442695, %v6802_v14 }
 0x83c   : > { %v14277_v32 = vpop.eup %11542  ;;  %v6871_v44 = vadd.f32 1.0, %v11541_v41  ;;  %11564 = vpow2.f32 %v9294_v9  ;;  %v6804_v28 = vadd.f32 %v9225_v36, %v14236_v20  ;;  %v9296_v0 = vmul.f32 -1.442695, %v6806_v39 }
 0x83d   : > { %v11545_v59 = vpop.eup %11544 }
 0x83e   : > { %v11547_v13 = vpop.eup %11546  ;;  %11566 = vrcp.f32 %v6871_v44  ;;  %v6967_v10 = vadd.f32 1.0, %v11545_v59  ;;  %v9311_v20 = vmul.f32 -1.442695, %v6804_v28 }
 0x83f   : > { %v11549_v8 = vpop.eup %11548  ;;  %11568 = vpow2.f32 %v9310_v46  ;;  %v7079_v4 = vadd.f32 1.0, %v11547_v13  ;;  %v9231_v13 = vld [vmem:[%s12226_s15 + $0xde8] sm:$0xff] }
 0x840   : > { %v11551_v31 = vpop.eup %11550  ;;  %11570 = vrcp.f32 %v6967_v10  ;;  %v6872_v12 = vadd.f32 1.0, %v11549_v8 }
 0x841   : > { %v14283_v1 = vpop.eup %11552  ;;  %v7126_v60 = vmul.f32 %v11551_v31, %v13980_v53  ;;  %11572 = vrcp.f32 %v7078_v11  ;;  %v6803_v53 = vadd.f32 %v9224_v48, %v14232_v34  ;;  %v9229_v11 = vld [vmem:[%s12226_s15 + $0xdd8] sm:$0xff]  ;;  %v9281_v48 = vmul.f32 -1.442695, %v6809_v27 }
 0x842   : > { %v11555_v30 = vpop.eup %11554  ;;  %11574 = vrcp.f32 %v6872_v12  ;;  %v6808_v12 = vadd.f32 %v9229_v11, %v14252_v43 }
 0x843   : > { %v11557_v25 = vpop.eup %11556  ;;  %v14289_v49 = vadd.f32 %v7142_v62, %v7126_v60  ;;  %v6968_v35 = vadd.f32 1.0, %v11555_v30  ;;  %11576 = vpow2.f32 %v9279_v45  ;;  %v9280_v62 = vmul.f32 -1.442695, %v6805_v5 }
 0x844   : > { %v11559_v24 = vpop.eup %11558  ;;  %11578 = vtanh.f32 %v6799_v19  ;;  %v6810_v19 = vadd.f32 %v9231_v13, %v14263_v50 }
 0x845   : > { %v11561_v51 = vpop.eup %11560  ;;  %11580 = vrcp.f32 %v6968_v35  ;;  %v7080_v38 = vadd.f32 1.0, %v11559_v24  ;;  %v9312_v24 = vmul.f32 -1.442695, %v6808_v12 }
 0x846   : > { %v11563_v9 = vpop.eup %11562  ;;  %v6873_v6 = vadd.f32 1.0, %v11561_v51  ;;  %11582 = vpow2.f32 %v9295_v55  ;;  %v9297_v50 = vmul.f32 -1.442695, %v6810_v19  ;;  %v9233_v51 = vld [vmem:[%s12226_s15 + $0xdf8] sm:$0xff] }
 0x847   : > { %v11565_v41 = vpop.eup %11564  ;;  %11584 = vrcp.f32 %v7079_v4 }
 0x848   : > { %v11567_v46 = vpop.eup %11566  ;;  %11586 = vrcp.f32 %v6873_v6  ;;  %v6969_v44 = vadd.f32 1.0, %v11565_v41 }
 0x849   : > { %v11569_v59 = vpop.eup %11568  ;;  %v7143_v34 = vmul.f32 %v11567_v46, %v11557_v25  ;;  %11588 = vtanh.f32 %v6803_v53  ;;  %v9232_v25 = vld [vmem:[%s12226_s15 + $0xdf0] sm:$0xff] }
 0x84a   : > { %v11571_v10 = vpop.eup %11570  ;;  %11590 = vrcp.f32 %v6969_v44  ;;  %v7081_v45 = vadd.f32 1.0, %v11569_v59 }
 0x84b   : > { %v14299_v14 = vpop.eup %11572  ;;  %v7127_v8 = vmul.f32 %v11571_v10, %v14008_v63  ;;  %11592 = vpow2.f32 %v9280_v62  ;;  %v6807_v63 = vadd.f32 %v9228_v33, %v14247_v40  ;;  %v6811_v40 = vadd.f32 %v9232_v25, %v14259_v22 }
 0x84c   : > { %v11575_v31 = vpop.eup %11574  ;;  %11594 = vrcp.f32 %v7080_v38 }
 0x84d   : > { %v11577_v60 = vpop.eup %11576  ;;  %v14305_v18 = vadd.f32 %v7143_v34, %v7127_v8  ;;  %v7144_v30 = vmul.f32 %v11575_v31, %v11563_v9  ;;  %11596 = vpow2.f32 %v9311_v20 }
 0x84e   : > { %v11579_v55 = vpop.eup %11578  ;;  %v6874_v36 = vadd.f32 1.0, %v11577_v60  ;;  %11598 = vpow2.f32 %v9296_v0 }
 0x84f   : > { %v11581_v5 = vpop.eup %11580  ;;  %11600 = vrcp.f32 %v7081_v45 }
 0x850   : > { %v11583_v4 = vpop.eup %11582  ;;  %v7128_v43 = vmul.f32 %v11581_v5, %v14016_v23  ;;  %11602 = vrcp.f32 %v6874_v36  ;;  %v6812_v23 = vadd.f32 %v9233_v51, %v14265_v58 }
 0x851   : > { %v14310_v35 = vpop.eup %11584  ;;  %v6970_v54 = vadd.f32 1.0, %v11583_v4  ;;  %11604 = vpow2.f32 %v9281_v48 }
 0x852   : > { %v11587_v53 = vpop.eup %11586  ;;  %v14313_v28 = vadd.f32 %v7144_v30, %v7128_v43  ;;  %11606 = vtanh.f32 %v6807_v63  ;;  %v9313_v59 = vmul.f32 -1.442695, %v6812_v23 }
 0x853   : > { %v11589_v9 = vpop.eup %11588  ;;  %v7145_v6 = vmul.f32 %v11587_v53, %v11579_v55  ;;  %11608 = vrcp.f32 %v6970_v54 }
 0x854   : > { %v11591_v39 = vpop.eup %11590  ;;  %11610 = vpow2.f32 %v9297_v50 }
 0x855   : > { %v11593_v3 = vpop.eup %11592  ;;  %v7129_v41 = vmul.f32 %v11591_v39, %v14035_v52  ;;  %11612 = vpow2.f32 %v9312_v24 }
 0x856   : > { %v14318_v62 = vpop.eup %11594  ;;  %v6875_v46 = vadd.f32 1.0, %v11593_v3  ;;  %11614 = vtanh.f32 %v6811_v40 }
 0x857   : > { %v11597_v38 = vpop.eup %11596  ;;  %v14320_v44 = vadd.f32 %v7145_v6, %v7129_v41  ;;  %11616 = vtanh.f32 %v14243_v29 }
 0x858   : > { %v11599_v22 = vpop.eup %11598  ;;  %11618 = vrcp.f32 %v6875_v46  ;;  %v7082_v45 = vadd.f32 1.0, %v11597_v38 }
 0x859   : > { %v14323_v34 = vpop.eup %11600  ;;  %v6971_v20 = vadd.f32 1.0, %v11599_v22  ;;  %11620 = vtanh.f32 %v14267_v15 }
 0x85a   : > { %v11603_v58 = vpop.eup %11602  ;;  %11622 = vtanh.f32 %v14274_v17 }
 0x85b   : > { %v11605_v52 = vpop.eup %11604  ;;  %v7146_v11 = vmul.f32 %v11603_v58, %v11589_v9  ;;  %11624 = vrcp.f32 %v6971_v20 }
 0x85c   : > { %v11607_v27 = vpop.eup %11606  ;;  %v6876_v13 = vadd.f32 1.0, %v11605_v52  ;;  %11626 = vpow2.f32 %v9313_v59 }
 0x85d   : > { %v11609_v10 = vpop.eup %11608  ;;  %11628 = vtanh.f32 %v14289_v49 }
 0x85e   : > { %v11611_v0 = vpop.eup %11610  ;;  %v7130_v8 = vmul.f32 %v11609_v10, %v14045_v7  ;;  %11630 = vrcp.f32 %v6876_v13  ;;  %v9314_v13 = vld [vmem:[%s12226_s15 + $0xe00] sm:$0xff]  ;;  %v9315_v10 = vld [vmem:[%s12226_s15 + $0xe08] sm:$0xff] }
 0x85f   : > { %v11613_v33 = vpop.eup %11612  ;;  %v6972_v31 = vadd.f32 1.0, %v11611_v0  ;;  %11632 = vtanh.f32 %v14305_v18  ;;  %v9317_v0 = vld [vmem:[%s12226_s15 + $0xe18] sm:$0xff] }
 0x860   : > { %v11615_v12 = vpop.eup %11614  ;;  %v14330_v19 = vadd.f32 %v7146_v11, %v7130_v8  ;;  %11634 = vtanh.f32 %v14313_v28  ;;  %v7083_v40 = vadd.f32 1.0, %v11613_v33  ;;  %v9318_v33 = vld [vmem:[%s12226_s15 + $0xe20] sm:$0xff] }
 0x861   : > { %v11617_v60 = vpop.eup %11616  ;;  %11636 = vrcp.f32 %v6972_v31 }
 0x862   : > { %v11619_v30 = vpop.eup %11618  ;;  %11638 = vrcp.f32 %v7082_v45  ;;  %v7187_v36 = vmul.f32 %v11617_v60, %v14261_v21 }
 0x863   : > { %v11621_v48 = vpop.eup %11620  ;;  %v7147_v55 = vmul.f32 %v11619_v30, %v11607_v27  ;;  %11640 = vtanh.f32 %v14320_v44  ;;  %v9319_v30 = vld [vmem:[%s12226_s15 + $0xe28] sm:$0xff] }
 0x864   : > { %v11623_v7 = vpop.eup %11622  ;;  %v7188_v63 = vmul.f32 %v11621_v48, %v14277_v32  ;;  %11642 = vtanh.f32 %v14330_v19 }
 0x865   : > { %v11625_v5 = vpop.eup %11624  ;;  %v7189_v51 = vmul.f32 %v11623_v7, %v14283_v1  ;;  %11644 = vrcp.f32 %v7083_v40  ;;  %v9316_v40 = vld [vmem:[%s12226_s15 + $0xe10] sm:$0xff] }
 0x866   : > { %v11627_v25 = vpop.eup %11626  ;;  %v7131_v4 = vmul.f32 %v11625_v5, %v14053_v47  ;;  %v7329_v43 = vpack.c.bf16 %v7188_v63, %v7187_v36 }
 0x867   : > { %v11629_v50 = vpop.eup %11628  ;;  %v7084_v39 = vadd.f32 1.0, %v11627_v25 }
 0x868   : > { %v11631_v54 = vpop.eup %11630  ;;  %v14338_v24 = vadd.f32 %v7147_v55, %v7131_v4  ;;  %7589 = vmatmul.mubr.bf16.gmra.mrb[236].mxu0 %v7329_v43  ;;  %7702 = vmatmul.mubr.bf16.gmra.mrb[236].mxu1 %v7329_v43  ;;  %v7190_v53 = vmul.f32 %v11629_v50, %v14299_v14  ;;  %v9321_v50 = vld [vmem:[%s12226_s15 + $0xe38] sm:$0xff] }
 0x869   : > { %v11633_v21 = vpop.eup %11632  ;;  %v7148_v32 = vmul.f32 %v11631_v54, %v11615_v12  ;;  %7598 = vmatprep.mubr.bf16.mxu0 %v11988_v2  ;;  %7711 = vmatprep.mubr.bf16.mxu1 %v11988_v2 }
 0x86a   : > { %v11635_v9 = vpop.eup %11634  ;;  %v7330_v47 = vpack.c.bf16 %v7190_v53, %v7189_v51  ;;  %v7191_v23 = vmul.f32 %v11633_v21, %v14310_v35  ;;  %11646 = vtanh.f32 %v14338_v24 }
 0x86b   : > { %v11637_v6 = vpop.eup %11636  ;;  %v7192_v3 = vmul.f32 %v11635_v9, %v14318_v62  ;;  %11648 = vrcp.f32 %v7084_v39 }
 0x86c   : > { %v11639_v41 = vpop.eup %11638  ;;  %v7132_v1 = vmul.f32 %v11637_v6, %v14062_v26 }
 0x86d   : > { %v11641_v46 = vpop.eup %11640  ;;  %v7331_v14 = vpack.c.bf16 %v7192_v3, %v7191_v23  ;;  %v9320_v3 = vld [vmem:[%s12226_s15 + $0xe30] sm:$0xff] }
 0x86e   : > { %v11643_v38 = vpop.eup %11642  ;;  %v14347_v22 = vadd.f32 %v7148_v32, %v7132_v1  ;;  %v7193_v59 = vmul.f32 %v11641_v46, %v14323_v34  ;;  %v9322_v32 = vld [vmem:[%s12226_s15 + $0xe40] sm:$0xff] }
 0x86f   : > { %v7194_v20 = vmul.f32 %v11643_v38, %v11639_v41  ;;  %v11645_v35 = vpop.eup %11644 }
 0x870   : > { %7599 = vmatmul.mubr.bf16.gmra.mrb[240].mxu0 %v7330_v47  ;;  %7712 = vmatmul.mubr.bf16.gmra.mrb[240].mxu1 %v7330_v47  ;;  %11650 = vtanh.f32 %v14347_v22  ;;  %v9323_v47 = vld [vmem:[%s12226_s15 + $0xe48] sm:$0xff] }
 0x871   : > { %7608 = vmatprep.mubr.bf16.mxu0 %v11988_v2  ;;  %7721 = vmatprep.mubr.bf16.mxu1 %v11988_v2  ;;  %v7332_v26 = vpack.c.bf16 %v7194_v20, %v7193_v59 }
 0x874   : > { %v11647_v62 = vpop.eup %11646 }
 0x875   : > { %v11649_v58 = vpop.eup %11648  ;;  %v7195_v52 = vmul.f32 %v11647_v62, %v11645_v35  ;;  %v9326_v35 = vld [vmem:[%s12226_s15 + $0xe60] sm:$0xff] }
 0x878   : > { %7609 = vmatmul.mubr.bf16.gmra.mrb[244].mxu0 %v7331_v14  ;;  %7722 = vmatmul.mubr.bf16.gmra.mrb[244].mxu1 %v7331_v14 }
 0x879   : > { %7618 = vmatprep.mubr.bf16.mxu0 %v11988_v2  ;;  %7731 = vmatprep.mubr.bf16.mxu1 %v11988_v2 }
 0x87a   : > { %v11651_v34 = vpop.eup %11650 }
 0x87b   : > { %v7196_v11 = vmul.f32 %v11651_v34, %v11649_v58 }
 0x87c   : > { %v7560_v8 = vpop.f32.mrb[224].mxu0  ;;  %v7673_v45 = vpop.f32.mrb[224].mxu1 }
 0x87d   : > { %v7333_v27 = vpack.c.bf16 %v7196_v11, %v7195_v52  ;;  %v7752_v31 = vadd.f32 %v9314_v13, %v7560_v8  ;;  %v7562_v12 = vpop.f32.mrb[225].mxu0  ;;  %v7675_v60 = vpop.f32.mrb[225].mxu1  ;;  %v7754_v6 = vadd.f32 %v9316_v40, %v7673_v45  ;;  %v9327_v13 = vld [vmem:[%s12226_s15 + $0xe68] sm:$0xff]  ;;  %v9325_v45 = vld [vmem:[%s12226_s15 + $0xe58] sm:$0xff] }
 0x87e   : > { %v7753_v48 = vadd.f32 %v9315_v10, %v7562_v12  ;;  %v7755_v55 = vadd.f32 %v9317_v0, %v7675_v60  ;;  %v7564_v7 = vpop.f32.mrb[226].mxu0  ;;  %v7677_v36 = vpop.f32.mrb[226].mxu1  ;;  %v9324_v0 = vld [vmem:[%s12226_s15 + $0xe50] sm:$0xff] }
 0x87f   : > { %v9410_v63 = vmul.f32 -1.442695, %v7752_v31  ;;  %v7566_v5 = vpop.f32.mrb[227].mxu0  ;;  %v7679_v25 = vpop.f32.mrb[227].mxu1  ;;  %v7758_v11 = vadd.f32 %v9320_v3, %v7677_v36  ;;  %v9334_v3 = vld [vmem:[%s12226_s15 + $0xea0] sm:$0xff] }
 0x880   : > { %7619 = vmatmul.mubr.bf16.gmra.mrb[248].mxu0 %v7332_v26  ;;  %7732 = vmatmul.mubr.bf16.gmra.mrb[248].mxu1 %v7332_v26  ;;  %v9426_v4 = vmul.f32 -1.442695, %v7753_v48  ;;  %v7757_v43 = vadd.f32 %v9319_v30, %v7566_v5  ;;  %v9442_v54 = vmul.f32 -1.442695, %v7755_v55  ;;  %v7759_v21 = vadd.f32 %v9321_v50, %v7679_v25  ;;  %v9330_v48 = vld [vmem:[%s12226_s15 + $0xe80] sm:$0xff] }
 0x881   : > { %7628 = vmatprep.mubr.bf16.mxu0 %v11988_v2  ;;  %7741 = vmatprep.mubr.bf16.mxu1 %v11988_v2  ;;  %v7756_v2 = vadd.f32 %v9318_v33, %v7564_v7  ;;  %11652 = vpow2.f32 %v9410_v63 }
 0x882   : > { %11654 = vpow2.f32 %v9426_v4  ;;  %v9427_v53 = vmul.f32 -1.442695, %v7757_v43  ;;  %v9443_v9 = vmul.f32 -1.442695, %v7759_v21  ;;  %v9331_v43 = vld [vmem:[%s12226_s15 + $0xe88] sm:$0xff] }
 0x883   : > { %v9411_v51 = vmul.f32 -1.442695, %v7756_v2 }
 0x885   : > { %11656 = vpow2.f32 %v9411_v51 }
 0x886   : > { %11658 = vpow2.f32 %v9442_v54  ;;  %v7570_v39 = vpop.f32.mrb[228].mxu0  ;;  %v7683_v23 = vpop.f32.mrb[228].mxu1 }
 0x887   : > { %11660 = vpow2.f32 %v9427_v53  ;;  %v7760_v41 = vadd.f32 %v9322_v32, %v7570_v39  ;;  %v7572_v1 = vpop.f32.mrb[229].mxu0  ;;  %v7685_v46 = vpop.f32.mrb[229].mxu1  ;;  %v7762_v63 = vadd.f32 %v9324_v0, %v7683_v23 }
 0x888   : > { %7629 = vmatmul.mubr.bf16.gmra.mrb[252].mxu0 %v7333_v27  ;;  %7742 = vmatmul.mubr.bf16.gmra.mrb[252].mxu1 %v7333_v27  ;;  %v7761_v14 = vadd.f32 %v9323_v47, %v7572_v1  ;;  %v7574_v38 = vpop.f32.mrb[230].mxu0  ;;  %v14368_v59 = vpop.f32.mrb[230].mxu1  ;;  %11662 = vpow2.f32 %v9443_v9  ;;  %v7763_v2 = vadd.f32 %v9325_v45, %v7685_v46  ;;  %v9333_v45 = vld [vmem:[%s12226_s15 + $0xe98] sm:$0xff] }
 0x889   : > { %v9412_v26 = vmul.f32 -1.442695, %v7760_v41  ;;  %v7576_v62 = vpop.f32.mrb[231].mxu0  ;;  %v7689_v58 = vpop.f32.mrb[231].mxu1  ;;  %11664 = vtanh.f32 %v7754_v6  ;;  %v7764_v33 = vadd.f32 %v9326_v35, %v7574_v38  ;;  %v9329_v6 = vld [vmem:[%s12226_s15 + $0xe78] sm:$0xff] }
 0x88a   : > { %v9428_v8 = vmul.f32 -1.442695, %v7761_v14  ;;  %v7765_v30 = vadd.f32 %v9327_v13, %v7576_v62  ;;  %v9444_v47 = vmul.f32 -1.442695, %v7763_v2 }
 0x88b   : > { %v11653_v20 = vpop.eup %11652  ;;  %11666 = vpow2.f32 %v9412_v26  ;;  %v9413_v4 = vmul.f32 -1.442695, %v7764_v33 }
 0x88c   : > { %v11655_v34 = vpop.eup %11654  ;;  %v7864_v52 = vadd.f32 1.0, %v11653_v20  ;;  %v9429_v32 = vmul.f32 -1.442695, %v7765_v30  ;;  %v7767_v20 = vadd.f32 %v9329_v6, %v7689_v58 }
 0x88d   : > { %v7960_v27 = vadd.f32 1.0, %v11655_v34 }
 0x88e   : > { %11668 = vrcp.f32 %v7864_v52  ;;  %v7580_v55 = vpop.f32.mrb[232].mxu0  ;;  %v14375_v7 = vpop.f32.mrb[232].mxu1  ;;  %v9445_v58 = vmul.f32 -1.442695, %v7767_v20 }
 0x88f   : > { %v11657_v10 = vpop.eup %11656  ;;  %11670 = vrcp.f32 %v7960_v27  ;;  %v7582_v5 = vpop.f32.mrb[233].mxu0  ;;  %v7768_v53 = vadd.f32 %v9330_v48, %v7580_v55  ;;  %v9332_v55 = vld [vmem:[%s12226_s15 + $0xe90] sm:$0xff] }
 0x890   : > { %v11659_v31 = vpop.eup %11658  ;;  %v7865_v12 = vadd.f32 1.0, %v11657_v10  ;;  %11672 = vtanh.f32 %v7758_v11  ;;  %v7695_v25 = vpop.f32.mrb[233].mxu1  ;;  %v7769_v39 = vadd.f32 %v9331_v43, %v7582_v5 }
 0x891   : > { %v11661_v60 = vpop.eup %11660  ;;  %v7584_v50 = vpop.f32.mrb[234].mxu0  ;;  %v8072_v51 = vadd.f32 1.0, %v11659_v31  ;;  %v9414_v1 = vmul.f32 -1.442695, %v7768_v53 }
 0x892   : > { %11674 = vrcp.f32 %v7865_v12  ;;  %v7961_v36 = vadd.f32 1.0, %v11661_v60  ;;  %v14378_v54 = vpop.f32.mrb[234].mxu1  ;;  %v7586_v21 = vpop.f32.mrb[235].mxu0  ;;  %v9430_v62 = vmul.f32 -1.442695, %v7769_v39  ;;  %v7772_v34 = vadd.f32 %v9334_v3, %v7584_v50  ;;  %v9335_v60 = vld [vmem:[%s12226_s15 + $0xea8] sm:$0xff] }
 0x893   : > { %11676 = vpow2.f32 %v9428_v8  ;;  %v14380_v40 = vpop.f32.mrb[235].mxu1  ;;  %v11663_v9 = vpop.eup %11662  ;;  %v9328_v8 = vld [vmem:[%s12226_s15 + $0xe70] sm:$0xff]  ;;  %v7773_v43 = vadd.f32 %v9335_v60, %v7586_v21 }
 0x894   : > { %11678 = vrcp.f32 %v7961_v36  ;;  %v11665_v23 = vpop.eup %11664  ;;  %v8073_v14 = vadd.f32 1.0, %v11663_v9  ;;  %v9415_v12 = vmul.f32 -1.442695, %v7772_v34  ;;  %v7766_v48 = vadd.f32 %v9328_v8, %v14368_v59  ;;  %v9336_v39 = vld [vmem:[%s12226_s15 + $0xeb0] sm:$0xff] }
 0x895   : > { %11680 = vtanh.f32 %v7762_v63  ;;  %v11667_v41 = vpop.eup %11666  ;;  %v7771_v36 = vadd.f32 %v9333_v45, %v7695_v25 }
 0x896   : > { %11682 = vpow2.f32 %v9413_v4  ;;  %v7866_v38 = vadd.f32 1.0, %v11667_v41 }
 0x897   : > { %11684 = vrcp.f32 %v8072_v51  ;;  %v9446_v59 = vmul.f32 -1.442695, %v7771_v36 }
 0x898   : > { %v11669_v46 = vpop.eup %11668  ;;  %11686 = vpow2.f32 %v9429_v32 }
 0x899   : > { %v11671_v26 = vpop.eup %11670  ;;  %v8136_v35 = vmul.f32 %v11669_v46, %v11665_v23  ;;  %11688 = vpow2.f32 %v9444_v47  ;;  %v9431_v47 = vmul.f32 -1.442695, %v7773_v43 }
 0x89a   : > { %v11673_v52 = vpop.eup %11672  ;;  %v8120_v11 = vmul.f32 %v11671_v26, %v14106_v37  ;;  %11690 = vrcp.f32 %v7866_v38  ;;  %v7774_v38 = vadd.f32 %v9336_v39, %v14378_v54 }
 0x89b   : > { %11692 = vpow2.f32 %v9414_v1  ;;  %v9337_v1 = vld [vmem:[%s12226_s15 + $0xeb8] sm:$0xff] }
 0x89c   : > { %v11675_v27 = vpop.eup %11674  ;;  %v8152_v10 = vadd.f32 %v8136_v35, %v8120_v11  ;;  %11694 = vrcp.f32 %v8073_v14 }
 0x89d   : > { %v11677_v13 = vpop.eup %11676  ;;  %v8137_v0 = vmul.f32 %v11675_v27, %v11673_v52  ;;  %11696 = vpow2.f32 %v9430_v62  ;;  %v7775_v62 = vadd.f32 %v9337_v1, %v14380_v40 }
 0x89e   : > { %v11679_v33 = vpop.eup %11678  ;;  %v7962_v31 = vadd.f32 1.0, %v11677_v13  ;;  %11698 = vtanh.f32 %v8152_v10 }
 0x89f   : > { %v8121_v37 = vmul.f32 %v11679_v33, %v14112_v61  ;;  %v11681_v30 = vpop.eup %11680  ;;  %v7770_v61 = vadd.f32 %v9332_v55, %v14375_v7  ;;  %v9447_v8 = vmul.f32 -1.442695, %v7775_v62 }
 0x8a0   : > { %11700 = vrcp.f32 %v7962_v31  ;;  %v11683_v63 = vpop.eup %11682 }
 0x8a1   : > { %v8153_v2 = vadd.f32 %v8137_v0, %v8121_v37  ;;  %11702 = vpow2.f32 %v9445_v58  ;;  %v11685_v5 = vpop.eup %11684  ;;  %v7867_v4 = vadd.f32 1.0, %v11683_v63 }
 0x8a2   : > { %11704 = vpow2.f32 %v9415_v12  ;;  %v11687_v50 = vpop.eup %11686 }
 0x8a3   : > { %11706 = vtanh.f32 %v8153_v2  ;;  %v11689_v51 = vpop.eup %11688  ;;  %v7963_v53 = vadd.f32 1.0, %v11687_v50 }
 0x8a4   : > { %11708 = vtanh.f32 %v7766_v48  ;;  %v11691_v32 = vpop.eup %11690  ;;  %v8074_v3 = vadd.f32 1.0, %v11689_v51 }
 0x8a5   : > { %11710 = vrcp.f32 %v7867_v4  ;;  %v11693_v25 = vpop.eup %11692  ;;  %v8138_v9 = vmul.f32 %v11691_v32, %v11681_v30 }
 0x8a6   : > { %11712 = vrcp.f32 %v7963_v53  ;;  %v11695_v21 = vpop.eup %11694  ;;  %v7868_v6 = vadd.f32 1.0, %v11693_v25 }
 0x8a7   : > { %11714 = vtanh.f32 %v7770_v61  ;;  %v11697_v23 = vpop.eup %11696 }
 0x8a8   : > { %11716 = vpow2.f32 %v9446_v59  ;;  %v11699_v7 = vpop.eup %11698  ;;  %v7964_v41 = vadd.f32 1.0, %v11697_v23 }
 0x8a9   : > { %11718 = vrcp.f32 %v7868_v6  ;;  %v8184_v14 = vmul.f32 %v11699_v7, %v11685_v5  ;;  %v9338_v7 = vld [vmem:[%s12226_s15 + $0xec0] sm:$0xff] }
 0x8aa   : > { %v11701_v46 = vpop.eup %11700  ;;  %11720 = vpow2.f32 %v9431_v47 }
 0x8ab   : > { %v11703_v20 = vpop.eup %11702  ;;  %v8122_v26 = vmul.f32 %v11701_v46, %v14128_v42  ;;  %11722 = vrcp.f32 %v7964_v41  ;;  %8248 = vst [vmem:[%s14399_s4] sm:$0xff] %v8184_v14  ;;  %v9341_v41 = vld [vmem:[%s12226_s15 + $0xed8] sm:$0xff]  ;;  %v9342_v46 = vld [vmem:[%s12226_s15 + $0xee0] sm:$0xff] }
 0x8ac   : > { %v11705_v35 = vpop.eup %11704  ;;  %11724 = vrcp.f32 %v8074_v3  ;;  %v8075_v10 = vadd.f32 1.0, %v11703_v20  ;;  %v9339_v3 = vld [vmem:[%s12226_s15 + $0xec8] sm:$0xff] }
 0x8ad   : > { %v11707_v34 = vpop.eup %11706  ;;  %v8154_v52 = vadd.f32 %v8138_v9, %v8122_v26  ;;  %v7869_v11 = vadd.f32 1.0, %v11705_v35  ;;  %11726 = vtanh.f32 %v7774_v38  ;;  %v9343_v26 = vld [vmem:[%s12226_s15 + $0xee8] sm:$0xff]  ;;  %v9345_v35 = vld [vmem:[%s12226_s15 + $0xef8] sm:$0xff] }
 0x8ae   : > { %v11709_v27 = vpop.eup %11708  ;;  %v8185_v13 = vmul.f32 %v11707_v34, %v11695_v21 }
 0x8af   : > { %v11711_v54 = vpop.eup %11710  ;;  %11728 = vtanh.f32 %v8154_v52 }
 0x8b0   : > { %v11713_v42 = vpop.eup %11712  ;;  %8249 = vst [vmem:[%s14399_s4 + $0x8] sm:$0xff] %v8185_v13  ;;  %v8139_v0 = vmul.f32 %v11711_v54, %v11709_v27  ;;  %11730 = vrcp.f32 %v7869_v11 }
 0x8b1   : > { %v11715_v58 = vpop.eup %11714  ;;  %v8123_v45 = vmul.f32 %v11713_v42, %v14143_v16  ;;  %11732 = vrcp.f32 %v8075_v10  ;;  %v9340_v42 = vld [vmem:[%s12226_s15 + $0xed0] sm:$0xff] }
 0x8b2   : > { %v11717_v33 = vpop.eup %11716  ;;  %11734 = vpow2.f32 %v9447_v8 }
 0x8b3   : > { %v11719_v40 = vpop.eup %11718  ;;  %v8155_v31 = vadd.f32 %v8139_v0, %v8123_v45  ;;  %v8076_v30 = vadd.f32 1.0, %v11717_v33 }
 0x8b4   : > { %v11721_v12 = vpop.eup %11720  ;;  %v8140_v37 = vmul.f32 %v11719_v40, %v11715_v58 }
 0x8b5   : > { %v11723_v60 = vpop.eup %11722  ;;  %11736 = vtanh.f32 %v8155_v31  ;;  %v7965_v48 = vadd.f32 1.0, %v11721_v12  ;;  %v9346_v31 = vld [vmem:[%s12226_s15 + $0xf00] sm:$0xff] }
 0x8b6   : > { %v8124_v55 = vmul.f32 %v11723_v60, %v14159_v56  ;;  %v11725_v36 = vpop.eup %11724  ;;  %v9349_v60 = vld [vmem:[%s12226_s15 + $0xf18] sm:$0xff] }
 0x8b7   : > { %11738 = vrcp.f32 %v7965_v48  ;;  %v11727_v63 = vpop.eup %11726 }
 0x8b8   : > { %v8156_v2 = vadd.f32 %v8140_v37, %v8124_v55  ;;  %11740 = vrcp.f32 %v8076_v30  ;;  %v9347_v37 = vld [vmem:[%s12226_s15 + $0xf08] sm:$0xff] }
 0x8b9   : > { %v11729_v16 = vpop.eup %11728 }
 0x8ba   : > { %v11731_v5 = vpop.eup %11730  ;;  %v8186_v4 = vmul.f32 %v11729_v16, %v11725_v36  ;;  %11742 = vtanh.f32 %v8156_v2  ;;  %v9350_v36 = vld [vmem:[%s12226_s15 + $0xf20] sm:$0xff] }
 0x8bb   : > { %v8141_v43 = vmul.f32 %v11731_v5, %v11727_v63  ;;  %v11733_v50 = vpop.eup %11732  ;;  %v9344_v5 = vld [vmem:[%s12226_s15 + $0xef0] sm:$0xff] }
 0x8bc   : > { %8250 = vst [vmem:[%s14399_s4 + $0x10] sm:$0xff] %v8186_v4  ;;  %v11735_v61 = vpop.eup %11734 }
 0x8bd   : > { %v8077_v59 = vadd.f32 1.0, %v11735_v61 }
 0x8bf   : > { %v11737_v51 = vpop.eup %11736  ;;  %11744 = vrcp.f32 %v8077_v59 }
 0x8c0   : > { %v8187_v53 = vmul.f32 %v11737_v51, %v11733_v50 }
 0x8c1   : > { %v11739_v56 = vpop.eup %11738 }
 0x8c2   : > { %8251 = vst [vmem:[%s14399_s4 + $0x18] sm:$0xff] %v8187_v53  ;;  %v8125_v32 = vmul.f32 %v11739_v56, %v14177_v57  ;;  %v11741_v25 = vpop.eup %11740  ;;  %v9351_v56 = vld [vmem:[%s12226_s15 + $0xf28] sm:$0xff] }
 0x8c4   : > { %v11743_v9 = vpop.eup %11742  ;;  %v8157_v47 = vadd.f32 %v8141_v43, %v8125_v32 }
 0x8c5   : > { %v8188_v21 = vmul.f32 %v11743_v9, %v11741_v25 }
 0x8c6   : > { %11746 = vtanh.f32 %v8157_v47 }
 0x8c7   : > { %8252 = vst [vmem:[%s14399_s4 + $0x20] sm:$0xff] %v8188_v21  ;;  %v9348_v21 = vld [vmem:[%s12226_s15 + $0xf10] sm:$0xff] }
 0x8c9   : > { %v11745_v6 = vpop.eup %11744 }
 0x8d0   : > { %v11747_v39 = vpop.eup %11746 }
 0x8d1   : > { %v8189_v23 = vmul.f32 %v11747_v39, %v11745_v6 }
 0x8d3   : > { %8253 = vst [vmem:[%s14399_s4 + $0x28] sm:$0xff] %v8189_v23 }
 0x93b   : > { %v7590_v1 = vpop.f32.mrb[236].mxu0  ;;  %v7703_v57 = vpop.f32.mrb[236].mxu1 }
 0x93c   : > { %v7776_v14 = vadd.f32 %v9338_v7, %v7590_v1  ;;  %v7592_v38 = vpop.f32.mrb[237].mxu0  ;;  %v7705_v20 = vpop.f32.mrb[237].mxu1  ;;  %v7778_v12 = vadd.f32 %v9340_v42, %v7703_v57 }
 0x93d   : > { %v7777_v62 = vadd.f32 %v9339_v3, %v7592_v38  ;;  %v7779_v34 = vadd.f32 %v9341_v41, %v7705_v20  ;;  %v7594_v52 = vpop.f32.mrb[238].mxu0  ;;  %v7707_v11 = vpop.f32.mrb[238].mxu1  ;;  %v9352_v38 = vld [vmem:[%s12226_s15 + $0xf30] sm:$0xff]  ;;  %v9353_v20 = vld [vmem:[%s12226_s15 + $0xf38] sm:$0xff] }
 0x93e   : > { %v9416_v27 = vmul.f32 -1.442695, %v7776_v14  ;;  %v7780_v13 = vadd.f32 %v9342_v46, %v7594_v52  ;;  %v7596_v54 = vpop.f32.mrb[239].mxu0  ;;  %v7709_v10 = vpop.f32.mrb[239].mxu1  ;;  %v7782_v47 = vadd.f32 %v9344_v5, %v7707_v11 }
 0x93f   : > { %v9432_v0 = vmul.f32 -1.442695, %v7777_v62  ;;  %v9448_v8 = vmul.f32 -1.442695, %v7779_v34  ;;  %v7781_v58 = vadd.f32 %v9343_v26, %v7596_v54  ;;  %v7783_v45 = vadd.f32 %v9345_v35, %v7709_v10 }
 0x940   : > { %11748 = vpow2.f32 %v9416_v27  ;;  %v9417_v33 = vmul.f32 -1.442695, %v7780_v13  ;;  %v9354_v13 = vld [vmem:[%s12226_s15 + $0xf40] sm:$0xff] }
 0x941   : > { %11750 = vpow2.f32 %v9432_v0  ;;  %v9433_v40 = vmul.f32 -1.442695, %v7781_v58  ;;  %v9449_v30 = vmul.f32 -1.442695, %v7783_v45 }
 0x942   : > { %11752 = vpow2.f32 %v9448_v8 }
 0x943   : > { %11754 = vpow2.f32 %v9417_v33  ;;  %v7600_v48 = vpop.f32.mrb[240].mxu0  ;;  %v7713_v55 = vpop.f32.mrb[240].mxu1 }
 0x944   : > { %v7784_v63 = vadd.f32 %v9346_v31, %v7600_v48  ;;  %v7602_v2 = vpop.f32.mrb[241].mxu0  ;;  %v7715_v16 = vpop.f32.mrb[241].mxu1  ;;  %11756 = vpow2.f32 %v9433_v40  ;;  %v7786_v41 = vadd.f32 %v9348_v21, %v7713_v55  ;;  %v9355_v40 = vld [vmem:[%s12226_s15 + $0xf48] sm:$0xff] }
 0x945   : > { %v7785_v4 = vadd.f32 %v9347_v37, %v7602_v2  ;;  %v7787_v43 = vadd.f32 %v9349_v60, %v7715_v16  ;;  %v7604_v50 = vpop.f32.mrb[242].mxu0  ;;  %v7717_v61 = vpop.f32.mrb[242].mxu1  ;;  %11758 = vtanh.f32 %v7778_v12 }
 0x946   : > { %v9418_v51 = vmul.f32 -1.442695, %v7784_v63  ;;  %v7788_v53 = vadd.f32 %v9350_v36, %v7604_v50  ;;  %v7606_v59 = vpop.f32.mrb[243].mxu0  ;;  %v7719_v32 = vpop.f32.mrb[243].mxu1  ;;  %11760 = vpow2.f32 %v9449_v30  ;;  %v7790_v0 = vadd.f32 %v9352_v38, %v7717_v61  ;;  %v9358_v36 = vld [vmem:[%s12226_s15 + $0xf60] sm:$0xff] }
 0x947   : > { %v9434_v25 = vmul.f32 -1.442695, %v7785_v4  ;;  %v9450_v9 = vmul.f32 -1.442695, %v7787_v43  ;;  %v7789_v39 = vadd.f32 %v9351_v56, %v7606_v59  ;;  %v7791_v8 = vadd.f32 %v9353_v20, %v7719_v32 }
 0x948   : > { %11762 = vpow2.f32 %v9418_v51  ;;  %v9419_v6 = vmul.f32 -1.442695, %v7788_v53  ;;  %v9357_v51 = vld [vmem:[%s12226_s15 + $0xf58] sm:$0xff] }
 0x949   : > { %11764 = vpow2.f32 %v9434_v25  ;;  %v9435_v34 = vmul.f32 -1.442695, %v7789_v39  ;;  %v9451_v48 = vmul.f32 -1.442695, %v7791_v8  ;;  %v9362_v8 = vld [vmem:[%s12226_s15 + $0xf80] sm:$0xff] }
 0x94a   : > { %v11749_v23 = vpop.eup %11748  ;;  %11766 = vpow2.f32 %v9450_v9 }
 0x94b   : > { %v11751_v7 = vpop.eup %11750  ;;  %v7870_v3 = vadd.f32 1.0, %v11749_v23  ;;  %11768 = vpow2.f32 %v9419_v6  ;;  %v7610_v1 = vpop.f32.mrb[244].mxu0 }
 0x94c   : > { %v14425_v57 = vpop.f32.mrb[244].mxu1  ;;  %v11753_v46 = vpop.eup %11752  ;;  %v7966_v14 = vadd.f32 1.0, %v11751_v7  ;;  %11770 = vtanh.f32 %v7782_v47  ;;  %v7792_v12 = vadd.f32 %v9354_v13, %v7610_v1  ;;  %v9359_v1 = vld [vmem:[%s12226_s15 + $0xf68] sm:$0xff] }
 0x94d   : > { %v7612_v26 = vpop.f32.mrb[245].mxu0  ;;  %v7725_v35 = vpop.f32.mrb[245].mxu1  ;;  %11772 = vrcp.f32 %v7870_v3  ;;  %v8078_v45 = vadd.f32 1.0, %v11753_v46 }
 0x94e   : > { %v11755_v62 = vpop.eup %11754  ;;  %v7614_v52 = vpop.f32.mrb[246].mxu0  ;;  %11774 = vrcp.f32 %v7966_v14  ;;  %v7793_v55 = vadd.f32 %v9355_v40, %v7612_v26  ;;  %v9420_v61 = vmul.f32 -1.442695, %v7792_v12 }
 0x94f   : > { %v14429_v11 = vpop.f32.mrb[246].mxu1  ;;  %v7871_v27 = vadd.f32 1.0, %v11755_v62  ;;  %v7616_v54 = vpop.f32.mrb[247].mxu0  ;;  %11776 = vtanh.f32 %v7786_v41  ;;  %v7796_v9 = vadd.f32 %v9358_v36, %v7614_v52  ;;  %v7795_v41 = vadd.f32 %v9357_v51, %v7725_v35  ;;  %v9356_v52 = vld [vmem:[%s12226_s15 + $0xf50] sm:$0xff] }
 0x950   : > { %v14432_v10 = vpop.f32.mrb[247].mxu1  ;;  %v11757_v42 = vpop.eup %11756  ;;  %v9436_v39 = vmul.f32 -1.442695, %v7793_v55 }
 0x951   : > { %v11759_v58 = vpop.eup %11758  ;;  %11778 = vrcp.f32 %v7871_v27  ;;  %v7967_v33 = vadd.f32 1.0, %v11757_v42  ;;  %v9421_v20 = vmul.f32 -1.442695, %v7796_v9  ;;  %v7797_v27 = vadd.f32 %v9359_v1, %v7616_v54  ;;  %v9360_v54 = vld [vmem:[%s12226_s15 + $0xf70] sm:$0xff] }
 0x952   : > { %v11761_v31 = vpop.eup %11760  ;;  %11780 = vpow2.f32 %v9435_v34 }
 0x953   : > { %v11763_v37 = vpop.eup %11762  ;;  %11782 = vrcp.f32 %v7967_v33  ;;  %v14436_v63 = vpop.f32.mrb[248].mxu0  ;;  %v8079_v32 = vadd.f32 1.0, %v11761_v31 }
 0x954   : > { %v11765_v60 = vpop.eup %11764  ;;  %v7872_v30 = vadd.f32 1.0, %v11763_v37  ;;  %11784 = vtanh.f32 %v7790_v0  ;;  %v14438_v2 = vpop.f32.mrb[248].mxu1 }
 0x955   : > { %v11767_v16 = vpop.eup %11766  ;;  %11786 = vrcp.f32 %v8078_v45  ;;  %v7968_v5 = vadd.f32 1.0, %v11765_v60  ;;  %v14440_v4 = vpop.f32.mrb[249].mxu0  ;;  %v7794_v60 = vadd.f32 %v9356_v52, %v14425_v57 }
 0x956   : > { %v14442_v43 = vpop.f32.mrb[249].mxu1  ;;  %v11769_v50 = vpop.eup %11768  ;;  %11788 = vrcp.f32 %v7872_v30  ;;  %v8080_v3 = vadd.f32 1.0, %v11767_v16  ;;  %v9437_v16 = vmul.f32 -1.442695, %v7797_v27 }
 0x957   : > { %v14445_v53 = vpop.f32.mrb[250].mxu0  ;;  %v14447_v56 = vpop.f32.mrb[250].mxu1  ;;  %11790 = vrcp.f32 %v7968_v5  ;;  %v7873_v25 = vadd.f32 1.0, %v11769_v50  ;;  %v9361_v5 = vld [vmem:[%s12226_s15 + $0xf78] sm:$0xff]  ;;  %v9363_v50 = vld [vmem:[%s12226_s15 + $0xf88] sm:$0xff] }
 0x958   : > { %v11771_v59 = vpop.eup %11770  ;;  %v14449_v47 = vpop.f32.mrb[251].mxu0  ;;  %11792 = vpow2.f32 %v9451_v48  ;;  %v7799_v9 = vadd.f32 %v9361_v5, %v14432_v10 }
 0x959   : > { %v14451_v21 = vpop.f32.mrb[251].mxu1  ;;  %v11773_v6 = vpop.eup %11772  ;;  %11794 = vrcp.f32 %v7873_v25 }
 0x95a   : > { %v11775_v23 = vpop.eup %11774  ;;  %v8142_v7 = vmul.f32 %v11773_v6, %v11759_v58  ;;  %11796 = vpow2.f32 %v9420_v61  ;;  %v7801_v6 = vadd.f32 %v9363_v50, %v14440_v4  ;;  %v9453_v10 = vmul.f32 -1.442695, %v7799_v9 }
 0x95b   : > { %v11777_v46 = vpop.eup %11776  ;;  %v8126_v14 = vmul.f32 %v11775_v23, %v14243_v29  ;;  %11798 = vrcp.f32 %v8079_v32  ;;  %v14456_v13 = vpop.f32.mrb[252].mxu0  ;;  %v9452_v29 = vmul.f32 -1.442695, %v7795_v41 }
 0x95c   : > { %v11779_v38 = vpop.eup %11778  ;;  %11800 = vpow2.f32 %v9436_v39  ;;  %v14458_v42 = vpop.f32.mrb[252].mxu1 }
 0x95d   : > { %v11781_v26 = vpop.eup %11780  ;;  %v8158_v62 = vadd.f32 %v8142_v7, %v8126_v14  ;;  %v8143_v34 = vmul.f32 %v11779_v38, %v11771_v59  ;;  %11802 = vrcp.f32 %v8080_v3  ;;  %v14461_v58 = vpop.f32.mrb[253].mxu0  ;;  %v7798_v59 = vadd.f32 %v9360_v54, %v14429_v11  ;;  %v9366_v11 = vld [vmem:[%s12226_s15 + $0xfa0] sm:$0xff] }
 0x95e   : > { %v11783_v35 = vpop.eup %11782  ;;  %v7969_v0 = vadd.f32 1.0, %v11781_v26  ;;  %v14463_v45 = vpop.f32.mrb[253].mxu1  ;;  %v9438_v38 = vmul.f32 -1.442695, %v7801_v6 }
 0x95f   : > { %v11785_v33 = vpop.eup %11784  ;;  %11804 = vtanh.f32 %v8158_v62  ;;  %v8127_v40 = vmul.f32 %v11783_v35, %v14267_v15  ;;  %v14467_v31 = vpop.f32.mrb[254].mxu0  ;;  %v7800_v15 = vadd.f32 %v9362_v8, %v14436_v63 }
 0x960   : > { %v14469_v12 = vpop.f32.mrb[254].mxu1  ;;  %v11787_v37 = vpop.eup %11786  ;;  %11806 = vrcp.f32 %v7969_v0 }
 0x961   : > { %v14472_v30 = vpop.f32.mrb[255].mxu0  ;;  %v14474_v48 = vpop.f32.mrb[255].mxu1  ;;  %v8159_v36 = vadd.f32 %v8143_v34, %v8127_v40  ;;  %11808 = vpow2.f32 %v9421_v20  ;;  %v9422_v7 = vmul.f32 -1.442695, %v7800_v15  ;;  %v7804_v20 = vadd.f32 %v9366_v11, %v14445_v53  ;;  %v9367_v34 = vld [vmem:[%s12226_s15 + $0xfa8] sm:$0xff]  ;;  %v9364_v40 = vld [vmem:[%s12226_s15 + $0xf90] sm:$0xff] }
 0x962   : > { %v11789_v55 = vpop.eup %11788  ;;  %11810 = vpow2.f32 %v9452_v29  ;;  %v9365_v29 = vld [vmem:[%s12226_s15 + $0xf98] sm:$0xff]  ;;  %v7805_v54 = vadd.f32 %v9367_v34, %v14449_v47  ;;  %v7802_v50 = vadd.f32 %v9364_v40, %v14438_v2  ;;  %v9368_v2 = vld [vmem:[%s12226_s15 + $0xfb0] sm:$0xff]  ;;  %v9374_v11 = vld [vmem:[%s12226_s15 + $0xfe0] sm:$0xff] }
 0x963   : > { %v11791_v61 = vpop.eup %11790  ;;  %v8144_v51 = vmul.f32 %v11789_v55, %v11777_v46  ;;  %11812 = vtanh.f32 %v8159_v36  ;;  %v9423_v53 = vmul.f32 -1.442695, %v7804_v20 }
 0x964   : > { %v11793_v32 = vpop.eup %11792  ;;  %v8128_v57 = vmul.f32 %v11791_v61, %v14274_v17  ;;  %11814 = vtanh.f32 %v7794_v60 }
 0x965   : > { %v11795_v25 = vpop.eup %11794  ;;  %11816 = vpow2.f32 %v9437_v16  ;;  %v8081_v46 = vadd.f32 1.0, %v11793_v32  ;;  %v7803_v16 = vadd.f32 %v9365_v29, %v14442_v43 }
 0x966   : > { %v11797_v39 = vpop.eup %11796  ;;  %v8160_v23 = vadd.f32 %v8144_v51, %v8128_v57  ;;  %v8145_v63 = vmul.f32 %v11795_v25, %v11785_v33  ;;  %11818 = vtanh.f32 %v7798_v59  ;;  %v9439_v51 = vmul.f32 -1.442695, %v7805_v54  ;;  %v9371_v59 = vld [vmem:[%s12226_s15 + $0xfc8] sm:$0xff]  ;;  %v9369_v25 = vld [vmem:[%s12226_s15 + $0xfb8] sm:$0xff] }
 0x967   : > { %v11799_v3 = vpop.eup %11798  ;;  %v7874_v41 = vadd.f32 1.0, %v11797_v39  ;;  %v9454_v6 = vmul.f32 -1.442695, %v7803_v16 }
 0x968   : > { %v11801_v1 = vpop.eup %11800  ;;  %11820 = vtanh.f32 %v8160_v23 }
 0x969   : > { %v11803_v17 = vpop.eup %11802  ;;  %11822 = vrcp.f32 %v7874_v41  ;;  %v7970_v14 = vadd.f32 1.0, %v11801_v1  ;;  %v7807_v41 = vadd.f32 %v9369_v25, %v14451_v21 }
 0x96a   : > { %v11805_v4 = vpop.eup %11804  ;;  %11824 = vpow2.f32 %v9422_v7 }
 0x96b   : > { %v11807_v26 = vpop.eup %11806  ;;  %v8190_v62 = vmul.f32 %v11805_v4, %v11787_v37  ;;  %11826 = vrcp.f32 %v7970_v14  ;;  %v9370_v37 = vld [vmem:[%s12226_s15 + $0xfc0] sm:$0xff]  ;;  %v7806_v14 = vadd.f32 %v9368_v2, %v14447_v56  ;;  %v9455_v20 = vmul.f32 -1.442695, %v7807_v41 }
 0x96c   : > { %v11809_v52 = vpop.eup %11808  ;;  %v8129_v27 = vmul.f32 %v11807_v26, %v14289_v49  ;;  %11828 = vrcp.f32 %v8081_v46  ;;  %v7808_v61 = vadd.f32 %v9370_v37, %v14456_v13 }
 0x96d   : > { %v11811_v35 = vpop.eup %11810  ;;  %8254 = vst [vmem:[%s14399_s4 + $0x30] sm:$0xff] %v8190_v62  ;;  %v7875_v0 = vadd.f32 1.0, %v11809_v52  ;;  %11830 = vpow2.f32 %v9453_v10  ;;  %v9375_v52 = vld [vmem:[%s12226_s15 + $0xfe8] sm:$0xff] }
 0x96e   : > { %v11813_v8 = vpop.eup %11812  ;;  %v8161_v33 = vadd.f32 %v8145_v63, %v8129_v27  ;;  %11832 = vpow2.f32 %v9438_v38  ;;  %v8082_v36 = vadd.f32 1.0, %v11811_v35  ;;  %v9424_v13 = vmul.f32 -1.442695, %v7808_v61  ;;  %v9373_v35 = vld [vmem:[%s12226_s15 + $0xfd8] sm:$0xff] }
 0x96f   : > { %v11815_v60 = vpop.eup %11814  ;;  %v8191_v55 = vmul.f32 %v11813_v8, %v11799_v3  ;;  %11834 = vrcp.f32 %v7875_v0  ;;  %v7809_v63 = vadd.f32 %v9371_v59, %v14461_v58  ;;  %v9372_v8 = vld [vmem:[%s12226_s15 + $0xfd0] sm:$0xff]  ;;  %v7813_v40 = vadd.f32 %v9375_v52, %v14472_v30 }
 0x970   : > { %v11817_v49 = vpop.eup %11816  ;;  %11836 = vtanh.f32 %v8161_v33  ;;  %v7811_v37 = vadd.f32 %v9373_v35, %v14463_v45  ;;  %v9376_v59 = vld [vmem:[%s12226_s15 + $0xff0] sm:$0xff] }
 0x971   : > { %v11819_v5 = vpop.eup %11818  ;;  %8255 = vst [vmem:[%s14399_s4 + $0x38] sm:$0xff] %v8191_v55  ;;  %v7971_v15 = vadd.f32 1.0, %v11817_v49  ;;  %11838 = vpow2.f32 %v9423_v53  ;;  %v9440_v58 = vmul.f32 -1.442695, %v7809_v63  ;;  %v7810_v49 = vadd.f32 %v9372_v8, %v14458_v42 }
 0x972   : > { %v11821_v47 = vpop.eup %11820 }
 0x973   : > { %v11823_v32 = vpop.eup %11822  ;;  %v8192_v57 = vmul.f32 %v11821_v47, %v11803_v17  ;;  %11840 = vrcp.f32 %v7971_v15 }
 0x974   : > { %v11825_v9 = vpop.eup %11824  ;;  %v8146_v43 = vmul.f32 %v11823_v32, %v11815_v60  ;;  %11842 = vrcp.f32 %v8082_v36  ;;  %v9377_v32 = vld [vmem:[%s12226_s15 + $0xff8] sm:$0xff]  ;;  %s9464_s15 = sshll.u32 %s11978_s12, 11  ;;  %s11990_s12 = smov [#allocation4]  }
 0x975   : > { %v11827_v39 = vpop.eup %11826  ;;  %8256 = vst [vmem:[%s14399_s4 + $0x40] sm:$0xff] %v8192_v57  ;;  %v7876_v23 = vadd.f32 1.0, %v11825_v9  ;;  %11844 = vtanh.f32 %v7802_v50  ;;  %v9456_v50 = vmul.f32 -1.442695, %v7811_v37  ;;  %s14532_s8 = scalar_lea.hbm %s14587_s2, %s9464_s15  ;;  %s11912_s20 = sshll.u32 %s11990_s12, 4  ;;  %s11913_s20 = int_to_ptr.vmem [resolvable:$false] %s11912_s20 }
 0x976   : > { %v11829_v7 = vpop.eup %11828  ;;  %v8130_v3 = vmul.f32 %v11827_v39, %v14305_v18  ;;  %11846 = vpow2.f32 %v9439_v51  ;;  %v7812_v18 = vadd.f32 %v9374_v11, %v14467_v31  ;;  %v7814_v39 = vadd.f32 %v9376_v59, %v14469_v12  ;;  %s11914_s23 = scalar_lea.vmem %s11913_s20, 4096  ;;  %p11915_p1 = scmp.lt.s32.totalorder %s14534_s5, %s11913_s20 }
 0x977   : > { %v11831_v1 = vpop.eup %11830  ;;  %11848 = vrcp.f32 %v7876_v23  ;;  %v7815_v23 = vadd.f32 %v9377_v32, %v14474_v48  ;;  %p11916_p2 = scmp.lt.s32.totalorder %s11914_s23, %s11908_s18 }
 0x978   : > { %v11833_v46 = vpop.eup %11832  ;;  %v8162_v17 = vadd.f32 %v8146_v43, %v8130_v3  ;;  %11850 = vpow2.f32 %v9454_v6  ;;  %v8083_v34 = vadd.f32 1.0, %v11831_v1  ;;  %v9425_v0 = vmul.f32 -1.442695, %v7812_v18 }
 0x979   : > { %v11835_v10 = vpop.eup %11834  ;;  %v7972_v4 = vadd.f32 1.0, %v11833_v46  ;;  %11852 = vpow2.f32 %v9424_v13  ;;  %v9457_v1 = vmul.f32 -1.442695, %v7815_v23  ;;  %p11917_p3 = por %p11916_p2, %p11915_p1 }
 0x97a   : > { %v11837_v38 = vpop.eup %11836  ;;  %11854 = vtanh.f32 %v8162_v17  ;;  %v8147_v21 = vmul.f32 %v11835_v10, %v11819_v5  ;;  %v9441_v5 = vmul.f32 -1.442695, %v7813_v40 }
 0x97b   : > { %v8193_v26 = vmul.f32 %v11837_v38, %v11829_v7  ;;  %11856 = vrcp.f32 %v7972_v4  ;;  %v11839_v62 = vpop.eup %11838  ;;  %p11918_p5 = pnand %p11917_p3, %p11911_p0 }
 0x97c   : > { %11858 = vtanh.f32 %v7806_v14  ;;  %v7877_v27 = vadd.f32 1.0, %v11839_v62 }
 0x97d   : > { %v11841_v56 = vpop.eup %11840  ;;  %8257 = vst [vmem:[%s14399_s4 + $0x48] sm:$0xff] %v8193_v26  ;;  %11860 = vpow2.f32 %v9440_v58 }
 0x97e   : > { %v11843_v29 = vpop.eup %11842  ;;  %v8131_v31 = vmul.f32 %v11841_v56, %v14313_v28  ;;  %11862 = vpow2.f32 %v9455_v20 }
 0x97f   : > { %v11845_v33 = vpop.eup %11844  ;;  %11864 = vrcp.f32 %v7877_v27 }
 0x980   : > { %v11847_v53 = vpop.eup %11846  ;;  %v8163_v54 = vadd.f32 %v8147_v21, %v8131_v31  ;;  %11866 = vrcp.f32 %v8083_v34 }
 0x981   : > { %v11849_v60 = vpop.eup %11848  ;;  %v7973_v55 = vadd.f32 1.0, %v11847_v53  ;;  %11868 = vpow2.f32 %v9425_v0 }
 0x982   : > { %v11851_v36 = vpop.eup %11850  ;;  %11870 = vtanh.f32 %v8163_v54  ;;  %v8148_v28 = vmul.f32 %v11849_v60, %v11845_v33 }
 0x983   : > { %v11853_v16 = vpop.eup %11852  ;;  %11872 = vrcp.f32 %v7973_v55  ;;  %v8084_v45 = vadd.f32 1.0, %v11851_v36 }
 0x984   : > { %v11855_v30 = vpop.eup %11854  ;;  %v7878_v15 = vadd.f32 1.0, %v11853_v16  ;;  %11874 = vtanh.f32 %v7810_v49 }
 0x985   : > { %v11857_v61 = vpop.eup %11856  ;;  %v8194_v47 = vmul.f32 %v11855_v30, %v11843_v29 }
 0x986   : > { %v11859_v51 = vpop.eup %11858  ;;  %v8132_v42 = vmul.f32 %v11857_v61, %v14320_v44  ;;  %11876 = vrcp.f32 %v7878_v15 }
 0x987   : > { %v11861_v57 = vpop.eup %11860  ;;  %8258 = vst [vmem:[%s14399_s4 + $0x50] sm:$0xff] %v8194_v47  ;;  %11878 = vpow2.f32 %v9441_v5 }
 0x988   : > { %v11863_v25 = vpop.eup %11862  ;;  %v8164_v9 = vadd.f32 %v8148_v28, %v8132_v42  ;;  %v7974_v43 = vadd.f32 1.0, %v11861_v57  ;;  %11880 = vpow2.f32 %v9456_v50 }
 0x989   : > { %v11865_v6 = vpop.eup %11864  ;;  %11882 = vrcp.f32 %v8084_v45  ;;  %v8085_v7 = vadd.f32 1.0, %v11863_v25 }
 0x98a   : > { %v11867_v2 = vpop.eup %11866  ;;  %11884 = vtanh.f32 %v8164_v9  ;;  %v8149_v44 = vmul.f32 %v11865_v6, %v11859_v51 }
 0x98b   : > { %v11869_v13 = vpop.eup %11868  ;;  %11886 = vrcp.f32 %v7974_v43 }
 0x98c   : > { %v11871_v63 = vpop.eup %11870  ;;  %v7879_v3 = vadd.f32 1.0, %v11869_v13  ;;  %11888 = vtanh.f32 %v7814_v39 }
 0x98d   : > { %v11873_v41 = vpop.eup %11872  ;;  %v8195_v11 = vmul.f32 %v11871_v63, %v11867_v2 }
 0x98e   : > { %v8133_v46 = vmul.f32 %v11873_v41, %v14330_v19  ;;  %11890 = vrcp.f32 %v7879_v3  ;;  %v11875_v17 = vpop.eup %11874 }
 0x98f   : > { %8259 = vst [vmem:[%s14399_s4 + $0x58] sm:$0xff] %v8195_v11  ;;  %11892 = vrcp.f32 %v8085_v7 }
 0x990   : > { %v11877_v12 = vpop.eup %11876  ;;  %v8165_v48 = vadd.f32 %v8149_v44, %v8133_v46  ;;  %11894 = vpow2.f32 %v9457_v1 }
 0x991   : > { %v11879_v14 = vpop.eup %11878  ;;  %v8150_v10 = vmul.f32 %v11877_v12, %v11875_v17 }
 0x992   : > { %v11881_v4 = vpop.eup %11880  ;;  %11896 = vtanh.f32 %v8165_v48  ;;  %v7975_v58 = vadd.f32 1.0, %v11879_v14 }
 0x993   : > { %v11883_v18 = vpop.eup %11882  ;;  %v8086_v19 = vadd.f32 1.0, %v11881_v4 }
 0x994   : > { %v11885_v38 = vpop.eup %11884  ;;  %11898 = vrcp.f32 %v7975_v58 }
 0x995   : > { %v11887_v21 = vpop.eup %11886  ;;  %v8196_v20 = vmul.f32 %v11885_v38, %v11883_v18  ;;  %11900 = vrcp.f32 %v8086_v19 }
 0x996   : > { %v8134_v26 = vmul.f32 %v11887_v21, %v14338_v24  ;;  %v11889_v62 = vpop.eup %11888 }
 0x997   : > { %8260 = vst [vmem:[%s14399_s4 + $0x60] sm:$0xff] %v8196_v20 }
 0x998   : > { %v11891_v34 = vpop.eup %11890  ;;  %v8166_v52 = vadd.f32 %v8150_v10, %v8134_v26 }
 0x999   : > { %v8151_v56 = vmul.f32 %v11891_v34, %v11889_v62  ;;  %v11893_v27 = vpop.eup %11892 }
 0x99a   : > { %11902 = vtanh.f32 %v8166_v52  ;;  %v11895_v35 = vpop.eup %11894 }
 0x99b   : > { %v8087_v8 = vadd.f32 1.0, %v11895_v35 }
 0x99c   : > { %v11897_v0 = vpop.eup %11896 }
 0x99d   : > { %v8197_v29 = vmul.f32 %v11897_v0, %v11893_v27  ;;  %11904 = vrcp.f32 %v8087_v8 }
 0x99e   : > { %v11899_v31 = vpop.eup %11898 }
 0x99f   : > { %8261 = vst [vmem:[%s14399_s4 + $0x68] sm:$0xff] %v8197_v29  ;;  %v8135_v24 = vmul.f32 %v11899_v31, %v14347_v22  ;;  %v11901_v40 = vpop.eup %11900 }
 0x9a1   : > { %v8167_v33 = vadd.f32 %v8151_v56, %v8135_v24 }
 0x9a3   : > { %11906 = vtanh.f32 %v8167_v33 }
 0x9a4   : > { %v11903_v53 = vpop.eup %11902 }
 0x9a5   : > { %v8198_v54 = vmul.f32 %v11903_v53, %v11901_v40 }
 0x9a7   : > { %8262 = vst [vmem:[%s14399_s4 + $0x70] sm:$0xff] %v8198_v54  ;;  %v11905_v37 = vpop.eup %11904 }
 0x9ad   : > { %v11907_v60 = vpop.eup %11906 }
 0x9ae   : > { %v8199_v22 = vmul.f32 %v11907_v60, %v11905_v37 }
 0x9b0   : > { %8263 = vst [vmem:[%s14399_s4 + $0x78] sm:$0xff] %v8199_v22 }
 0x9b1   : > { %11921 = shalt.err (!%p11918_p5)
}
 0x9b2   : > { %s11922_s24 = scalar_lea.hbm %s14532_s8, 2048  ;;  %s11926_s27 = scalar_lea.hbm %s14587_s2, 4096 }
 0x9b3   : > { %p11923_p6 = scmp.ne.s32.totalorder %s14532_s8, %s11922_s24  ;;  %p11927_p10 = scmp.lt.u32.totalorder %s14532_s8, %s14587_s2 }
 0x9b4   : > { %p11928_p11 = scmp.lt.u32.totalorder %s11926_s27, %s11922_s24  ;;  %p11930_p13 = scmp.lt.u32.totalorder %s11922_s24, %s14532_s8 }
 0x9b5   : > { %p11924_p7 = pnand %p11923_p6, %p12048_p4 }
 0x9b6   : > { %p11929_p12 = por %p11928_p11, %p11927_p10 }
 0x9b7   : > { %p11925_p9 = pneg %p11924_p7 }
 0x9b8   : > { %p11931_p0 = por %p11930_p13, %p11929_p12 }
 0x9ba   : > { %p11932_p1 = pnand %p11931_p0, %p11925_p9 }
 0x9bc   : > { %11935 = shalt.err (!%p11932_p1)
}
 0x9bd   : > { %s11991_s30 = smov 128   ;;  %s11992_s3 = smov 8  }
 0x9be   : > { %9465 = dma.vmem_to_hbm [thread:$0]  (%p12048_p4), %s14534_s5, 2048, %s14532_s8, %s14539_s16, %s11991_s30, %s11991_s30, %s11992_s3  }
 0x9bf PF: > { %p9471_p2 = scmp.ge.s32.totalorder %s11986_s14, 2  ;;  %s8295_s4 = sand.u32 1, %s11966_s9  }
 0x9c0   : > { %s8296_s15 = scalar_lea.sflag [#allocation5], %s8295_s4 }
 0x9c1   : > { %p9468_p3 = pnand %p9471_p2, %p12055_p8 }
 0x9c3   : > { %11961 = dma.done.wait (!%p9468_p3), %s8296_s15, 2048  }
 0x9c4   : > { %11963 = vsyncadd (!%p9468_p3), %s8296_s15, 4294965248  ;;  %s15_s14 = sadd.s32 1, %s11986_s14   ;;  %s14590_s9 = smov %s11970_s10 }
 0x9c5   : > { %p12_p5 = scmp.ge.s32.totalorder %s15_s14, 4   ;;  %s14591_s10 = smov %s11974_s11 }
 0x9c6   : > { %s14592_s11 = smov %s12061_s22  ;;  %s14593_s12 = smov %s11982_s13 }
 0x9c7   : > { %s14594_s13 = smov %s14596_s17  ;;  %14 = sbr.rel (!%p12_p5) target bundleno = 4 (0x4), region = 70 }
 0x9ce   :  { %8301 = vsyncpa [#allocation5], 1 }
 0x9cf   :  { %8303 = vsyncpa [#allocation5 + $0x1], 1 }

</bundles_post_ra>
